<compile_context>
chip_gen: v5e
topology: v5e:2x2
jax: 0.10.0
libtpu: 0.0.40
codegen_flags: <defaults>
</compile_context>

<pallas_src>
import functools

import numpy as np
import jax
import jax.numpy as jnp
from jax.experimental import pallas as pl
from jax.experimental.pallas import tpu as pltpu


_VMEM = pl.BlockSpec(memory_space=pltpu.MemorySpace.VMEM)


# ----------------------------- Pallas kernels ------------------------------

def _conv_pool_relu_kernel(x_ref, w_ref, b_ref, s_ref, o_ref, acc_ref,
                           *, k, width, L, Lw):
    """Fused VALID conv (stride 1) + bias + 2x2 max-pool + ReLU.

    x_ref: (Cin_pad, B*H*W)   per-channel flattened input (row-major b,h,w)
    w_ref: (k*k, Cout_pad, Cin_pad)   weight slice per tap (di, dj)
    b_ref: (Cout_pad, 1)
    s_ref: (Lw, B*Hp*Wp)      0/1 column-selection matrix (pool downsample)
    o_ref: (Cout_pad, B*Hp*Wp)
    acc_ref: VMEM scratch (Cout_pad, L) holding the flat conv result.
    """
    cout = w_ref.shape[1]
    acc = jnp.zeros((cout, L), jnp.float32)
    # k*k shifted-slice matmuls on the MXU; contiguous slices, no reshapes.
    for di in range(k):
        for dj in range(k):
            start = di * width + dj
            acc = acc + jnp.dot(w_ref[di * k + dj],
                                x_ref[:, start:start + L],
                                preferred_element_type=jnp.float32)
    acc_ref[...] = acc + b_ref[...]                       # bias, lane-broadcast
    # 2x2 max-pool: the 4 window corners live at columns m, m+1, m+W, m+W+1.
    win = jnp.maximum(
        jnp.maximum(acc_ref[:, 0:Lw], acc_ref[:, 1:Lw + 1]),
        jnp.maximum(acc_ref[:, width:width + Lw],
                    acc_ref[:, width + 1:width + 1 + Lw]))
    win = jnp.maximum(win, 0.0)                           # ReLU (commutes with pool)
    # Stride-2 downsample + drop wrap-around columns in one MXU matmul; output
    # is the compact lane-dense (Cout, B*Hp*Wp) layout the next stage expects.
    o_ref[...] = jnp.dot(win, s_ref[...],
                         preferred_element_type=jnp.float32).astype(o_ref.dtype)


def _fc3_kernel(x_ref, w1_ref, b1_ref, w2_ref, b2_ref, w3_ref, b3_ref, o_ref):
    """Fused fc1+ReLU -> fc2+ReLU -> (Dropout) -> out. N dims padded to 128."""
    h = jnp.dot(x_ref[...], w1_ref[...], preferred_element_type=jnp.float32) + b1_ref[...]
    h = jnp.maximum(h, 0.0)
    h = jnp.dot(h, w2_ref[...], preferred_element_type=jnp.float32) + b2_ref[...]
    h = jnp.maximum(h, 0.0)
    # nn.Dropout(p=0.2) is identity at inference.
    # TODO(synk): training-mode dropout mask (pltpu.prng_*) not implemented.
    o_ref[...] = (jnp.dot(h, w3_ref[...], preferred_element_type=jnp.float32)
                  + b3_ref[...]).astype(o_ref.dtype)


# ----------------------------- kernel wrappers ------------------------------

def conv_pool_relu(x_flat, w, b, s, *, k, width):
    """x_flat: (Cin_pad, B*H*W) -> (Cout_pad, B*Hp*Wp), conv+bias+pool+ReLU."""
    cin, total = x_flat.shape
    kk, cout, cin_w = w.shape
    assert kk == k * k and cin_w == cin, (w.shape, x_flat.shape)
    L = total - (k - 1) * (width + 1)
    Lw = L - (width + 1)
    n_pool = s.shape[1]
    assert s.shape[0] == Lw, (s.shape, Lw)
    kern = functools.partial(_conv_pool_relu_kernel, k=k, width=width, L=L, Lw=Lw)
    return pl.pallas_call(
        kern,
        out_shape=jax.ShapeDtypeStruct((cout, n_pool), jnp.float32),
        in_specs=[_VMEM, _VMEM, _VMEM, _VMEM],
        out_specs=_VMEM,
        scratch_shapes=[pltpu.VMEM((cout, L), jnp.float32)],
    )(x_flat, w, b, s)


def fc_fused(x, w1, b1, w2, b2, w3, b3):
    n_out = w3.shape[1]
    return pl.pallas_call(
        _fc3_kernel,
        out_shape=jax.ShapeDtypeStruct((x.shape[0], n_out), jnp.float32),
        in_specs=[_VMEM] * 7,
        out_specs=_VMEM,
    )(x, w1, b1, w2, b2, w3, b3)


# ------------------------ one-time parameter packing ------------------------

def _pack_conv(w, b, cout_pad, cin_pad):
    w = np.asarray(w, np.float32)                 # (Cout, Cin, k, k) torch layout
    bb = np.asarray(b, np.float32)
    cout, cin, kh, kw = w.shape
    wp = np.zeros((kh * kw, cout_pad, cin_pad), np.float32)
    wp[:, :cout, :cin] = np.transpose(w, (2, 3, 0, 1)).reshape(kh * kw, cout, cin)
    bp = np.zeros((cout_pad, 1), np.float32)
    bp[:cout, 0] = bb
    return jnp.asarray(wp), jnp.asarray(bp)


def _pack_fc(w, b, in_pad, out_pad):
    w = np.asarray(w, np.float32)                 # (out_features, in_features)
    bb = np.asarray(b, np.float32)
    out_f, in_f = w.shape
    wp = np.zeros((in_pad, out_pad), np.float32)
    wp[:in_f, :out_f] = w.T
    bp = np.zeros((1, out_pad), np.float32)
    bp[0, :out_f] = bb
    return jnp.asarray(wp), jnp.asarray(bp)


def _pool_select_matrix(batch, size, k):
    """0/1 matrix mapping flat conv columns -> compact pooled columns."""
    ho = size - k + 1
    hp = ho // 2
    total = batch * size * size
    L = total - (k - 1) * (size + 1)
    Lw = L - (size + 1)
    s = np.zeros((Lw, batch * hp * hp), np.float32)
    for bi in range(batch):
        for ph in range(hp):
            for pw in range(hp):
                r = bi * hp * hp + ph * hp + pw
                m = bi * size * size + (2 * ph) * size + (2 * pw)
                s[m, r] = 1.0
    return jnp.asarray(s)


def prepare_params(params, batch):
    """Hoisted out of the forward path: transposes, zero-padding, pool selectors."""
    w1, b1 = _pack_conv(params["conv1_w"], params["conv1_b"], cout_pad=8, cin_pad=8)
    w2, b2 = _pack_conv(params["conv2_w"], params["conv2_b"], cout_pad=16, cin_pad=8)
    wf1, bf1 = _pack_fc(params["fc1_w"], params["fc1_b"], in_pad=16 * 5 * 5, out_pad=128)
    wf2, bf2 = _pack_fc(params["fc2_w"], params["fc2_b"], in_pad=128, out_pad=128)
    wf3, bf3 = _pack_fc(params["out_w"], params["out_b"], in_pad=128, out_pad=128)
    return {
        "w1": w1, "b1": b1, "s1": _pool_select_matrix(batch, 32, 5),
        "w2": w2, "b2": b2, "s2": _pool_select_matrix(batch, 14, 5),
        "wf1": wf1, "bf1": bf1, "wf2": wf2, "bf2": bf2, "wf3": wf3, "bf3": bf3,
    }


# ------------------------------ LeNet forward -------------------------------

def lenet_forward(prep, x, *, out_features):
    """x: (B, 3, 32, 32) NCHW float32, exactly like the PyTorch module."""
    B = x.shape[0]
    # Tiny layout prep: per-channel flatten + zero-pad channels 3 -> 8.
    x1 = jnp.transpose(x.astype(jnp.float32), (1, 0, 2, 3)).reshape(3, B * 32 * 32)
    x1 = jnp.pad(x1, ((0, 5), (0, 0)))
    # first_layer Conv2d(3->6,k=5) + second_layer prefix MaxPool2d(2)+ReLU
    p1 = conv_pool_relu(x1, prep["w1"], prep["b1"], prep["s1"], k=5, width=32)  # (8, B*196)
    # second_layer Conv2d(6->16,k=5) + projection prefix MaxPool2d(2)+ReLU
    p2 = conv_pool_relu(p1, prep["w2"], prep["b2"], prep["s2"], k=5, width=14)  # (16, B*25)
    # Flatten to torch NCHW order (800-element relayout; negligible glue).
    xf = jnp.transpose(p2.reshape(16, B, 25), (1, 0, 2)).reshape(B, 16 * 5 * 5)
    # Linear(400,120)+ReLU -> Linear(120,84)+ReLU -> Dropout(eval) -> Linear(84,out)
    y = fc_fused(xf, prep["wf1"], prep["bf1"], prep["wf2"], prep["bf2"],
                 prep["wf3"], prep["bf3"])                                      # (B, 128)
    return y[:, :out_features]


# ---------------------------------- main -------------------------------------

if __name__ == "__main__":
    out_features = 10   # LeNet(out_features=10), mnist=False -> 3x32x32 input
    batch = 2
    key = jax.random.PRNGKey(0)
    keys = jax.random.split(key, 11)
    params = {
        # conv weights in PyTorch (Cout, Cin, k, k) layout
        "conv1_w": 0.10 * jax.random.normal(keys[0], (6, 3, 5, 5), jnp.float32),
        "conv1_b": 0.10 * jax.random.normal(keys[1], (6,), jnp.float32),
        "conv2_w": 0.10 * jax.random.normal(keys[2], (16, 6, 5, 5), jnp.float32),
        "conv2_b": 0.10 * jax.random.normal(keys[3], (16,), jnp.float32),
        # linear weights in PyTorch (out_features, in_features) layout
        "fc1_w": 0.05 * jax.random.normal(keys[4], (120, 16 * 5 * 5), jnp.float32),
        "fc1_b": 0.05 * jax.random.normal(keys[5], (120,), jnp.float32),
        "fc2_w": 0.05 * jax.random.normal(keys[6], (84, 120), jnp.float32),
        "fc2_b": 0.05 * jax.random.normal(keys[7], (84,), jnp.float32),
        "out_w": 0.05 * jax.random.normal(keys[8], (out_features, 84), jnp.float32),
        "out_b": 0.05 * jax.random.normal(keys[9], (out_features,), jnp.float32),
    }
    x = jax.random.normal(keys[10], (batch, 3, 32, 32), jnp.float32)  # NCHW, CIFAR-size

    prep = prepare_params(params, batch)        # one-time packing, not per-forward
    fwd = jax.jit(functools.partial(lenet_forward, out_features=out_features))
    y = jax.block_until_ready(fwd(prep, x))
    assert y.shape == (batch, out_features), y.shape
    print("KERNEL_OK")
</pallas_src>

<mosaic_0001>
module attributes {stable_mosaic.version = 11 : i64} {
  func.func @_conv_pool_relu_kernel(%arg0: memref<8x2048xf32, #tpu.memory_space<vmem>>, %arg1: memref<25x8x8xf32, #tpu.memory_space<vmem>>, %arg2: memref<8x1xf32, #tpu.memory_space<vmem>>, %arg3: memref<1883x392xf32, #tpu.memory_space<vmem>>, %arg4: memref<8x392xf32, #tpu.memory_space<vmem>>, %arg5: memref<8x1916xf32, #tpu.memory_space<vmem>>) attributes {dimension_semantics = [], scalar_prefetch = 0 : i64, scratch_operands = 1 : i64, tpu.core_type = #tpu.core_type<tc>} {
    %cst = arith.constant 0.000000e+00 : f32
    %0 = vector.broadcast %cst : f32 to vector<8x1916xf32>
    %c0 = arith.constant 0 : index
    %c0_0 = arith.constant 0 : index
    %c0_1 = arith.constant 0 : index
    %1 = vector.load %arg1[%c0, %c0_0, %c0_1] : memref<25x8x8xf32, #tpu.memory_space<vmem>>, vector<1x8x8xf32>
    %2 = vector.shape_cast %1 : vector<1x8x8xf32> to vector<8x8xf32>
    %c0_2 = arith.constant 0 : index
    %c0_3 = arith.constant 0 : index
    %3 = vector.load %arg0[%c0_2, %c0_3] : memref<8x2048xf32, #tpu.memory_space<vmem>>, vector<8x1916xf32>
    %cst_4 = arith.constant dense<0.000000e+00> : vector<8x1916xf32>
    %4 = tpu.matmul %2, %3, %cst_4 {dimension_numbers = #tpu.dot_dimension_numbers<[1], [0], [0], [1], [0, 0, 1, 1], [], []>} : vector<8x8xf32>, vector<8x1916xf32>, vector<8x1916xf32> -> vector<8x1916xf32>
    %5 = arith.addf %0, %4 : vector<8x1916xf32>
    %c1 = arith.constant 1 : index
    %c0_5 = arith.constant 0 : index
    %c0_6 = arith.constant 0 : index
    %6 = vector.load %arg1[%c1, %c0_5, %c0_6] : memref<25x8x8xf32, #tpu.memory_space<vmem>>, vector<1x8x8xf32>
    %7 = vector.shape_cast %6 : vector<1x8x8xf32> to vector<8x8xf32>
    %c0_7 = arith.constant 0 : index
    %c1_8 = arith.constant 1 : index
    %8 = vector.load %arg0[%c0_7, %c1_8] : memref<8x2048xf32, #tpu.memory_space<vmem>>, vector<8x1916xf32>
    %cst_9 = arith.constant dense<0.000000e+00> : vector<8x1916xf32>
    %9 = tpu.matmul %7, %8, %cst_9 {dimension_numbers = #tpu.dot_dimension_numbers<[1], [0], [0], [1], [0, 0, 1, 1], [], []>} : vector<8x8xf32>, vector<8x1916xf32>, vector<8x1916xf32> -> vector<8x1916xf32>
    %10 = arith.addf %5, %9 : vector<8x1916xf32>
    %c2 = arith.constant 2 : index
    %c0_10 = arith.constant 0 : index
    %c0_11 = arith.constant 0 : index
    %11 = vector.load %arg1[%c2, %c0_10, %c0_11] : memref<25x8x8xf32, #tpu.memory_space<vmem>>, vector<1x8x8xf32>
    %12 = vector.shape_cast %11 : vector<1x8x8xf32> to vector<8x8xf32>
    %c0_12 = arith.constant 0 : index
    %c2_13 = arith.constant 2 : index
    %13 = vector.load %arg0[%c0_12, %c2_13] : memref<8x2048xf32, #tpu.memory_space<vmem>>, vector<8x1916xf32>
    %cst_14 = arith.constant dense<0.000000e+00> : vector<8x1916xf32>
    %14 = tpu.matmul %12, %13, %cst_14 {dimension_numbers = #tpu.dot_dimension_numbers<[1], [0], [0], [1], [0, 0, 1, 1], [], []>} : vector<8x8xf32>, vector<8x1916xf32>, vector<8x1916xf32> -> vector<8x1916xf32>
    %15 = arith.addf %10, %14 : vector<8x1916xf32>
    %c3 = arith.constant 3 : index
    %c0_15 = arith.constant 0 : index
    %c0_16 = arith.constant 0 : index
    %16 = vector.load %arg1[%c3, %c0_15, %c0_16] : memref<25x8x8xf32, #tpu.memory_space<vmem>>, vector<1x8x8xf32>
    %17 = vector.shape_cast %16 : vector<1x8x8xf32> to vector<8x8xf32>
    %c0_17 = arith.constant 0 : index
    %c3_18 = arith.constant 3 : index
    %18 = vector.load %arg0[%c0_17, %c3_18] : memref<8x2048xf32, #tpu.memory_space<vmem>>, vector<8x1916xf32>
    %cst_19 = arith.constant dense<0.000000e+00> : vector<8x1916xf32>
    %19 = tpu.matmul %17, %18, %cst_19 {dimension_numbers = #tpu.dot_dimension_numbers<[1], [0], [0], [1], [0, 0, 1, 1], [], []>} : vector<8x8xf32>, vector<8x1916xf32>, vector<8x1916xf32> -> vector<8x1916xf32>
    %20 = arith.addf %15, %19 : vector<8x1916xf32>
    %c4 = arith.constant 4 : index
    %c0_20 = arith.constant 0 : index
    %c0_21 = arith.constant 0 : index
    %21 = vector.load %arg1[%c4, %c0_20, %c0_21] : memref<25x8x8xf32, #tpu.memory_space<vmem>>, vector<1x8x8xf32>
    %22 = vector.shape_cast %21 : vector<1x8x8xf32> to vector<8x8xf32>
    %c0_22 = arith.constant 0 : index
    %c4_23 = arith.constant 4 : index
    %23 = vector.load %arg0[%c0_22, %c4_23] : memref<8x2048xf32, #tpu.memory_space<vmem>>, vector<8x1916xf32>
    %cst_24 = arith.constant dense<0.000000e+00> : vector<8x1916xf32>
    %24 = tpu.matmul %22, %23, %cst_24 {dimension_numbers = #tpu.dot_dimension_numbers<[1], [0], [0], [1], [0, 0, 1, 1], [], []>} : vector<8x8xf32>, vector<8x1916xf32>, vector<8x1916xf32> -> vector<8x1916xf32>
    %25 = arith.addf %20, %24 : vector<8x1916xf32>
    %c5 = arith.constant 5 : index
    %c0_25 = arith.constant 0 : index
    %c0_26 = arith.constant 0 : index
    %26 = vector.load %arg1[%c5, %c0_25, %c0_26] : memref<25x8x8xf32, #tpu.memory_space<vmem>>, vector<1x8x8xf32>
    %27 = vector.shape_cast %26 : vector<1x8x8xf32> to vector<8x8xf32>
    %c0_27 = arith.constant 0 : index
    %c32 = arith.constant 32 : index
    %28 = vector.load %arg0[%c0_27, %c32] : memref<8x2048xf32, #tpu.memory_space<vmem>>, vector<8x1916xf32>
    %cst_28 = arith.constant dense<0.000000e+00> : vector<8x1916xf32>
    %29 = tpu.matmul %27, %28, %cst_28 {dimension_numbers = #tpu.dot_dimension_numbers<[1], [0], [0], [1], [0, 0, 1, 1], [], []>} : vector<8x8xf32>, vector<8x1916xf32>, vector<8x1916xf32> -> vector<8x1916xf32>
    %30 = arith.addf %25, %29 : vector<8x1916xf32>
    %c6 = arith.constant 6 : index
    %c0_29 = arith.constant 0 : index
    %c0_30 = arith.constant 0 : index
    %31 = vector.load %arg1[%c6, %c0_29, %c0_30] : memref<25x8x8xf32, #tpu.memory_space<vmem>>, vector<1x8x8xf32>
    %32 = vector.shape_cast %31 : vector<1x8x8xf32> to vector<8x8xf32>
    %c0_31 = arith.constant 0 : index
    %c33 = arith.constant 33 : index
    %33 = vector.load %arg0[%c0_31, %c33] : memref<8x2048xf32, #tpu.memory_space<vmem>>, vector<8x1916xf32>
    %cst_32 = arith.constant dense<0.000000e+00> : vector<8x1916xf32>
    %34 = tpu.matmul %32, %33, %cst_32 {dimension_numbers = #tpu.dot_dimension_numbers<[1], [0], [0], [1], [0, 0, 1, 1], [], []>} : vector<8x8xf32>, vector<8x1916xf32>, vector<8x1916xf32> -> vector<8x1916xf32>
    %35 = arith.addf %30, %34 : vector<8x1916xf32>
    %c7 = arith.constant 7 : index
    %c0_33 = arith.constant 0 : index
    %c0_34 = arith.constant 0 : index
    %36 = vector.load %arg1[%c7, %c0_33, %c0_34] : memref<25x8x8xf32, #tpu.memory_space<vmem>>, vector<1x8x8xf32>
    %37 = vector.shape_cast %36 : vector<1x8x8xf32> to vector<8x8xf32>
    %c0_35 = arith.constant 0 : index
    %c34 = arith.constant 34 : index
    %38 = vector.load %arg0[%c0_35, %c34] : memref<8x2048xf32, #tpu.memory_space<vmem>>, vector<8x1916xf32>
    %cst_36 = arith.constant dense<0.000000e+00> : vector<8x1916xf32>
    %39 = tpu.matmul %37, %38, %cst_36 {dimension_numbers = #tpu.dot_dimension_numbers<[1], [0], [0], [1], [0, 0, 1, 1], [], []>} : vector<8x8xf32>, vector<8x1916xf32>, vector<8x1916xf32> -> vector<8x1916xf32>
    %40 = arith.addf %35, %39 : vector<8x1916xf32>
    %c8 = arith.constant 8 : index
    %c0_37 = arith.constant 0 : index
    %c0_38 = arith.constant 0 : index
    %41 = vector.load %arg1[%c8, %c0_37, %c0_38] : memref<25x8x8xf32, #tpu.memory_space<vmem>>, vector<1x8x8xf32>
    %42 = vector.shape_cast %41 : vector<1x8x8xf32> to vector<8x8xf32>
    %c0_39 = arith.constant 0 : index
    %c35 = arith.constant 35 : index
    %43 = vector.load %arg0[%c0_39, %c35] : memref<8x2048xf32, #tpu.memory_space<vmem>>, vector<8x1916xf32>
    %cst_40 = arith.constant dense<0.000000e+00> : vector<8x1916xf32>
    %44 = tpu.matmul %42, %43, %cst_40 {dimension_numbers = #tpu.dot_dimension_numbers<[1], [0], [0], [1], [0, 0, 1, 1], [], []>} : vector<8x8xf32>, vector<8x1916xf32>, vector<8x1916xf32> -> vector<8x1916xf32>
    %45 = arith.addf %40, %44 : vector<8x1916xf32>
    %c9 = arith.constant 9 : index
    %c0_41 = arith.constant 0 : index
    %c0_42 = arith.constant 0 : index
    %46 = vector.load %arg1[%c9, %c0_41, %c0_42] : memref<25x8x8xf32, #tpu.memory_space<vmem>>, vector<1x8x8xf32>
    %47 = vector.shape_cast %46 : vector<1x8x8xf32> to vector<8x8xf32>
    %c0_43 = arith.constant 0 : index
    %c36 = arith.constant 36 : index
    %48 = vector.load %arg0[%c0_43, %c36] : memref<8x2048xf32, #tpu.memory_space<vmem>>, vector<8x1916xf32>
    %cst_44 = arith.constant dense<0.000000e+00> : vector<8x1916xf32>
    %49 = tpu.matmul %47, %48, %cst_44 {dimension_numbers = #tpu.dot_dimension_numbers<[1], [0], [0], [1], [0, 0, 1, 1], [], []>} : vector<8x8xf32>, vector<8x1916xf32>, vector<8x1916xf32> -> vector<8x1916xf32>
    %50 = arith.addf %45, %49 : vector<8x1916xf32>
    %c10 = arith.constant 10 : index
    %c0_45 = arith.constant 0 : index
    %c0_46 = arith.constant 0 : index
    %51 = vector.load %arg1[%c10, %c0_45, %c0_46] : memref<25x8x8xf32, #tpu.memory_space<vmem>>, vector<1x8x8xf32>
    %52 = vector.shape_cast %51 : vector<1x8x8xf32> to vector<8x8xf32>
    %c0_47 = arith.constant 0 : index
    %c64 = arith.constant 64 : index
    %53 = vector.load %arg0[%c0_47, %c64] : memref<8x2048xf32, #tpu.memory_space<vmem>>, vector<8x1916xf32>
    %cst_48 = arith.constant dense<0.000000e+00> : vector<8x1916xf32>
    %54 = tpu.matmul %52, %53, %cst_48 {dimension_numbers = #tpu.dot_dimension_numbers<[1], [0], [0], [1], [0, 0, 1, 1], [], []>} : vector<8x8xf32>, vector<8x1916xf32>, vector<8x1916xf32> -> vector<8x1916xf32>
    %55 = arith.addf %50, %54 : vector<8x1916xf32>
    %c11 = arith.constant 11 : index
    %c0_49 = arith.constant 0 : index
    %c0_50 = arith.constant 0 : index
    %56 = vector.load %arg1[%c11, %c0_49, %c0_50] : memref<25x8x8xf32, #tpu.memory_space<vmem>>, vector<1x8x8xf32>
    %57 = vector.shape_cast %56 : vector<1x8x8xf32> to vector<8x8xf32>
    %c0_51 = arith.constant 0 : index
    %c65 = arith.constant 65 : index
    %58 = vector.load %arg0[%c0_51, %c65] : memref<8x2048xf32, #tpu.memory_space<vmem>>, vector<8x1916xf32>
    %cst_52 = arith.constant dense<0.000000e+00> : vector<8x1916xf32>
    %59 = tpu.matmul %57, %58, %cst_52 {dimension_numbers = #tpu.dot_dimension_numbers<[1], [0], [0], [1], [0, 0, 1, 1], [], []>} : vector<8x8xf32>, vector<8x1916xf32>, vector<8x1916xf32> -> vector<8x1916xf32>
    %60 = arith.addf %55, %59 : vector<8x1916xf32>
    %c12 = arith.constant 12 : index
    %c0_53 = arith.constant 0 : index
    %c0_54 = arith.constant 0 : index
    %61 = vector.load %arg1[%c12, %c0_53, %c0_54] : memref<25x8x8xf32, #tpu.memory_space<vmem>>, vector<1x8x8xf32>
    %62 = vector.shape_cast %61 : vector<1x8x8xf32> to vector<8x8xf32>
    %c0_55 = arith.constant 0 : index
    %c66 = arith.constant 66 : index
    %63 = vector.load %arg0[%c0_55, %c66] : memref<8x2048xf32, #tpu.memory_space<vmem>>, vector<8x1916xf32>
    %cst_56 = arith.constant dense<0.000000e+00> : vector<8x1916xf32>
    %64 = tpu.matmul %62, %63, %cst_56 {dimension_numbers = #tpu.dot_dimension_numbers<[1], [0], [0], [1], [0, 0, 1, 1], [], []>} : vector<8x8xf32>, vector<8x1916xf32>, vector<8x1916xf32> -> vector<8x1916xf32>
    %65 = arith.addf %60, %64 : vector<8x1916xf32>
    %c13 = arith.constant 13 : index
    %c0_57 = arith.constant 0 : index
    %c0_58 = arith.constant 0 : index
    %66 = vector.load %arg1[%c13, %c0_57, %c0_58] : memref<25x8x8xf32, #tpu.memory_space<vmem>>, vector<1x8x8xf32>
    %67 = vector.shape_cast %66 : vector<1x8x8xf32> to vector<8x8xf32>
    %c0_59 = arith.constant 0 : index
    %c67 = arith.constant 67 : index
    %68 = vector.load %arg0[%c0_59, %c67] : memref<8x2048xf32, #tpu.memory_space<vmem>>, vector<8x1916xf32>
    %cst_60 = arith.constant dense<0.000000e+00> : vector<8x1916xf32>
    %69 = tpu.matmul %67, %68, %cst_60 {dimension_numbers = #tpu.dot_dimension_numbers<[1], [0], [0], [1], [0, 0, 1, 1], [], []>} : vector<8x8xf32>, vector<8x1916xf32>, vector<8x1916xf32> -> vector<8x1916xf32>
    %70 = arith.addf %65, %69 : vector<8x1916xf32>
    %c14 = arith.constant 14 : index
    %c0_61 = arith.constant 0 : index
    %c0_62 = arith.constant 0 : index
    %71 = vector.load %arg1[%c14, %c0_61, %c0_62] : memref<25x8x8xf32, #tpu.memory_space<vmem>>, vector<1x8x8xf32>
    %72 = vector.shape_cast %71 : vector<1x8x8xf32> to vector<8x8xf32>
    %c0_63 = arith.constant 0 : index
    %c68 = arith.constant 68 : index
    %73 = vector.load %arg0[%c0_63, %c68] : memref<8x2048xf32, #tpu.memory_space<vmem>>, vector<8x1916xf32>
    %cst_64 = arith.constant dense<0.000000e+00> : vector<8x1916xf32>
    %74 = tpu.matmul %72, %73, %cst_64 {dimension_numbers = #tpu.dot_dimension_numbers<[1], [0], [0], [1], [0, 0, 1, 1], [], []>} : vector<8x8xf32>, vector<8x1916xf32>, vector<8x1916xf32> -> vector<8x1916xf32>
    %75 = arith.addf %70, %74 : vector<8x1916xf32>
    %c15 = arith.constant 15 : index
    %c0_65 = arith.constant 0 : index
    %c0_66 = arith.constant 0 : index
    %76 = vector.load %arg1[%c15, %c0_65, %c0_66] : memref<25x8x8xf32, #tpu.memory_space<vmem>>, vector<1x8x8xf32>
    %77 = vector.shape_cast %76 : vector<1x8x8xf32> to vector<8x8xf32>
    %c0_67 = arith.constant 0 : index
    %c96 = arith.constant 96 : index
    %78 = vector.load %arg0[%c0_67, %c96] : memref<8x2048xf32, #tpu.memory_space<vmem>>, vector<8x1916xf32>
    %cst_68 = arith.constant dense<0.000000e+00> : vector<8x1916xf32>
    %79 = tpu.matmul %77, %78, %cst_68 {dimension_numbers = #tpu.dot_dimension_numbers<[1], [0], [0], [1], [0, 0, 1, 1], [], []>} : vector<8x8xf32>, vector<8x1916xf32>, vector<8x1916xf32> -> vector<8x1916xf32>
    %80 = arith.addf %75, %79 : vector<8x1916xf32>
    %c16 = arith.constant 16 : index
    %c0_69 = arith.constant 0 : index
    %c0_70 = arith.constant 0 : index
    %81 = vector.load %arg1[%c16, %c0_69, %c0_70] : memref<25x8x8xf32, #tpu.memory_space<vmem>>, vector<1x8x8xf32>
    %82 = vector.shape_cast %81 : vector<1x8x8xf32> to vector<8x8xf32>
    %c0_71 = arith.constant 0 : index
    %c97 = arith.constant 97 : index
    %83 = vector.load %arg0[%c0_71, %c97] : memref<8x2048xf32, #tpu.memory_space<vmem>>, vector<8x1916xf32>
    %cst_72 = arith.constant dense<0.000000e+00> : vector<8x1916xf32>
    %84 = tpu.matmul %82, %83, %cst_72 {dimension_numbers = #tpu.dot_dimension_numbers<[1], [0], [0], [1], [0, 0, 1, 1], [], []>} : vector<8x8xf32>, vector<8x1916xf32>, vector<8x1916xf32> -> vector<8x1916xf32>
    %85 = arith.addf %80, %84 : vector<8x1916xf32>
    %c17 = arith.constant 17 : index
    %c0_73 = arith.constant 0 : index
    %c0_74 = arith.constant 0 : index
    %86 = vector.load %arg1[%c17, %c0_73, %c0_74] : memref<25x8x8xf32, #tpu.memory_space<vmem>>, vector<1x8x8xf32>
    %87 = vector.shape_cast %86 : vector<1x8x8xf32> to vector<8x8xf32>
    %c0_75 = arith.constant 0 : index
    %c98 = arith.constant 98 : index
    %88 = vector.load %arg0[%c0_75, %c98] : memref<8x2048xf32, #tpu.memory_space<vmem>>, vector<8x1916xf32>
    %cst_76 = arith.constant dense<0.000000e+00> : vector<8x1916xf32>
    %89 = tpu.matmul %87, %88, %cst_76 {dimension_numbers = #tpu.dot_dimension_numbers<[1], [0], [0], [1], [0, 0, 1, 1], [], []>} : vector<8x8xf32>, vector<8x1916xf32>, vector<8x1916xf32> -> vector<8x1916xf32>
    %90 = arith.addf %85, %89 : vector<8x1916xf32>
    %c18 = arith.constant 18 : index
    %c0_77 = arith.constant 0 : index
    %c0_78 = arith.constant 0 : index
    %91 = vector.load %arg1[%c18, %c0_77, %c0_78] : memref<25x8x8xf32, #tpu.memory_space<vmem>>, vector<1x8x8xf32>
    %92 = vector.shape_cast %91 : vector<1x8x8xf32> to vector<8x8xf32>
    %c0_79 = arith.constant 0 : index
    %c99 = arith.constant 99 : index
    %93 = vector.load %arg0[%c0_79, %c99] : memref<8x2048xf32, #tpu.memory_space<vmem>>, vector<8x1916xf32>
    %cst_80 = arith.constant dense<0.000000e+00> : vector<8x1916xf32>
    %94 = tpu.matmul %92, %93, %cst_80 {dimension_numbers = #tpu.dot_dimension_numbers<[1], [0], [0], [1], [0, 0, 1, 1], [], []>} : vector<8x8xf32>, vector<8x1916xf32>, vector<8x1916xf32> -> vector<8x1916xf32>
    %95 = arith.addf %90, %94 : vector<8x1916xf32>
    %c19 = arith.constant 19 : index
    %c0_81 = arith.constant 0 : index
    %c0_82 = arith.constant 0 : index
    %96 = vector.load %arg1[%c19, %c0_81, %c0_82] : memref<25x8x8xf32, #tpu.memory_space<vmem>>, vector<1x8x8xf32>
    %97 = vector.shape_cast %96 : vector<1x8x8xf32> to vector<8x8xf32>
    %c0_83 = arith.constant 0 : index
    %c100 = arith.constant 100 : index
    %98 = vector.load %arg0[%c0_83, %c100] : memref<8x2048xf32, #tpu.memory_space<vmem>>, vector<8x1916xf32>
    %cst_84 = arith.constant dense<0.000000e+00> : vector<8x1916xf32>
    %99 = tpu.matmul %97, %98, %cst_84 {dimension_numbers = #tpu.dot_dimension_numbers<[1], [0], [0], [1], [0, 0, 1, 1], [], []>} : vector<8x8xf32>, vector<8x1916xf32>, vector<8x1916xf32> -> vector<8x1916xf32>
    %100 = arith.addf %95, %99 : vector<8x1916xf32>
    %c20 = arith.constant 20 : index
    %c0_85 = arith.constant 0 : index
    %c0_86 = arith.constant 0 : index
    %101 = vector.load %arg1[%c20, %c0_85, %c0_86] : memref<25x8x8xf32, #tpu.memory_space<vmem>>, vector<1x8x8xf32>
    %102 = vector.shape_cast %101 : vector<1x8x8xf32> to vector<8x8xf32>
    %c0_87 = arith.constant 0 : index
    %c128 = arith.constant 128 : index
    %103 = vector.load %arg0[%c0_87, %c128] : memref<8x2048xf32, #tpu.memory_space<vmem>>, vector<8x1916xf32>
    %cst_88 = arith.constant dense<0.000000e+00> : vector<8x1916xf32>
    %104 = tpu.matmul %102, %103, %cst_88 {dimension_numbers = #tpu.dot_dimension_numbers<[1], [0], [0], [1], [0, 0, 1, 1], [], []>} : vector<8x8xf32>, vector<8x1916xf32>, vector<8x1916xf32> -> vector<8x1916xf32>
    %105 = arith.addf %100, %104 : vector<8x1916xf32>
    %c21 = arith.constant 21 : index
    %c0_89 = arith.constant 0 : index
    %c0_90 = arith.constant 0 : index
    %106 = vector.load %arg1[%c21, %c0_89, %c0_90] : memref<25x8x8xf32, #tpu.memory_space<vmem>>, vector<1x8x8xf32>
    %107 = vector.shape_cast %106 : vector<1x8x8xf32> to vector<8x8xf32>
    %c0_91 = arith.constant 0 : index
    %c129 = arith.constant 129 : index
    %108 = vector.load %arg0[%c0_91, %c129] : memref<8x2048xf32, #tpu.memory_space<vmem>>, vector<8x1916xf32>
    %cst_92 = arith.constant dense<0.000000e+00> : vector<8x1916xf32>
    %109 = tpu.matmul %107, %108, %cst_92 {dimension_numbers = #tpu.dot_dimension_numbers<[1], [0], [0], [1], [0, 0, 1, 1], [], []>} : vector<8x8xf32>, vector<8x1916xf32>, vector<8x1916xf32> -> vector<8x1916xf32>
    %110 = arith.addf %105, %109 : vector<8x1916xf32>
    %c22 = arith.constant 22 : index
    %c0_93 = arith.constant 0 : index
    %c0_94 = arith.constant 0 : index
    %111 = vector.load %arg1[%c22, %c0_93, %c0_94] : memref<25x8x8xf32, #tpu.memory_space<vmem>>, vector<1x8x8xf32>
    %112 = vector.shape_cast %111 : vector<1x8x8xf32> to vector<8x8xf32>
    %c0_95 = arith.constant 0 : index
    %c130 = arith.constant 130 : index
    %113 = vector.load %arg0[%c0_95, %c130] : memref<8x2048xf32, #tpu.memory_space<vmem>>, vector<8x1916xf32>
    %cst_96 = arith.constant dense<0.000000e+00> : vector<8x1916xf32>
    %114 = tpu.matmul %112, %113, %cst_96 {dimension_numbers = #tpu.dot_dimension_numbers<[1], [0], [0], [1], [0, 0, 1, 1], [], []>} : vector<8x8xf32>, vector<8x1916xf32>, vector<8x1916xf32> -> vector<8x1916xf32>
    %115 = arith.addf %110, %114 : vector<8x1916xf32>
    %c23 = arith.constant 23 : index
    %c0_97 = arith.constant 0 : index
    %c0_98 = arith.constant 0 : index
    %116 = vector.load %arg1[%c23, %c0_97, %c0_98] : memref<25x8x8xf32, #tpu.memory_space<vmem>>, vector<1x8x8xf32>
    %117 = vector.shape_cast %116 : vector<1x8x8xf32> to vector<8x8xf32>
    %c0_99 = arith.constant 0 : index
    %c131 = arith.constant 131 : index
    %118 = vector.load %arg0[%c0_99, %c131] : memref<8x2048xf32, #tpu.memory_space<vmem>>, vector<8x1916xf32>
    %cst_100 = arith.constant dense<0.000000e+00> : vector<8x1916xf32>
    %119 = tpu.matmul %117, %118, %cst_100 {dimension_numbers = #tpu.dot_dimension_numbers<[1], [0], [0], [1], [0, 0, 1, 1], [], []>} : vector<8x8xf32>, vector<8x1916xf32>, vector<8x1916xf32> -> vector<8x1916xf32>
    %120 = arith.addf %115, %119 : vector<8x1916xf32>
    %c24 = arith.constant 24 : index
    %c0_101 = arith.constant 0 : index
    %c0_102 = arith.constant 0 : index
    %121 = vector.load %arg1[%c24, %c0_101, %c0_102] : memref<25x8x8xf32, #tpu.memory_space<vmem>>, vector<1x8x8xf32>
    %122 = vector.shape_cast %121 : vector<1x8x8xf32> to vector<8x8xf32>
    %c0_103 = arith.constant 0 : index
    %c132 = arith.constant 132 : index
    %123 = vector.load %arg0[%c0_103, %c132] : memref<8x2048xf32, #tpu.memory_space<vmem>>, vector<8x1916xf32>
    %cst_104 = arith.constant dense<0.000000e+00> : vector<8x1916xf32>
    %124 = tpu.matmul %122, %123, %cst_104 {dimension_numbers = #tpu.dot_dimension_numbers<[1], [0], [0], [1], [0, 0, 1, 1], [], []>} : vector<8x8xf32>, vector<8x1916xf32>, vector<8x1916xf32> -> vector<8x1916xf32>
    %125 = arith.addf %120, %124 : vector<8x1916xf32>
    %c0_105 = arith.constant 0 : index
    %c0_106 = arith.constant 0 : index
    %126 = vector.load %arg2[%c0_105, %c0_106] : memref<8x1xf32, #tpu.memory_space<vmem>>, vector<8x1xf32>
    %127 = vector.broadcast %126 : vector<8x1xf32> to vector<8x1916xf32>
    %128 = arith.addf %125, %127 : vector<8x1916xf32>
    %c0_107 = arith.constant 0 : index
    %c0_108 = arith.constant 0 : index
    %129 = vector.load %arg5[%c0_107, %c0_108] : memref<8x1916xf32, #tpu.memory_space<vmem>>, vector<8x1916xf32>
    tpu.vector_store %arg5[%c0_107, %c0_108], %128 {strides = array<i32>} : memref<8x1916xf32, #tpu.memory_space<vmem>>, vector<8x1916xf32>,
    %c0_109 = arith.constant 0 : index
    %c0_110 = arith.constant 0 : index
    %130 = vector.load %arg5[%c0_109, %c0_110] : memref<8x1916xf32, #tpu.memory_space<vmem>>, vector<8x1883xf32>
    %c0_111 = arith.constant 0 : index
    %c1_112 = arith.constant 1 : index
    %131 = vector.load %arg5[%c0_111, %c1_112] : memref<8x1916xf32, #tpu.memory_space<vmem>>, vector<8x1883xf32>
    %132 = arith.maximumf %130, %131 : vector<8x1883xf32>
    %c0_113 = arith.constant 0 : index
    %c32_114 = arith.constant 32 : index
    %133 = vector.load %arg5[%c0_113, %c32_114] : memref<8x1916xf32, #tpu.memory_space<vmem>>, vector<8x1883xf32>
    %c0_115 = arith.constant 0 : index
    %c33_116 = arith.constant 33 : index
    %134 = vector.load %arg5[%c0_115, %c33_116] : memref<8x1916xf32, #tpu.memory_space<vmem>>, vector<8x1883xf32>
    %135 = arith.maximumf %133, %134 : vector<8x1883xf32>
    %136 = arith.maximumf %132, %135 : vector<8x1883xf32>
    %cst_117 = arith.constant 0.000000e+00 : f32
    %137 = vector.broadcast %cst_117 : f32 to vector<8x1883xf32>
    %138 = arith.maximumf %136, %137 : vector<8x1883xf32>
    %c0_118 = arith.constant 0 : index
    %c0_119 = arith.constant 0 : index
    %139 = vector.load %arg3[%c0_118, %c0_119] : memref<1883x392xf32, #tpu.memory_space<vmem>>, vector<1883x392xf32>
    %cst_120 = arith.constant dense<0.000000e+00> : vector<8x392xf32>
    %140 = tpu.matmul %138, %139, %cst_120 {dimension_numbers = #tpu.dot_dimension_numbers<[1], [0], [0], [1], [0, 0, 1, 1], [], []>} : vector<8x1883xf32>, vector<1883x392xf32>, vector<8x392xf32> -> vector<8x392xf32>
    %c0_121 = arith.constant 0 : index
    %c0_122 = arith.constant 0 : index
    %141 = vector.load %arg4[%c0_121, %c0_122] : memref<8x392xf32, #tpu.memory_space<vmem>>, vector<8x392xf32>
    tpu.vector_store %arg4[%c0_121, %c0_122], %140 {strides = array<i32>} : memref<8x392xf32, #tpu.memory_space<vmem>>, vector<8x392xf32>,
    return
  }
}

module attributes {stable_mosaic.version = 11 : i64} {
  func.func @_fc3_kernel(%arg0: memref<2x400xf32, #tpu.memory_space<vmem>>, %arg1: memref<400x128xf32, #tpu.memory_space<vmem>>, %arg2: memref<1x128xf32, #tpu.memory_space<vmem>>, %arg3: memref<128x128xf32, #tpu.memory_space<vmem>>, %arg4: memref<1x128xf32, #tpu.memory_space<vmem>>, %arg5: memref<128x128xf32, #tpu.memory_space<vmem>>, %arg6: memref<1x128xf32, #tpu.memory_space<vmem>>, %arg7: memref<2x128xf32, #tpu.memory_space<vmem>>) attributes {dimension_semantics = [], scalar_prefetch = 0 : i64, scratch_operands = 0 : i64, tpu.core_type = #tpu.core_type<tc>} {
    %c0 = arith.constant 0 : index
    %c0_0 = arith.constant 0 : index
    %0 = vector.load %arg0[%c0, %c0_0] : memref<2x400xf32, #tpu.memory_space<vmem>>, vector<2x400xf32>
    %c0_1 = arith.constant 0 : index
    %c0_2 = arith.constant 0 : index
    %1 = vector.load %arg1[%c0_1, %c0_2] : memref<400x128xf32, #tpu.memory_space<vmem>>, vector<400x128xf32>
    %cst = arith.constant dense<0.000000e+00> : vector<2x128xf32>
    %2 = tpu.matmul %0, %1, %cst {dimension_numbers = #tpu.dot_dimension_numbers<[1], [0], [0], [1], [0, 0, 1, 1], [], []>} : vector<2x400xf32>, vector<400x128xf32>, vector<2x128xf32> -> vector<2x128xf32>
    %c0_3 = arith.constant 0 : index
    %c0_4 = arith.constant 0 : index
    %3 = vector.load %arg2[%c0_3, %c0_4] : memref<1x128xf32, #tpu.memory_space<vmem>>, vector<1x128xf32>
    %4 = vector.broadcast %3 : vector<1x128xf32> to vector<2x128xf32>
    %5 = arith.addf %2, %4 : vector<2x128xf32>
    %cst_5 = arith.constant 0.000000e+00 : f32
    %6 = vector.broadcast %cst_5 : f32 to vector<2x128xf32>
    %7 = arith.maximumf %5, %6 : vector<2x128xf32>
    %c0_6 = arith.constant 0 : index
    %c0_7 = arith.constant 0 : index
    %8 = vector.load %arg3[%c0_6, %c0_7] : memref<128x128xf32, #tpu.memory_space<vmem>>, vector<128x128xf32>
    %cst_8 = arith.constant dense<0.000000e+00> : vector<2x128xf32>
    %9 = tpu.matmul %7, %8, %cst_8 {dimension_numbers = #tpu.dot_dimension_numbers<[1], [0], [0], [1], [0, 0, 1, 1], [], []>} : vector<2x128xf32>, vector<128x128xf32>, vector<2x128xf32> -> vector<2x128xf32>
    %c0_9 = arith.constant 0 : index
    %c0_10 = arith.constant 0 : index
    %10 = vector.load %arg4[%c0_9, %c0_10] : memref<1x128xf32, #tpu.memory_space<vmem>>, vector<1x128xf32>
    %11 = vector.broadcast %10 : vector<1x128xf32> to vector<2x128xf32>
    %12 = arith.addf %9, %11 : vector<2x128xf32>
    %cst_11 = arith.constant 0.000000e+00 : f32
    %13 = vector.broadcast %cst_11 : f32 to vector<2x128xf32>
    %14 = arith.maximumf %12, %13 : vector<2x128xf32>
    %c0_12 = arith.constant 0 : index
    %c0_13 = arith.constant 0 : index
    %15 = vector.load %arg5[%c0_12, %c0_13] : memref<128x128xf32, #tpu.memory_space<vmem>>, vector<128x128xf32>
    %cst_14 = arith.constant dense<0.000000e+00> : vector<2x128xf32>
    %16 = tpu.matmul %14, %15, %cst_14 {dimension_numbers = #tpu.dot_dimension_numbers<[1], [0], [0], [1], [0, 0, 1, 1], [], []>} : vector<2x128xf32>, vector<128x128xf32>, vector<2x128xf32> -> vector<2x128xf32>
    %c0_15 = arith.constant 0 : index
    %c0_16 = arith.constant 0 : index
    %17 = vector.load %arg6[%c0_15, %c0_16] : memref<1x128xf32, #tpu.memory_space<vmem>>, vector<1x128xf32>
    %18 = vector.broadcast %17 : vector<1x128xf32> to vector<2x128xf32>
    %19 = arith.addf %16, %18 : vector<2x128xf32>
    %c0_17 = arith.constant 0 : index
    %c0_18 = arith.constant 0 : index
    %20 = vector.load %arg7[%c0_17, %c0_18] : memref<2x128xf32, #tpu.memory_space<vmem>>, vector<2x128xf32>
    tpu.vector_store %arg7[%c0_17, %c0_18], %19 {strides = array<i32>} : memref<2x128xf32, #tpu.memory_space<vmem>>, vector<2x128xf32>,
    return
  }
}

module attributes {stable_mosaic.version = 11 : i64} {
  func.func @_conv_pool_relu_kernel(%arg0: memref<8x392xf32, #tpu.memory_space<vmem>>, %arg1: memref<25x16x8xf32, #tpu.memory_space<vmem>>, %arg2: memref<16x1xf32, #tpu.memory_space<vmem>>, %arg3: memref<317x50xf32, #tpu.memory_space<vmem>>, %arg4: memref<16x50xf32, #tpu.memory_space<vmem>>, %arg5: memref<16x332xf32, #tpu.memory_space<vmem>>) attributes {dimension_semantics = [], scalar_prefetch = 0 : i64, scratch_operands = 1 : i64, tpu.core_type = #tpu.core_type<tc>} {
    %cst = arith.constant 0.000000e+00 : f32
    %0 = vector.broadcast %cst : f32 to vector<16x332xf32>
    %c0 = arith.constant 0 : index
    %c0_0 = arith.constant 0 : index
    %c0_1 = arith.constant 0 : index
    %1 = vector.load %arg1[%c0, %c0_0, %c0_1] : memref<25x16x8xf32, #tpu.memory_space<vmem>>, vector<1x16x8xf32>
    %2 = vector.shape_cast %1 : vector<1x16x8xf32> to vector<16x8xf32>
    %c0_2 = arith.constant 0 : index
    %c0_3 = arith.constant 0 : index
    %3 = vector.load %arg0[%c0_2, %c0_3] : memref<8x392xf32, #tpu.memory_space<vmem>>, vector<8x332xf32>
    %cst_4 = arith.constant dense<0.000000e+00> : vector<16x332xf32>
    %4 = tpu.matmul %2, %3, %cst_4 {dimension_numbers = #tpu.dot_dimension_numbers<[1], [0], [0], [1], [0, 0, 1, 1], [], []>} : vector<16x8xf32>, vector<8x332xf32>, vector<16x332xf32> -> vector<16x332xf32>
    %5 = arith.addf %0, %4 : vector<16x332xf32>
    %c1 = arith.constant 1 : index
    %c0_5 = arith.constant 0 : index
    %c0_6 = arith.constant 0 : index
    %6 = vector.load %arg1[%c1, %c0_5, %c0_6] : memref<25x16x8xf32, #tpu.memory_space<vmem>>, vector<1x16x8xf32>
    %7 = vector.shape_cast %6 : vector<1x16x8xf32> to vector<16x8xf32>
    %c0_7 = arith.constant 0 : index
    %c1_8 = arith.constant 1 : index
    %8 = vector.load %arg0[%c0_7, %c1_8] : memref<8x392xf32, #tpu.memory_space<vmem>>, vector<8x332xf32>
    %cst_9 = arith.constant dense<0.000000e+00> : vector<16x332xf32>
    %9 = tpu.matmul %7, %8, %cst_9 {dimension_numbers = #tpu.dot_dimension_numbers<[1], [0], [0], [1], [0, 0, 1, 1], [], []>} : vector<16x8xf32>, vector<8x332xf32>, vector<16x332xf32> -> vector<16x332xf32>
    %10 = arith.addf %5, %9 : vector<16x332xf32>
    %c2 = arith.constant 2 : index
    %c0_10 = arith.constant 0 : index
    %c0_11 = arith.constant 0 : index
    %11 = vector.load %arg1[%c2, %c0_10, %c0_11] : memref<25x16x8xf32, #tpu.memory_space<vmem>>, vector<1x16x8xf32>
    %12 = vector.shape_cast %11 : vector<1x16x8xf32> to vector<16x8xf32>
    %c0_12 = arith.constant 0 : index
    %c2_13 = arith.constant 2 : index
    %13 = vector.load %arg0[%c0_12, %c2_13] : memref<8x392xf32, #tpu.memory_space<vmem>>, vector<8x332xf32>
    %cst_14 = arith.constant dense<0.000000e+00> : vector<16x332xf32>
    %14 = tpu.matmul %12, %13, %cst_14 {dimension_numbers = #tpu.dot_dimension_numbers<[1], [0], [0], [1], [0, 0, 1, 1], [], []>} : vector<16x8xf32>, vector<8x332xf32>, vector<16x332xf32> -> vector<16x332xf32>
    %15 = arith.addf %10, %14 : vector<16x332xf32>
    %c3 = arith.constant 3 : index
    %c0_15 = arith.constant 0 : index
    %c0_16 = arith.constant 0 : index
    %16 = vector.load %arg1[%c3, %c0_15, %c0_16] : memref<25x16x8xf32, #tpu.memory_space<vmem>>, vector<1x16x8xf32>
    %17 = vector.shape_cast %16 : vector<1x16x8xf32> to vector<16x8xf32>
    %c0_17 = arith.constant 0 : index
    %c3_18 = arith.constant 3 : index
    %18 = vector.load %arg0[%c0_17, %c3_18] : memref<8x392xf32, #tpu.memory_space<vmem>>, vector<8x332xf32>
    %cst_19 = arith.constant dense<0.000000e+00> : vector<16x332xf32>
    %19 = tpu.matmul %17, %18, %cst_19 {dimension_numbers = #tpu.dot_dimension_numbers<[1], [0], [0], [1], [0, 0, 1, 1], [], []>} : vector<16x8xf32>, vector<8x332xf32>, vector<16x332xf32> -> vector<16x332xf32>
    %20 = arith.addf %15, %19 : vector<16x332xf32>
    %c4 = arith.constant 4 : index
    %c0_20 = arith.constant 0 : index
    %c0_21 = arith.constant 0 : index
    %21 = vector.load %arg1[%c4, %c0_20, %c0_21] : memref<25x16x8xf32, #tpu.memory_space<vmem>>, vector<1x16x8xf32>
    %22 = vector.shape_cast %21 : vector<1x16x8xf32> to vector<16x8xf32>
    %c0_22 = arith.constant 0 : index
    %c4_23 = arith.constant 4 : index
    %23 = vector.load %arg0[%c0_22, %c4_23] : memref<8x392xf32, #tpu.memory_space<vmem>>, vector<8x332xf32>
    %cst_24 = arith.constant dense<0.000000e+00> : vector<16x332xf32>
    %24 = tpu.matmul %22, %23, %cst_24 {dimension_numbers = #tpu.dot_dimension_numbers<[1], [0], [0], [1], [0, 0, 1, 1], [], []>} : vector<16x8xf32>, vector<8x332xf32>, vector<16x332xf32> -> vector<16x332xf32>
    %25 = arith.addf %20, %24 : vector<16x332xf32>
    %c5 = arith.constant 5 : index
    %c0_25 = arith.constant 0 : index
    %c0_26 = arith.constant 0 : index
    %26 = vector.load %arg1[%c5, %c0_25, %c0_26] : memref<25x16x8xf32, #tpu.memory_space<vmem>>, vector<1x16x8xf32>
    %27 = vector.shape_cast %26 : vector<1x16x8xf32> to vector<16x8xf32>
    %c0_27 = arith.constant 0 : index
    %c14 = arith.constant 14 : index
    %28 = vector.load %arg0[%c0_27, %c14] : memref<8x392xf32, #tpu.memory_space<vmem>>, vector<8x332xf32>
    %cst_28 = arith.constant dense<0.000000e+00> : vector<16x332xf32>
    %29 = tpu.matmul %27, %28, %cst_28 {dimension_numbers = #tpu.dot_dimension_numbers<[1], [0], [0], [1], [0, 0, 1, 1], [], []>} : vector<16x8xf32>, vector<8x332xf32>, vector<16x332xf32> -> vector<16x332xf32>
    %30 = arith.addf %25, %29 : vector<16x332xf32>
    %c6 = arith.constant 6 : index
    %c0_29 = arith.constant 0 : index
    %c0_30 = arith.constant 0 : index
    %31 = vector.load %arg1[%c6, %c0_29, %c0_30] : memref<25x16x8xf32, #tpu.memory_space<vmem>>, vector<1x16x8xf32>
    %32 = vector.shape_cast %31 : vector<1x16x8xf32> to vector<16x8xf32>
    %c0_31 = arith.constant 0 : index
    %c15 = arith.constant 15 : index
    %33 = vector.load %arg0[%c0_31, %c15] : memref<8x392xf32, #tpu.memory_space<vmem>>, vector<8x332xf32>
    %cst_32 = arith.constant dense<0.000000e+00> : vector<16x332xf32>
    %34 = tpu.matmul %32, %33, %cst_32 {dimension_numbers = #tpu.dot_dimension_numbers<[1], [0], [0], [1], [0, 0, 1, 1], [], []>} : vector<16x8xf32>, vector<8x332xf32>, vector<16x332xf32> -> vector<16x332xf32>
    %35 = arith.addf %30, %34 : vector<16x332xf32>
    %c7 = arith.constant 7 : index
    %c0_33 = arith.constant 0 : index
    %c0_34 = arith.constant 0 : index
    %36 = vector.load %arg1[%c7, %c0_33, %c0_34] : memref<25x16x8xf32, #tpu.memory_space<vmem>>, vector<1x16x8xf32>
    %37 = vector.shape_cast %36 : vector<1x16x8xf32> to vector<16x8xf32>
    %c0_35 = arith.constant 0 : index
    %c16 = arith.constant 16 : index
    %38 = vector.load %arg0[%c0_35, %c16] : memref<8x392xf32, #tpu.memory_space<vmem>>, vector<8x332xf32>
    %cst_36 = arith.constant dense<0.000000e+00> : vector<16x332xf32>
    %39 = tpu.matmul %37, %38, %cst_36 {dimension_numbers = #tpu.dot_dimension_numbers<[1], [0], [0], [1], [0, 0, 1, 1], [], []>} : vector<16x8xf32>, vector<8x332xf32>, vector<16x332xf32> -> vector<16x332xf32>
    %40 = arith.addf %35, %39 : vector<16x332xf32>
    %c8 = arith.constant 8 : index
    %c0_37 = arith.constant 0 : index
    %c0_38 = arith.constant 0 : index
    %41 = vector.load %arg1[%c8, %c0_37, %c0_38] : memref<25x16x8xf32, #tpu.memory_space<vmem>>, vector<1x16x8xf32>
    %42 = vector.shape_cast %41 : vector<1x16x8xf32> to vector<16x8xf32>
    %c0_39 = arith.constant 0 : index
    %c17 = arith.constant 17 : index
    %43 = vector.load %arg0[%c0_39, %c17] : memref<8x392xf32, #tpu.memory_space<vmem>>, vector<8x332xf32>
    %cst_40 = arith.constant dense<0.000000e+00> : vector<16x332xf32>
    %44 = tpu.matmul %42, %43, %cst_40 {dimension_numbers = #tpu.dot_dimension_numbers<[1], [0], [0], [1], [0, 0, 1, 1], [], []>} : vector<16x8xf32>, vector<8x332xf32>, vector<16x332xf32> -> vector<16x332xf32>
    %45 = arith.addf %40, %44 : vector<16x332xf32>
    %c9 = arith.constant 9 : index
    %c0_41 = arith.constant 0 : index
    %c0_42 = arith.constant 0 : index
    %46 = vector.load %arg1[%c9, %c0_41, %c0_42] : memref<25x16x8xf32, #tpu.memory_space<vmem>>, vector<1x16x8xf32>
    %47 = vector.shape_cast %46 : vector<1x16x8xf32> to vector<16x8xf32>
    %c0_43 = arith.constant 0 : index
    %c18 = arith.constant 18 : index
    %48 = vector.load %arg0[%c0_43, %c18] : memref<8x392xf32, #tpu.memory_space<vmem>>, vector<8x332xf32>
    %cst_44 = arith.constant dense<0.000000e+00> : vector<16x332xf32>
    %49 = tpu.matmul %47, %48, %cst_44 {dimension_numbers = #tpu.dot_dimension_numbers<[1], [0], [0], [1], [0, 0, 1, 1], [], []>} : vector<16x8xf32>, vector<8x332xf32>, vector<16x332xf32> -> vector<16x332xf32>
    %50 = arith.addf %45, %49 : vector<16x332xf32>
    %c10 = arith.constant 10 : index
    %c0_45 = arith.constant 0 : index
    %c0_46 = arith.constant 0 : index
    %51 = vector.load %arg1[%c10, %c0_45, %c0_46] : memref<25x16x8xf32, #tpu.memory_space<vmem>>, vector<1x16x8xf32>
    %52 = vector.shape_cast %51 : vector<1x16x8xf32> to vector<16x8xf32>
    %c0_47 = arith.constant 0 : index
    %c28 = arith.constant 28 : index
    %53 = vector.load %arg0[%c0_47, %c28] : memref<8x392xf32, #tpu.memory_space<vmem>>, vector<8x332xf32>
    %cst_48 = arith.constant dense<0.000000e+00> : vector<16x332xf32>
    %54 = tpu.matmul %52, %53, %cst_48 {dimension_numbers = #tpu.dot_dimension_numbers<[1], [0], [0], [1], [0, 0, 1, 1], [], []>} : vector<16x8xf32>, vector<8x332xf32>, vector<16x332xf32> -> vector<16x332xf32>
    %55 = arith.addf %50, %54 : vector<16x332xf32>
    %c11 = arith.constant 11 : index
    %c0_49 = arith.constant 0 : index
    %c0_50 = arith.constant 0 : index
    %56 = vector.load %arg1[%c11, %c0_49, %c0_50] : memref<25x16x8xf32, #tpu.memory_space<vmem>>, vector<1x16x8xf32>
    %57 = vector.shape_cast %56 : vector<1x16x8xf32> to vector<16x8xf32>
    %c0_51 = arith.constant 0 : index
    %c29 = arith.constant 29 : index
    %58 = vector.load %arg0[%c0_51, %c29] : memref<8x392xf32, #tpu.memory_space<vmem>>, vector<8x332xf32>
    %cst_52 = arith.constant dense<0.000000e+00> : vector<16x332xf32>
    %59 = tpu.matmul %57, %58, %cst_52 {dimension_numbers = #tpu.dot_dimension_numbers<[1], [0], [0], [1], [0, 0, 1, 1], [], []>} : vector<16x8xf32>, vector<8x332xf32>, vector<16x332xf32> -> vector<16x332xf32>
    %60 = arith.addf %55, %59 : vector<16x332xf32>
    %c12 = arith.constant 12 : index
    %c0_53 = arith.constant 0 : index
    %c0_54 = arith.constant 0 : index
    %61 = vector.load %arg1[%c12, %c0_53, %c0_54] : memref<25x16x8xf32, #tpu.memory_space<vmem>>, vector<1x16x8xf32>
    %62 = vector.shape_cast %61 : vector<1x16x8xf32> to vector<16x8xf32>
    %c0_55 = arith.constant 0 : index
    %c30 = arith.constant 30 : index
    %63 = vector.load %arg0[%c0_55, %c30] : memref<8x392xf32, #tpu.memory_space<vmem>>, vector<8x332xf32>
    %cst_56 = arith.constant dense<0.000000e+00> : vector<16x332xf32>
    %64 = tpu.matmul %62, %63, %cst_56 {dimension_numbers = #tpu.dot_dimension_numbers<[1], [0], [0], [1], [0, 0, 1, 1], [], []>} : vector<16x8xf32>, vector<8x332xf32>, vector<16x332xf32> -> vector<16x332xf32>
    %65 = arith.addf %60, %64 : vector<16x332xf32>
    %c13 = arith.constant 13 : index
    %c0_57 = arith.constant 0 : index
    %c0_58 = arith.constant 0 : index
    %66 = vector.load %arg1[%c13, %c0_57, %c0_58] : memref<25x16x8xf32, #tpu.memory_space<vmem>>, vector<1x16x8xf32>
    %67 = vector.shape_cast %66 : vector<1x16x8xf32> to vector<16x8xf32>
    %c0_59 = arith.constant 0 : index
    %c31 = arith.constant 31 : index
    %68 = vector.load %arg0[%c0_59, %c31] : memref<8x392xf32, #tpu.memory_space<vmem>>, vector<8x332xf32>
    %cst_60 = arith.constant dense<0.000000e+00> : vector<16x332xf32>
    %69 = tpu.matmul %67, %68, %cst_60 {dimension_numbers = #tpu.dot_dimension_numbers<[1], [0], [0], [1], [0, 0, 1, 1], [], []>} : vector<16x8xf32>, vector<8x332xf32>, vector<16x332xf32> -> vector<16x332xf32>
    %70 = arith.addf %65, %69 : vector<16x332xf32>
    %c14_61 = arith.constant 14 : index
    %c0_62 = arith.constant 0 : index
    %c0_63 = arith.constant 0 : index
    %71 = vector.load %arg1[%c14_61, %c0_62, %c0_63] : memref<25x16x8xf32, #tpu.memory_space<vmem>>, vector<1x16x8xf32>
    %72 = vector.shape_cast %71 : vector<1x16x8xf32> to vector<16x8xf32>
    %c0_64 = arith.constant 0 : index
    %c32 = arith.constant 32 : index
    %73 = vector.load %arg0[%c0_64, %c32] : memref<8x392xf32, #tpu.memory_space<vmem>>, vector<8x332xf32>
    %cst_65 = arith.constant dense<0.000000e+00> : vector<16x332xf32>
    %74 = tpu.matmul %72, %73, %cst_65 {dimension_numbers = #tpu.dot_dimension_numbers<[1], [0], [0], [1], [0, 0, 1, 1], [], []>} : vector<16x8xf32>, vector<8x332xf32>, vector<16x332xf32> -> vector<16x332xf32>
    %75 = arith.addf %70, %74 : vector<16x332xf32>
    %c15_66 = arith.constant 15 : index
    %c0_67 = arith.constant 0 : index
    %c0_68 = arith.constant 0 : index
    %76 = vector.load %arg1[%c15_66, %c0_67, %c0_68] : memref<25x16x8xf32, #tpu.memory_space<vmem>>, vector<1x16x8xf32>
    %77 = vector.shape_cast %76 : vector<1x16x8xf32> to vector<16x8xf32>
    %c0_69 = arith.constant 0 : index
    %c42 = arith.constant 42 : index
    %78 = vector.load %arg0[%c0_69, %c42] : memref<8x392xf32, #tpu.memory_space<vmem>>, vector<8x332xf32>
    %cst_70 = arith.constant dense<0.000000e+00> : vector<16x332xf32>
    %79 = tpu.matmul %77, %78, %cst_70 {dimension_numbers = #tpu.dot_dimension_numbers<[1], [0], [0], [1], [0, 0, 1, 1], [], []>} : vector<16x8xf32>, vector<8x332xf32>, vector<16x332xf32> -> vector<16x332xf32>
    %80 = arith.addf %75, %79 : vector<16x332xf32>
    %c16_71 = arith.constant 16 : index
    %c0_72 = arith.constant 0 : index
    %c0_73 = arith.constant 0 : index
    %81 = vector.load %arg1[%c16_71, %c0_72, %c0_73] : memref<25x16x8xf32, #tpu.memory_space<vmem>>, vector<1x16x8xf32>
    %82 = vector.shape_cast %81 : vector<1x16x8xf32> to vector<16x8xf32>
    %c0_74 = arith.constant 0 : index
    %c43 = arith.constant 43 : index
    %83 = vector.load %arg0[%c0_74, %c43] : memref<8x392xf32, #tpu.memory_space<vmem>>, vector<8x332xf32>
    %cst_75 = arith.constant dense<0.000000e+00> : vector<16x332xf32>
    %84 = tpu.matmul %82, %83, %cst_75 {dimension_numbers = #tpu.dot_dimension_numbers<[1], [0], [0], [1], [0, 0, 1, 1], [], []>} : vector<16x8xf32>, vector<8x332xf32>, vector<16x332xf32> -> vector<16x332xf32>
    %85 = arith.addf %80, %84 : vector<16x332xf32>
    %c17_76 = arith.constant 17 : index
    %c0_77 = arith.constant 0 : index
    %c0_78 = arith.constant 0 : index
    %86 = vector.load %arg1[%c17_76, %c0_77, %c0_78] : memref<25x16x8xf32, #tpu.memory_space<vmem>>, vector<1x16x8xf32>
    %87 = vector.shape_cast %86 : vector<1x16x8xf32> to vector<16x8xf32>
    %c0_79 = arith.constant 0 : index
    %c44 = arith.constant 44 : index
    %88 = vector.load %arg0[%c0_79, %c44] : memref<8x392xf32, #tpu.memory_space<vmem>>, vector<8x332xf32>
    %cst_80 = arith.constant dense<0.000000e+00> : vector<16x332xf32>
    %89 = tpu.matmul %87, %88, %cst_80 {dimension_numbers = #tpu.dot_dimension_numbers<[1], [0], [0], [1], [0, 0, 1, 1], [], []>} : vector<16x8xf32>, vector<8x332xf32>, vector<16x332xf32> -> vector<16x332xf32>
    %90 = arith.addf %85, %89 : vector<16x332xf32>
    %c18_81 = arith.constant 18 : index
    %c0_82 = arith.constant 0 : index
    %c0_83 = arith.constant 0 : index
    %91 = vector.load %arg1[%c18_81, %c0_82, %c0_83] : memref<25x16x8xf32, #tpu.memory_space<vmem>>, vector<1x16x8xf32>
    %92 = vector.shape_cast %91 : vector<1x16x8xf32> to vector<16x8xf32>
    %c0_84 = arith.constant 0 : index
    %c45 = arith.constant 45 : index
    %93 = vector.load %arg0[%c0_84, %c45] : memref<8x392xf32, #tpu.memory_space<vmem>>, vector<8x332xf32>
    %cst_85 = arith.constant dense<0.000000e+00> : vector<16x332xf32>
    %94 = tpu.matmul %92, %93, %cst_85 {dimension_numbers = #tpu.dot_dimension_numbers<[1], [0], [0], [1], [0, 0, 1, 1], [], []>} : vector<16x8xf32>, vector<8x332xf32>, vector<16x332xf32> -> vector<16x332xf32>
    %95 = arith.addf %90, %94 : vector<16x332xf32>
    %c19 = arith.constant 19 : index
    %c0_86 = arith.constant 0 : index
    %c0_87 = arith.constant 0 : index
    %96 = vector.load %arg1[%c19, %c0_86, %c0_87] : memref<25x16x8xf32, #tpu.memory_space<vmem>>, vector<1x16x8xf32>
    %97 = vector.shape_cast %96 : vector<1x16x8xf32> to vector<16x8xf32>
    %c0_88 = arith.constant 0 : index
    %c46 = arith.constant 46 : index
    %98 = vector.load %arg0[%c0_88, %c46] : memref<8x392xf32, #tpu.memory_space<vmem>>, vector<8x332xf32>
    %cst_89 = arith.constant dense<0.000000e+00> : vector<16x332xf32>
    %99 = tpu.matmul %97, %98, %cst_89 {dimension_numbers = #tpu.dot_dimension_numbers<[1], [0], [0], [1], [0, 0, 1, 1], [], []>} : vector<16x8xf32>, vector<8x332xf32>, vector<16x332xf32> -> vector<16x332xf32>
    %100 = arith.addf %95, %99 : vector<16x332xf32>
    %c20 = arith.constant 20 : index
    %c0_90 = arith.constant 0 : index
    %c0_91 = arith.constant 0 : index
    %101 = vector.load %arg1[%c20, %c0_90, %c0_91] : memref<25x16x8xf32, #tpu.memory_space<vmem>>, vector<1x16x8xf32>
    %102 = vector.shape_cast %101 : vector<1x16x8xf32> to vector<16x8xf32>
    %c0_92 = arith.constant 0 : index
    %c56 = arith.constant 56 : index
    %103 = vector.load %arg0[%c0_92, %c56] : memref<8x392xf32, #tpu.memory_space<vmem>>, vector<8x332xf32>
    %cst_93 = arith.constant dense<0.000000e+00> : vector<16x332xf32>
    %104 = tpu.matmul %102, %103, %cst_93 {dimension_numbers = #tpu.dot_dimension_numbers<[1], [0], [0], [1], [0, 0, 1, 1], [], []>} : vector<16x8xf32>, vector<8x332xf32>, vector<16x332xf32> -> vector<16x332xf32>
    %105 = arith.addf %100, %104 : vector<16x332xf32>
    %c21 = arith.constant 21 : index
    %c0_94 = arith.constant 0 : index
    %c0_95 = arith.constant 0 : index
    %106 = vector.load %arg1[%c21, %c0_94, %c0_95] : memref<25x16x8xf32, #tpu.memory_space<vmem>>, vector<1x16x8xf32>
    %107 = vector.shape_cast %106 : vector<1x16x8xf32> to vector<16x8xf32>
    %c0_96 = arith.constant 0 : index
    %c57 = arith.constant 57 : index
    %108 = vector.load %arg0[%c0_96, %c57] : memref<8x392xf32, #tpu.memory_space<vmem>>, vector<8x332xf32>
    %cst_97 = arith.constant dense<0.000000e+00> : vector<16x332xf32>
    %109 = tpu.matmul %107, %108, %cst_97 {dimension_numbers = #tpu.dot_dimension_numbers<[1], [0], [0], [1], [0, 0, 1, 1], [], []>} : vector<16x8xf32>, vector<8x332xf32>, vector<16x332xf32> -> vector<16x332xf32>
    %110 = arith.addf %105, %109 : vector<16x332xf32>
    %c22 = arith.constant 22 : index
    %c0_98 = arith.constant 0 : index
    %c0_99 = arith.constant 0 : index
    %111 = vector.load %arg1[%c22, %c0_98, %c0_99] : memref<25x16x8xf32, #tpu.memory_space<vmem>>, vector<1x16x8xf32>
    %112 = vector.shape_cast %111 : vector<1x16x8xf32> to vector<16x8xf32>
    %c0_100 = arith.constant 0 : index
    %c58 = arith.constant 58 : index
    %113 = vector.load %arg0[%c0_100, %c58] : memref<8x392xf32, #tpu.memory_space<vmem>>, vector<8x332xf32>
    %cst_101 = arith.constant dense<0.000000e+00> : vector<16x332xf32>
    %114 = tpu.matmul %112, %113, %cst_101 {dimension_numbers = #tpu.dot_dimension_numbers<[1], [0], [0], [1], [0, 0, 1, 1], [], []>} : vector<16x8xf32>, vector<8x332xf32>, vector<16x332xf32> -> vector<16x332xf32>
    %115 = arith.addf %110, %114 : vector<16x332xf32>
    %c23 = arith.constant 23 : index
    %c0_102 = arith.constant 0 : index
    %c0_103 = arith.constant 0 : index
    %116 = vector.load %arg1[%c23, %c0_102, %c0_103] : memref<25x16x8xf32, #tpu.memory_space<vmem>>, vector<1x16x8xf32>
    %117 = vector.shape_cast %116 : vector<1x16x8xf32> to vector<16x8xf32>
    %c0_104 = arith.constant 0 : index
    %c59 = arith.constant 59 : index
    %118 = vector.load %arg0[%c0_104, %c59] : memref<8x392xf32, #tpu.memory_space<vmem>>, vector<8x332xf32>
    %cst_105 = arith.constant dense<0.000000e+00> : vector<16x332xf32>
    %119 = tpu.matmul %117, %118, %cst_105 {dimension_numbers = #tpu.dot_dimension_numbers<[1], [0], [0], [1], [0, 0, 1, 1], [], []>} : vector<16x8xf32>, vector<8x332xf32>, vector<16x332xf32> -> vector<16x332xf32>
    %120 = arith.addf %115, %119 : vector<16x332xf32>
    %c24 = arith.constant 24 : index
    %c0_106 = arith.constant 0 : index
    %c0_107 = arith.constant 0 : index
    %121 = vector.load %arg1[%c24, %c0_106, %c0_107] : memref<25x16x8xf32, #tpu.memory_space<vmem>>, vector<1x16x8xf32>
    %122 = vector.shape_cast %121 : vector<1x16x8xf32> to vector<16x8xf32>
    %c0_108 = arith.constant 0 : index
    %c60 = arith.constant 60 : index
    %123 = vector.load %arg0[%c0_108, %c60] : memref<8x392xf32, #tpu.memory_space<vmem>>, vector<8x332xf32>
    %cst_109 = arith.constant dense<0.000000e+00> : vector<16x332xf32>
    %124 = tpu.matmul %122, %123, %cst_109 {dimension_numbers = #tpu.dot_dimension_numbers<[1], [0], [0], [1], [0, 0, 1, 1], [], []>} : vector<16x8xf32>, vector<8x332xf32>, vector<16x332xf32> -> vector<16x332xf32>
    %125 = arith.addf %120, %124 : vector<16x332xf32>
    %c0_110 = arith.constant 0 : index
    %c0_111 = arith.constant 0 : index
    %126 = vector.load %arg2[%c0_110, %c0_111] : memref<16x1xf32, #tpu.memory_space<vmem>>, vector<16x1xf32>
    %127 = vector.broadcast %126 : vector<16x1xf32> to vector<16x332xf32>
    %128 = arith.addf %125, %127 : vector<16x332xf32>
    %c0_112 = arith.constant 0 : index
    %c0_113 = arith.constant 0 : index
    %129 = vector.load %arg5[%c0_112, %c0_113] : memref<16x332xf32, #tpu.memory_space<vmem>>, vector<16x332xf32>
    tpu.vector_store %arg5[%c0_112, %c0_113], %128 {strides = array<i32>} : memref<16x332xf32, #tpu.memory_space<vmem>>, vector<16x332xf32>,
    %c0_114 = arith.constant 0 : index
    %c0_115 = arith.constant 0 : index
    %130 = vector.load %arg5[%c0_114, %c0_115] : memref<16x332xf32, #tpu.memory_space<vmem>>, vector<16x317xf32>
    %c0_116 = arith.constant 0 : index
    %c1_117 = arith.constant 1 : index
    %131 = vector.load %arg5[%c0_116, %c1_117] : memref<16x332xf32, #tpu.memory_space<vmem>>, vector<16x317xf32>
    %132 = arith.maximumf %130, %131 : vector<16x317xf32>
    %c0_118 = arith.constant 0 : index
    %c14_119 = arith.constant 14 : index
    %133 = vector.load %arg5[%c0_118, %c14_119] : memref<16x332xf32, #tpu.memory_space<vmem>>, vector<16x317xf32>
    %c0_120 = arith.constant 0 : index
    %c15_121 = arith.constant 15 : index
    %134 = vector.load %arg5[%c0_120, %c15_121] : memref<16x332xf32, #tpu.memory_space<vmem>>, vector<16x317xf32>
    %135 = arith.maximumf %133, %134 : vector<16x317xf32>
    %136 = arith.maximumf %132, %135 : vector<16x317xf32>
    %cst_122 = arith.constant 0.000000e+00 : f32
    %137 = vector.broadcast %cst_122 : f32 to vector<16x317xf32>
    %138 = arith.maximumf %136, %137 : vector<16x317xf32>
    %c0_123 = arith.constant 0 : index
    %c0_124 = arith.constant 0 : index
    %139 = vector.load %arg3[%c0_123, %c0_124] : memref<317x50xf32, #tpu.memory_space<vmem>>, vector<317x50xf32>
    %cst_125 = arith.constant dense<0.000000e+00> : vector<16x50xf32>
    %140 = tpu.matmul %138, %139, %cst_125 {dimension_numbers = #tpu.dot_dimension_numbers<[1], [0], [0], [1], [0, 0, 1, 1], [], []>} : vector<16x317xf32>, vector<317x50xf32>, vector<16x50xf32> -> vector<16x50xf32>
    %c0_126 = arith.constant 0 : index
    %c0_127 = arith.constant 0 : index
    %141 = vector.load %arg4[%c0_126, %c0_127] : memref<16x50xf32, #tpu.memory_space<vmem>>, vector<16x50xf32>
    tpu.vector_store %arg4[%c0_126, %c0_127], %140 {strides = array<i32>} : memref<16x50xf32, #tpu.memory_space<vmem>>, vector<16x50xf32>,
    return
  }
}

</mosaic_0001>

<bundles_post_ra>
// kernel: lenet_forward.5
= control target key start
LH: loop header
LB: loop body
LE: loop exit
PB: predicated region body
PF: predicated region fallthrough
CT: control target
= control target key end

     0   :  { %s606_s0 = inlined_call_operand.vmem [shape: f32[2,400], index: 0, kind: input, shape index: {}]   ;;  %s607_s1 = inlined_call_operand.vmem [shape: f32[400,128], index: 1, kind: input, shape index: {}]   ;;  %s608_s2 = inlined_call_operand.vmem [shape: f32[1,128], index: 2, kind: input, shape index: {}]   ;;  %s609_s3 = inlined_call_operand.vmem [shape: f32[128,128], index: 3, kind: input, shape index: {}]   ;;  %s610_s4 = inlined_call_operand.vmem [shape: f32[1,128], index: 4, kind: input, shape index: {}]   ;;  %s611_s5 = inlined_call_operand.vmem [shape: f32[128,128], index: 5, kind: input, shape index: {}]   ;;  %s612_s6 = inlined_call_operand.vmem [shape: f32[1,128], index: 6, kind: input, shape index: {}]   ;;  %s613_s7 = inlined_call_operand.hbm [shape: f32[2,128], index: 7, kind: output, shape index: {}]  }
   0x1   :  { %v75_v0 = vld [vmem:[%s607_s1 + $0x178] sm:$0xff]  ;;  %v74_v2 = vld [vmem:[%s607_s1 + $0x170] sm:$0xff]  ;;  %v73_v5 = vld [vmem:[%s607_s1 + $0x168] sm:$0xff] }
   0x2   :  { %v43_v1 = vld [vmem:[%s607_s1 + $0x78] sm:$0xff]  ;;  %134 = vmatpush.msra.mxu2 %v75_v0  ;;  %v42_v3 = vld [vmem:[%s607_s1 + $0x70] sm:$0xff]  ;;  %v41_v6 = vld [vmem:[%s607_s1 + $0x68] sm:$0xff] }
   0x3   :  { %94 = vmatpush.msra.mxu0 %v43_v1  ;;  %v59_v4 = vld [vmem:[%s607_s1 + $0xf8] sm:$0xff]  ;;  %v58_v7 = vld [vmem:[%s607_s1 + $0xf0] sm:$0xff]  ;;  %v57_v8 = vld [vmem:[%s607_s1 + $0xe8] sm:$0xff] }
   0x4   :  { %114 = vmatpush.msra.mxu1 %v59_v4  ;;  %135 = vmatpush.msra.mxu2 %v74_v2  ;;  %v72_v9 = vld [vmem:[%s607_s1 + $0x160] sm:$0xff]  ;;  %v71_v12 = vld [vmem:[%s607_s1 + $0x158] sm:$0xff]  ;;  %v70_v15 = vld [vmem:[%s607_s1 + $0x150] sm:$0xff] }
   0x5   :  { %95 = vmatpush.msra.mxu0 %v42_v3  ;;  %v40_v10 = vld [vmem:[%s607_s1 + $0x60] sm:$0xff]  ;;  %v39_v13 = vld [vmem:[%s607_s1 + $0x58] sm:$0xff]  ;;  %v38_v16 = vld [vmem:[%s607_s1 + $0x50] sm:$0xff] }
   0x6   :  { %115 = vmatpush.msra.mxu1 %v58_v7  ;;  %136 = vmatpush.msra.mxu2 %v73_v5  ;;  %v56_v11 = vld [vmem:[%s607_s1 + $0xe0] sm:$0xff]  ;;  %v55_v14 = vld [vmem:[%s607_s1 + $0xd8] sm:$0xff]  ;;  %v54_v17 = vld [vmem:[%s607_s1 + $0xd0] sm:$0xff] }
   0x7   :  { %96 = vmatpush.msra.mxu0 %v41_v6  ;;  %v69_v18 = vld [vmem:[%s607_s1 + $0x148] sm:$0xff]  ;;  %v68_v21 = vld [vmem:[%s607_s1 + $0x140] sm:$0xff]  ;;  %v67_v24 = vld [vmem:[%s607_s1 + $0x138] sm:$0xff] }
   0x8   :  { %116 = vmatpush.msra.mxu1 %v57_v8  ;;  %137 = vmatpush.msra.mxu2 %v72_v9  ;;  %v37_v19 = vld [vmem:[%s607_s1 + $0x48] sm:$0xff]  ;;  %v36_v22 = vld [vmem:[%s607_s1 + $0x40] sm:$0xff]  ;;  %v35_v25 = vld [vmem:[%s607_s1 + $0x38] sm:$0xff] }
   0x9   :  { %97 = vmatpush.msra.mxu0 %v40_v10  ;;  %v53_v20 = vld [vmem:[%s607_s1 + $0xc8] sm:$0xff]  ;;  %v52_v23 = vld [vmem:[%s607_s1 + $0xc0] sm:$0xff]  ;;  %v51_v26 = vld [vmem:[%s607_s1 + $0xb8] sm:$0xff] }
   0xa   :  { %117 = vmatpush.msra.mxu1 %v56_v11  ;;  %138 = vmatpush.msra.mxu2 %v71_v12  ;;  %v77_v27 = vld [vmem:[%s607_s1 + $0x188] sm:$0xff]  ;;  %v27_v28 = vld [vmem:[%s606_s0] sm:$0xff]  ;;  %v66_v29 = vld [vmem:[%s607_s1 + $0x130] sm:$0xff] }
   0xb   :  { %98 = vmatpush.msra.mxu0 %v39_v13  ;;  %v34_v30 = vld [vmem:[%s607_s1 + $0x30] sm:$0xff]  ;;  %168 = vmatpush.msra.mxu3 %v77_v27  ;;  %83 = vst [vmem:[#allocation1] ss:$4 sm:$0xff] %v27_v28  ;;  %v76_v31 = vld [vmem:[%s607_s1 + $0x180] sm:$0xff]  ;;  %v190_v33 = vld [vmem:[%s609_s3 + $0x78] sm:$0xff] }
   0xc   :  { %118 = vmatpush.msra.mxu1 %v55_v14  ;;  %139 = vmatpush.msra.mxu2 %v70_v15  ;;  %v50_v32 = vld [vmem:[%s607_s1 + $0xb0] sm:$0xff]  ;;  %v65_v34 = vld [vmem:[%s607_s1 + $0x128] sm:$0xff]  ;;  %v64_v36 = vld [vmem:[%s607_s1 + $0x120] sm:$0xff] }
   0xd   :  { %99 = vmatpush.msra.mxu0 %v38_v16  ;;  %v33_v35 = vld [vmem:[%s607_s1 + $0x28] sm:$0xff]  ;;  %169 = vmatpush.msra.mxu3 %v76_v31  ;;  %v32_v37 = vld [vmem:[%s607_s1 + $0x20] sm:$0xff]  ;;  %v189_v39 = vld [vmem:[%s609_s3 + $0x70] sm:$0xff] }
   0xe   :  { %119 = vmatpush.msra.mxu1 %v54_v17  ;;  %140 = vmatpush.msra.mxu2 %v69_v18  ;;  %v49_v38 = vld [vmem:[%s607_s1 + $0xa8] sm:$0xff]  ;;  %v48_v40 = vld [vmem:[%s607_s1 + $0xa0] sm:$0xff] }
   0xf   :  { %100 = vmatpush.msra.mxu0 %v37_v19  ;;  %195 = vmatpush.msrb.mxu3 %v190_v33  ;;  %v188_v41 = vld [vmem:[%s609_s3 + $0x68] sm:$0xff] }
  0x10   :  { %120 = vmatpush.msra.mxu1 %v53_v20  ;;  %141 = vmatpush.msra.mxu2 %v68_v21 }
  0x11   :  { %101 = vmatpush.msra.mxu0 %v36_v22 }
  0x12   :  { %121 = vmatpush.msra.mxu1 %v52_v23  ;;  %142 = vmatpush.msra.mxu2 %v67_v24 }
  0x13   :  { %102 = vmatpush.msra.mxu0 %v35_v25 }
  0x14   :  { %122 = vmatpush.msra.mxu1 %v51_v26  ;;  %143 = vmatpush.msra.mxu2 %v66_v29 }
  0x15   :  { %103 = vmatpush.msra.mxu0 %v34_v30 }
  0x16   :  { %123 = vmatpush.msra.mxu1 %v50_v32  ;;  %144 = vmatpush.msra.mxu2 %v65_v34 }
  0x17   :  { %104 = vmatpush.msra.mxu0 %v33_v35 }
  0x18   :  { %12 = vsyncpa [#allocation3], 0  ;;  %124 = vmatpush.msra.mxu1 %v49_v38  ;;  %v63_v42 = vld [vmem:[%s607_s1 + $0x118] sm:$0xff]  ;;  %196 = vmatpush.msrb.mxu3 %v189_v39  ;;  %vm91_vm0 = vcmask 130048   ;;  %v62_v45 = vld [vmem:[%s607_s1 + $0x110] sm:$0xff]  ;;  %s304_s24 = smov [#allocation2]  }
  0x19   :  { %v31_v43 = vld [vmem:[%s607_s1 + $0x18] sm:$0xff]  ;;  %145 = vmatpush.msra.mxu2 %v64_v36  ;;  %105 = vmatpush.msra.mxu0 %v32_v37  ;;  %v30_v46 = vld [vmem:[%s607_s1 + $0x10] sm:$0xff]  ;;  %v187_v49 = vld [vmem:[%s609_s3 + $0x60] sm:$0xff]  ;;  %s262_s25 = sshll.u32 %s304_s24, 4  ;;  %s264_s28 = sshll.u32 %s613_s7, 4  ;;  %s263_s25 = int_to_ptr.vmem [resolvable:$true] %s262_s25  ;;  %s265_s28 = int_to_ptr.hbm [resolvable:$true] %s264_s28 }
  0x1a   :  { %v47_v44 = vld [vmem:[%s607_s1 + $0x98] sm:$0xff]  ;;  %125 = vmatpush.msra.mxu1 %v48_v40  ;;  %197 = vmatpush.msrb.mxu3 %v188_v41  ;;  %v46_v48 = vld [vmem:[%s607_s1 + $0x90] sm:$0xff]  ;;  %v61_v50 = vld [vmem:[%s607_s1 + $0x108] sm:$0xff] }
  0x1b   :  { %v87_v47 = vld.sshfl [vmem:[#allocation1 + $0x18] sm:$0xff pattern:$0x73625140]  ;;  %146 = vmatpush.msra.mxu2 %v63_v42  ;;  %106 = vmatpush.msra.mxu0 %v31_v43  ;;  %v29_v51 = vld [vmem:[%s607_s1 + $0x8] sm:$0xff]  ;;  %v60_v54 = vld [vmem:[%s607_s1 + $0x100] sm:$0xff] }
  0x1c   :  { %126 = vmatpush.msra.mxu1 %v47_v44  ;;  %273 = vmatmul.msk.f32.vlgmr.msra.gmra.mxu3 %vm91_vm0, %v87_v47  ;;  %v45_v52 = vld [vmem:[%s607_s1 + $0x88] sm:$0xff]  ;;  %v186_v53 = vld [vmem:[%s609_s3 + $0x58] sm:$0xff]  ;;  %v28_v55 = vld [vmem:[%s607_s1] sm:$0xff] }
  0x1d   :  { %147 = vmatpush.msra.mxu2 %v62_v45  ;;  %107 = vmatpush.msra.mxu0 %v30_v46  ;;  %v86_v56 = vld.sshfl [vmem:[#allocation1 + $0x10] sm:$0xff pattern:$0x73625140]  ;;  %v84_v57 = vld.sshfl [vmem:[#allocation1] sm:$0xff pattern:$0x73625140] }
  0x1e   :  { %127 = vmatpush.msra.mxu1 %v46_v48  ;;  %198 = vmatpush.msrb.mxu3 %v187_v49  ;;  %v44_v58 = vld [vmem:[%s607_s1 + $0x80] sm:$0xff]  ;;  %v185_v59 = vld [vmem:[%s609_s3 + $0x50] sm:$0xff]  ;;  %v85_v60 = vld.sshfl [vmem:[#allocation1 + $0x8] sm:$0xff pattern:$0x73625140] }
  0x1f   :  { %148 = vmatpush.msra.mxu2 %v61_v50  ;;  %108 = vmatpush.msra.mxu0 %v29_v51  ;;  %v184_v61 = vld [vmem:[%s609_s3 + $0x48] sm:$0xff]  ;;  %v183_v62 = vld [vmem:[%s609_s3 + $0x40] sm:$0xff]  ;;  %v182_v63 = vld [vmem:[%s609_s3 + $0x38] sm:$0xff] }
  0x20   :  { %128 = vmatpush.msra.mxu1 %v45_v52  ;;  %199 = vmatpush.msrb.mxu3 %v186_v53  ;;  %v181_v0 = vld [vmem:[%s609_s3 + $0x30] sm:$0xff]  ;;  %v180_v1 = vld [vmem:[%s609_s3 + $0x28] sm:$0xff]  ;;  %v179_v2 = vld [vmem:[%s609_s3 + $0x20] sm:$0xff] }
  0x21   :  { %149 = vmatpush.msra.mxu2 %v60_v54  ;;  %109 = vmatpush.msra.mxu0 %v28_v55  ;;  %v178_v3 = vld [vmem:[%s609_s3 + $0x18] sm:$0xff]  ;;  %v177_v4 = vld [vmem:[%s609_s3 + $0x10] sm:$0xff]  ;;  %v176_v5 = vld [vmem:[%s609_s3 + $0x8] sm:$0xff] }
  0x22   :  { %150 = vmatmul.f32.vlgmr.msra.gmra.mxu2 %v86_v56  ;;  %110 = vmatmul.f32.vlgmr.msra.gmra.mxu0 %v84_v57  ;;  %v175_v6 = vld [vmem:[%s609_s3] sm:$0xff]  ;;  %v231_v7 = vld [vmem:[%s611_s5 + $0x78] sm:$0xff]  ;;  %v230_v8 = vld [vmem:[%s611_s5 + $0x70] sm:$0xff] }
  0x23   :  { %129 = vmatpush.msra.mxu1 %v44_v58  ;;  %200 = vmatpush.msrb.mxu3 %v185_v59  ;;  %v229_v9 = vld [vmem:[%s611_s5 + $0x68] sm:$0xff]  ;;  %v228_v10 = vld [vmem:[%s611_s5 + $0x60] sm:$0xff]  ;;  %v227_v11 = vld [vmem:[%s611_s5 + $0x58] sm:$0xff] }
  0x24   :  { %130 = vmatmul.f32.vlgmr.msra.gmra.mxu1 %v85_v60  ;;  %236 = vmatpush.msrb.mxu0 %v231_v7  ;;  %v226_v12 = vld [vmem:[%s611_s5 + $0x50] sm:$0xff]  ;;  %v225_v13 = vld [vmem:[%s611_s5 + $0x48] sm:$0xff]  ;;  %v224_v14 = vld [vmem:[%s611_s5 + $0x40] sm:$0xff] }
  0x25   :  { %201 = vmatpush.msrb.mxu3 %v184_v61  ;;  %v223_v15 = vld [vmem:[%s611_s5 + $0x38] sm:$0xff]  ;;  %v275_v16 = vld [vmem:[%s608_s2] ss:$0 sm:$0xff]  ;;  %v222_v17 = vld [vmem:[%s611_s5 + $0x30] sm:$0xff] }
  0x26   :  { %237 = vmatpush.msrb.mxu0 %v230_v8  ;;  %v221_v18 = vld [vmem:[%s611_s5 + $0x28] sm:$0xff]  ;;  %v220_v21 = vld [vmem:[%s611_s5 + $0x20] sm:$0xff]  ;;  %v219_v24 = vld [vmem:[%s611_s5 + $0x18] sm:$0xff] }
  0x27   :  { %202 = vmatpush.msrb.mxu3 %v183_v62  ;;  %v218_v30 = vld [vmem:[%s611_s5 + $0x10] sm:$0xff]  ;;  %v217_v31 = vld [vmem:[%s611_s5 + $0x8] sm:$0xff]  ;;  %v216_v32 = vld [vmem:[%s611_s5] sm:$0xff] }
  0x28   :  { %238 = vmatpush.msrb.mxu0 %v229_v9  ;;  %v276_v33 = vld [vmem:[%s610_s4] ss:$0 sm:$0xff] }
  0x29   :  { %203 = vmatpush.msrb.mxu3 %v182_v63  ;;  %v277_v37 = vld [vmem:[%s612_s6] ss:$0 sm:$0xff] }
  0x2a   :  { %239 = vmatpush.msrb.mxu0 %v228_v10 }
  0x2b   :  { %204 = vmatpush.msrb.mxu3 %v181_v0 }
  0x2c   :  { %240 = vmatpush.msrb.mxu0 %v227_v11 }
  0x2d   :  { %205 = vmatpush.msrb.mxu3 %v180_v1 }
  0x2e   :  { %241 = vmatpush.msrb.mxu0 %v226_v12 }
  0x2f   :  { %206 = vmatpush.msrb.mxu3 %v179_v2 }
  0x30   :  { %242 = vmatpush.msrb.mxu0 %v225_v13 }
  0x31   :  { %207 = vmatpush.msrb.mxu3 %v178_v3 }
  0x32   :  { %243 = vmatpush.msrb.mxu0 %v224_v14 }
  0x33   :  { %208 = vmatpush.msrb.mxu3 %v177_v4 }
  0x34   :  { %244 = vmatpush.msrb.mxu0 %v223_v15 }
  0x35   :  { %209 = vmatpush.msrb.mxu3 %v176_v5 }
  0x36   :  { %245 = vmatpush.msrb.mxu0 %v222_v17 }
  0x37   :  { %210 = vmatpush.msrb.mxu3 %v175_v6 }
  0x38   :  { %246 = vmatpush.msrb.mxu0 %v221_v18 }
  0x3a   :  { %247 = vmatpush.msrb.mxu0 %v220_v21 }
  0x3c   :  { %248 = vmatpush.msrb.mxu0 %v219_v24 }
  0x3e   :  { %249 = vmatpush.msrb.mxu0 %v218_v30 }
  0x40   :  { %250 = vmatpush.msrb.mxu0 %v217_v31 }
  0x42   :  { %251 = vmatpush.msrb.mxu0 %v216_v32 }
  0x9f   :  { %v111_v19 = vpop.f32.mrf.mxu0  ;;  %v171_v26 = vpop.f32.mrf.mxu3 }
  0xa0   :  { %v112_v20 = vadd.f32 %v275_v16, %v111_v19 }
  0xa1   :  { %v131_v22 = vpop.f32.mrf.mxu1 }
  0xa2   :  { %v132_v23 = vadd.f32 %v131_v22, %v112_v20 }
  0xa5   :  { %v151_v25 = vpop.f32.mrf.mxu2 }
  0xa6   :  { %v152_v27 = vadd.f32 %v151_v25, %v132_v23 }
  0xa8   :  { %v172_v28 = vadd.f32 %v171_v26, %v152_v27 }
  0xaa   :  { %v174_v29 = vmax.f32 %v172_v28, 0.0 }
  0xac   :  { %211 = vmatmul.f32.vlgmr.msrb.gmra.mxu3 %v174_v29 }
 0x12f   :  { %v212_v34 = vpop.f32.mrf.mxu3 }
 0x130   :  { %v213_v35 = vadd.f32 %v276_v33, %v212_v34 }
 0x132   :  { %v215_v36 = vmax.f32 %v213_v35, 0.0 }
 0x134   :  { %252 = vmatmul.f32.vlgmr.msrb.gmra.mxu0 %v215_v36 }
 0x1b1   :  { %v253_v38 = vpop.f32.mrf.mxu0 }
 0x1b2   :  { %v254_v39 = vadd.f32 %v277_v37, %v253_v38 }
 0x1b4   :  { %256 = vst [vmem:[#allocation2] sm:$0x3] %v254_v39 }
 0x1b5   :  { %267 = dma.vmem_to_hbm [thread:$0]  %s263_s25, 32, %s265_s28, [#allocation3]  }
 0x1b6   :  { %302 = dma.done.wait [#allocation3], 32  }
 0x1b7   :  { %303 = vsyncadd [#allocation3], 4294967264 }
 0x1b8   :  { %272 = vsyncpa [#allocation3], 1 }

// kernel: lenet_forward.4
= control target key start
LH: loop header
LB: loop body
LE: loop exit
PB: predicated region body
PF: predicated region fallthrough
CT: control target
= control target key end

     0   :  { %s3037_s21 = smov 126   ;;  %s3038_s22 = smov 127   ;;  %vm40_vm0 = vcmask 64512   ;;  %vm34_vm1 = vcmask 1039360   ;;  %vm200_vm2 = vcmask 1031168   ;;  %vm296_vm3 = vcmask 1022976   ;;  %s4006_s0 = inlined_call_operand.vmem [shape: f32[8,392], index: 0, kind: input, shape index: {}]   ;;  %s4007_s1 = inlined_call_operand.vmem [shape: f32[25,16,8], index: 1, kind: input, shape index: {}]   ;;  %s4008_s2 = inlined_call_operand.vmem [shape: f32[16,1], index: 2, kind: input, shape index: {}]   ;;  %s4009_s3 = inlined_call_operand.vmem [shape: f32[317,50], index: 3, kind: input, shape index: {}]   ;;  %s4010_s4 = inlined_call_operand.vmem [shape: f32[16,50], index: 4, kind: output, shape index: {}]  }
   0x1   :  { %v3090_v0 = vld [vmem:[%s4006_s0] sm:$0xff]  ;;  %v20_v1 = vld [vmem:[%s4006_s0 + $0x8] sm:$0xff]  ;;  %v3098_v2 = vld [vmem:[%s4006_s0 + $0x10] sm:$0xff]  ;;  %s3039_s23 = smov 125   ;;  %s3040_s24 = smov 124   ;;  %vm488_vm4 = vcmask 932864  }
   0x2   :  { %v3101_v3 = vpack.i.bf16 %v20_v1, %v3090_v0  ;;  %v3104_v4 = vpack.i.bf16 %v3098_v2, %v20_v1  ;;  %137 = vmatpush.msra.mxu3 %v3090_v0  ;;  %160 = vmatpush.msra.mxu0 %v20_v1  ;;  %v2895_v5 = vpack.i.bf16 %v3090_v0, %v3098_v2  ;;  %v3120_v6 = vld [vmem:[%s4007_s1] sm:$0xff]  ;;  %s3041_s27 = smov 114   ;;  %s3042_s28 = smov 113   ;;  %v3150_v7 = vld [vmem:[%s4007_s1 + $0x8] sm:$0xff]  ;;  %v2654_v14 = vld [vmem:[%s4007_s1 + $0x10] sm:$0xff]  ;;  %vm392_vm5 = vcmask 1014784  }
   0x3   :  { %2662 = vmatmul.msk.f32.vlgmr.msra.gmra.mxu3 %vm40_vm0, %v3120_v6  ;;  %2664 = vmatmul.msk.f32.vlgmr.msra.gmra.mxu0 %vm40_vm0, %v3120_v6  ;;  %s3043_s29 = smov 112   ;;  %s3044_s30 = smov 111   ;;  %v3175_v22 = vld [vmem:[%s4007_s1 + $0x20] sm:$0xff]  ;;  %v2655_v29 = vld [vmem:[%s4007_s1 + $0x18] sm:$0xff]  ;;  %v2669_v32 = vld [vmem:[%s4007_s1 + $0x28] sm:$0xff]  ;;  %vm584_vm6 = vcmask 924672  }
   0x4   :  { %2886 = vrot.lane.b32.xlu1 %v3101_v3, %s3037_s21  ;;  %2881 = vrot.lane.b32.xlu0 %v3101_v3, %s3038_s22  ;;  %s3045_s5 = smov 110   ;;  %s3046_s6 = smov 100   ;;  %v2676_v39 = vld [vmem:[%s4007_s1 + $0x30] sm:$0xff]  ;;  %v3209_v44 = vld [vmem:[%s4007_s1 + $0x40] sm:$0xff]  ;;  %vm680_vm7 = vcmask 916480   ;;  %vm872_vm8 = vcmask 900096  }
   0x5   :  { %2891 = vrot.lane.b32.xlu2 %v3104_v4, %s3039_s23  ;;  %s3047_s7 = smov 99   ;;  %s3048_s8 = smov 98   ;;  %v2677_v48 = vld [vmem:[%s4007_s1 + $0x38] sm:$0xff]  ;;  %v3227_v49 = vld [vmem:[%s4007_s1 + $0x48] sm:$0xff]  ;;  %v2692_v51 = vld [vmem:[%s4007_s1 + $0x50] sm:$0xff]  ;;  %vm776_vm9 = vcmask 908288  }
   0x6   :  { %s3049_s9 = smov 97   ;;  %s3050_s10 = smov 96   ;;  %v2693_v55 = vld [vmem:[%s4007_s1 + $0x58] sm:$0xff]  ;;  %v2700_v62 = vld [vmem:[%s4007_s1 + $0x60] sm:$0xff]  ;;  %vm968_vm10 = vcmask 818176   ;;  %vm1064_vm11 = vcmask 809984  }
   0x7   :  { %s3051_s11 = smov 86   ;;  %s3052_s12 = smov 85   ;;  %vm1256_vm12 = vcmask 793600   ;;  %vm1160_vm13 = vcmask 801792   ;;  %vm1352_vm14 = vcmask 785408   ;;  %vm1448_vm15 = vcmask 703488  }
   0x8   :  { %s3053_s13 = smov 84   ;;  %s3054_s16 = smov 83  }
   0x9   :  { %s3055_s17 = smov 82   ;;  %s3056_s18 = smov 71  }
   0xa   :  { %s3057_s19 = smov 72  }
   0xb   :  { %2663 = vmatmul.msk.f32.gmra.mxu3 %vm40_vm0, %v3150_v7  ;;  %2665 = vmatmul.msk.f32.gmra.mxu0 %vm40_vm0, %v3150_v7 }
   0xc   :  { %198 = vrot.lane.b32.xlu1 %v3098_v2, %s3037_s21  ;;  %32 = vrot.lane.b32.xlu0 %v3098_v2, %s3038_s22 }
   0xd   :  { %290 = vrot.lane.b32.xlu2 %v3090_v0, %s3039_s23  ;;  %s3058_s23 = smov 70  }
  0x14   :  { %2896 = vrot.lane.b32.xlu0 %v2895_v5, %s3040_s24  ;;  %388 = vrot.lane.b32.xlu1 %v20_v1, %s3040_s24 }
  0x15   :  { %2901 = vrot.lane.b32.xlu2 %v3101_v3, %s3041_s27 }
  0x1c   :  { %2906 = vrot.lane.b32.xlu0 %v3101_v3, %s3042_s28  ;;  %486 = vrot.lane.b32.xlu1 %v3098_v2, %s3041_s27 }
  0x1d   :  { %582 = vrot.lane.b32.xlu2 %v3098_v2, %s3042_s28 }
  0x24   :  { %2911 = vrot.lane.b32.xlu0 %v3104_v4, %s3043_s29  ;;  %674 = vrot.lane.b32.xlu1 %v3090_v0, %s3043_s29 }
  0x25   :  { %2916 = vrot.lane.b32.xlu2 %v2895_v5, %s3044_s30 }
  0x2c   :  { %2921 = vrot.lane.b32.xlu1 %v3101_v3, %s3045_s5  ;;  %772 = vrot.lane.b32.xlu0 %v20_v1, %s3044_s30 }
  0x2d   :  { %2926 = vrot.lane.b32.xlu2 %v3101_v3, %s3046_s6 }
  0x34   :  { %966 = vrot.lane.b32.xlu1 %v3098_v2, %s3046_s6  ;;  %870 = vrot.lane.b32.xlu0 %v3098_v2, %s3045_s5 }
  0x35   :  { %2931 = vrot.lane.b32.xlu2 %v3104_v4, %s3047_s7 }
  0x3c   :  { %1058 = vrot.lane.b32.xlu0 %v3090_v0, %s3047_s7  ;;  %2936 = vrot.lane.b32.xlu1 %v2895_v5, %s3048_s8 }
  0x3d   :  { %1156 = vrot.lane.b32.xlu2 %v20_v1, %s3048_s8 }
  0x44   :  { %2941 = vrot.lane.b32.xlu0 %v3101_v3, %s3049_s9  ;;  %2946 = vrot.lane.b32.xlu1 %v3101_v3, %s3050_s10 }
  0x45   :  { %1254 = vrot.lane.b32.xlu2 %v3098_v2, %s3049_s9  ;;  %s3059_s9 = smov 69  }
  0x4c   :  { %1350 = vrot.lane.b32.xlu0 %v3098_v2, %s3050_s10  ;;  %2951 = vrot.lane.b32.xlu1 %v3104_v4, %s3051_s11 }
  0x4d   :  { %1442 = vrot.lane.b32.xlu2 %v3090_v0, %s3051_s11 }
  0x54   :  { %2956 = vrot.lane.b32.xlu0 %v2895_v5, %s3052_s12  ;;  %1540 = vrot.lane.b32.xlu1 %v20_v1, %s3052_s12 }
  0x55   :  { %2961 = vrot.lane.b32.xlu2 %v3101_v3, %s3053_s13 }
  0x5c   :  { %2966 = vrot.lane.b32.xlu0 %v3101_v3, %s3054_s16  ;;  %1638 = vrot.lane.b32.xlu1 %v3098_v2, %s3053_s13 }
  0x5d   :  { %1734 = vrot.lane.b32.xlu2 %v3098_v2, %s3054_s16  ;;  %s3060_s16 = smov 68  }
  0x5f   :  { %v2892_v8 = vpop.permute.xlu2 %2891 }
  0x60   :  { %v2893_v19 = vunpack.i.l.bf16 %v2892_v8  ;;  %v2894_v23 = vunpack.i.h.bf16 %v2892_v8 }
  0x62   :  { %v298_v36 = vsel %vm296_vm3, %v2893_v19, %v2894_v23 }
  0x64   :  { %2971 = vrot.lane.b32.xlu0 %v3104_v4, %s3055_s17  ;;  %1826 = vrot.lane.b32.xlu1 %v3090_v0, %s3055_s17 }
  0x67   :  { %v291_v9 = vpop.permute.xlu2 %290 }
  0x68   :  { %v297_v30 = vsel %vm296_vm3, %v291_v9, %v2893_v19  ;;  %v2709_v19 = vld [vmem:[%s4007_s1 + $0x78] sm:$0xff]  ;;  %vm1544_vm3 = vcmask 695296  }
  0x6c   :  { %2986 = vrot.lane.b32.xlu1 %v3101_v3, %s3056_s18  ;;  %2981 = vrot.lane.b32.xlu0 %v3101_v3, %s3057_s19 }
  0x6f   :  { %v2902_v18 = vpop.permute.xlu2 %2901 }
  0x70   :  { %v2904_v24 = vunpack.i.h.bf16 %v2902_v18  ;;  %v2903_v25 = vunpack.i.l.bf16 %v2902_v18 }
  0x72   :  { %v489_v31 = vsel %vm488_vm4, %v2903_v25, %v2904_v24 }
  0x74   :  { %2132 = vrot.lane.b32.xlu1 %v3098_v2, %s3058_s23 }
  0x76   :  { %v2887_v10 = vpop.permute.xlu1 %2886  ;;  %v2882_v11 = vpop.permute.xlu0 %2881 }
  0x77   :  { %v2884_v12 = vunpack.i.h.bf16 %v2882_v11  ;;  %v2883_v13 = vunpack.i.l.bf16 %v2882_v11  ;;  %v2889_v16 = vunpack.i.h.bf16 %v2887_v10  ;;  %v2888_v17 = vunpack.i.l.bf16 %v2887_v10  ;;  %v583_v41 = vpop.permute.xlu2 %582 }
  0x79   :  { %v35_v15 = vsel %vm34_vm1, %v2883_v13, %v2884_v12  ;;  %v201_v28 = vsel %vm200_vm2, %v2888_v17, %v2889_v16  ;;  %v2708_v13 = vld [vmem:[%s4007_s1 + $0x70] sm:$0xff] }
  0x7a   :  { %62 = vmatpush.msra.mxu2 %v35_v15 }
  0x7b   :  { %2656 = vmatmul.msk.f32.vlgmr.msra.gmra.mxu2 %vm40_vm0, %v2654_v14 }
  0x7c   :  { %2227 = vrot.lane.b32.xlu1 %v3090_v0, %s3059_s9 }
  0x7e   :  { %v199_v20 = vpop.permute.xlu1 %198  ;;  %v33_v21 = vpop.permute.xlu0 %32 }
  0x7f   :  { %108 = vmatpush.msrb.mxu2 %v33_v21  ;;  %v36_v26 = vsel %vm34_vm1, %v2884_v12, %v33_v21  ;;  %v202_v27 = vsel %vm200_vm2, %v2889_v16, %v199_v20  ;;  %273 = vmatpush.msrb.mxu0 %v199_v20  ;;  %v2917_v59 = vpop.permute.xlu2 %2916  ;;  %v3281_v16 = vld [vmem:[%s4007_s1 + $0x80] sm:$0xff]  ;;  %v3296_v20 = vld [vmem:[%s4007_s1 + $0x88] sm:$0xff]  ;;  %vm1640_vm2 = vcmask 687104  }
  0x80   :  { %85 = vmatpush.msra.mxu1 %v36_v26  ;;  %250 = vmatpush.msrb.mxu3 %v202_v27  ;;  %v2919_v63 = vunpack.i.h.bf16 %v2917_v59  ;;  %v2918_v9 = vunpack.i.l.bf16 %v2917_v59  ;;  %v3315_v26 = vld [vmem:[%s4007_s1 + $0x98] sm:$0xff]  ;;  %v3406_v59 = vld [vmem:[%s4007_s1 + $0xd0] sm:$0xff] }
  0x81   :  { %2672 = vmatmul.msk.f32.vlgmr.msrb.gmra.mxu3 %vm40_vm0, %v3175_v22  ;;  %2658 = vmatmul.msk.f32.vlgmr.msra.gmra.mxu1 %vm40_vm0, %v2654_v14 }
  0x82   :  { %183 = vmatpush.msrb.mxu1 %v3098_v2  ;;  %227 = vmatpush.msra.mxu2 %v201_v28 }
  0x83   :  { %2657 = vmatmul.msk.f32.gmra.mxu2 %vm40_vm0, %v2655_v29  ;;  %369 = vmatpush.msra.mxu3 %v2894_v23 }
  0x84   :  { %323 = vmatpush.msra.mxu1 %v297_v30  ;;  %2674 = vmatmul.msk.f32.vlgmr.msrb.gmra.mxu0 %vm40_vm0, %v3175_v22  ;;  %v1925_v30 = vld [vmem:[%s4006_s0 + $0x18] sm:$0xff] }
  0x85   :  { %515 = vmatpush.msrb.mxu3 %v489_v31  ;;  %3011 = vrot.lane.b32.xlu1 %v3101_v3, %s3060_s16 }
  0x86   :  { %v2897_v33 = vpop.permute.xlu0 %2896  ;;  %v389_v34 = vpop.permute.xlu1 %388 }
  0x87   :  { %v2899_v35 = vunpack.i.h.bf16 %v2897_v33  ;;  %v2898_v38 = vunpack.i.l.bf16 %v2897_v33  ;;  %v2927_v10 = vpop.permute.xlu2 %2926  ;;  %v2995_v33 = vpack.i.bf16 %v1925_v30, %v3098_v2 }
  0x88   :  { %v2929_v11 = vunpack.i.h.bf16 %v2927_v10  ;;  %v2928_v25 = vunpack.i.l.bf16 %v2927_v10 }
  0x89   :  { %2673 = vmatmul.msk.f32.gmra.mxu3 %vm40_vm0, %v2669_v32  ;;  %2659 = vmatmul.msk.f32.gmra.mxu1 %vm40_vm0, %v2655_v29  ;;  %v393_v37 = vsel %vm392_vm5, %v2899_v35, %v389_v34  ;;  %v394_v42 = vsel %vm392_vm5, %v389_v34, %v2898_v38  ;;  %v2732_v34 = vld [vmem:[%s4007_s1 + $0xa0] sm:$0xff]  ;;  %vm1736_vm5 = vcmask 678912  }
  0x8a   :  { %419 = vmatpush.msra.mxu0 %v393_v37  ;;  %v969_v27 = vsel %vm968_vm10, %v2928_v25, %v2929_v11  ;;  %2996 = vrot.lane.b32.xlu0 %v2995_v33, %s3056_s18 }
  0x8b   :  { %2660 = vmatmul.msk.f32.vlgmr.msrb.gmra.mxu2 %vm40_vm0, %v2654_v14  ;;  %2976 = vrot.lane.b32.xlu2 %v2995_v33, %s3057_s19 }
  0x8c   :  { %346 = vmatpush.msrb.mxu2 %v298_v36  ;;  %2675 = vmatmul.msk.f32.gmra.mxu0 %vm40_vm0, %v2669_v32 }
  0x8e   :  { %v2907_v40 = vpop.permute.xlu0 %2906  ;;  %v487_v46 = vpop.permute.xlu1 %486 }
  0x8f   :  { %v2909_v43 = vunpack.i.h.bf16 %v2907_v40  ;;  %v490_v47 = vsel %vm488_vm4, %v2904_v24, %v487_v46  ;;  %v2908_v54 = vunpack.i.l.bf16 %v2907_v40  ;;  %v2932_v21 = vpop.permute.xlu2 %2931  ;;  %v2733_v40 = vld [vmem:[%s4007_s1 + $0xa8] sm:$0xff] }
  0x90   :  { %538 = vmatpush.msrb.mxu0 %v490_v47  ;;  %v2934_v23 = vunpack.i.h.bf16 %v2932_v21  ;;  %v2933_v28 = vunpack.i.l.bf16 %v2932_v21 }
  0x91   :  { %2682 = vmatmul.msk.f32.vlgmr.msra.gmra.mxu3 %vm40_vm0, %v2676_v39  ;;  %2666 = vmatmul.msk.f32.vlgmr.msrb.gmra.mxu1 %vm40_vm0, %v3120_v6  ;;  %v586_v45 = vsel %vm584_vm6, %v2909_v43, %v583_v41  ;;  %v585_v56 = vsel %vm584_vm6, %v2908_v54, %v2909_v43  ;;  %v3392_v54 = vld [vmem:[%s4007_s1 + $0xc8] sm:$0xff]  ;;  %vm1832_vm6 = vcmask 670720  }
  0x92   :  { %442 = vmatpush.msrb.mxu1 %v394_v42  ;;  %634 = vmatpush.msra.mxu3 %v586_v45  ;;  %v3354_v45 = vpop.f32.mrf.mxu0 }
  0x93   :  { %2661 = vmatmul.msk.f32.gmra.mxu2 %vm40_vm0, %v2655_v29  ;;  %2134 = vrot.lane.b32.xlu0 %v1925_v30, %s3058_s23 }
  0x94   :  { %2686 = vmatmul.msk.f32.vlgmr.msra.gmra.mxu0 %vm40_vm0, %v3209_v44  ;;  %2991 = vrot.lane.b32.xlu2 %v3101_v3, %s3058_s23 }
  0x95   :  { %657 = vmatpush.msra.mxu0 %v583_v41  ;;  %v1066_v41 = vsel %vm1064_vm11, %v2933_v28, %v2934_v23 }
  0x96   :  { %v2912_v50 = vpop.permute.xlu0 %2911  ;;  %v675_v53 = vpop.permute.xlu1 %674 }
  0x97   :  { %v2914_v52 = vunpack.i.h.bf16 %v2912_v50  ;;  %v2913_v57 = vunpack.i.l.bf16 %v2912_v50  ;;  %v1157_v2 = vpop.permute.xlu2 %1156  ;;  %v3372_v50 = vld [vmem:[%s4007_s1 + $0xc0] sm:$0xff] }
  0x99   :  { %2683 = vmatmul.msk.f32.gmra.mxu3 %vm40_vm0, %v2677_v48  ;;  %2667 = vmatmul.msk.f32.gmra.mxu1 %vm40_vm0, %v3150_v7  ;;  %v681_v0 = vsel %vm680_vm7, %v675_v53, %v2913_v57  ;;  %v2701_v7 = vld [vmem:[%s4007_s1 + $0x68] sm:$0xff]  ;;  %v682_v8 = vsel %vm680_vm7, %v2913_v57, %v2914_v52  ;;  %vm2037_vm7 = vcmask 580608  }
  0x9a   :  { %v165_v53 = vpop.f32.mrf.mxu0 }
  0x9b   :  { %2670 = vmatmul.msk.f32.vlgmr.msra.gmra.mxu2 %vm40_vm0, %v3175_v22  ;;  %v3304_v22 = vld [vmem:[%s4007_s1 + $0x90] sm:$0xff]  ;;  %3006 = vrot.lane.b32.xlu0 %v2995_v33, %s3060_s16  ;;  %v3463_v33 = vld [vmem:[%s4007_s1 + $0xe8] sm:$0xff] }
  0x9c   :  { %465 = vmatpush.msra.mxu2 %v2898_v38  ;;  %2687 = vmatmul.msk.f32.gmra.mxu0 %vm40_vm0, %v3227_v49 }
  0x9d   :  { %3001 = vrot.lane.b32.xlu2 %v3104_v4, %s3059_s9 }
  0x9e   :  { %v2922_v58 = vpop.permute.xlu1 %2921  ;;  %v773_v5 = vpop.permute.xlu0 %772 }
  0x9f   :  { %v2924_v60 = vunpack.i.h.bf16 %v2922_v58  ;;  %v2923_v61 = vunpack.i.l.bf16 %v2922_v58  ;;  %v777_v6 = vsel %vm776_vm9, %v2919_v63, %v773_v5  ;;  %v778_v14 = vsel %vm776_vm9, %v773_v5, %v2918_v9 }
  0xa0   :  { %vm2136_vm9 = vcmask 572416  }
  0xa1   :  { %2694 = vmatmul.msk.f32.vlgmr.msrb.gmra.mxu3 %vm40_vm0, %v2692_v51  ;;  %2678 = vmatmul.msk.f32.vlgmr.msra.gmra.mxu1 %vm40_vm0, %v2676_v39  ;;  %v873_v1 = vsel %vm872_vm8, %v2923_v61, %v2924_v60 }
  0xa2   :  { %561 = vmatpush.msra.mxu1 %v487_v46  ;;  %753 = vmatpush.msrb.mxu3 %v2914_v52  ;;  %v2740_v46 = vld [vmem:[%s4007_s1 + $0xb0] sm:$0xff]  ;;  %v3382_v52 = vld [vmem:[%s4007_s1 + $0xb8] sm:$0xff] }
  0xa3   :  { %2671 = vmatmul.msk.f32.gmra.mxu2 %vm40_vm0, %v2669_v32 }
  0xa4   :  { %2696 = vmatmul.msk.f32.vlgmr.msrb.gmra.mxu0 %vm40_vm0, %v2692_v51 }
  0xa5   :  { %803 = vmatpush.msrb.mxu0 %v777_v6  ;;  %2233 = vrot.lane.b32.xlu2 %v1925_v30, %s3059_s9  ;;  %v3420_v6 = vld [vmem:[%s4007_s1 + $0xd8] sm:$0xff] }
  0xa6   :  { %v967_v12 = vpop.permute.xlu1 %966  ;;  %v871_v17 = vpop.permute.xlu0 %870 }
  0xa7   :  { %v970_v15 = vsel %vm968_vm10, %v2929_v11, %v967_v12  ;;  %v874_v18 = vsel %vm872_vm8, %v2924_v60, %v871_v17  ;;  %vm1938_vm8 = vcmask 588800   ;;  %vm2235_vm10 = vcmask 564224  }
  0xa9   :  { %2695 = vmatmul.msk.f32.gmra.mxu3 %vm40_vm0, %v2693_v55  ;;  %2679 = vmatmul.msk.f32.gmra.mxu1 %vm40_vm0, %v2677_v48 }
  0xab   :  { %2680 = vmatmul.msk.f32.vlgmr.msrb.gmra.mxu2 %vm40_vm0, %v2676_v39 }
  0xac   :  { %2697 = vmatmul.msk.f32.gmra.mxu0 %vm40_vm0, %v2693_v55  ;;  %611 = vmatpush.msrb.mxu2 %v585_v56 }
  0xae   :  { %v1059_v24 = vpop.permute.xlu0 %1058  ;;  %v2937_v36 = vpop.permute.xlu1 %2936 }
  0xaf   :  { %v1065_v35 = vsel %vm1064_vm11, %v1059_v24, %v2933_v28  ;;  %v2939_v38 = vunpack.i.h.bf16 %v2937_v36  ;;  %v2938_v42 = vunpack.i.l.bf16 %v2937_v36  ;;  %vm2334_vm11 = vcmask 556032  }
  0xb1   :  { %2704 = vmatmul.msk.f32.vlgmr.msra.gmra.mxu3 %vm40_vm0, %v2700_v62  ;;  %2688 = vmatmul.msk.f32.vlgmr.msrb.gmra.mxu1 %vm40_vm0, %v3209_v44  ;;  %v1161_v39 = vsel %vm1160_vm13, %v2939_v38, %v1157_v2  ;;  %v1162_v47 = vsel %vm1160_vm13, %v1157_v2, %v2938_v42  ;;  %vm2647_vm13 = vcmask 408576  }
  0xb2   :  { %707 = vmatpush.msrb.mxu1 %v681_v0  ;;  %899 = vmatpush.msra.mxu3 %v873_v1 }
  0xb3   :  { %2681 = vmatmul.msk.f32.gmra.mxu2 %vm40_vm0, %v2677_v48 }
  0xb4   :  { %2706 = vmatmul.msk.f32.vlgmr.msra.gmra.mxu0 %vm40_vm0, %v2700_v62 }
  0xb5   :  { %922 = vmatpush.msra.mxu0 %v874_v18 }
  0xb6   :  { %v2942_v29 = vpop.permute.xlu0 %2941  ;;  %v2947_v43 = vpop.permute.xlu1 %2946 }
  0xb7   :  { %v2944_v31 = vunpack.i.h.bf16 %v2942_v29  ;;  %v2943_v32 = vunpack.i.l.bf16 %v2942_v29  ;;  %v2948_v0 = vunpack.i.l.bf16 %v2947_v43 }
  0xb9   :  { %2705 = vmatmul.msk.f32.gmra.mxu3 %vm40_vm0, %v2701_v7  ;;  %2689 = vmatmul.msk.f32.gmra.mxu1 %vm40_vm0, %v3227_v49  ;;  %v1257_v37 = vsel %vm1256_vm12, %v2943_v32, %v2944_v31 }
  0xbb   :  { %2690 = vmatmul.msk.f32.vlgmr.msra.gmra.mxu2 %vm40_vm0, %v3209_v44  ;;  %v2949_v44 = vunpack.i.h.bf16 %v2947_v43 }
  0xbc   :  { %730 = vmatpush.msra.mxu2 %v682_v8  ;;  %2707 = vmatmul.msk.f32.gmra.mxu0 %vm40_vm0, %v2701_v7 }
  0xbe   :  { %v1351_v3 = vpop.permute.xlu0 %1350  ;;  %v3397_v56 = vpop.permute.xlu1 %2951 }
  0xbf   :  { %v1354_v48 = vsel %vm1352_vm14, %v2949_v44, %v1351_v3  ;;  %v2954_v60 = vunpack.i.h.bf16 %v3397_v56  ;;  %v2953_v11 = vunpack.i.l.bf16 %v3397_v56 }
  0xc1   :  { %2714 = vmatmul.msk.f32.vlgmr.msrb.gmra.mxu3 %vm40_vm0, %v2708_v13  ;;  %2698 = vmatmul.msk.f32.vlgmr.msra.gmra.mxu1 %vm40_vm0, %v2692_v51  ;;  %v1255_v51 = vpop.permute.xlu2 %1254  ;;  %v1450_v36 = vsel %vm1448_vm15, %v2953_v11, %v2954_v60 }
  0xc2   :  { %826 = vmatpush.msra.mxu1 %v778_v14  ;;  %1018 = vmatpush.msrb.mxu3 %v970_v15  ;;  %v1258_v4 = vsel %vm1256_vm12, %v2944_v31, %v1255_v51  ;;  %vm2574_vm12 = vcmask 1044480  }
  0xc3   :  { %2691 = vmatmul.msk.f32.gmra.mxu2 %vm40_vm0, %v3227_v49  ;;  %v3364_v49 = vpop.f32.mrf.mxu3 }
  0xc4   :  { %2718 = vmatmul.msk.f32.vlgmr.msrb.gmra.mxu0 %vm40_vm0, %v3281_v16 }
  0xc5   :  { %1041 = vmatpush.msrb.mxu0 %v967_v12 }
  0xc9   :  { %2715 = vmatmul.msk.f32.gmra.mxu3 %vm40_vm0, %v2709_v19  ;;  %2699 = vmatmul.msk.f32.gmra.mxu1 %vm40_vm0, %v2693_v55 }
  0xcb   :  { %2702 = vmatmul.msk.f32.vlgmr.msrb.gmra.mxu2 %vm40_vm0, %v2700_v62  ;;  %v142_v55 = vpop.f32.mrf.mxu3  ;;  %v1443_v62 = vpop.permute.xlu2 %1442 }
  0xcc   :  { %849 = vmatpush.msrb.mxu2 %v2918_v9  ;;  %2719 = vmatmul.msk.f32.gmra.mxu0 %vm40_vm0, %v3296_v20  ;;  %v1353_v9 = vsel %vm1352_vm14, %v2948_v0, %v2949_v44  ;;  %v1449_v21 = vsel %vm1448_vm15, %v1443_v62, %v2953_v11 }
  0xd1   :  { %2726 = vmatmul.msk.f32.vlgmr.msra.gmra.mxu3 %vm40_vm0, %v3304_v22  ;;  %2710 = vmatmul.msk.f32.vlgmr.msrb.gmra.mxu1 %vm40_vm0, %v2708_v13 }
  0xd2   :  { %945 = vmatpush.msrb.mxu1 %v871_v17  ;;  %1137 = vmatpush.msra.mxu3 %v2934_v23 }
  0xd3   :  { %2703 = vmatmul.msk.f32.gmra.mxu2 %vm40_vm0, %v2701_v7  ;;  %v3431_v12 = vpop.permute.xlu2 %2961 }
  0xd4   :  { %2728 = vmatmul.msk.f32.vlgmr.msra.gmra.mxu0 %vm40_vm0, %v3304_v22  ;;  %v2964_v14 = vunpack.i.h.bf16 %v3431_v12  ;;  %v2963_v15 = vunpack.i.l.bf16 %v3431_v12 }
  0xd5   :  { %1187 = vmatpush.msra.mxu0 %v1161_v39 }
  0xd6   :  { %v1641_v23 = vsel %vm1640_vm2, %v2963_v15, %v2964_v14 }
  0xd9   :  { %2727 = vmatmul.msk.f32.gmra.mxu3 %vm40_vm0, %v3315_v26  ;;  %2711 = vmatmul.msk.f32.gmra.mxu1 %vm40_vm0, %v2709_v19 }
  0xdb   :  { %2712 = vmatmul.msk.f32.vlgmr.msra.gmra.mxu2 %vm40_vm0, %v2708_v13  ;;  %v1735_v43 = vpop.permute.xlu2 %1734 }
  0xdc   :  { %2729 = vmatmul.msk.f32.gmra.mxu0 %vm40_vm0, %v3315_v26  ;;  %995 = vmatpush.msra.mxu2 %v969_v27  ;;  %v1541_v27 = vpop.permute.xlu1 %1540 }
  0xe1   :  { %2736 = vmatmul.msk.f32.vlgmr.msrb.gmra.mxu3 %vm40_vm0, %v2732_v34  ;;  %2720 = vmatmul.msk.f32.vlgmr.msra.gmra.mxu1 %vm40_vm0, %v3281_v16 }
  0xe2   :  { %1091 = vmatpush.msra.mxu1 %v1065_v35  ;;  %1283 = vmatpush.msrb.mxu3 %v1257_v37 }
  0xe3   :  { %2713 = vmatmul.msk.f32.gmra.mxu2 %vm40_vm0, %v2709_v19  ;;  %v3442_v19 = vld [vmem:[%s4007_s1 + $0xe0] sm:$0xff] }
  0xe4   :  { %2738 = vmatmul.msk.f32.vlgmr.msrb.gmra.mxu0 %vm40_vm0, %v2732_v34 }
  0xe5   :  { %1306 = vmatpush.msrb.mxu0 %v1258_v4  ;;  %v3498_v4 = vld [vmem:[%s4007_s1 + $0x100] sm:$0xff] }
  0xe9   :  { %2737 = vmatmul.msk.f32.gmra.mxu3 %vm40_vm0, %v2733_v40  ;;  %2721 = vmatmul.msk.f32.gmra.mxu1 %vm40_vm0, %v3296_v20 }
  0xeb   :  { %2722 = vmatmul.msk.f32.vlgmr.msrb.gmra.mxu2 %vm40_vm0, %v3281_v16 }
  0xec   :  { %1114 = vmatpush.msrb.mxu2 %v1066_v41  ;;  %2739 = vmatmul.msk.f32.gmra.mxu0 %vm40_vm0, %v2733_v40 }
  0xf1   :  { %2746 = vmatmul.msk.f32.vlgmr.msra.gmra.mxu3 %vm40_vm0, %v2740_v46  ;;  %2730 = vmatmul.msk.f32.vlgmr.msrb.gmra.mxu1 %vm40_vm0, %v3304_v22  ;;  %v3445_v22 = vpop.permute.xlu0 %2956 }
  0xf2   :  { %1210 = vmatpush.msrb.mxu1 %v1162_v47  ;;  %1402 = vmatpush.msra.mxu3 %v1354_v48  ;;  %v2959_v24 = vunpack.i.h.bf16 %v3445_v22  ;;  %v2958_v38 = vunpack.i.l.bf16 %v3445_v22 }
  0xf3   :  { %2723 = vmatmul.msk.f32.gmra.mxu2 %vm40_vm0, %v3296_v20 }
  0xf4   :  { %2750 = vmatmul.msk.f32.vlgmr.msra.gmra.mxu0 %vm40_vm0, %v3372_v50  ;;  %v1545_v28 = vsel %vm1544_vm3, %v2959_v24, %v1541_v27  ;;  %v1546_v48 = vsel %vm1544_vm3, %v1541_v27, %v2958_v38 }
  0xf5   :  { %1425 = vmatpush.msra.mxu0 %v1351_v3 }
  0xf9   :  { %2747 = vmatmul.msk.f32.gmra.mxu3 %vm40_vm0, %v3382_v52  ;;  %2731 = vmatmul.msk.f32.gmra.mxu1 %vm40_vm0, %v3315_v26  ;;  %v3473_v2 = vpop.permute.xlu0 %2966 }
  0xfb   :  { %2734 = vmatmul.msk.f32.vlgmr.msra.gmra.mxu2 %vm40_vm0, %v2732_v34 }
  0xfc   :  { %1233 = vmatpush.msra.mxu2 %v2938_v42  ;;  %2751 = vmatmul.msk.f32.gmra.mxu0 %vm40_vm0, %v3392_v54 }
  0xfe   :  { %v3399_v57 = vpop.f32.mrf.mxu2  ;;  %v3401_v58 = vpop.f32.mrf.mxu1 }
  0xff   :  { %v140_v41 = vadd.f32 %v3364_v49, %v3399_v57 }
 0x101   :  { %2758 = vmatmul.msk.f32.vlgmr.msrb.gmra.mxu3 %vm40_vm0, %v3406_v59  ;;  %2742 = vmatmul.msk.f32.vlgmr.msra.gmra.mxu1 %vm40_vm0, %v2740_v46  ;;  %v275_v61 = vpop.f32.mrf.mxu0 }
 0x102   :  { %1329 = vmatpush.msra.mxu1 %v1255_v51  ;;  %1521 = vmatpush.msrb.mxu3 %v2954_v60 }
 0x103   :  { %2735 = vmatmul.msk.f32.gmra.mxu2 %vm40_vm0, %v2733_v40  ;;  %v2969_v40 = vunpack.i.h.bf16 %v3473_v2 }
 0x104   :  { %v3413_v63 = vpop.f32.mrf.mxu3  ;;  %2760 = vmatmul.msk.f32.vlgmr.msrb.gmra.mxu0 %vm40_vm0, %v3406_v59 }
 0x105   :  { %1571 = vmatpush.msrb.mxu0 %v1545_v28 }
 0x106   :  { %v67_v1 = vpop.f32.mrf.mxu2  ;;  %v90_v5 = vpop.f32.mrf.mxu1 }
 0x107   :  { %v3422_v7 = vadd.f32 %v142_v55, %v67_v1  ;;  %v166_v10 = vadd.f32 %v165_v53, %v90_v5  ;;  %v3520_v1 = vld [vmem:[%s4007_s1 + $0x108] sm:$0xff]  ;;  %v163_v5 = vadd.f32 %v3354_v45, %v3401_v58  ;;  %v3536_v45 = vld [vmem:[%s4007_s1 + $0x110] sm:$0xff] }
 0x109   :  { %2759 = vmatmul.msk.f32.gmra.mxu3 %vm40_vm0, %v3420_v6  ;;  %2743 = vmatmul.msk.f32.gmra.mxu1 %vm40_vm0, %v3382_v52  ;;  %v278_v8 = vpop.f32.mrf.mxu0 }
 0x10b   :  { %2744 = vmatmul.msk.f32.vlgmr.msrb.gmra.mxu2 %vm40_vm0, %v2740_v46  ;;  %v3485_v46 = vld [vmem:[%s4007_s1 + $0xf0] sm:$0xff] }
 0x10c   :  { %v255_v13 = vpop.f32.mrf.mxu3  ;;  %2761 = vmatmul.msk.f32.gmra.mxu0 %vm40_vm0, %v3420_v6  ;;  %1379 = vmatpush.msrb.mxu2 %v1353_v9 }
 0x10d   :  { %v3437_v16 = vadd.f32 %v255_v13, %v166_v10  ;;  %v3531_v10 = vpop.permute.xlu0 %2971 }
 0x10e   :  { %v110_v17 = vpop.f32.mrf.mxu2  ;;  %v185_v18 = vpop.f32.mrf.mxu1  ;;  %v2974_v58 = vunpack.i.h.bf16 %v3531_v10 }
 0x10f   :  { %v186_v20 = vadd.f32 %v185_v18, %v110_v17 }
 0x111   :  { %2768 = vmatmul.msk.f32.vlgmr.msra.gmra.mxu3 %vm40_vm0, %v3442_v19  ;;  %v283_v25 = vadd.f32 %v275_v61, %v186_v20  ;;  %2752 = vmatmul.msk.f32.vlgmr.msrb.gmra.mxu1 %vm40_vm0, %v3372_v50  ;;  %v421_v26 = vpop.f32.mrf.mxu0  ;;  %v3510_v61 = vld [vmem:[%s4007_s1 + $0xf8] sm:$0xff]  ;;  %v2968_v20 = vunpack.i.l.bf16 %v3473_v2 }
 0x112   :  { %1475 = vmatpush.msrb.mxu1 %v1449_v21  ;;  %1667 = vmatpush.msra.mxu3 %v1641_v23  ;;  %v3555_v23 = vld [vmem:[%s4007_s1 + $0x118] sm:$0xff] }
 0x113   :  { %2745 = vmatmul.msk.f32.gmra.mxu2 %vm40_vm0, %v3382_v52  ;;  %v1639_v52 = vpop.permute.xlu1 %1638  ;;  %v1737_v27 = vsel %vm1736_vm5, %v2968_v20, %v2969_v40 }
 0x114   :  { %v371_v29 = vpop.f32.mrf.mxu3  ;;  %2770 = vmatmul.msk.f32.vlgmr.msra.gmra.mxu0 %vm40_vm0, %v3442_v19  ;;  %v1642_v53 = vsel %vm1640_vm2, %v2964_v14, %v1639_v52 }
 0x115   :  { %v3458_v30 = vadd.f32 %v371_v29, %v283_v25  ;;  %1690 = vmatpush.msra.mxu0 %v1642_v53  ;;  %v2973_v29 = vunpack.i.l.bf16 %v3531_v10 }
 0x116   :  { %v113_v31 = vpop.f32.mrf.mxu2  ;;  %v188_v32 = vpop.f32.mrf.mxu1 }
 0x117   :  { %v189_v34 = vadd.f32 %v188_v32, %v113_v31 }
 0x119   :  { %2769 = vmatmul.msk.f32.gmra.mxu3 %vm40_vm0, %v3463_v33  ;;  %v286_v35 = vadd.f32 %v278_v8, %v189_v34  ;;  %2753 = vmatmul.msk.f32.gmra.mxu1 %vm40_vm0, %v3392_v54  ;;  %v424_v37 = vpop.f32.mrf.mxu0 }
 0x11b   :  { %2754 = vmatmul.msk.f32.vlgmr.msra.gmra.mxu2 %vm40_vm0, %v3372_v50  ;;  %v1738_v50 = vsel %vm1736_vm5, %v2969_v40, %v1735_v43  ;;  %v1827_v17 = vpop.permute.xlu1 %1826 }
 0x11c   :  { %v374_v39 = vpop.f32.mrf.mxu3  ;;  %1498 = vmatpush.msra.mxu2 %v1450_v36  ;;  %2771 = vmatmul.msk.f32.gmra.mxu0 %vm40_vm0, %v3463_v33  ;;  %v1833_v2 = vsel %vm1832_vm6, %v1827_v17, %v2973_v29 }
 0x11d   :  { %v3480_v42 = vadd.f32 %v374_v39, %v286_v35  ;;  %v2982_v39 = vpop.permute.xlu0 %2981 }
 0x11e   :  { %v229_v44 = vpop.f32.mrf.mxu2  ;;  %v325_v3 = vpop.f32.mrf.mxu1 }
 0x11f   :  { %v281_v47 = vadd.f32 %v229_v44, %v140_v41  ;;  %v2984_v41 = vunpack.i.h.bf16 %v2982_v39 }
 0x121   :  { %v377_v51 = vadd.f32 %v325_v3, %v281_v47  ;;  %2778 = vmatmul.msk.f32.vlgmr.msrb.gmra.mxu3 %vm40_vm0, %v3485_v46  ;;  %2762 = vmatmul.msk.f32.vlgmr.msra.gmra.mxu1 %vm40_vm0, %v3406_v59  ;;  %v540_v49 = vpop.f32.mrf.mxu0 }
 0x122   :  { %1594 = vmatpush.msra.mxu1 %v1546_v48  ;;  %1786 = vmatpush.msrb.mxu3 %v1738_v50 }
 0x123   :  { %v473_v55 = vadd.f32 %v421_v26, %v377_v51  ;;  %2755 = vmatmul.msk.f32.gmra.mxu2 %vm40_vm0, %v3392_v54  ;;  %v3568_v31 = vpop.permute.xlu1 %2986 }
 0x124   :  { %v517_v56 = vpop.f32.mrf.mxu3  ;;  %2782 = vmatmul.msk.f32.vlgmr.msrb.gmra.mxu0 %vm40_vm0, %v3498_v4  ;;  %v2989_v32 = vunpack.i.h.bf16 %v3568_v31 }
 0x125   :  { %v3505_v57 = vadd.f32 %v517_v56, %v473_v55  ;;  %1809 = vmatpush.msrb.mxu0 %v1735_v43  ;;  %v2983_v43 = vunpack.i.l.bf16 %v2982_v39  ;;  %v1834_v56 = vsel %vm1832_vm6, %v2973_v29, %v2974_v58 }
 0x126   :  { %v232_v59 = vpop.f32.mrf.mxu2  ;;  %v328_v60 = vpop.f32.mrf.mxu1 }
 0x127   :  { %v284_v62 = vadd.f32 %v232_v59, %v3422_v7  ;;  %v1939_v47 = vsel %vm1938_vm8, %v2983_v43, %v2984_v41 }
 0x129   :  { %v380_v0 = vadd.f32 %v328_v60, %v284_v62  ;;  %2779 = vmatmul.msk.f32.gmra.mxu3 %vm40_vm0, %v3510_v61  ;;  %2763 = vmatmul.msk.f32.gmra.mxu1 %vm40_vm0, %v3420_v6  ;;  %v543_v54 = vpop.f32.mrf.mxu0  ;;  %v282_v6 = vadd.f32 %v3413_v63, %v163_v5 }
 0x12b   :  { %v476_v8 = vadd.f32 %v424_v37, %v380_v0  ;;  %2766 = vmatmul.msk.f32.vlgmr.msrb.gmra.mxu2 %vm40_vm0, %v3442_v19  ;;  %v3579_v37 = vld [vmem:[%s4007_s1 + $0x120] sm:$0xff]  ;;  %v2133_v5 = vpop.permute.xlu1 %2132 }
 0x12c   :  { %v520_v7 = vpop.f32.mrf.mxu3  ;;  %1617 = vmatpush.msrb.mxu2 %v2958_v38  ;;  %2783 = vmatmul.msk.f32.gmra.mxu0 %vm40_vm0, %v3520_v1 }
 0x12d   :  { %v3529_v9 = vadd.f32 %v520_v7, %v476_v8 }
 0x12e   :  { %v348_v11 = vpop.f32.mrf.mxu2  ;;  %v444_v12 = vpop.f32.mrf.mxu1 }
 0x12f   :  { %v378_v13 = vadd.f32 %v348_v11, %v282_v6 }
 0x131   :  { %v474_v14 = vadd.f32 %v444_v12, %v378_v13  ;;  %2790 = vmatmul.msk.f32.vlgmr.msra.gmra.mxu3 %vm40_vm0, %v3536_v45  ;;  %2774 = vmatmul.msk.f32.vlgmr.msrb.gmra.mxu1 %vm40_vm0, %v3485_v46  ;;  %v659_v63 = vpop.f32.mrf.mxu0  ;;  %v2997_v12 = vpop.permute.xlu0 %2996 }
 0x132   :  { %1713 = vmatpush.msrb.mxu1 %v1639_v52  ;;  %1905 = vmatpush.msra.mxu3 %v2974_v58  ;;  %v3600_v52 = vld [vmem:[%s4007_s1 + $0x128] sm:$0xff] }
 0x133   :  { %v570_v15 = vadd.f32 %v540_v49, %v474_v14  ;;  %2767 = vmatmul.msk.f32.gmra.mxu2 %vm40_vm0, %v3463_v33  ;;  %v2988_v33 = vunpack.i.l.bf16 %v3568_v31  ;;  %v3636_v14 = vld [vmem:[%s4007_s1 + $0x140] sm:$0xff] }
 0x134   :  { %v636_v18 = vpop.f32.mrf.mxu3  ;;  %2792 = vmatmul.msk.f32.vlgmr.msra.gmra.mxu0 %vm40_vm0, %v3536_v45 }
 0x135   :  { %v3549_v19 = vadd.f32 %v636_v18, %v570_v15  ;;  %v2038_v40 = vsel %vm2037_vm7, %v2988_v33, %v2989_v32  ;;  %1966 = vmatpush.msra.mxu0 %v1939_v47  ;;  %v3701_v47 = vld [vmem:[%s4007_s1 + $0x158] sm:$0xff] }
 0x136   :  { %v351_v21 = vpop.f32.mrf.mxu2  ;;  %v447_v22 = vpop.f32.mrf.mxu1 }
 0x137   :  { %v381_v24 = vadd.f32 %v351_v21, %v3437_v16 }
 0x139   :  { %v477_v25 = vadd.f32 %v447_v22, %v381_v24  ;;  %2791 = vmatmul.msk.f32.gmra.mxu3 %vm40_vm0, %v3555_v23  ;;  %2775 = vmatmul.msk.f32.gmra.mxu1 %vm40_vm0, %v3510_v61  ;;  %v662_v26 = vpop.f32.mrf.mxu0  ;;  %v3654_v22 = vld [vmem:[%s4007_s1 + $0x138] sm:$0xff] }
 0x13b   :  { %v573_v28 = vadd.f32 %v543_v54, %v477_v25  ;;  %2776 = vmatmul.msk.f32.vlgmr.msra.gmra.mxu2 %vm40_vm0, %v3485_v46  ;;  %v2977_v46 = vpop.permute.xlu2 %2976 }
 0x13c   :  { %v639_v16 = vpop.f32.mrf.mxu3  ;;  %2793 = vmatmul.msk.f32.gmra.mxu0 %vm40_vm0, %v3555_v23  ;;  %1763 = vmatpush.msra.mxu2 %v1737_v27  ;;  %v3665_v27 = vld [vmem:[%s4007_s1 + $0x148] sm:$0xff] }
 0x13d   :  { %v3574_v34 = vadd.f32 %v639_v16, %v573_v28 }
 0x13e   :  { %v467_v35 = vpop.f32.mrf.mxu2  ;;  %v563_v36 = vpop.f32.mrf.mxu1 }
 0x13f   :  { %v475_v38 = vadd.f32 %v467_v35, %v3458_v30  ;;  %v3679_v35 = vld [vmem:[%s4007_s1 + $0x150] sm:$0xff] }
 0x141   :  { %v571_v44 = vadd.f32 %v563_v36, %v475_v38  ;;  %2800 = vmatmul.msk.f32.vlgmr.msrb.gmra.mxu3 %vm40_vm0, %v3579_v37  ;;  %2784 = vmatmul.msk.f32.vlgmr.msra.gmra.mxu1 %vm40_vm0, %v3498_v4  ;;  %v805_v3 = vpop.f32.mrf.mxu0 }
 0x142   :  { %1859 = vmatpush.msra.mxu1 %v1833_v2  ;;  %2065 = vmatpush.msrb.mxu3 %v2038_v40 }
 0x143   :  { %v667_v30 = vadd.f32 %v659_v63, %v571_v44  ;;  %2777 = vmatmul.msk.f32.gmra.mxu2 %vm40_vm0, %v3510_v61  ;;  %v2978_v61 = vunpack.i.l.bf16 %v2977_v46  ;;  %v3612_v62 = vpop.permute.xlu2 %2991 }
 0x144   :  { %v755_v48 = vpop.f32.mrf.mxu3  ;;  %2802 = vmatmul.msk.f32.vlgmr.msrb.gmra.mxu0 %vm40_vm0, %v3579_v37  ;;  %v2994_v0 = vunpack.i.h.bf16 %v3612_v62  ;;  %v2993_v44 = vunpack.i.l.bf16 %v3612_v62 }
 0x145   :  { %v3595_v50 = vadd.f32 %v755_v48, %v667_v30  ;;  %v1940_v10 = vsel %vm1938_vm8, %v2984_v41, %v2978_v61 }
 0x146   :  { %v470_v51 = vpop.f32.mrf.mxu2  ;;  %v566_v49 = vpop.f32.mrf.mxu1  ;;  %v2138_v11 = vsel %vm2136_vm9, %v2994_v0, %v2133_v5 }
 0x147   :  { %v478_v53 = vadd.f32 %v470_v51, %v3480_v42 }
 0x149   :  { %v574_v55 = vadd.f32 %v566_v49, %v478_v53  ;;  %2801 = vmatmul.msk.f32.gmra.mxu3 %vm40_vm0, %v3600_v52  ;;  %2785 = vmatmul.msk.f32.gmra.mxu1 %vm40_vm0, %v3520_v1  ;;  %v808_v59 = vpop.f32.mrf.mxu0 }
 0x14b   :  { %v670_v60 = vadd.f32 %v662_v26, %v574_v55  ;;  %2786 = vmatmul.msk.f32.vlgmr.msrb.gmra.mxu2 %vm40_vm0, %v3498_v4  ;;  %v3622_v4 = vld [vmem:[%s4007_s1 + $0x130] sm:$0xff]  ;;  %v3649_v18 = vpop.permute.xlu2 %3001 }
 0x14c   :  { %v758_v42 = vpop.f32.mrf.mxu3  ;;  %1882 = vmatpush.msrb.mxu2 %v1834_v56  ;;  %2803 = vmatmul.msk.f32.gmra.mxu0 %vm40_vm0, %v3600_v52  ;;  %v3004_v29 = vunpack.i.h.bf16 %v3649_v18  ;;  %v3003_v55 = vunpack.i.l.bf16 %v3649_v18 }
 0x14d   :  { %v3617_v54 = vadd.f32 %v758_v42, %v670_v60 }
 0x14e   :  { %v613_v8 = vpop.f32.mrf.mxu2  ;;  %v709_v7 = vpop.f32.mrf.mxu1 }
 0x14f   :  { %v665_v6 = vadd.f32 %v613_v8, %v3505_v57  ;;  %v2998_v57 = vunpack.i.l.bf16 %v2997_v12 }
 0x151   :  { %v761_v58 = vadd.f32 %v709_v7, %v665_v6  ;;  %2810 = vmatmul.msk.f32.vlgmr.msra.gmra.mxu3 %vm40_vm0, %v3622_v4  ;;  %2794 = vmatmul.msk.f32.vlgmr.msrb.gmra.mxu1 %vm40_vm0, %v3536_v45  ;;  %v924_v13 = vpop.f32.mrf.mxu0  ;;  %v2039_v15 = vsel %vm2037_vm7, %v2989_v32, %v2998_v57  ;;  %v2979_v45 = vunpack.i.h.bf16 %v2977_v46 }
 0x152   :  { %1989 = vmatpush.msrb.mxu1 %v1940_v10  ;;  %2187 = vmatpush.msra.mxu3 %v2138_v11 }
 0x153   :  { %v3638_v63 = vadd.f32 %v805_v3, %v761_v58  ;;  %2787 = vmatmul.msk.f32.gmra.mxu2 %vm40_vm0, %v3520_v1  ;;  %2088 = vmatpush.msrb.mxu0 %v2039_v15  ;;  %v1941_v25 = vsel %vm1938_vm8, %v2978_v61, %v2979_v45  ;;  %v2234_v16 = vpop.permute.xlu2 %2233  ;;  %v2228_v3 = vpop.permute.xlu1 %2227  ;;  %v3721_v61 = vld [vmem:[%s4007_s1 + $0x160] sm:$0xff] }
 0x154   :  { %v3645_v17 = vpop.f32.mrf.mxu3  ;;  %2814 = vmatmul.msk.f32.vlgmr.msra.gmra.mxu0 %vm40_vm0, %v3636_v14  ;;  %v2238_v2 = vsel %vm2235_vm10, %v3004_v29, %v2234_v16  ;;  %v2236_v42 = vsel %vm2235_vm10, %v2228_v3, %v3003_v55 }
 0x156   :  { %v616_v20 = vpop.f32.mrf.mxu2  ;;  %v712_v21 = vpop.f32.mrf.mxu1 }
 0x157   :  { %v668_v1 = vadd.f32 %v616_v20, %v3529_v9  ;;  %v2999_v9 = vunpack.i.h.bf16 %v2997_v12  ;;  %v2237_v20 = vsel %vm2235_vm10, %v3003_v55, %v3004_v29 }
 0x159   :  { %v764_v24 = vadd.f32 %v712_v21, %v668_v1  ;;  %2811 = vmatmul.msk.f32.gmra.mxu3 %vm40_vm0, %v3654_v22  ;;  %2795 = vmatmul.msk.f32.gmra.mxu1 %vm40_vm0, %v3555_v23  ;;  %v927_v26 = vpop.f32.mrf.mxu0  ;;  %v2135_v23 = vpop.permute.xlu0 %2134  ;;  %v2040_v38 = vsel %vm2037_vm7, %v2998_v57, %v2999_v9  ;;  %v2836_v9 = vld [vmem:[%s4007_s1 + $0x170] sm:$0xff] }
 0x15a   :  { %v2139_v36 = vsel %vm2136_vm9, %v2133_v5, %v2135_v23 }
 0x15b   :  { %v3667_v28 = vadd.f32 %v808_v59, %v764_v24  ;;  %2798 = vmatmul.msk.f32.vlgmr.msra.gmra.mxu2 %vm40_vm0, %v3579_v37  ;;  %2210 = vmatpush.msra.mxu0 %v2139_v36 }
 0x15c   :  { %v3672_v31 = vpop.f32.mrf.mxu3  ;;  %2012 = vmatpush.msra.mxu2 %v1941_v25  ;;  %2815 = vmatmul.msk.f32.gmra.mxu0 %vm40_vm0, %v3665_v27 }
 0x15e   :  { %v732_v32 = vpop.f32.mrf.mxu2  ;;  %v828_v33 = vpop.f32.mrf.mxu1 }
 0x15f   :  { %v762_v37 = vadd.f32 %v732_v32, %v3549_v19 }
 0x161   :  { %v858_v39 = vadd.f32 %v828_v33, %v762_v37  ;;  %2822 = vmatmul.msk.f32.vlgmr.msrb.gmra.mxu3 %vm40_vm0, %v3679_v35  ;;  %2806 = vmatmul.msk.f32.vlgmr.msra.gmra.mxu1 %vm40_vm0, %v3622_v4  ;;  %v1043_v40 = vpop.f32.mrf.mxu0  ;;  %v3007_v15 = vpop.permute.xlu0 %3006  ;;  %v956_v33 = vadd.f32 %v3672_v31, %v3667_v28  ;;  %v2845_v28 = vld [vmem:[%s4007_s1 + $0x188] sm:$0xff] }
 0x162   :  { %2111 = vmatpush.msra.mxu1 %v2040_v38  ;;  %2309 = vmatpush.msrb.mxu3 %v2238_v2  ;;  %v3008_v1 = vunpack.i.l.bf16 %v3007_v15  ;;  %v2837_v2 = vld [vmem:[%s4007_s1 + $0x178] sm:$0xff]  ;;  %v2423_v31 = vld [vmem:[%s4008_s2 + $0x8] sm:$0xff] }
 0x163   :  { %v954_v41 = vadd.f32 %v924_v13, %v858_v39  ;;  %2799 = vmatmul.msk.f32.gmra.mxu2 %vm40_vm0, %v3600_v52  ;;  %v2137_v52 = vsel %vm2136_vm9, %v2993_v44, %v2994_v0  ;;  %v3012_v0 = vpop.permute.xlu1 %3011  ;;  %v3739_v13 = vld [vmem:[%s4007_s1 + $0x168] sm:$0xff] }
 0x164   :  { %v1020_v19 = vpop.f32.mrf.mxu3  ;;  %2824 = vmatmul.msk.f32.vlgmr.msrb.gmra.mxu0 %vm40_vm0, %v3679_v35  ;;  %v3014_v5 = vunpack.i.h.bf16 %v3012_v0  ;;  %v3013_v8 = vunpack.i.l.bf16 %v3012_v0 }
 0x165   :  { %v3695_v43 = vadd.f32 %v1020_v19, %v954_v41  ;;  %v3061_v19 = vmov 0  }
 0x166   :  { %v735_v30 = vpop.f32.mrf.mxu2  ;;  %v831_v46 = vpop.f32.mrf.mxu1  ;;  %3016 = vset.pattern.permute.xlu0 %v3061_v19  ;;  %3015 = vset.pattern.permute.xlu2 %v3061_v19 }
 0x167   :  { %v765_v48 = vadd.f32 %v735_v30, %v3574_v34  ;;  %2431 = vperm.xlu0 %3016, %v2423_v31  }
 0x169   :  { %v861_v51 = vadd.f32 %v831_v46, %v765_v48  ;;  %2823 = vmatmul.msk.f32.gmra.mxu3 %vm40_vm0, %v3701_v47  ;;  %2807 = vmatmul.msk.f32.gmra.mxu1 %vm40_vm0, %v3654_v22  ;;  %v1046_v49 = vpop.f32.mrf.mxu0 }
 0x16b   :  { %v957_v53 = vadd.f32 %v927_v26, %v861_v51  ;;  %2808 = vmatmul.msk.f32.vlgmr.msrb.gmra.mxu2 %vm40_vm0, %v3622_v4 }
 0x16c   :  { %v1023_v56 = vpop.f32.mrf.mxu3  ;;  %2825 = vmatmul.msk.f32.gmra.mxu0 %vm40_vm0, %v3701_v47  ;;  %2164 = vmatpush.msrb.mxu2 %v2137_v52 }
 0x16d   :  { %v3716_v34 = vadd.f32 %v1023_v56, %v957_v53 }
 0x16e   :  { %v851_v59 = vpop.f32.mrf.mxu2  ;;  %v947_v60 = vpop.f32.mrf.mxu1 }
 0x16f   :  { %v859_v62 = vadd.f32 %v851_v59, %v3595_v50  ;;  %v2335_v50 = vsel %vm2334_vm11, %v3013_v8, %v3014_v5 }
 0x170   :  { %2362 = vmatpush.msrb.mxu0 %v2335_v50 }
 0x171   :  { %v955_v7 = vadd.f32 %v947_v60, %v859_v62  ;;  %2832 = vmatmul.msk.f32.vlgmr.msra.gmra.mxu3 %vm40_vm0, %v3721_v61  ;;  %2816 = vmatmul.msk.f32.vlgmr.msrb.gmra.mxu1 %vm40_vm0, %v3636_v14  ;;  %v1189_v4 = vpop.f32.mrf.mxu0 }
 0x172   :  { %2263 = vmatpush.msrb.mxu1 %v2236_v42 }
 0x173   :  { %v1051_v6 = vadd.f32 %v1043_v40, %v955_v7  ;;  %2809 = vmatmul.msk.f32.gmra.mxu2 %vm40_vm0, %v3654_v22 }
 0x174   :  { %v1139_v10 = vpop.f32.mrf.mxu3  ;;  %2834 = vmatmul.msk.f32.vlgmr.msra.gmra.mxu0 %vm40_vm0, %v3721_v61 }
 0x175   :  { %v3734_v11 = vadd.f32 %v1139_v10, %v1051_v6 }
 0x176   :  { %v854_v12 = vpop.f32.mrf.mxu2  ;;  %v950_v58 = vpop.f32.mrf.mxu1 }
 0x177   :  { %v862_v57 = vadd.f32 %v854_v12, %v3617_v54  ;;  %v953_v54 = vadd.f32 %v3645_v17, %v3638_v63  ;;  %v3767_v63 = vld [vmem:[%s4007_s1 + $0x180] sm:$0xff] }
 0x179   :  { %v958_v45 = vadd.f32 %v950_v58, %v862_v57  ;;  %2833 = vmatmul.msk.f32.gmra.mxu3 %vm40_vm0, %v3739_v13  ;;  %2817 = vmatmul.msk.f32.gmra.mxu1 %vm40_vm0, %v3665_v27  ;;  %v1192_v21 = vpop.f32.mrf.mxu0 }
 0x17b   :  { %v1054_v22 = vadd.f32 %v1046_v49, %v958_v45  ;;  %2818 = vmatmul.msk.f32.vlgmr.msra.gmra.mxu2 %vm40_vm0, %v3636_v14  ;;  %v2336_v14 = vsel %vm2334_vm11, %v3014_v5, %v3008_v1 }
 0x17c   :  { %v1142_v24 = vpop.f32.mrf.mxu3  ;;  %2286 = vmatpush.msra.mxu2 %v2237_v20  ;;  %2835 = vmatmul.msk.f32.gmra.mxu0 %vm40_vm0, %v3739_v13 }
 0x17d   :  { %v3755_v25 = vadd.f32 %v1142_v24, %v1054_v22 }
 0x17e   :  { %v997_v26 = vpop.f32.mrf.mxu2  ;;  %v1093_v18 = vpop.f32.mrf.mxu1 }
 0x17f   :  { %v1049_v29 = vadd.f32 %v997_v26, %v953_v54 }
 0x181   :  { %v1145_v23 = vadd.f32 %v1093_v18, %v1049_v29  ;;  %2842 = vmatmul.msk.f32.vlgmr.msrb.gmra.mxu3 %vm40_vm0, %v2836_v9  ;;  %2826 = vmatmul.msk.f32.vlgmr.msra.gmra.mxu1 %vm40_vm0, %v3679_v35  ;;  %v1308_v16 = vpop.f32.mrf.mxu0  ;;  %v3009_v35 = vunpack.i.h.bf16 %v3007_v15 }
 0x182   :  { %2385 = vmatpush.msra.mxu1 %v2336_v14 }
 0x183   :  { %v1241_v17 = vadd.f32 %v1189_v4, %v1145_v23  ;;  %2819 = vmatmul.msk.f32.gmra.mxu2 %vm40_vm0, %v3665_v27  ;;  %v2337_v27 = vsel %vm2334_vm11, %v3008_v1, %v3009_v35 }
 0x184   :  { %v1285_v32 = vpop.f32.mrf.mxu3  ;;  %2846 = vmatmul.msk.f32.vlgmr.msrb.gmra.mxu0 %vm40_vm0, %v3767_v63 }
 0x185   :  { %v3775_v36 = vadd.f32 %v1285_v32, %v1241_v17 }
 0x186   :  { %v1000_v37 = vpop.f32.mrf.mxu2  ;;  %v1096_v38 = vpop.f32.mrf.mxu1 }
 0x187   :  { %v1052_v39 = vadd.f32 %v1000_v37, %v956_v33 }
 0x189   :  { %v1148_v40 = vadd.f32 %v1096_v38, %v1052_v39  ;;  %2843 = vmatmul.msk.f32.gmra.mxu3 %vm40_vm0, %v2837_v2  ;;  %2827 = vmatmul.msk.f32.gmra.mxu1 %vm40_vm0, %v3701_v47  ;;  %v1311_v41 = vpop.f32.mrf.mxu0 }
 0x18b   :  { %v1244_v44 = vadd.f32 %v1192_v21, %v1148_v40  ;;  %2830 = vmatmul.msk.f32.vlgmr.msrb.gmra.mxu2 %vm40_vm0, %v3721_v61 }
 0x18c   :  { %v1288_v3 = vpop.f32.mrf.mxu3  ;;  %2408 = vmatpush.msrb.mxu2 %v2337_v27  ;;  %2847 = vmatmul.msk.f32.gmra.mxu0 %vm40_vm0, %v2845_v28 }
 0x18d   :  { %v1340_v30 = vadd.f32 %v1288_v3, %v1244_v44 }
 0x18e   :  { %v1116_v46 = vpop.f32.mrf.mxu2  ;;  %v1212_v47 = vpop.f32.mrf.mxu1 }
 0x18f   :  { %v1146_v48 = vadd.f32 %v1116_v46, %v3695_v43  ;;  %v2422_v43 = vld [vmem:[%s4008_s2] sm:$0xff] }
 0x190   :  { %2426 = vperm.xlu2 %3015, %v2422_v43  }
 0x191   :  { %v1242_v51 = vadd.f32 %v1212_v47, %v1146_v48  ;;  %2838 = vmatmul.msk.f32.vlgmr.msrb.gmra.mxu1 %vm40_vm0, %v2836_v9  ;;  %v1427_v49 = vpop.f32.mrf.mxu0 }
 0x193   :  { %v1338_v52 = vadd.f32 %v1308_v16, %v1242_v51  ;;  %2831 = vmatmul.msk.f32.gmra.mxu2 %vm40_vm0, %v3739_v13 }
 0x194   :  { %v1404_v53 = vpop.f32.mrf.mxu3 }
 0x195   :  { %v1434_v55 = vadd.f32 %v1404_v53, %v1338_v52 }
 0x196   :  { %v1119_v56 = vpop.f32.mrf.mxu2  ;;  %v1215_v59 = vpop.f32.mrf.mxu1 }
 0x197   :  { %v1149_v60 = vadd.f32 %v1119_v56, %v3716_v34 }
 0x199   :  { %v1245_v61 = vadd.f32 %v1215_v59, %v1149_v60  ;;  %2839 = vmatmul.msk.f32.gmra.mxu1 %vm40_vm0, %v2837_v2  ;;  %v1430_v62 = vpop.f32.mrf.mxu0 }
 0x19b   :  { %v1341_v42 = vadd.f32 %v1311_v41, %v1245_v61  ;;  %2840 = vmatmul.msk.f32.vlgmr.msra.gmra.mxu2 %vm40_vm0, %v2836_v9 }
 0x19c   :  { %v1407_v0 = vpop.f32.mrf.mxu3 }
 0x19d   :  { %v1437_v5 = vadd.f32 %v1407_v0, %v1341_v42 }
 0x19e   :  { %v1235_v8 = vpop.f32.mrf.mxu2  ;;  %v1331_v7 = vpop.f32.mrf.mxu1 }
 0x19f   :  { %v1243_v4 = vadd.f32 %v1235_v8, %v3734_v11 }
 0x1a1   :  { %v1339_v6 = vadd.f32 %v1331_v7, %v1243_v4  ;;  %2848 = vmatmul.msk.f32.vlgmr.msra.gmra.mxu1 %vm40_vm0, %v3767_v63  ;;  %v1573_v34 = vpop.f32.mrf.mxu0 }
 0x1a3   :  { %v1435_v50 = vadd.f32 %v1427_v49, %v1339_v6  ;;  %2841 = vmatmul.msk.f32.gmra.mxu2 %vm40_vm0, %v2837_v2 }
 0x1a4   :  { %v1523_v10 = vpop.f32.mrf.mxu3 }
 0x1a5   :  { %v1531_v12 = vadd.f32 %v1523_v10, %v1435_v50 }
 0x1a6   :  { %v1238_v58 = vpop.f32.mrf.mxu2  ;;  %v1334_v13 = vpop.f32.mrf.mxu1 }
 0x1a7   :  { %v1246_v57 = vadd.f32 %v1238_v58, %v3755_v25 }
 0x1a9   :  { %v1342_v15 = vadd.f32 %v1334_v13, %v1246_v57  ;;  %2849 = vmatmul.msk.f32.gmra.mxu1 %vm40_vm0, %v2845_v28  ;;  %v1576_v45 = vpop.f32.mrf.mxu0 }
 0x1ab   :  { %v1438_v20 = vadd.f32 %v1430_v62, %v1342_v15  ;;  %2850 = vmatmul.msk.f32.vlgmr.msrb.gmra.mxu2 %vm40_vm0, %v3767_v63 }
 0x1ac   :  { %v1526_v11 = vpop.f32.mrf.mxu3 }
 0x1ad   :  { %v1534_v21 = vadd.f32 %v1526_v11, %v1438_v20 }
 0x1ae   :  { %v1381_v22 = vpop.f32.mrf.mxu2  ;;  %v1477_v1 = vpop.f32.mrf.mxu1 }
 0x1af   :  { %v1433_v24 = vadd.f32 %v1381_v22, %v3775_v36 }
 0x1b1   :  { %v1529_v54 = vadd.f32 %v1477_v1, %v1433_v24  ;;  %v1692_v26 = vpop.f32.mrf.mxu0 }
 0x1b3   :  { %v1625_v18 = vadd.f32 %v1573_v34, %v1529_v54  ;;  %2851 = vmatmul.msk.f32.gmra.mxu2 %vm40_vm0, %v2845_v28  ;;  %vm2442_vm0 = vcmask 621568  }
 0x1b4   :  { %v1669_v37 = vpop.f32.mrf.mxu3 }
 0x1b6   :  { %v1384_v25 = vpop.f32.mrf.mxu2  ;;  %v1480_v9 = vpop.f32.mrf.mxu1 }
 0x1b7   :  { %v1436_v29 = vadd.f32 %v1384_v25, %v1340_v30 }
 0x1b9   :  { %v1532_v14 = vadd.f32 %v1480_v9, %v1436_v29  ;;  %v1695_v23 = vpop.f32.mrf.mxu0 }
 0x1bb   :  { %v1628_v16 = vadd.f32 %v1576_v45, %v1532_v14 }
 0x1bc   :  { %v1672_v28 = vpop.f32.mrf.mxu3 }
 0x1bd   :  { %v1724_v11 = vadd.f32 %v1672_v28, %v1628_v16 }
 0x1be   :  { %v1500_v17 = vpop.f32.mrf.mxu2  ;;  %v1596_v32 = vpop.f32.mrf.mxu1 }
 0x1bf   :  { %v1530_v63 = vadd.f32 %v1500_v17, %v1434_v55 }
 0x1c1   :  { %v1626_v33 = vadd.f32 %v1596_v32, %v1530_v63  ;;  %v1811_v35 = vpop.f32.mrf.mxu0 }
 0x1c3   :  { %v1722_v38 = vadd.f32 %v1692_v26, %v1626_v33 }
 0x1c4   :  { %v1788_v51 = vpop.f32.mrf.mxu3 }
 0x1c5   :  { %v1818_v29 = vadd.f32 %v1788_v51, %v1722_v38 }
 0x1c6   :  { %v1503_v2 = vpop.f32.mrf.mxu2  ;;  %v1599_v36 = vpop.f32.mrf.mxu1 }
 0x1c7   :  { %v1533_v39 = vadd.f32 %v1503_v2, %v1437_v5 }
 0x1c9   :  { %v1629_v40 = vadd.f32 %v1599_v36, %v1533_v39  ;;  %v1814_v27 = vpop.f32.mrf.mxu0 }
 0x1cb   :  { %v1725_v41 = vadd.f32 %v1695_v23, %v1629_v40 }
 0x1cc   :  { %v1791_v60 = vpop.f32.mrf.mxu3 }
 0x1cd   :  { %v1821_v39 = vadd.f32 %v1791_v60, %v1725_v41 }
 0x1ce   :  { %v1619_v31 = vpop.f32.mrf.mxu2  ;;  %v1715_v19 = vpop.f32.mrf.mxu1 }
 0x1cf   :  { %v1627_v44 = vadd.f32 %v1619_v31, %v1531_v12  ;;  %v1721_v12 = vadd.f32 %v1669_v37, %v1625_v18 }
 0x1d1   :  { %v1723_v3 = vadd.f32 %v1715_v19, %v1627_v44  ;;  %v1968_v30 = vpop.f32.mrf.mxu0 }
 0x1d3   :  { %v3813_v46 = vadd.f32 %v1811_v35, %v1723_v3 }
 0x1d4   :  { %v1907_v42 = vpop.f32.mrf.mxu3 }
 0x1d6   :  { %v1622_v47 = vpop.f32.mrf.mxu2  ;;  %v1718_v48 = vpop.f32.mrf.mxu1 }
 0x1d7   :  { %v1630_v49 = vadd.f32 %v1622_v47, %v1534_v21 }
 0x1d9   :  { %v1726_v52 = vadd.f32 %v1718_v48, %v1630_v49  ;;  %v1971_v55 = vpop.f32.mrf.mxu0  ;;  %v2432_v38 = vpop.permute.xlu0 %2431 }
 0x1db   :  { %v3815_v53 = vadd.f32 %v1814_v27, %v1726_v52  ;;  %v1915_v52 = vadd.f32 %v1907_v42, %v3813_v46 }
 0x1dc   :  { %v1910_v7 = vpop.f32.mrf.mxu3 }
 0x1de   :  { %v1765_v56 = vpop.f32.mrf.mxu2  ;;  %v1861_v59 = vpop.f32.mrf.mxu1 }
 0x1df   :  { %v1817_v13 = vadd.f32 %v1765_v56, %v1721_v12 }
 0x1e1   :  { %v2090_v61 = vpop.f32.mrf.mxu0  ;;  %v1913_v15 = vadd.f32 %v1861_v59, %v1817_v13 }
 0x1e3   :  { %v2020_v21 = vadd.f32 %v1968_v30, %v1913_v15 }
 0x1e4   :  { %v2067_v58 = vpop.f32.mrf.mxu3 }
 0x1e5   :  { %v2119_v24 = vadd.f32 %v2067_v58, %v2020_v21 }
 0x1e6   :  { %v1768_v62 = vpop.f32.mrf.mxu2  ;;  %v1864_v43 = vpop.f32.mrf.mxu1 }
 0x1e7   :  { %v1820_v22 = vadd.f32 %v1768_v62, %v1724_v11 }
 0x1e9   :  { %v2093_v8 = vpop.f32.mrf.mxu0  ;;  %v1916_v54 = vadd.f32 %v1864_v43, %v1820_v22 }
 0x1ea   :  { %v2427_v32 = vpop.permute.xlu2 %2426 }
 0x1eb   :  { %v2023_v23 = vadd.f32 %v1971_v55, %v1916_v54  ;;  %v2566_v54 = vld [vmem:[%s4009_s3 + $0x138] sm:$0x1f] }
 0x1ec   :  { %v2070_v1 = vpop.f32.mrf.mxu3  ;;  %2852 = vmatpush.msk.msrb.mxu1 %vm2574_vm12, %v2566_v54 }
 0x1ed   :  { %v2122_v35 = vadd.f32 %v2070_v1, %v2023_v23  ;;  %v2540_v23 = vld [vmem:[%s4009_s3 + $0x68] sm:$0xff] }
 0x1ee   :  { %v1884_v0 = vpop.f32.mrf.mxu2  ;;  %v1991_v5 = vpop.f32.mrf.mxu1 }
 0x1ef   :  { %v1914_v18 = vadd.f32 %v1884_v0, %v1818_v29  ;;  %v2564_v29 = vld [vmem:[%s4009_s3 + $0x128] sm:$0xff] }
 0x1f1   :  { %v2212_v34 = vpop.f32.mrf.mxu0  ;;  %v2021_v37 = vadd.f32 %v1991_v5, %v1914_v18  ;;  %v2556_v18 = vld [vmem:[%s4009_s3 + $0xe8] sm:$0xff] }
 0x1f3   :  { %v2120_v28 = vadd.f32 %v2090_v61, %v2021_v37 }
 0x1f4   :  { %v2189_v63 = vpop.f32.mrf.mxu3 }
 0x1f5   :  { %v2219_v3 = vadd.f32 %v2189_v63, %v2120_v28  ;;  %v2555_v63 = vld [vmem:[%s4009_s3 + $0xe0] sm:$0xff] }
 0x1f6   :  { %v1887_v4 = vpop.f32.mrf.mxu2  ;;  %v1994_v6 = vpop.f32.mrf.mxu1 }
 0x1f7   :  { %v1917_v31 = vadd.f32 %v1887_v4, %v1821_v39  ;;  %v1918_v4 = vadd.f32 %v1910_v7, %v3815_v53 }
 0x1f9   :  { %v3817_v57 = vpop.f32.mrf.mxu0  ;;  %v2024_v30 = vadd.f32 %v1994_v6, %v1917_v31 }
 0x1fb   :  { %v2123_v56 = vadd.f32 %v2093_v8, %v2024_v30 }
 0x1fc   :  { %v2192_v47 = vpop.f32.mrf.mxu3 }
 0x1fd   :  { %v2222_v61 = vadd.f32 %v2192_v47, %v2123_v56 }
 0x1fe   :  { %v2014_v50 = vpop.f32.mrf.mxu2  ;;  %v2113_v10 = vpop.f32.mrf.mxu1 }
 0x1ff   :  { %v2022_v59 = vadd.f32 %v2014_v50, %v1915_v52 }
 0x201   :  { %v2364_v26 = vpop.f32.mrf.mxu0  ;;  %v2121_v62 = vadd.f32 %v2113_v10, %v2022_v59  ;;  %v2538_v59 = vld [vmem:[%s4009_s3 + $0x58] sm:$0xff] }
 0x203   :  { %v2220_v46 = vadd.f32 %v2212_v34, %v2121_v62  ;;  %v2552_v62 = vld [vmem:[%s4009_s3 + $0xc8] sm:$0xff] }
 0x204   :  { %v2311_v12 = vpop.f32.mrf.mxu3 }
 0x205   :  { %v2319_v58 = vadd.f32 %v2311_v12, %v2220_v46  ;;  %v2559_v12 = vld [vmem:[%s4009_s3 + $0x100] sm:$0xff]  ;;  %v2533_v46 = vld [vmem:[%s4009_s3 + $0x30] sm:$0xff] }
 0x206   :  { %v2017_v45 = vpop.f32.mrf.mxu2  ;;  %v2116_v20 = vpop.f32.mrf.mxu1 }
 0x207   :  { %v2025_v42 = vadd.f32 %v2017_v45, %v1918_v4  ;;  %v2534_v4 = vld [vmem:[%s4009_s3 + $0x38] sm:$0xff] }
 0x209   :  { %v2367_v27 = vpop.f32.mrf.mxu0  ;;  %v2124_v13 = vadd.f32 %v2116_v20, %v2025_v42  ;;  %v2549_v42 = vld [vmem:[%s4009_s3 + $0xb0] sm:$0xff] }
 0x20b   :  { %v2223_v53 = vadd.f32 %v3817_v57, %v2124_v13  ;;  %v2565_v57 = vld [vmem:[%s4009_s3 + $0x130] sm:$0xff]  ;;  %v2547_v13 = vld [vmem:[%s4009_s3 + $0xa0] sm:$0xff] }
 0x20c   :  { %v2314_v21 = vpop.f32.mrf.mxu3  ;;  %2633 = vmatpush.msrb.mxu1 %v2565_v57 }
 0x20d   :  { %v2322_v34 = vadd.f32 %v2314_v21, %v2223_v53  ;;  %v2545_v53 = vld [vmem:[%s4009_s3 + $0x90] sm:$0xff]  ;;  %v2544_v21 = vld [vmem:[%s4009_s3 + $0x88] sm:$0xff] }
 0x20e   :  { %v2166_v25 = vpop.f32.mrf.mxu2  ;;  %v2265_v9 = vpop.f32.mrf.mxu1  ;;  %2634 = vmatpush.msrb.mxu1 %v2564_v29 }
 0x20f   :  { %v2218_v14 = vadd.f32 %v2166_v25, %v2119_v24  ;;  %v2558_v25 = vld [vmem:[%s4009_s3 + $0xf8] sm:$0xff] }
 0x210   :  { %2601 = vmatpush.msra.mxu0 %v2558_v25 }
 0x211   :  { %v2317_v17 = vadd.f32 %v2265_v9, %v2218_v14  ;;  %v2541_v9 = vld [vmem:[%s4009_s3 + $0x70] sm:$0xff] }
 0x212   :  { %v2557_v14 = vld [vmem:[%s4009_s3 + $0xf0] sm:$0xff] }
 0x213   :  { %v2416_v33 = vadd.f32 %v2364_v26, %v2317_v17  ;;  %v2542_v26 = vld [vmem:[%s4009_s3 + $0x78] sm:$0xff]  ;;  %2602 = vmatpush.msra.mxu0 %v2557_v14  ;;  %v2563_v17 = vld [vmem:[%s4009_s3 + $0x120] sm:$0xff] }
 0x214   :  { %2578 = vmatpush.msra.mxu3 %v2542_v26  ;;  %2635 = vmatpush.msrb.mxu1 %v2563_v17 }
 0x215   :  { %v3819_v2 = vadd.f32 %v2427_v32, %v2416_v33  ;;  %2603 = vmatpush.msra.mxu0 %v2556_v18  ;;  %v2562_v33 = vld [vmem:[%s4009_s3 + $0x118] sm:$0xff] }
 0x216   :  { %v2169_v16 = vpop.f32.mrf.mxu2  ;;  %v2268_v36 = vpop.f32.mrf.mxu1  ;;  %2579 = vmatpush.msra.mxu3 %v2541_v9  ;;  %2636 = vmatpush.msrb.mxu1 %v2562_v33 }
 0x217   :  { %v2221_v40 = vadd.f32 %v2169_v16, %v2122_v35  ;;  %2604 = vmatpush.msra.mxu0 %v2555_v63  ;;  %v2561_v35 = vld [vmem:[%s4009_s3 + $0x110] sm:$0xff] }
 0x218   :  { %2580 = vmatpush.msra.mxu3 %v2540_v23  ;;  %2637 = vmatpush.msrb.mxu1 %v2561_v35 }
 0x219   :  { %v2320_v19 = vadd.f32 %v2268_v36, %v2221_v40 }
 0x21b   :  { %v2419_v44 = vadd.f32 %v2367_v27, %v2320_v19 }
 0x21d   :  { %v3821_v48 = vadd.f32 %v2432_v38, %v2419_v44 }
 0x21e   :  { %v2288_v51 = vpop.f32.mrf.mxu2  ;;  %v2387_v49 = vpop.f32.mrf.mxu1 }
 0x21f   :  { %v2318_v55 = vadd.f32 %v2288_v51, %v2219_v3 }
 0x221   :  { %v2417_v41 = vadd.f32 %v2387_v49, %v2318_v55 }
 0x223   :  { %v3824_v60 = vadd.f32 %v2427_v32, %v2417_v41  ;;  %v2537_v41 = vld [vmem:[%s4009_s3 + $0x50] sm:$0xff] }
 0x225   :  { %v3017_v43 = vpack.i.bf16 %v3824_v60, %v3819_v2 }
 0x226   :  { %v2291_v0 = vpop.f32.mrf.mxu2  ;;  %v2390_v5 = vpop.f32.mrf.mxu1 }
 0x227   :  { %v2321_v6 = vadd.f32 %v2291_v0, %v2222_v61  ;;  %3018 = vrot.lane.b32.xlu1 %v3017_v43, %s3038_s22  ;;  %v2536_v61 = vld [vmem:[%s4009_s3 + $0x48] sm:$0xff]  ;;  %v2535_v43 = vld [vmem:[%s4009_s3 + $0x40] sm:$0xff] }
 0x228   :  { %v2551_v0 = vld [vmem:[%s4009_s3 + $0xc0] sm:$0xff] }
 0x229   :  { %v2420_v8 = vadd.f32 %v2390_v5, %v2321_v6  ;;  %v2560_v5 = vld [vmem:[%s4009_s3 + $0x108] sm:$0xff]  ;;  %v2550_v6 = vld [vmem:[%s4009_s3 + $0xb8] sm:$0xff] }
 0x22a   :  { %2638 = vmatpush.msrb.mxu1 %v2560_v5 }
 0x22b   :  { %v3830_v50 = vadd.f32 %v2432_v38, %v2420_v8  ;;  %v2532_v8 = vld [vmem:[%s4009_s3 + $0x28] sm:$0xff] }
 0x22c   :  { %2639 = vmatpush.msrb.mxu1 %v2559_v12 }
 0x22d   :  { %v3022_v10 = vpack.i.bf16 %v3830_v50, %v3821_v48 }
 0x22e   :  { %v2410_v15 = vpop.f32.mrf.mxu2 }
 0x22f   :  { %v2418_v11 = vadd.f32 %v2410_v15, %v2319_v58  ;;  %3023 = vrot.lane.b32.xlu1 %v3022_v10, %s3038_s22  ;;  %v2531_v58 = vld [vmem:[%s4009_s3 + $0x20] sm:$0xff]  ;;  %v2530_v10 = vld [vmem:[%s4009_s3 + $0x18] sm:$0xff] }
 0x230   :  { %v2546_v15 = vld [vmem:[%s4009_s3 + $0x98] sm:$0xff] }
 0x231   :  { %v2436_v7 = vadd.f32 %v2427_v32, %v2418_v11  ;;  %v2539_v32 = vld [vmem:[%s4009_s3 + $0x60] sm:$0xff]  ;;  %v2529_v11 = vld [vmem:[%s4009_s3 + $0x10] sm:$0xff] }
 0x232   :  { %2581 = vmatpush.msra.mxu3 %v2539_v32 }
 0x233   :  { %2443 = vst.msk [vmem:[#allocation2 + $0x10] sm:$0xff] %vm2442_vm0, %v2436_v7  ;;  %v2528_v7 = vld [vmem:[%s4009_s3 + $0x8] sm:$0xff] }
 0x234   :  { %2582 = vmatpush.msra.mxu3 %v2538_v59 }
 0x236   :  { %v2413_v45 = vpop.f32.mrf.mxu2  ;;  %2583 = vmatpush.msra.mxu3 %v2537_v41 }
 0x237   :  { %v2421_v22 = vadd.f32 %v2413_v45, %v2322_v34  ;;  %v2527_v34 = vld [vmem:[%s4009_s3] sm:$0xff] }
 0x238   :  { %2584 = vmatpush.msra.mxu3 %v2536_v61  ;;  %v2543_v45 = vld [vmem:[%s4009_s3 + $0x80] sm:$0xff] }
 0x239   :  { %v2439_v1 = vadd.f32 %v2432_v38, %v2421_v22 }
 0x23a   :  { %v2449_v24 = vld [vmem:[#allocation2 + $0x10] sm:$0xff]  ;;  %2585 = vmatpush.msra.mxu3 %v2535_v43 }
 0x23b   :  { %2446 = vst.msk [vmem:[#allocation2 + $0x28] sm:$0xff] %vm2442_vm0, %v2439_v1  ;;  %2463 = vrot.lane.b32.xlu2 %v2449_v24, %s3038_s22 }
 0x23c   :  { %2586 = vmatpush.msra.mxu3 %v2534_v4 }
 0x23e   :  { %2587 = vmatpush.msra.mxu3 %v2533_v46 }
 0x240   :  { %2588 = vmatpush.msra.mxu3 %v2532_v8 }
 0x242   :  { %v2452_v20 = vld [vmem:[#allocation2 + $0x28] sm:$0xff]  ;;  %2589 = vmatpush.msra.mxu3 %v2531_v58 }
 0x243   :  { %2469 = vrot.lane.b32.xlu2 %v2452_v20, %s3038_s22 }
 0x244   :  { %2590 = vmatpush.msra.mxu3 %v2530_v10 }
 0x246   :  { %2591 = vmatpush.msra.mxu3 %v2529_v11 }
 0x248   :  { %2592 = vmatpush.msra.mxu3 %v2528_v7 }
 0x24a   :  { %2593 = vmatpush.msra.mxu3 %v2527_v34 }
 0x295   :  { %v2464_v37 = vpop.permute.xlu2 %2463 }
 0x296   :  { %v3880_v16 = vmax.f32 %v2449_v24, %v2464_v37 }
 0x298   :  { %2497 = vrot.lane.b32.xlu1 %v3880_v16, %s3041_s27 }
 0x299   :  { %v3019_v36 = vpop.permute.xlu1 %3018 }
 0x29a   :  { %v3021_v39 = vunpack.i.h.bf16 %v3019_v36  ;;  %v3020_v40 = vunpack.i.l.bf16 %v3019_v36 }
 0x29c   :  { %v2472_v27 = vsel %vm34_vm1, %v3021_v39, %v2464_v37  ;;  %v2471_v28 = vsel %vm34_vm1, %v3020_v40, %v3021_v39 }
 0x29d   :  { %v3887_v31 = vmax.f32 %v3819_v2, %v2471_v28  ;;  %v3890_v19 = vmax.f32 %v3824_v60, %v2472_v27  ;;  %v2470_v47 = vpop.permute.xlu2 %2469  ;;  %v2553_v60 = vld [vmem:[%s4009_s3 + $0xd0] sm:$0xff] }
 0x29e   :  { %v3903_v55 = vmax.f32 %v2452_v20, %v2470_v47 }
 0x29f   :  { %v3027_v38 = vpack.i.bf16 %v3890_v19, %v3887_v31 }
 0x2a1   :  { %v3024_v44 = vpop.permute.xlu1 %3023  ;;  %3028 = vrot.lane.b32.xlu0 %v3027_v38, %s3041_s27 }
 0x2a2   :  { %v3026_v3 = vunpack.i.h.bf16 %v3024_v44  ;;  %v3025_v30 = vunpack.i.l.bf16 %v3024_v44 }
 0x2a4   :  { %v2474_v51 = vsel %vm34_vm1, %v3026_v3, %v2470_v47  ;;  %v2473_v49 = vsel %vm34_vm1, %v3025_v30, %v3026_v3  ;;  %vm2567_vm1 = vcmask 498688  }
 0x2a5   :  { %v3898_v52 = vmax.f32 %v3821_v48, %v2473_v49  ;;  %v3901_v2 = vmax.f32 %v3830_v50, %v2474_v51  ;;  %v2554_v48 = vld [vmem:[%s4009_s3 + $0xd8] sm:$0xff]  ;;  %v2548_v50 = vld [vmem:[%s4009_s3 + $0xa8] sm:$0xff] }
 0x2a6   :  { %2605 = vmatpush.msra.mxu0 %v2554_v48 }
 0x2a7   :  { %v3032_v56 = vpack.i.bf16 %v3901_v2, %v3898_v52 }
 0x2a8   :  { %2606 = vmatpush.msra.mxu0 %v2553_v60 }
 0x2a9   :  { %3033 = vrot.lane.b32.xlu2 %v3032_v56, %s3041_s27  ;;  %2503 = vrot.lane.b32.xlu0 %v3903_v55, %s3041_s27 }
 0x2aa   :  { %2607 = vmatpush.msra.mxu0 %v2552_v62 }
 0x2ac   :  { %2608 = vmatpush.msra.mxu0 %v2551_v0 }
 0x2ae   :  { %2609 = vmatpush.msra.mxu0 %v2550_v6 }
 0x2b0   :  { %2610 = vmatpush.msra.mxu0 %v2549_v42 }
 0x2b2   :  { %2611 = vmatpush.msra.mxu0 %v2548_v50 }
 0x2b4   :  { %2612 = vmatpush.msra.mxu0 %v2547_v13 }
 0x2b6   :  { %2613 = vmatpush.msra.mxu0 %v2546_v15 }
 0x2b8   :  { %2614 = vmatpush.msra.mxu0 %v2545_v53 }
 0x2ba   :  { %2615 = vmatpush.msra.mxu0 %v2544_v21 }
 0x2bc   :  { %2616 = vmatpush.msra.mxu0 %v2543_v45 }
 0x303   :  { %v3034_v20 = vpop.permute.xlu2 %3033 }
 0x304   :  { %v3036_v25 = vunpack.i.h.bf16 %v3034_v20  ;;  %v3035_v9 = vunpack.i.l.bf16 %v3034_v20 }
 0x306   :  { %v2507_v63 = vsel %vm488_vm4, %v3035_v9, %v3036_v25 }
 0x307   :  { %v2518_v36 = vmax.f32 %v3898_v52, %v2507_v63 }
 0x309   :  { %v2524_v27 = vmax.f32 %v2518_v36, 0.0 }
 0x30a   :  { %v2498_v22 = vpop.permute.xlu1 %2497 }
 0x30b   :  { %v2517_v1 = vmax.f32 %v3880_v16, %v2498_v22 }
 0x30d   :  { %v2523_v24 = vmax.f32 %v2517_v1, 0.0 }
 0x30f   :  { %2853 = vmatmul.msk.f32.vlgmr.msrb.gmra.mxu1 %vm2567_vm1, %v2523_v24 }
 0x313   :  { %v3029_v54 = vpop.permute.xlu0 %3028 }
 0x314   :  { %v3031_v57 = vunpack.i.h.bf16 %v3029_v54  ;;  %v3030_v26 = vunpack.i.l.bf16 %v3029_v54 }
 0x316   :  { %v2506_v29 = vsel %vm488_vm4, %v3031_v57, %v2498_v22  ;;  %v2505_v14 = vsel %vm488_vm4, %v3030_v26, %v3031_v57 }
 0x317   :  { %v2516_v23 = vmax.f32 %v3890_v19, %v2506_v29  ;;  %v2515_v18 = vmax.f32 %v3887_v31, %v2505_v14 }
 0x319   :  { %v2522_v17 = vmax.f32 %v2516_v23, 0.0  ;;  %v2521_v32 = vmax.f32 %v2515_v18, 0.0 }
 0x31b   :  { %v2504_v33 = vpop.permute.xlu0 %2503  ;;  %2594 = vmatmul.f32.vlgmr.msra.gmra.mxu3 %v2521_v32  ;;  %2617 = vmatmul.f32.vlgmr.msra.gmra.mxu0 %v2522_v17 }
 0x31c   :  { %v2508_v35 = vsel %vm488_vm4, %v3036_v25, %v2504_v33  ;;  %v2520_v37 = vmax.f32 %v3903_v55, %v2504_v33 }
 0x31d   :  { %v2519_v16 = vmax.f32 %v3901_v2, %v2508_v35 }
 0x31e   :  { %v2526_v39 = vmax.f32 %v2520_v37, 0.0 }
 0x31f   :  { %v2525_v40 = vmax.f32 %v2519_v16, 0.0 }
 0x320   :  { %2854 = vmatmul.msk.f32.gmra.mxu1 %vm2567_vm1, %v2526_v39 }
 0x323   :  { %2597 = vmatmul.f32.gmra.mxu3 %v2524_v27  ;;  %2620 = vmatmul.f32.gmra.mxu0 %v2525_v40 }
 0x38c   :  { %v2641_v38 = vpop.f32.mrf.mxu1 }
 0x398   :  { %v2618_v28 = vpop.f32.mrf.mxu0 }
 0x39d   :  { %v2644_v51 = vpop.f32.mrf.mxu1 }
 0x39e   :  { %v2595_v31 = vpop.f32.mrf.mxu3 }
 0x39f   :  { %v2619_v19 = vadd.f32 %v2618_v28, %v2595_v31 }
 0x3a0   :  { %v2621_v3 = vpop.f32.mrf.mxu0 }
 0x3a1   :  { %v2642_v44 = vadd.f32 %v2641_v38, %v2619_v19 }
 0x3a3   :  { %2648 = vst.msk [vmem:[%s4010_s4] sm:$0xff] %vm2647_vm13, %v2642_v44 }
 0x3a6   :  { %v2598_v30 = vpop.f32.mrf.mxu3 }
 0x3a7   :  { %v2622_v47 = vadd.f32 %v2621_v3, %v2598_v30 }
 0x3a9   :  { %v2645_v49 = vadd.f32 %v2644_v51, %v2622_v47 }
 0x3ab   :  { %2649 = vst.msk [vmem:[%s4010_s4 + $0x8] sm:$0xff] %vm2647_vm13, %v2645_v49 }

// kernel: lenet_forward.3
= control target key start
LH: loop header
LB: loop body
LE: loop exit
PB: predicated region body
PF: predicated region fallthrough
CT: control target
= control target key end

     0   :  { %s13275_s23 = smov 127   ;;  %s13276_s20 = smov 126   ;;  %vm80_vm0 = vcmask 1039360   ;;  %vm110_vm1 = vcmask 64512   ;;  %vm749_vm2 = vcmask 1031168   ;;  %vm1129_vm3 = vcmask 1022976   ;;  %s19816_s0 = inlined_call_operand.vmem [shape: f32[8,2048], index: 0, kind: input, shape index: {}]   ;;  %s19817_s1 = inlined_call_operand.vmem [shape: f32[25,8,8], index: 1, kind: input, shape index: {}]   ;;  %s19818_s2 = inlined_call_operand.vmem [shape: f32[8,1], index: 2, kind: input, shape index: {}]   ;;  %s19819_s3 = inlined_call_operand.vmem [shape: f32[1883,392], index: 3, kind: input, shape index: {}]   ;;  %s19820_s4 = inlined_call_operand.vmem [shape: f32[8,392], index: 4, kind: output, shape index: {}]  }
   0x1   :  { %v13323_v0 = vld [vmem:[%s19816_s0 + $0x20] sm:$0xff]  ;;  %v13328_v1 = vld [vmem:[%s19816_s0 + $0x30] sm:$0xff]  ;;  %v13342_v4 = vld [vmem:[%s19816_s0 + $0x8] sm:$0xff]  ;;  %s13277_s21 = smov 125   ;;  %s13278_s22 = smov 124   ;;  %vm1509_vm4 = vcmask 1014784  }
   0x2   :  { %v13333_v2 = vld [vmem:[%s19816_s0] sm:$0xff]  ;;  %v13337_v3 = vpack.i.bf16 %v13328_v1, %v13323_v0  ;;  %v13360_v7 = vld [vmem:[%s19816_s0 + $0x28] sm:$0xff]  ;;  %v13365_v8 = vld [vmem:[%s19816_s0 + $0x38] sm:$0xff]  ;;  %s13279_s26 = smov 96   ;;  %s13280_s27 = smov 95   ;;  %vm1923_vm5 = vcmask 785408  }
   0x3   :  { %v13346_v5 = vpack.i.bf16 %v13342_v4, %v13333_v2  ;;  %v13353_v6 = vld [vmem:[%s19816_s0 + $0x40] sm:$0xff]  ;;  %v13370_v9 = vld [vmem:[%s19816_s0 + $0x50] sm:$0xff]  ;;  %v13380_v11 = vld [vmem:[%s19816_s0 + $0x18] sm:$0xff]  ;;  %v13388_v13 = vpack.i.bf16 %v13360_v7, %v13365_v8  ;;  %v13487_v29 = vpack.i.bf16 %v13365_v8, %v13323_v0  ;;  %v13491_v30 = vpack.i.bf16 %v13328_v1, %v13360_v7  ;;  %s13281_s6 = smov 94   ;;  %s13282_s9 = smov 93  }
   0x4   :  { %12321 = vrot.lane.b32.xlu1 %v13337_v3, %s13275_s23  ;;  %v13375_v10 = vld [vmem:[%s19816_s0 + $0x10] sm:$0xff]  ;;  %v13384_v12 = vpack.i.bf16 %v13370_v9, %v13353_v6  ;;  %v13399_v15 = vld [vmem:[%s19816_s0 + $0x48] sm:$0xff]  ;;  %v13404_v16 = vld [vmem:[%s19816_s0 + $0x58] sm:$0xff]  ;;  %v13441_v22 = vpack.i.bf16 %v13380_v11, %v13360_v7  ;;  %v13453_v24 = vpack.i.bf16 %v13353_v6, %v13328_v1  ;;  %v13523_v33 = vpack.i.bf16 %v13380_v11, %v13333_v2  ;;  %s13283_s12 = smov 92   ;;  %s13284_s17 = smov 64  }
   0x5   :  { %12311 = vrot.lane.b32.xlu0 %v13346_v5, %s13275_s23  ;;  %v13394_v14 = vpack.i.bf16 %v13380_v11, %v13375_v10  ;;  %v13410_v17 = vpack.i.bf16 %v13399_v15, %v13404_v16  ;;  %v13417_v18 = vld [vmem:[%s19816_s0 + $0x60] sm:$0xff]  ;;  %v13422_v19 = vld [vmem:[%s19816_s0 + $0x70] sm:$0xff]  ;;  %v13433_v21 = vld [vmem:[%s19816_s0 + $0x68] sm:$0xff]  ;;  %v13447_v23 = vpack.i.bf16 %v13323_v0, %v13375_v10  ;;  %v13465_v26 = vpack.i.bf16 %v13365_v8, %v13399_v15  ;;  %s13285_s11 = smov 63   ;;  %s13286_s5 = smov 62  }
   0x6   :  { %12331 = vrot.lane.b32.xlu2 %v13384_v12, %s13275_s23  ;;  %v13428_v20 = vpack.i.bf16 %v13422_v19, %v13417_v18  ;;  %v13459_v25 = vpack.i.bf16 %v13417_v18, %v13370_v9  ;;  %v13471_v27 = vpack.i.bf16 %v13404_v16, %v13433_v21  ;;  %v13477_v28 = vpack.i.bf16 %v13375_v10, %v13342_v4  ;;  %v13538_v40 = vld [vmem:[%s19817_s1 + $0x8] sm:$0xff]  ;;  %s13288_s18 = smov 60   ;;  %s13290_s30 = smov 31  }
   0x7   :  { %v13499_v31 = vpack.i.bf16 %v13422_v19, %v13433_v21  ;;  %v13503_v32 = vpack.i.bf16 %v13404_v16, %v13353_v6  ;;  %v13529_v34 = vpack.i.bf16 %v13370_v9, %v13399_v15  ;;  %v13547_v45 = vpack.i.bf16 %v13360_v7, %v13375_v10  ;;  %s13291_s24 = smov 30   ;;  %s13293_s14 = smov 28  }
   0x8   :  { %v13551_v46 = vpack.i.bf16 %v13323_v0, %v13380_v11  ;;  %vm2306_vm6 = vcmask 777216   ;;  %vm2689_vm7 = vcmask 769024   ;;  %vm3072_vm8 = vcmask 760832  }
   0x9   :  { %vm3455_vm9 = vcmask 752640   ;;  %vm3838_vm10 = vcmask 523264   ;;  %vm4221_vm11 = vcmask 515072   ;;  %vm4604_vm12 = vcmask 506880  }
   0xa   :  { %vm4987_vm13 = vcmask 498688   ;;  %vm5370_vm14 = vcmask 490496   ;;  %vm5753_vm15 = vcmask 261120  }
   0xc   :  { %12326 = vrot.lane.b32.xlu1 %v13388_v13, %s13275_s23 }
   0xd   :  { %12316 = vrot.lane.b32.xlu0 %v13394_v14, %s13275_s23 }
   0xe   :  { %12336 = vrot.lane.b32.xlu2 %v13410_v17, %s13275_s23 }
  0x14   :  { %76 = vrot.lane.b32.xlu1 %v13433_v21, %s13275_s23 }
  0x15   :  { %12341 = vrot.lane.b32.xlu0 %v13428_v20, %s13275_s23 }
  0x16   :  { %12346 = vrot.lane.b32.xlu2 %v13346_v5, %s13276_s20 }
  0x1c   :  { %12356 = vrot.lane.b32.xlu1 %v13441_v22, %s13276_s20 }
  0x1d   :  { %12351 = vrot.lane.b32.xlu0 %v13447_v23, %s13276_s20 }
  0x1e   :  { %12361 = vrot.lane.b32.xlu2 %v13453_v24, %s13276_s20 }
  0x24   :  { %12371 = vrot.lane.b32.xlu1 %v13459_v25, %s13276_s20 }
  0x25   :  { %12366 = vrot.lane.b32.xlu0 %v13465_v26, %s13276_s20 }
  0x26   :  { %12376 = vrot.lane.b32.xlu2 %v13471_v27, %s13276_s20 }
  0x2c   :  { %12381 = vrot.lane.b32.xlu1 %v13477_v28, %s13277_s21 }
  0x2d   :  { %747 = vrot.lane.b32.xlu0 %v13422_v19, %s13276_s20 }
  0x2e   :  { %12386 = vrot.lane.b32.xlu2 %v13523_v33, %s13277_s21 }
  0x34   :  { %12396 = vrot.lane.b32.xlu1 %v13487_v29, %s13277_s21 }
  0x35   :  { %12391 = vrot.lane.b32.xlu0 %v13491_v30, %s13277_s21 }
  0x36   :  { %12401 = vrot.lane.b32.xlu2 %v13529_v34, %s13277_s21 }
  0x3c   :  { %12411 = vrot.lane.b32.xlu1 %v13499_v31, %s13277_s21 }
  0x3d   :  { %12406 = vrot.lane.b32.xlu0 %v13503_v32, %s13277_s21 }
  0x3e   :  { %1123 = vrot.lane.b32.xlu2 %v13417_v18, %s13277_s21 }
  0x44   :  { %12421 = vrot.lane.b32.xlu1 %v13346_v5, %s13278_s22 }
  0x45   :  { %12416 = vrot.lane.b32.xlu0 %v13394_v14, %s13278_s22 }
  0x46   :  { %12426 = vrot.lane.b32.xlu2 %v13337_v3, %s13278_s22 }
  0x4c   :  { %12436 = vrot.lane.b32.xlu1 %v13384_v12, %s13278_s22 }
  0x4d   :  { %12431 = vrot.lane.b32.xlu0 %v13388_v13, %s13278_s22 }
  0x4e   :  { %12441 = vrot.lane.b32.xlu2 %v13410_v17, %s13278_s22 }
  0x54   :  { %1505 = vrot.lane.b32.xlu1 %v13433_v21, %s13278_s22 }
  0x55   :  { %12446 = vrot.lane.b32.xlu0 %v13428_v20, %s13278_s22 }
  0x56   :  { %12451 = vrot.lane.b32.xlu2 %v13346_v5, %s13279_s26 }
  0x5c   :  { %12461 = vrot.lane.b32.xlu1 %v13547_v45, %s13279_s26 }
  0x5d   :  { %12456 = vrot.lane.b32.xlu0 %v13551_v46, %s13279_s26 }
  0x60   :  { %v12332_v35 = vpop.permute.xlu2 %12331 }
  0x61   :  { %v12333_v50 = vunpack.i.l.bf16 %v12332_v35  ;;  %v12334_v54 = vunpack.i.h.bf16 %v12332_v35 }
  0x68   :  { %v12337_v44 = vpop.permute.xlu2 %12336 }
  0x69   :  { %v12339_v56 = vunpack.i.h.bf16 %v12337_v44  ;;  %v12338_v60 = vunpack.i.l.bf16 %v12337_v44 }
  0x6b   :  { %v89_v35 = vsel %vm80_vm0, %v12333_v50, %v12339_v56 }
  0x76   :  { %v12322_v36 = vpop.permute.xlu1 %12321 }
  0x77   :  { %v12312_v37 = vpop.permute.xlu0 %12311  ;;  %v12323_v42 = vunpack.i.l.bf16 %v12322_v36  ;;  %v12324_v47 = vunpack.i.h.bf16 %v12322_v36  ;;  %v90_v36 = vsel %vm80_vm0, %v12339_v56, %v12334_v54 }
  0x78   :  { %v12314_v38 = vunpack.i.h.bf16 %v12312_v37  ;;  %v12313_v39 = vunpack.i.l.bf16 %v12312_v37  ;;  %v91_v37 = vsel %vm80_vm0, %v12334_v54, %v12338_v60 }
  0x7a   :  { %v81_v41 = vsel %vm80_vm0, %v12313_v39, %v12314_v38 }
  0x7b   :  { %129 = vmatpush.msra.mxu3 %v81_v41 }
  0x7c   :  { %11884 = vmatmul.msk.f32.vlgmr.msra.gmra.mxu3 %vm110_vm1, %v13538_v40 }
  0x7e   :  { %v12327_v43 = vpop.permute.xlu1 %12326 }
  0x7f   :  { %v12329_v48 = vunpack.i.h.bf16 %v12327_v43  ;;  %v12317_v49 = vpop.permute.xlu0 %12316  ;;  %v12328_v51 = vunpack.i.l.bf16 %v12327_v43 }
  0x80   :  { %v12319_v52 = vunpack.i.h.bf16 %v12317_v49  ;;  %v12318_v53 = vunpack.i.l.bf16 %v12317_v49  ;;  %v13598_v49 = vpack.i.bf16 %v13417_v18, %v13404_v16 }
  0x81   :  { %v85_v55 = vsel %vm80_vm0, %v12323_v42, %v12329_v48  ;;  %v86_v61 = vsel %vm80_vm0, %v12329_v48, %v12324_v47  ;;  %v87_v62 = vsel %vm80_vm0, %v12324_v47, %v12328_v51  ;;  %v88_v63 = vsel %vm80_vm0, %v12328_v51, %v12333_v50 }
  0x82   :  { %v82_v57 = vsel %vm80_vm0, %v12314_v38, %v12318_v53  ;;  %v83_v58 = vsel %vm80_vm0, %v12318_v53, %v12319_v52  ;;  %v84_v59 = vsel %vm80_vm0, %v12319_v52, %v12323_v42  ;;  %209 = vmatpush.msra.mxu0 %v85_v55  ;;  %v13579_v38 = vpack.i.bf16 %v13399_v15, %v13328_v1 }
  0x83   :  { %149 = vmatpush.msra.mxu1 %v82_v57  ;;  %169 = vmatpush.msra.mxu2 %v83_v58 }
  0x84   :  { %189 = vmatpush.msrb.mxu3 %v84_v59  ;;  %11885 = vmatmul.msk.f32.vlgmr.msra.gmra.mxu1 %vm110_vm1, %v13538_v40 }
  0x85   :  { %11886 = vmatmul.msk.f32.vlgmr.msra.gmra.mxu2 %vm110_vm1, %v13538_v40  ;;  %11887 = vmatmul.msk.f32.vlgmr.msrb.gmra.mxu3 %vm110_vm1, %v13538_v40 }
  0x86   :  { %11888 = vmatmul.msk.f32.vlgmr.msra.gmra.mxu0 %vm110_vm1, %v13538_v40  ;;  %229 = vmatpush.msrb.mxu1 %v86_v61  ;;  %v77_v41 = vpop.permute.xlu1 %76  ;;  %v13719_v61 = vld [vmem:[%s19817_s1 + $0x10] sm:$0xff] }
  0x87   :  { %249 = vmatpush.msrb.mxu2 %v87_v62  ;;  %269 = vmatpush.msra.mxu3 %v88_v63  ;;  %v12342_v39 = vpop.permute.xlu0 %12341 }
  0x88   :  { %289 = vmatpush.msrb.mxu0 %v89_v35  ;;  %309 = vmatpush.msra.mxu1 %v90_v36  ;;  %v12344_v42 = vunpack.i.h.bf16 %v12342_v39  ;;  %v12343_v43 = vunpack.i.l.bf16 %v12342_v39 }
  0x89   :  { %329 = vmatpush.msra.mxu2 %v91_v37  ;;  %12471 = vrot.lane.b32.xlu0 %v13579_v38, %s13279_s26 }
  0x8a   :  { %v92_v44 = vsel %vm80_vm0, %v12338_v60, %v12343_v43  ;;  %v93_v47 = vsel %vm80_vm0, %v12343_v43, %v77_v41  ;;  %v94_v48 = vsel %vm80_vm0, %v77_v41, %v12344_v42  ;;  %12476 = vrot.lane.b32.xlu1 %v13598_v49, %s13279_s26 }
  0x8b   :  { %349 = vmatpush.msrb.mxu3 %v92_v44  ;;  %369 = vmatpush.msra.mxu0 %v93_v47 }
  0x8c   :  { %11889 = vmatmul.msk.f32.vlgmr.msrb.gmra.mxu1 %vm110_vm1, %v13538_v40 }
  0x8d   :  { %11890 = vmatmul.msk.f32.vlgmr.msrb.gmra.mxu2 %vm110_vm1, %v13538_v40  ;;  %11891 = vmatmul.msk.f32.vlgmr.msra.gmra.mxu3 %vm110_vm1, %v13538_v40 }
  0x8e   :  { %11892 = vmatmul.msk.f32.vlgmr.msrb.gmra.mxu0 %vm110_vm1, %v13538_v40  ;;  %389 = vmatpush.msrb.mxu1 %v94_v48 }
  0x8f   :  { %409 = vmatpush.msrb.mxu2 %v12344_v42  ;;  %432 = vmatpush.msra.mxu3 %v13333_v2  ;;  %v13615_v2 = vld [vmem:[%s19816_s0 + $0x78] sm:$0xff] }
  0x90   :  { %452 = vmatpush.msrb.mxu0 %v13342_v4  ;;  %v13622_v4 = vpack.i.bf16 %v13615_v2, %v13422_v19 }
  0x91   :  { %12486 = vrot.lane.b32.xlu0 %v13346_v5, %s13280_s27 }
  0x92   :  { %12491 = vrot.lane.b32.xlu1 %v13622_v4, %s13279_s26 }
  0x94   :  { %11893 = vmatmul.msk.f32.vlgmr.msra.gmra.mxu1 %vm110_vm1, %v13538_v40 }
  0x95   :  { %11894 = vmatmul.msk.f32.vlgmr.msra.gmra.mxu2 %vm110_vm1, %v13538_v40  ;;  %11895 = vmatmul.msk.f32.vlgmr.msrb.gmra.mxu3 %vm110_vm1, %v13538_v40 }
  0x96   :  { %11896 = vmatmul.msk.f32.vlgmr.msra.gmra.mxu0 %vm110_vm1, %v13538_v40  ;;  %472 = vmatpush.msra.mxu1 %v13375_v10  ;;  %v13634_v10 = vld [vmem:[%s19817_s1] sm:$0xff] }
  0x97   :  { %492 = vmatpush.msra.mxu2 %v13380_v11  ;;  %512 = vmatpush.msrb.mxu3 %v13323_v0  ;;  %v13647_v0 = vpack.i.bf16 %v13353_v6, %v13365_v8 }
  0x98   :  { %532 = vmatpush.msra.mxu0 %v13360_v7  ;;  %v12352_v7 = vpop.permute.xlu0 %12351 }
  0x99   :  { %12501 = vrot.lane.b32.xlu0 %v13441_v22, %s13280_s27  ;;  %12466 = vrot.lane.b32.xlu2 %v13647_v0, %s13279_s26  ;;  %v12353_v22 = vunpack.i.l.bf16 %v12352_v7  ;;  %v12354_v50 = vunpack.i.h.bf16 %v12352_v7 }
  0x9a   :  { %12506 = vrot.lane.b32.xlu1 %v13453_v24, %s13280_s27 }
  0x9c   :  { %11897 = vmatmul.msk.f32.vlgmr.msrb.gmra.mxu1 %vm110_vm1, %v13538_v40 }
  0x9d   :  { %11898 = vmatmul.msk.f32.vlgmr.msrb.gmra.mxu2 %vm110_vm1, %v13538_v40  ;;  %11899 = vmatmul.msk.f32.vlgmr.msra.gmra.mxu3 %vm110_vm1, %v13634_v10 }
  0x9e   :  { %11900 = vmatmul.msk.f32.vlgmr.msrb.gmra.mxu0 %vm110_vm1, %v13634_v10  ;;  %552 = vmatpush.msrb.mxu1 %v13328_v1  ;;  %v12347_v1 = vpop.permute.xlu2 %12346 }
  0x9f   :  { %572 = vmatpush.msrb.mxu2 %v13365_v8  ;;  %592 = vmatpush.msra.mxu3 %v13353_v6  ;;  %v12357_v6 = vpop.permute.xlu1 %12356  ;;  %v13669_v8 = vpack.i.bf16 %v13433_v21, %v13370_v9  ;;  %v12349_v11 = vunpack.i.h.bf16 %v12347_v1 }
  0xa0   :  { %612 = vmatpush.msrb.mxu0 %v13399_v15  ;;  %v12348_v15 = vunpack.i.l.bf16 %v12347_v1  ;;  %v12358_v51 = vunpack.i.l.bf16 %v12357_v6 }
  0xa1   :  { %12516 = vrot.lane.b32.xlu0 %v13459_v25, %s13280_s27  ;;  %12481 = vrot.lane.b32.xlu2 %v13669_v8, %s13279_s26  ;;  %v12359_v25 = vunpack.i.h.bf16 %v12357_v6 }
  0xa2   :  { %12521 = vrot.lane.b32.xlu1 %v13471_v27, %s13280_s27  ;;  %v754_v55 = vsel %vm749_vm2, %v12354_v50, %v12358_v51 }
  0xa3   :  { %v752_v27 = vsel %vm749_vm2, %v12353_v22, %v12359_v25 }
  0xa4   :  { %11901 = vmatmul.msk.f32.vlgmr.msra.gmra.mxu1 %vm110_vm1, %v13634_v10 }
  0xa5   :  { %11902 = vmatmul.msk.f32.vlgmr.msra.gmra.mxu2 %vm110_vm1, %v13634_v10  ;;  %11903 = vmatmul.msk.f32.vlgmr.msrb.gmra.mxu3 %vm110_vm1, %v13634_v10 }
  0xa6   :  { %11904 = vmatmul.msk.f32.vlgmr.msra.gmra.mxu0 %vm110_vm1, %v13634_v10  ;;  %632 = vmatpush.msra.mxu1 %v13370_v9  ;;  %v750_v9 = vsel %vm749_vm2, %v12348_v15, %v12349_v11  ;;  %v12362_v40 = vpop.permute.xlu2 %12361 }
  0xa7   :  { %652 = vmatpush.msra.mxu2 %v13404_v16  ;;  %672 = vmatpush.msrb.mxu3 %v13417_v18  ;;  %v751_v16 = vsel %vm749_vm2, %v12349_v11, %v12353_v22  ;;  %v12363_v52 = vunpack.i.l.bf16 %v12362_v40  ;;  %v12372_v54 = vpop.permute.xlu1 %12371  ;;  %v12364_v57 = vunpack.i.h.bf16 %v12362_v40 }
  0xa8   :  { %692 = vmatpush.msra.mxu0 %v13433_v21  ;;  %v12373_v59 = vunpack.i.l.bf16 %v12372_v54 }
  0xa9   :  { %12531 = vrot.lane.b32.xlu0 %v13477_v28, %s13281_s6  ;;  %v12367_v28 = vpop.permute.xlu0 %12366  ;;  %12496 = vrot.lane.b32.xlu2 %v13447_v23, %s13280_s27  ;;  %v755_v56 = vsel %vm749_vm2, %v12358_v51, %v12363_v52 }
  0xaa   :  { %v12369_v53 = vunpack.i.h.bf16 %v12367_v28  ;;  %12536 = vrot.lane.b32.xlu1 %v13523_v33, %s13281_s6  ;;  %v12368_v58 = vunpack.i.l.bf16 %v12367_v28 }
  0xac   :  { %11905 = vmatmul.msk.f32.vlgmr.msrb.gmra.mxu1 %vm110_vm1, %v13634_v10  ;;  %v756_v33 = vsel %vm749_vm2, %v12363_v52, %v12369_v53  ;;  %v757_v63 = vsel %vm749_vm2, %v12369_v53, %v12364_v57  ;;  %v758_v35 = vsel %vm749_vm2, %v12364_v57, %v12368_v58  ;;  %v759_v36 = vsel %vm749_vm2, %v12368_v58, %v12373_v59 }
  0xad   :  { %11906 = vmatmul.msk.f32.vlgmr.msrb.gmra.mxu2 %vm110_vm1, %v13634_v10  ;;  %11907 = vmatmul.msk.f32.vlgmr.msra.gmra.mxu3 %vm110_vm1, %v13634_v10 }
  0xae   :  { %11908 = vmatmul.msk.f32.vlgmr.msrb.gmra.mxu0 %vm110_vm1, %v13634_v10  ;;  %712 = vmatpush.msrb.mxu1 %v13422_v19  ;;  %v753_v19 = vsel %vm749_vm2, %v12359_v25, %v12354_v50 }
  0xaf   :  { %797 = vmatpush.msrb.mxu2 %v750_v9  ;;  %817 = vmatpush.msra.mxu3 %v751_v16  ;;  %v12382_v37 = vpop.permute.xlu1 %12381  ;;  %v13766_v9 = vpack.i.bf16 %v13615_v2, %v13417_v18 }
  0xb0   :  { %837 = vmatpush.msrb.mxu0 %v752_v27  ;;  %v12384_v7 = vunpack.i.h.bf16 %v12382_v37 }
  0xb1   :  { %12546 = vrot.lane.b32.xlu0 %v13487_v29, %s13281_s6  ;;  %v12377_v29 = vpop.permute.xlu2 %12376  ;;  %12511 = vrot.lane.b32.xlu2 %v13465_v26, %s13280_s27  ;;  %v748_v62 = vpop.permute.xlu0 %747 }
  0xb2   :  { %v12379_v60 = vunpack.i.h.bf16 %v12377_v29  ;;  %12551 = vrot.lane.b32.xlu1 %v13529_v34, %s13281_s6  ;;  %v12374_v34 = vunpack.i.h.bf16 %v12372_v54  ;;  %v12378_v39 = vunpack.i.l.bf16 %v12377_v29 }
  0xb4   :  { %11909 = vmatmul.msk.f32.vlgmr.msra.gmra.mxu1 %vm110_vm1, %v13634_v10  ;;  %v761_v41 = vsel %vm749_vm2, %v12379_v60, %v12374_v34  ;;  %v762_v42 = vsel %vm749_vm2, %v12374_v34, %v12378_v39  ;;  %v763_v43 = vsel %vm749_vm2, %v12378_v39, %v748_v62 }
  0xb5   :  { %11910 = vmatmul.msk.f32.vlgmr.msra.gmra.mxu2 %vm110_vm1, %v13634_v10  ;;  %11911 = vmatmul.msk.f32.vlgmr.msrb.gmra.mxu3 %vm110_vm1, %v13634_v10 }
  0xb6   :  { %11912 = vmatmul.msk.f32.vlgmr.msra.gmra.mxu0 %vm110_vm1, %v13634_v10  ;;  %857 = vmatpush.msra.mxu1 %v753_v19 }
  0xb7   :  { %877 = vmatpush.msra.mxu2 %v754_v55  ;;  %897 = vmatpush.msrb.mxu3 %v755_v56  ;;  %v12397_v48 = vpop.permute.xlu1 %12396  ;;  %v13789_v56 = vld [vmem:[%s19817_s1 + $0x18] sm:$0xff] }
  0xb8   :  { %917 = vmatpush.msra.mxu0 %v756_v33  ;;  %v12398_v11 = vunpack.i.l.bf16 %v12397_v48  ;;  %v12399_v40 = vunpack.i.h.bf16 %v12397_v48 }
  0xb9   :  { %12561 = vrot.lane.b32.xlu0 %v13499_v31, %s13281_s6  ;;  %v760_v31 = vsel %vm749_vm2, %v12373_v59, %v12379_v60  ;;  %12526 = vrot.lane.b32.xlu2 %v13622_v4, %s13280_s27  ;;  %v12387_v44 = vpop.permute.xlu2 %12386  ;;  %v12392_v47 = vpop.permute.xlu0 %12391 }
  0xba   :  { %v12388_v1 = vunpack.i.l.bf16 %v12387_v44  ;;  %v12389_v6 = vunpack.i.h.bf16 %v12387_v44  ;;  %v12393_v16 = vunpack.i.l.bf16 %v12392_v47  ;;  %v12394_v27 = vunpack.i.h.bf16 %v12392_v47  ;;  %12566 = vrot.lane.b32.xlu1 %v13766_v9, %s13281_s6 }
  0xbc   :  { %11913 = vmatmul.msk.f32.vlgmr.msrb.gmra.mxu1 %vm110_vm1, %v13634_v10  ;;  %v12383_v10 = vunpack.i.l.bf16 %v12382_v37  ;;  %v1132_v25 = vsel %vm1129_vm3, %v12384_v7, %v12389_v6  ;;  %v1134_v51 = vsel %vm1129_vm3, %v12398_v11, %v12393_v16  ;;  %v1135_v18 = vsel %vm1129_vm3, %v12393_v16, %v12394_v27 }
  0xbd   :  { %11915 = vmatmul.msk.f32.vlgmr.msrb.gmra.mxu2 %vm110_vm1, %v13719_v61  ;;  %11916 = vmatmul.msk.f32.vlgmr.msra.gmra.mxu3 %vm110_vm1, %v13719_v61  ;;  %v1136_v52 = vsel %vm1129_vm3, %v12394_v27, %v12399_v40 }
  0xbe   :  { %11917 = vmatmul.msk.f32.vlgmr.msrb.gmra.mxu0 %vm110_vm1, %v13719_v61  ;;  %937 = vmatpush.msrb.mxu1 %v757_v63  ;;  %v1130_v15 = vsel %vm1129_vm3, %v12388_v1, %v12383_v10  ;;  %v1131_v22 = vsel %vm1129_vm3, %v12383_v10, %v12384_v7  ;;  %v12605_v10 = vpack.i.bf16 %v13433_v21, %v13615_v2 }
  0xbf   :  { %957 = vmatpush.msrb.mxu2 %v758_v35  ;;  %977 = vmatpush.msra.mxu3 %v759_v36  ;;  %v12412_v53 = vpop.permute.xlu1 %12411 }
  0xc0   :  { %997 = vmatpush.msrb.mxu0 %v760_v31  ;;  %v12414_v60 = vunpack.i.h.bf16 %v12412_v53 }
  0xc1   :  { %12576 = vrot.lane.b32.xlu0 %v13346_v5, %s13282_s9  ;;  %12541 = vrot.lane.b32.xlu2 %v13491_v30, %s13281_s6  ;;  %v1133_v30 = vsel %vm1129_vm3, %v12389_v6, %v12398_v11  ;;  %v12402_v28 = vpop.permute.xlu2 %12401 }
  0xc2   :  { %v12404_v55 = vunpack.i.h.bf16 %v12402_v28  ;;  %12581 = vrot.lane.b32.xlu1 %v13337_v3, %s13282_s9 }
  0xc4   :  { %11918 = vmatmul.msk.f32.vlgmr.msra.gmra.mxu1 %vm110_vm1, %v13719_v61 }
  0xc5   :  { %11919 = vmatmul.msk.f32.vlgmr.msra.gmra.mxu2 %vm110_vm1, %v13719_v61  ;;  %11920 = vmatmul.msk.f32.vlgmr.msrb.gmra.mxu3 %vm110_vm1, %v13719_v61 }
  0xc6   :  { %11921 = vmatmul.msk.f32.vlgmr.msra.gmra.mxu0 %vm110_vm1, %v13719_v61  ;;  %1017 = vmatpush.msra.mxu1 %v761_v41 }
  0xc7   :  { %1037 = vmatpush.msra.mxu2 %v762_v42  ;;  %1057 = vmatpush.msrb.mxu3 %v763_v43 }
  0xc8   :  { %1077 = vmatpush.msra.mxu0 %v748_v62 }
  0xc9   :  { %12591 = vrot.lane.b32.xlu0 %v13384_v12, %s13282_s9  ;;  %v12407_v12 = vpop.permute.xlu0 %12406  ;;  %12556 = vrot.lane.b32.xlu2 %v13503_v32, %s13281_s6  ;;  %v12403_v32 = vunpack.i.l.bf16 %v12402_v28  ;;  %v1124_v33 = vpop.permute.xlu2 %1123 }
  0xca   :  { %v12408_v50 = vunpack.i.l.bf16 %v12407_v12  ;;  %v12409_v19 = vunpack.i.h.bf16 %v12407_v12  ;;  %12596 = vrot.lane.b32.xlu1 %v13410_v17, %s13282_s9 }
  0xcb   :  { %v1139_v57 = vsel %vm1129_vm3, %v12403_v32, %v12404_v55 }
  0xcc   :  { %11922 = vmatmul.msk.f32.vlgmr.msrb.gmra.mxu1 %vm110_vm1, %v13719_v61  ;;  %v1137_v54 = vsel %vm1129_vm3, %v12399_v40, %v12408_v50  ;;  %v1138_v29 = vsel %vm1129_vm3, %v12408_v50, %v12403_v32  ;;  %v1140_v58 = vsel %vm1129_vm3, %v12404_v55, %v12409_v19  ;;  %v1141_v3 = vsel %vm1129_vm3, %v12409_v19, %v1124_v33 }
  0xcd   :  { %11923 = vmatmul.msk.f32.vlgmr.msrb.gmra.mxu2 %vm110_vm1, %v13719_v61  ;;  %11924 = vmatmul.msk.f32.vlgmr.msra.gmra.mxu3 %vm110_vm1, %v13719_v61 }
  0xce   :  { %11925 = vmatmul.msk.f32.vlgmr.msrb.gmra.mxu0 %vm110_vm1, %v13719_v61  ;;  %1177 = vmatpush.msrb.mxu1 %v1130_v15 }
  0xcf   :  { %1197 = vmatpush.msrb.mxu2 %v1131_v22  ;;  %1217 = vmatpush.msra.mxu3 %v1132_v25  ;;  %v13842_v22 = vld [vmem:[%s19817_s1 + $0x20] sm:$0xff] }
  0xd0   :  { %1237 = vmatpush.msrb.mxu0 %v1133_v30 }
  0xd1   :  { %12571 = vrot.lane.b32.xlu2 %v13394_v14, %s13282_s9  ;;  %v12417_v59 = vpop.permute.xlu0 %12416  ;;  %v12422_v14 = vpop.permute.xlu1 %12421  ;;  %12606 = vrot.lane.b32.xlu0 %v12605_v10, %s13282_s9  ;;  %v13926_v10 = vld [vmem:[%s19817_s1 + $0x28] sm:$0xff] }
  0xd2   :  { %v12424_v62 = vunpack.i.h.bf16 %v12422_v14  ;;  %v12423_v63 = vunpack.i.l.bf16 %v12422_v14  ;;  %v12427_v37 = vpop.permute.xlu2 %12426  ;;  %v12418_v31 = vunpack.i.l.bf16 %v12417_v59  ;;  %v12419_v34 = vunpack.i.h.bf16 %v12417_v59  ;;  %12611 = vrot.lane.b32.xlu1 %v13346_v5, %s13283_s12 }
  0xd3   :  { %v12428_v39 = vunpack.i.l.bf16 %v12427_v37  ;;  %v12429_v1 = vunpack.i.h.bf16 %v12427_v37 }
  0xd4   :  { %11926 = vmatmul.msk.f32.vlgmr.msra.gmra.mxu1 %vm110_vm1, %v13719_v61  ;;  %v1510_v17 = vsel %vm1509_vm4, %v12423_v63, %v12424_v62  ;;  %v1511_v43 = vsel %vm1509_vm4, %v12424_v62, %v12418_v31  ;;  %v1512_v44 = vsel %vm1509_vm4, %v12418_v31, %v12419_v34 }
  0xd5   :  { %11927 = vmatmul.msk.f32.vlgmr.msra.gmra.mxu2 %vm110_vm1, %v13719_v61  ;;  %11928 = vmatmul.msk.f32.vlgmr.msrb.gmra.mxu3 %vm110_vm1, %v13719_v61  ;;  %v1513_v47 = vsel %vm1509_vm4, %v12419_v34, %v12428_v39 }
  0xd6   :  { %11929 = vmatmul.msk.f32.vlgmr.msra.gmra.mxu0 %vm110_vm1, %v13719_v61  ;;  %1257 = vmatpush.msra.mxu1 %v1134_v51  ;;  %v12413_v61 = vunpack.i.l.bf16 %v12412_v53 }
  0xd7   :  { %1277 = vmatpush.msra.mxu2 %v1135_v18  ;;  %1297 = vmatpush.msrb.mxu3 %v1136_v52 }
  0xd8   :  { %1317 = vmatpush.msra.mxu0 %v1137_v54  ;;  %v1142_v35 = vsel %vm1129_vm3, %v1124_v33, %v12413_v61  ;;  %v1143_v36 = vsel %vm1129_vm3, %v12413_v61, %v12414_v60 }
  0xd9   :  { %12586 = vrot.lane.b32.xlu2 %v13388_v13, %s13282_s9  ;;  %v12432_v13 = vpop.permute.xlu0 %12431  ;;  %v12437_v42 = vpop.permute.xlu1 %12436  ;;  %12621 = vrot.lane.b32.xlu0 %v13547_v45, %s13283_s12 }
  0xda   :  { %v12434_v41 = vunpack.i.h.bf16 %v12432_v13  ;;  %v12442_v5 = vpop.permute.xlu2 %12441  ;;  %v12433_v7 = vunpack.i.l.bf16 %v12432_v13  ;;  %v12438_v6 = vunpack.i.l.bf16 %v12437_v42  ;;  %12626 = vrot.lane.b32.xlu1 %v13647_v0, %s13283_s12  ;;  %v12439_v16 = vunpack.i.h.bf16 %v12437_v42 }
  0xdb   :  { %v12444_v11 = vunpack.i.h.bf16 %v12442_v5  ;;  %v12443_v40 = vunpack.i.l.bf16 %v12442_v5 }
  0xdc   :  { %11931 = vmatmul.msk.f32.vlgmr.msrb.gmra.mxu1 %vm110_vm1, %v13789_v56  ;;  %v1514_v48 = vsel %vm1509_vm4, %v12428_v39, %v12434_v41  ;;  %v1515_v2 = vsel %vm1509_vm4, %v12434_v41, %v12429_v1  ;;  %v1516_v25 = vsel %vm1509_vm4, %v12429_v1, %v12433_v7  ;;  %v1517_v30 = vsel %vm1509_vm4, %v12433_v7, %v12438_v6 }
  0xdd   :  { %11932 = vmatmul.msk.f32.vlgmr.msrb.gmra.mxu2 %vm110_vm1, %v13789_v56  ;;  %11933 = vmatmul.msk.f32.vlgmr.msra.gmra.mxu3 %vm110_vm1, %v13789_v56  ;;  %v1518_v0 = vsel %vm1509_vm4, %v12438_v6, %v12444_v11  ;;  %v1519_v50 = vsel %vm1509_vm4, %v12444_v11, %v12439_v16  ;;  %v1520_v51 = vsel %vm1509_vm4, %v12439_v16, %v12443_v40 }
  0xde   :  { %11934 = vmatmul.msk.f32.vlgmr.msrb.gmra.mxu0 %vm110_vm1, %v13789_v56  ;;  %1337 = vmatpush.msrb.mxu1 %v1138_v29 }
  0xdf   :  { %1357 = vmatpush.msrb.mxu2 %v1139_v57  ;;  %1377 = vmatpush.msra.mxu3 %v1140_v58 }
  0xe0   :  { %1397 = vmatpush.msrb.mxu0 %v1141_v3 }
  0xe1   :  { %v12447_v15 = vpop.permute.xlu0 %12446  ;;  %v1506_v12 = vpop.permute.xlu1 %1505  ;;  %12636 = vrot.lane.b32.xlu0 %v13598_v49, %s13283_s12  ;;  %12601 = vrot.lane.b32.xlu2 %v13428_v20, %s13282_s9 }
  0xe2   :  { %v12448_v27 = vunpack.i.l.bf16 %v12447_v15  ;;  %12641 = vrot.lane.b32.xlu1 %v13669_v8, %s13283_s12  ;;  %v12452_v28 = vpop.permute.xlu2 %12451  ;;  %v12449_v54 = vunpack.i.h.bf16 %v12447_v15 }
  0xe3   :  { %v12454_v32 = vunpack.i.h.bf16 %v12452_v28  ;;  %v12453_v19 = vunpack.i.l.bf16 %v12452_v28 }
  0xe4   :  { %11935 = vmatmul.msk.f32.vlgmr.msra.gmra.mxu1 %vm110_vm1, %v13789_v56  ;;  %v1521_v18 = vsel %vm1509_vm4, %v12443_v40, %v12448_v27  ;;  %v1522_v45 = vsel %vm1509_vm4, %v12448_v27, %v1506_v12  ;;  %v1523_v29 = vsel %vm1509_vm4, %v1506_v12, %v12449_v54 }
  0xe5   :  { %11936 = vmatmul.msk.f32.vlgmr.msra.gmra.mxu2 %vm110_vm1, %v13789_v56  ;;  %11937 = vmatmul.msk.f32.vlgmr.msrb.gmra.mxu3 %vm110_vm1, %v13789_v56  ;;  %v1924_v57 = vsel %vm1923_vm5, %v12453_v19, %v12454_v32 }
  0xe6   :  { %11938 = vmatmul.msk.f32.vlgmr.msra.gmra.mxu0 %vm110_vm1, %v13789_v56  ;;  %1457 = vmatpush.msrb.mxu3 %v12414_v60 }
  0xe7   :  { %1417 = vmatpush.msra.mxu1 %v1142_v35  ;;  %1437 = vmatpush.msra.mxu2 %v1143_v36 }
  0xe8   :  { %1557 = vmatpush.msra.mxu0 %v1510_v17 }
  0xe9   :  { %v12457_v52 = vpop.permute.xlu0 %12456  ;;  %v12462_v8 = vpop.permute.xlu1 %12461  ;;  %12651 = vrot.lane.b32.xlu0 %v13622_v4, %s13283_s12  ;;  %12616 = vrot.lane.b32.xlu2 %v13551_v46, %s13283_s12 }
  0xea   :  { %v12458_v3 = vunpack.i.l.bf16 %v12457_v52  ;;  %v12464_v61 = vunpack.i.h.bf16 %v12462_v8  ;;  %v12459_v62 = vunpack.i.h.bf16 %v12457_v52  ;;  %12656 = vrot.lane.b32.xlu1 %v13447_v23, %s13284_s17 }
  0xec   :  { %11939 = vmatmul.msk.f32.vlgmr.msrb.gmra.mxu1 %vm110_vm1, %v13789_v56  ;;  %v1927_v17 = vsel %vm1923_vm5, %v12458_v3, %v12459_v62  ;;  %v1928_v13 = vsel %vm1923_vm5, %v12459_v62, %v12464_v61 }
  0xed   :  { %11940 = vmatmul.msk.f32.vlgmr.msrb.gmra.mxu2 %vm110_vm1, %v13789_v56  ;;  %11941 = vmatmul.msk.f32.vlgmr.msra.gmra.mxu3 %vm110_vm1, %v13789_v56 }
  0xee   :  { %11942 = vmatmul.msk.f32.vlgmr.msrb.gmra.mxu0 %vm110_vm1, %v13789_v56  ;;  %1577 = vmatpush.msrb.mxu1 %v1511_v43 }
  0xef   :  { %1597 = vmatpush.msrb.mxu2 %v1512_v44  ;;  %1617 = vmatpush.msra.mxu3 %v1513_v47 }
  0xf0   :  { %1637 = vmatpush.msrb.mxu0 %v1514_v48 }
  0xf1   :  { %12631 = vrot.lane.b32.xlu2 %v13579_v38, %s13283_s12  ;;  %12666 = vrot.lane.b32.xlu0 %v13453_v24, %s13284_s17 }
  0xf2   :  { %12671 = vrot.lane.b32.xlu1 %v13465_v26, %s13284_s17 }
  0xf3   :  { %v12467_v58 = vpop.permute.xlu2 %12466 }
  0xf4   :  { %11943 = vmatmul.msk.f32.vlgmr.msra.gmra.mxu1 %vm110_vm1, %v13789_v56  ;;  %v12468_v41 = vunpack.i.l.bf16 %v12467_v58  ;;  %v12469_v44 = vunpack.i.h.bf16 %v12467_v58 }
  0xf5   :  { %11944 = vmatmul.msk.f32.vlgmr.msra.gmra.mxu2 %vm110_vm1, %v13789_v56  ;;  %11945 = vmatmul.msk.f32.vlgmr.msrb.gmra.mxu3 %vm110_vm1, %v13789_v56  ;;  %v12463_v56 = vunpack.i.l.bf16 %v12462_v8 }
  0xf6   :  { %11947 = vmatmul.msk.f32.vlgmr.msra.gmra.mxu0 %vm110_vm1, %v13842_v22  ;;  %1657 = vmatpush.msra.mxu1 %v1515_v2  ;;  %v1931_v6 = vsel %vm1923_vm5, %v12468_v41, %v12469_v44 }
  0xf7   :  { %1677 = vmatpush.msra.mxu2 %v1516_v25  ;;  %1697 = vmatpush.msrb.mxu3 %v1517_v30  ;;  %v1925_v49 = vsel %vm1923_vm5, %v12454_v32, %v12463_v56  ;;  %v1926_v37 = vsel %vm1923_vm5, %v12463_v56, %v12458_v3 }
  0xf8   :  { %1717 = vmatpush.msra.mxu0 %v1518_v0 }
  0xfa   :  { %12686 = vrot.lane.b32.xlu1 %v13622_v4, %s13284_s17 }
  0xfb   :  { %v12472_v59 = vpop.permute.xlu0 %12471  ;;  %v12482_v39 = vpop.permute.xlu2 %12481 }
  0xfc   :  { %11948 = vmatmul.msk.f32.vlgmr.msrb.gmra.mxu1 %vm110_vm1, %v13842_v22  ;;  %v12473_v35 = vunpack.i.l.bf16 %v12472_v59  ;;  %v12477_v31 = vpop.permute.xlu1 %12476  ;;  %v12474_v47 = vunpack.i.h.bf16 %v12472_v59  ;;  %v12483_v5 = vunpack.i.l.bf16 %v12482_v39  ;;  %v12484_v16 = vunpack.i.h.bf16 %v12482_v39 }
  0xfd   :  { %11949 = vmatmul.msk.f32.vlgmr.msrb.gmra.mxu2 %vm110_vm1, %v13842_v22  ;;  %11950 = vmatmul.msk.f32.vlgmr.msra.gmra.mxu3 %vm110_vm1, %v13842_v22  ;;  %v12478_v25 = vunpack.i.l.bf16 %v12477_v31  ;;  %v12479_v0 = vunpack.i.h.bf16 %v12477_v31 }
  0xfe   :  { %11951 = vmatmul.msk.f32.vlgmr.msrb.gmra.mxu0 %vm110_vm1, %v13842_v22  ;;  %1737 = vmatpush.msrb.mxu1 %v1519_v50  ;;  %v1929_v34 = vsel %vm1923_vm5, %v12464_v61, %v12473_v35  ;;  %v1930_v7 = vsel %vm1923_vm5, %v12473_v35, %v12468_v41  ;;  %v1932_v11 = vsel %vm1923_vm5, %v12469_v44, %v12474_v47  ;;  %v13994_v35 = vld [vmem:[%s19816_s0] sm:$0xff] }
  0xff   :  { %v13872_v53 = vpop.f32.mrf.mxu3  ;;  %1757 = vmatpush.msrb.mxu2 %v1520_v51  ;;  %1777 = vmatpush.msra.mxu3 %v1521_v18  ;;  %v1933_v15 = vsel %vm1923_vm5, %v12474_v47, %v12483_v5  ;;  %v1934_v28 = vsel %vm1923_vm5, %v12483_v5, %v12478_v25  ;;  %v1935_v50 = vsel %vm1923_vm5, %v12478_v25, %v12479_v0  ;;  %v14044_v25 = vld [vmem:[%s19816_s0 + $0x28] sm:$0xff] }
 0x100   :  { %1797 = vmatpush.msrb.mxu0 %v1522_v45  ;;  %v1936_v51 = vsel %vm1923_vm5, %v12479_v0, %v12484_v16  ;;  %v14049_v0 = vld [vmem:[%s19816_s0 + $0x18] sm:$0xff] }
 0x101   :  { %v13876_v55 = vpop.f32.mrf.mxu1 }
 0x103   :  { %v13878_v33 = vpop.f32.mrf.mxu0  ;;  %v12487_v46 = vpop.permute.xlu0 %12486 }
 0x104   :  { %11952 = vmatmul.msk.f32.vlgmr.msra.gmra.mxu1 %vm110_vm1, %v13842_v22  ;;  %v12492_v2 = vpop.permute.xlu1 %12491  ;;  %v12497_v18 = vpop.permute.xlu2 %12496  ;;  %v12489_v32 = vunpack.i.h.bf16 %v12487_v46  ;;  %v12488_v19 = vunpack.i.l.bf16 %v12487_v46 }
 0x105   :  { %11953 = vmatmul.msk.f32.vlgmr.msra.gmra.mxu2 %vm110_vm1, %v13842_v22  ;;  %11954 = vmatmul.msk.f32.vlgmr.msrb.gmra.mxu3 %vm110_vm1, %v13842_v22  ;;  %v12493_v40 = vunpack.i.l.bf16 %v12492_v2  ;;  %v12494_v45 = vunpack.i.h.bf16 %v12492_v2  ;;  %v12498_v56 = vunpack.i.l.bf16 %v12497_v18 }
 0x106   :  { %11955 = vmatmul.msk.f32.vlgmr.msra.gmra.mxu0 %vm110_vm1, %v13842_v22  ;;  %1837 = vmatpush.msra.mxu2 %v12449_v54  ;;  %v2307_v3 = vsel %vm2306_vm6, %v12488_v19, %v12489_v32 }
 0x107   :  { %1817 = vmatpush.msra.mxu1 %v1523_v29  ;;  %1972 = vmatpush.msrb.mxu3 %v1924_v57  ;;  %v1937_v38 = vsel %vm1923_vm5, %v12484_v16, %v12493_v40  ;;  %v1938_v59 = vsel %vm1923_vm5, %v12493_v40, %v12494_v45  ;;  %v2308_v61 = vsel %vm2306_vm6, %v12489_v32, %v12498_v56  ;;  %v14069_v32 = vld [vmem:[%s19817_s1 + $0x30] sm:$0xff] }
 0x108   :  { %v13891_v14 = vpop.f32.mrf.mxu2  ;;  %v13893_v60 = vpop.f32.mrf.mxu3  ;;  %1992 = vmatpush.msra.mxu0 %v1925_v49  ;;  %v14053_v16 = vpack.i.bf16 %v14049_v0, %v14044_v25 }
 0x109   :  { %v13897_v63 = vpop.f32.mrf.mxu1 }
 0x10b   :  { %v13901_v36 = vpop.f32.mrf.mxu0  ;;  %v12502_v52 = vpop.permute.xlu0 %12501 }
 0x10c   :  { %11956 = vmatmul.msk.f32.vlgmr.msrb.gmra.mxu1 %vm110_vm1, %v13842_v22  ;;  %v12504_v58 = vunpack.i.h.bf16 %v12502_v52  ;;  %v12512_v62 = vpop.permute.xlu2 %12511  ;;  %v12503_v44 = vunpack.i.l.bf16 %v12502_v52 }
 0x10d   :  { %11957 = vmatmul.msk.f32.vlgmr.msrb.gmra.mxu2 %vm110_vm1, %v13842_v22  ;;  %11958 = vmatmul.msk.f32.vlgmr.msra.gmra.mxu3 %vm110_vm1, %v13842_v22 }
 0x10e   :  { %11959 = vmatmul.msk.f32.vlgmr.msrb.gmra.mxu0 %vm110_vm1, %v13842_v22  ;;  %2012 = vmatpush.msrb.mxu1 %v1926_v37  ;;  %v2309_v24 = vsel %vm2306_vm6, %v12498_v56, %v12504_v58  ;;  %v13999_v37 = vld [vmem:[%s19816_s0 + $0x8] sm:$0xff] }
 0x10f   :  { %2032 = vmatpush.msrb.mxu2 %v1927_v17  ;;  %2052 = vmatpush.msra.mxu3 %v1928_v13  ;;  %v14003_v17 = vpack.i.bf16 %v13999_v37, %v13994_v35  ;;  %v14008_v13 = vld [vmem:[%s19816_s0 + $0x58] sm:$0xff] }
 0x110   :  { %v13915_v42 = vpop.f32.mrf.mxu2  ;;  %v13917_v43 = vpop.f32.mrf.mxu3  ;;  %2072 = vmatpush.msrb.mxu0 %v1929_v34  ;;  %v12680_v31 = vpack.i.bf16 %v14008_v13, %v13433_v21  ;;  %v12499_v34 = vunpack.i.h.bf16 %v12497_v18  ;;  %v12514_v21 = vunpack.i.h.bf16 %v12512_v62 }
 0x111   :  { %v13921_v48 = vpop.f32.mrf.mxu1  ;;  %12646 = vrot.lane.b32.xlu2 %v14003_v17, %s13284_s17 }
 0x112   :  { %12681 = vrot.lane.b32.xlu0 %v12680_v31, %s13284_s17 }
 0x113   :  { %v13928_v1 = vpop.f32.mrf.mxu0 }
 0x114   :  { %11960 = vmatmul.msk.f32.vlgmr.msra.gmra.mxu1 %vm110_vm1, %v13842_v22  ;;  %v12527_v19 = vpop.permute.xlu2 %12526 }
 0x115   :  { %11961 = vmatmul.msk.f32.vlgmr.msra.gmra.mxu2 %vm110_vm1, %v13842_v22  ;;  %11963 = vmatmul.msk.f32.vlgmr.msrb.gmra.mxu3 %vm110_vm1, %v13926_v10 }
 0x116   :  { %11964 = vmatmul.msk.f32.vlgmr.msra.gmra.mxu0 %vm110_vm1, %v13926_v10  ;;  %2092 = vmatpush.msra.mxu1 %v1930_v7 }
 0x117   :  { %2112 = vmatpush.msra.mxu2 %v1931_v6  ;;  %2132 = vmatpush.msrb.mxu3 %v1932_v11  ;;  %v14025_v11 = vpop.permute.xlu0 %12516 }
 0x118   :  { %v13942_v30 = vpop.f32.mrf.mxu2  ;;  %v13944_v12 = vpop.f32.mrf.mxu3  ;;  %2152 = vmatpush.msra.mxu0 %v1933_v15  ;;  %v2310_v15 = vsel %vm2306_vm6, %v12504_v58, %v12499_v34  ;;  %v12518_v18 = vunpack.i.l.bf16 %v14025_v11 }
 0x119   :  { %v13948_v22 = vpop.f32.mrf.mxu1  ;;  %12661 = vrot.lane.b32.xlu2 %v14053_v16, %s13284_s17 }
 0x11b   :  { %v13952_v27 = vpop.f32.mrf.mxu0 }
 0x11c   :  { %11965 = vmatmul.msk.f32.vlgmr.msrb.gmra.mxu1 %vm110_vm1, %v13926_v10 }
 0x11d   :  { %11966 = vmatmul.msk.f32.vlgmr.msrb.gmra.mxu2 %vm110_vm1, %v13926_v10  ;;  %11967 = vmatmul.msk.f32.vlgmr.msra.gmra.mxu3 %vm110_vm1, %v13926_v10 }
 0x11e   :  { %11968 = vmatmul.msk.f32.vlgmr.msrb.gmra.mxu0 %vm110_vm1, %v13926_v10  ;;  %2172 = vmatpush.msrb.mxu1 %v1934_v28 }
 0x11f   :  { %2192 = vmatpush.msrb.mxu2 %v1935_v50  ;;  %2212 = vmatpush.msra.mxu3 %v1936_v51  ;;  %v12513_v51 = vunpack.i.l.bf16 %v12512_v62 }
 0x120   :  { %v13966_v8 = vpop.f32.mrf.mxu2  ;;  %v434_v54 = vpop.f32.mrf.mxu3  ;;  %2232 = vmatpush.msrb.mxu0 %v1937_v38 }
 0x121   :  { %v13971_v29 = vadd.f32 %v434_v54, %v13872_v53  ;;  %v13973_v57 = vpop.f32.mrf.mxu1  ;;  %v12507_v53 = vpop.permute.xlu1 %12506 }
 0x122   :  { %v12508_v47 = vunpack.i.l.bf16 %v12507_v53  ;;  %v12509_v40 = vunpack.i.h.bf16 %v12507_v53  ;;  %v12695_v53 = vpack.i.bf16 %v14049_v0, %v13994_v35 }
 0x123   :  { %v13977_v49 = vpop.f32.mrf.mxu0 }
 0x124   :  { %11969 = vmatmul.msk.f32.vlgmr.msra.gmra.mxu1 %vm110_vm1, %v13926_v10  ;;  %v2313_v4 = vsel %vm2306_vm6, %v12508_v47, %v12514_v21  ;;  %v2314_v58 = vsel %vm2306_vm6, %v12514_v21, %v12509_v40  ;;  %12696 = vrot.lane.b32.xlu0 %v12695_v53, %s13285_s11 }
 0x125   :  { %11970 = vmatmul.msk.f32.vlgmr.msra.gmra.mxu2 %vm110_vm1, %v13926_v10  ;;  %11971 = vmatmul.msk.f32.vlgmr.msrb.gmra.mxu3 %vm110_vm1, %v13926_v10 }
 0x126   :  { %11972 = vmatmul.msk.f32.vlgmr.msra.gmra.mxu0 %vm110_vm1, %v13926_v10  ;;  %2252 = vmatpush.msra.mxu1 %v1938_v59  ;;  %v14078_v59 = vpop.permute.xlu0 %12531 }
 0x127   :  { %2355 = vmatpush.msra.mxu2 %v2307_v3  ;;  %2375 = vmatpush.msrb.mxu3 %v2308_v61  ;;  %v12534_v53 = vunpack.i.h.bf16 %v14078_v59 }
 0x128   :  { %v494_v39 = vpop.f32.mrf.mxu2  ;;  %v514_v41 = vpop.f32.mrf.mxu3  ;;  %2395 = vmatpush.msra.mxu0 %v2309_v24  ;;  %v12519_v24 = vunpack.i.h.bf16 %v14025_v11 }
 0x129   :  { %v14015_v5 = vadd.f32 %v494_v39, %v13893_v60  ;;  %v14018_v7 = vadd.f32 %v514_v41, %v13878_v33  ;;  %v14020_v6 = vpop.f32.mrf.mxu1  ;;  %v2311_v33 = vsel %vm2306_vm6, %v12499_v34, %v12503_v44  ;;  %v2312_v60 = vsel %vm2306_vm6, %v12503_v44, %v12508_v47  ;;  %v12522_v2 = vpop.permute.xlu1 %12521 }
 0x12a   :  { %v12524_v54 = vunpack.i.h.bf16 %v12522_v2  ;;  %v12523_v34 = vunpack.i.l.bf16 %v12522_v2  ;;  %v12528_v39 = vunpack.i.l.bf16 %v12527_v19  ;;  %v12529_v47 = vunpack.i.h.bf16 %v12527_v19  ;;  %v14131_v2 = vld [vmem:[%s19816_s0 + $0x40] sm:$0xff] }
 0x12b   :  { %v14027_v46 = vpop.f32.mrf.mxu0  ;;  %v455_v19 = vadd.f32 %v13952_v27, %v13876_v55 }
 0x12c   :  { %11973 = vmatmul.msk.f32.vlgmr.msrb.gmra.mxu1 %vm110_vm1, %v13926_v10  ;;  %v2317_v3 = vsel %vm2306_vm6, %v12518_v18, %v12524_v54 }
 0x12d   :  { %11974 = vmatmul.msk.f32.vlgmr.msrb.gmra.mxu2 %vm110_vm1, %v13926_v10  ;;  %11975 = vmatmul.msk.f32.vlgmr.msra.gmra.mxu3 %vm110_vm1, %v13926_v10 }
 0x12e   :  { %11976 = vmatmul.msk.f32.vlgmr.msrb.gmra.mxu0 %vm110_vm1, %v13926_v10  ;;  %2415 = vmatpush.msrb.mxu1 %v2310_v15  ;;  %v2318_v15 = vsel %vm2306_vm6, %v12524_v54, %v12519_v24 }
 0x12f   :  { %2435 = vmatpush.msrb.mxu2 %v2311_v33  ;;  %2455 = vmatpush.msra.mxu3 %v2312_v60  ;;  %v2319_v33 = vsel %vm2306_vm6, %v12519_v24, %v12523_v34  ;;  %v14117_v60 = vpop.permute.xlu2 %12541 }
 0x130   :  { %v574_v28 = vpop.f32.mrf.mxu2  ;;  %v594_v50 = vpop.f32.mrf.mxu3  ;;  %2475 = vmatpush.msrb.mxu0 %v2313_v4 }
 0x131   :  { %v14059_v38 = vadd.f32 %v574_v28, %v13917_v43  ;;  %v14062_v52 = vadd.f32 %v594_v50, %v13901_v36  ;;  %v14064_v45 = vpop.f32.mrf.mxu1  ;;  %v2315_v43 = vsel %vm2306_vm6, %v12509_v40, %v12513_v51  ;;  %v2316_v36 = vsel %vm2306_vm6, %v12513_v51, %v12518_v18  ;;  %v12537_v21 = vpop.permute.xlu1 %12536  ;;  %v14140_v28 = vld [vmem:[%s19816_s0 + $0x50] sm:$0xff]  ;;  %v14145_v50 = vld [vmem:[%s19816_s0 + $0x60] sm:$0xff]  ;;  %v14154_v18 = vld [vmem:[%s19816_s0 + $0x48] sm:$0xff] }
 0x132   :  { %v14126_v4 = vpop.permute.xlu0 %12546  ;;  %v14135_v40 = vpack.i.bf16 %v14008_v13, %v14131_v2  ;;  %v14149_v51 = vpack.i.bf16 %v14145_v50, %v14140_v28  ;;  %v12710_v54 = vpack.i.bf16 %v14140_v28, %v14154_v18  ;;  %v12539_v24 = vunpack.i.h.bf16 %v12537_v21 }
 0x133   :  { %v14071_v56 = vpop.f32.mrf.mxu0  ;;  %v12548_v27 = vunpack.i.l.bf16 %v14126_v4 }
 0x134   :  { %11977 = vmatmul.msk.f32.vlgmr.msra.gmra.mxu1 %vm110_vm1, %v13926_v10  ;;  %v14090_v10 = vld [vmem:[%s19816_s0 + $0x30] sm:$0xff]  ;;  %19828 = vst [vmem:[#allocation4_spill] sm:$0xff] %v14135_v40  ;;  %12676 = vrot.lane.b32.xlu2 %v14149_v51, %s13284_s17  ;;  %s13289_s17 = smov 32  }
 0x135   :  { %11979 = vmatmul.msk.f32.vlgmr.msra.gmra.mxu2 %vm110_vm1, %v14069_v32  ;;  %11980 = vmatmul.msk.f32.vlgmr.msrb.gmra.mxu3 %vm110_vm1, %v14069_v32  ;;  %v14094_v61 = vpack.i.bf16 %v14090_v10, %v14044_v25 }
 0x136   :  { %11981 = vmatmul.msk.f32.vlgmr.msra.gmra.mxu0 %vm110_vm1, %v14069_v32  ;;  %2495 = vmatpush.msra.mxu1 %v2314_v58  ;;  %v12533_v58 = vunpack.i.l.bf16 %v14078_v59 }
 0x137   :  { %19827 = vst [vmem:[#allocation3_spill] sm:$0xff] %v14094_v61  ;;  %2515 = vmatpush.msra.mxu2 %v2315_v43  ;;  %2535 = vmatpush.msrb.mxu3 %v2316_v36  ;;  %v12538_v43 = vunpack.i.l.bf16 %v12537_v21  ;;  %v2693_v21 = vsel %vm2689_vm7, %v12539_v24, %v12548_v27 }
 0x138   :  { %v654_v62 = vpop.f32.mrf.mxu2  ;;  %v674_v31 = vpop.f32.mrf.mxu3  ;;  %2555 = vmatpush.msra.mxu0 %v2317_v3  ;;  %12701 = vrot.lane.b32.xlu1 %v14094_v61, %s13285_s11 }
 0x139   :  { %v14102_v41 = vadd.f32 %v654_v62, %v13944_v12  ;;  %v14105_v44 = vadd.f32 %v674_v31, %v13928_v1  ;;  %v14107_v35 = vpop.f32.mrf.mxu1  ;;  %v2320_v12 = vsel %vm2306_vm6, %v12523_v34, %v12528_v39  ;;  %v2321_v1 = vsel %vm2306_vm6, %v12528_v39, %v12529_v47  ;;  %12711 = vrot.lane.b32.xlu0 %v12710_v54, %s13285_s11  ;;  %v14182_v47 = vpop.permute.xlu1 %12551 }
 0x13a   :  { %v2690_v34 = vsel %vm2689_vm7, %v12538_v43, %v12533_v58  ;;  %v2692_v39 = vsel %vm2689_vm7, %v12534_v53, %v12539_v24  ;;  %v12543_v54 = vunpack.i.l.bf16 %v14117_v60  ;;  %v12544_v43 = vunpack.i.h.bf16 %v14117_v60 }
 0x13b   :  { %v14110_v11 = vpop.f32.mrf.mxu0  ;;  %vm6136_vm6 = vcmask 252928  }
 0x13c   :  { %11982 = vmatmul.msk.f32.vlgmr.msrb.gmra.mxu1 %vm110_vm1, %v14069_v32 }
 0x13d   :  { %11983 = vmatmul.msk.f32.vlgmr.msrb.gmra.mxu2 %vm110_vm1, %v14069_v32  ;;  %11984 = vmatmul.msk.f32.vlgmr.msra.gmra.mxu3 %vm110_vm1, %v14069_v32 }
 0x13e   :  { %11985 = vmatmul.msk.f32.vlgmr.msrb.gmra.mxu0 %vm110_vm1, %v14069_v32  ;;  %2575 = vmatpush.msrb.mxu1 %v2318_v15  ;;  %v12557_v15 = vpop.permute.xlu2 %12556 }
 0x13f   :  { %2595 = vmatpush.msrb.mxu2 %v2319_v33  ;;  %2615 = vmatpush.msra.mxu3 %v2320_v12  ;;  %v14194_v33 = vld [vmem:[%s19816_s0 + $0x10] sm:$0xff]  ;;  %v12558_v24 = vunpack.i.l.bf16 %v12557_v15 }
 0x140   :  { %v799_v36 = vpop.f32.mrf.mxu2  ;;  %v819_v3 = vpop.f32.mrf.mxu3  ;;  %2635 = vmatpush.msrb.mxu0 %v2321_v1  ;;  %12716 = vrot.lane.b32.xlu1 %v14135_v40, %s13285_s11  ;;  %v14198_v12 = vpack.i.bf16 %v14194_v33, %v13999_v37  ;;  %v535_v1 = vadd.f32 %v13977_v49, %v13897_v63  ;;  %v2694_v49 = vsel %vm2689_vm7, %v12548_v27, %v12543_v54 }
 0x141   :  { %v14165_v62 = vadd.f32 %v799_v36, %v13971_v29  ;;  %v14167_v31 = vadd.f32 %v819_v3, %v455_v19  ;;  %v14169_v55 = vpop.f32.mrf.mxu1  ;;  %v2691_v29 = vsel %vm2689_vm7, %v12533_v58, %v12534_v53  ;;  %v12549_v36 = vunpack.i.h.bf16 %v14126_v4  ;;  %12726 = vrot.lane.b32.xlu0 %v13766_v9, %s13285_s11  ;;  %v14223_v4 = vpop.permute.xlu0 %12561 }
 0x142   :  { %12691 = vrot.lane.b32.xlu2 %v14198_v12, %s13285_s11  ;;  %v12567_v27 = vpop.permute.xlu1 %12566 }
 0x143   :  { %v14175_v59 = vpop.f32.mrf.mxu0  ;;  %v2696_v60 = vsel %vm2689_vm7, %v12544_v43, %v12549_v36  ;;  %v2697_v9 = vsel %vm2689_vm7, %v12549_v36, %v12558_v24  ;;  %v12569_v40 = vunpack.i.h.bf16 %v12567_v27 }
 0x144   :  { %11986 = vmatmul.msk.f32.vlgmr.msra.gmra.mxu1 %vm110_vm1, %v14069_v32 }
 0x145   :  { %11987 = vmatmul.msk.f32.vlgmr.msra.gmra.mxu2 %vm110_vm1, %v14069_v32  ;;  %11988 = vmatmul.msk.f32.vlgmr.msrb.gmra.mxu3 %vm110_vm1, %v14069_v32 }
 0x146   :  { %11989 = vmatmul.msk.f32.vlgmr.msra.gmra.mxu0 %vm110_vm1, %v14069_v32  ;;  %2738 = vmatpush.msra.mxu1 %v2690_v34  ;;  %v14234_v34 = vpack.i.bf16 %v14049_v0, %v14194_v33 }
 0x147   :  { %2758 = vmatpush.msra.mxu2 %v2691_v29  ;;  %2778 = vmatpush.msrb.mxu3 %v2692_v39  ;;  %v14239_v29 = vld [vmem:[%s19816_s0 + $0x20] sm:$0xff]  ;;  %v14244_v39 = vld [vmem:[%s19816_s0 + $0x38] sm:$0xff] }
 0x148   :  { %v879_v19 = vpop.f32.mrf.mxu2  ;;  %v899_v58 = vpop.f32.mrf.mxu3  ;;  %2798 = vmatpush.msra.mxu0 %v2693_v21  ;;  %19829 = vst [vmem:[#allocation5_spill] sm:$0xff] %v14234_v34  ;;  %v14248_v21 = vpack.i.bf16 %v14244_v39, %v14239_v29  ;;  %12731 = vrot.lane.b32.xlu1 %v14234_v34, %s13286_s5 }
 0x149   :  { %v14206_v3 = vadd.f32 %v879_v19, %v14018_v7  ;;  %v14208_v53 = vadd.f32 %v899_v58, %v535_v1  ;;  %v14210_v37 = vpop.f32.mrf.mxu1  ;;  %v2695_v7 = vsel %vm2689_vm7, %v12543_v54, %v12544_v43  ;;  %v12553_v1 = vunpack.i.l.bf16 %v14182_v47 }
 0x14a   :  { %19830 = vst [vmem:[#allocation6_spill] sm:$0xff] %v14248_v21  ;;  %v12554_v58 = vunpack.i.h.bf16 %v14182_v47  ;;  %v12559_v43 = vunpack.i.h.bf16 %v12557_v15  ;;  %12706 = vrot.lane.b32.xlu2 %v14248_v21, %s13285_s11 }
 0x14b   :  { %v14216_v63 = vpop.f32.mrf.mxu0  ;;  %v2698_v15 = vsel %vm2689_vm7, %v12558_v24, %v12553_v1  ;;  %v12577_v24 = vpop.permute.xlu0 %12576 }
 0x14c   :  { %11990 = vmatmul.msk.f32.vlgmr.msrb.gmra.mxu1 %vm110_vm1, %v14069_v32 }
 0x14d   :  { %11991 = vmatmul.msk.f32.vlgmr.msrb.gmra.mxu2 %vm110_vm1, %v14069_v32  ;;  %11992 = vmatmul.msk.f32.vlgmr.msra.gmra.mxu3 %vm110_vm1, %v14069_v32 }
 0x14e   :  { %11993 = vmatmul.msk.f32.vlgmr.msrb.gmra.mxu0 %vm110_vm1, %v14069_v32  ;;  %2818 = vmatpush.msrb.mxu1 %v2694_v49  ;;  %v615_v32 = vadd.f32 %v14027_v46, %v13921_v48  ;;  %v14266_v46 = vld [vmem:[%s19817_s1 + $0x38] sm:$0xff] }
 0x14f   :  { %2838 = vmatpush.msrb.mxu2 %v2695_v7  ;;  %2858 = vmatpush.msra.mxu3 %v2696_v60  ;;  %v12568_v7 = vunpack.i.l.bf16 %v12567_v27  ;;  %v2700_v60 = vsel %vm2689_vm7, %v12554_v58, %v12559_v43 }
 0x150   :  { %v959_v54 = vpop.f32.mrf.mxu2  ;;  %v979_v19 = vpop.f32.mrf.mxu3  ;;  %2878 = vmatpush.msrb.mxu0 %v2697_v9 }
 0x151   :  { %v14257_v36 = vadd.f32 %v959_v54, %v14062_v52  ;;  %v14259_v49 = vadd.f32 %v979_v19, %v615_v32  ;;  %v14261_v48 = vpop.f32.mrf.mxu1  ;;  %v2699_v52 = vsel %vm2689_vm7, %v12553_v1, %v12554_v58  ;;  %v14277_v9 = vpop.permute.xlu2 %12571  ;;  %v2701_v32 = vsel %vm2689_vm7, %v12559_v43, %v12568_v7 }
 0x152   :  { %v14288_v1 = vpack.i.bf16 %v14044_v25, %v14244_v39  ;;  %v12740_v54 = vpack.i.bf16 %v14090_v10, %v14239_v29  ;;  %v695_v19 = vadd.f32 %v14071_v56, %v13948_v22  ;;  %v12563_v58 = vunpack.i.l.bf16 %v14223_v4 }
 0x153   :  { %19831 = vst [vmem:[#allocation7_spill] sm:$0xff] %v14257_v36  ;;  %v14270_v47 = vpop.f32.mrf.mxu0  ;;  %v12579_v22 = vunpack.i.h.bf16 %v12577_v24  ;;  %v12578_v56 = vunpack.i.l.bf16 %v12577_v24  ;;  %v12755_v24 = vpack.i.bf16 %v14154_v18, %v14008_v13 }
 0x154   :  { %11995 = vmatmul.msk.f32.vlgmr.msra.gmra.mxu1 %vm110_vm1, %v14266_v46  ;;  %19832 = vst [vmem:[#allocation8_spill] sm:$0xff] %v14288_v1  ;;  %12746 = vrot.lane.b32.xlu1 %v14288_v1, %s13286_s5 }
 0x155   :  { %11996 = vmatmul.msk.f32.vlgmr.msra.gmra.mxu2 %vm110_vm1, %v14266_v46  ;;  %11997 = vmatmul.msk.f32.vlgmr.msrb.gmra.mxu3 %vm110_vm1, %v14266_v46 }
 0x156   :  { %11998 = vmatmul.msk.f32.vlgmr.msra.gmra.mxu0 %vm110_vm1, %v14266_v46  ;;  %2898 = vmatpush.msra.mxu1 %v2698_v15  ;;  %v12564_v15 = vunpack.i.h.bf16 %v14223_v4  ;;  %v2702_v4 = vsel %vm2689_vm7, %v12568_v7, %v12563_v58  ;;  %v3073_v7 = vsel %vm3072_vm8, %v12578_v56, %v12579_v22 }
 0x157   :  { %2918 = vmatpush.msra.mxu2 %v2699_v52  ;;  %2938 = vmatpush.msrb.mxu3 %v2700_v60  ;;  %v475_v60 = vadd.f32 %v13973_v57, %v13891_v14  ;;  %v14332_v14 = vld [vmem:[%s19816_s0 + $0x68] sm:$0xff] }
 0x158   :  { %v1039_v43 = vpop.f32.mrf.mxu2  ;;  %v1059_v34 = vpop.f32.mrf.mxu3  ;;  %2958 = vmatpush.msra.mxu0 %v2701_v32  ;;  %12741 = vrot.lane.b32.xlu0 %v12740_v54, %s13286_s5  ;;  %v2703_v27 = vsel %vm2689_vm7, %v12563_v58, %v12564_v15 }
 0x159   :  { %v14299_v61 = vadd.f32 %v1039_v43, %v14105_v44  ;;  %v14301_v36 = vadd.f32 %v1059_v34, %v695_v19  ;;  %v14303_v21 = vpop.f32.mrf.mxu1  ;;  %v2704_v44 = vsel %vm2689_vm7, %v12564_v15, %v12569_v40  ;;  %v14313_v34 = vpop.permute.xlu1 %12581  ;;  %v14327_v40 = vld [vmem:[%s19816_s0 + $0x70] sm:$0xff]  ;;  %v1084_v54 = vadd.f32 %v14110_v11, %v475_v60 }
 0x15a   :  { %v12587_v32 = vpop.permute.xlu2 %12586  ;;  %v14336_v57 = vpack.i.bf16 %v14327_v40, %v14332_v14  ;;  %v12573_v19 = vunpack.i.l.bf16 %v14277_v9  ;;  %v12574_v15 = vunpack.i.h.bf16 %v14277_v9  ;;  %v12583_v56 = vunpack.i.l.bf16 %v14313_v34  ;;  %v14356_v9 = vpop.permute.xlu0 %12591 }
 0x15b   :  { %v14306_v52 = vpop.f32.mrf.mxu0  ;;  %v12589_v60 = vunpack.i.h.bf16 %v12587_v32  ;;  %vm6519_vm7 = vcmask 244736  }
 0x15c   :  { %11999 = vmatmul.msk.f32.vlgmr.msrb.gmra.mxu1 %vm110_vm1, %v14266_v46  ;;  %12721 = vrot.lane.b32.xlu2 %v14336_v57, %s13285_s11  ;;  %s13287_s11 = smov 61  }
 0x15d   :  { %12000 = vmatmul.msk.f32.vlgmr.msrb.gmra.mxu2 %vm110_vm1, %v14266_v46  ;;  %12001 = vmatmul.msk.f32.vlgmr.msra.gmra.mxu3 %vm110_vm1, %v14266_v46 }
 0x15e   :  { %12002 = vmatmul.msk.f32.vlgmr.msrb.gmra.mxu0 %vm110_vm1, %v14266_v46  ;;  %2978 = vmatpush.msrb.mxu1 %v2702_v4 }
 0x15f   :  { %2998 = vmatpush.msrb.mxu2 %v2703_v27  ;;  %3018 = vmatpush.msra.mxu3 %v2704_v44  ;;  %v3074_v44 = vsel %vm3072_vm8, %v12579_v22, %v12573_v19 }
 0x160   :  { %v1199_v58 = vpop.f32.mrf.mxu2  ;;  %v1219_v43 = vpop.f32.mrf.mxu3  ;;  %3121 = vmatpush.msrb.mxu0 %v3073_v7  ;;  %12756 = vrot.lane.b32.xlu0 %v12755_v24, %s13286_s5  ;;  %v3076_v7 = vsel %vm3072_vm8, %v12574_v15, %v12583_v56 }
 0x161   :  { %v14347_v4 = vadd.f32 %v1199_v58, %v14167_v31  ;;  %v14349_v1 = vadd.f32 %v1219_v43, %v1084_v54  ;;  %v14351_v11 = vpop.f32.mrf.mxu1  ;;  %12761 = vrot.lane.b32.xlu1 %v13428_v20, %s13286_s5  ;;  %v3075_v31 = vsel %vm3072_vm8, %v12573_v19, %v12574_v15  ;;  %v555_v54 = vadd.f32 %v14020_v6, %v13915_v42  ;;  %v12597_v22 = vpop.permute.xlu1 %12596 }
 0x162   :  { %v3077_v20 = vsel %vm3072_vm8, %v12583_v56, %v12589_v60  ;;  %v12584_v19 = vunpack.i.h.bf16 %v14313_v34  ;;  %v12588_v58 = vunpack.i.l.bf16 %v12587_v32  ;;  %v12593_v43 = vunpack.i.l.bf16 %v14356_v9  ;;  %v14388_v34 = vpop.permute.xlu2 %12601 }
 0x163   :  { %v14358_v27 = vpop.f32.mrf.mxu0  ;;  %v1088_v24 = vadd.f32 %v14175_v59, %v555_v54  ;;  %v12599_v59 = vunpack.i.h.bf16 %v12597_v22 }
 0x164   :  { %12003 = vmatmul.msk.f32.vlgmr.msra.gmra.mxu1 %vm110_vm1, %v14266_v46  ;;  %12736 = vrot.lane.b32.xlu2 %v14003_v17, %s13286_s5  ;;  %v3080_v54 = vsel %vm3072_vm8, %v12588_v58, %v12593_v43 }
 0x165   :  { %12004 = vmatmul.msk.f32.vlgmr.msra.gmra.mxu2 %vm110_vm1, %v14266_v46  ;;  %12005 = vmatmul.msk.f32.vlgmr.msrb.gmra.mxu3 %vm110_vm1, %v14266_v46 }
 0x166   :  { %12006 = vmatmul.msk.f32.vlgmr.msra.gmra.mxu0 %vm110_vm1, %v14266_v46  ;;  %3141 = vmatpush.msra.mxu1 %v3074_v44 }
 0x167   :  { %3161 = vmatpush.msra.mxu2 %v3075_v31  ;;  %3181 = vmatpush.msrb.mxu3 %v3076_v7  ;;  %v14395_v31 = vld [vmem:[%s19817_s1 + $0x40] sm:$0xff]  ;;  %v3079_v7 = vsel %vm3072_vm8, %v12584_v19, %v12588_v58  ;;  %v12598_v58 = vunpack.i.l.bf16 %v12597_v22 }
 0x168   :  { %v1279_v42 = vpop.f32.mrf.mxu2  ;;  %v1299_v6 = vpop.f32.mrf.mxu3  ;;  %3201 = vmatpush.msra.mxu0 %v3077_v20  ;;  %12771 = vrot.lane.b32.xlu0 %v14003_v17, %s13287_s11 }
 0x169   :  { %v14380_v15 = vadd.f32 %v1279_v42, %v14208_v53  ;;  %v14382_v56 = vadd.f32 %v1299_v6, %v1088_v24  ;;  %v14384_v44 = vpop.f32.mrf.mxu1  ;;  %v3078_v53 = vsel %vm3072_vm8, %v12589_v60, %v12584_v19  ;;  %v12607_v20 = vpop.permute.xlu0 %12606  ;;  %v635_v24 = vadd.f32 %v14064_v45, %v13942_v30 }
 0x16a   :  { %v3081_v42 = vsel %vm3072_vm8, %v12593_v43, %v12599_v59  ;;  %v14413_v60 = vpack.i.bf16 %v14239_v29, %v14049_v0  ;;  %v12594_v30 = vunpack.i.h.bf16 %v14356_v9  ;;  %v12612_v9 = vpop.permute.xlu1 %12611 }
 0x16b   :  { %v14390_v32 = vpop.f32.mrf.mxu0  ;;  %v1092_v19 = vadd.f32 %v14216_v63, %v635_v24  ;;  %v12609_v63 = vunpack.i.h.bf16 %v12607_v20  ;;  %v14434_v24 = vpop.permute.xlu2 %12616 }
 0x16c   :  { %12007 = vmatmul.msk.f32.vlgmr.msrb.gmra.mxu1 %vm110_vm1, %v14266_v46  ;;  %19833 = vst [vmem:[#allocation9_spill] sm:$0xff] %v14413_v60  ;;  %12776 = vrot.lane.b32.xlu1 %v14413_v60, %s13287_s11  ;;  %v3083_v22 = vsel %vm3072_vm8, %v12594_v30, %v12598_v58 }
 0x16d   :  { %12008 = vmatmul.msk.f32.vlgmr.msrb.gmra.mxu2 %vm110_vm1, %v14266_v46  ;;  %12009 = vmatmul.msk.f32.vlgmr.msra.gmra.mxu3 %vm110_vm1, %v14266_v46  ;;  %v12603_v46 = vunpack.i.l.bf16 %v14388_v34 }
 0x16e   :  { %12011 = vmatmul.msk.f32.vlgmr.msrb.gmra.mxu0 %vm110_vm1, %v14395_v31  ;;  %3221 = vmatpush.msrb.mxu1 %v3078_v53 }
 0x16f   :  { %3241 = vmatpush.msrb.mxu2 %v3079_v7  ;;  %3261 = vmatpush.msra.mxu3 %v3080_v54  ;;  %v3082_v7 = vsel %vm3072_vm8, %v12599_v59, %v12594_v30  ;;  %v3084_v54 = vsel %vm3072_vm8, %v12598_v58, %v12603_v46  ;;  %v3085_v59 = vsel %vm3072_vm8, %v12603_v46, %v12609_v63  ;;  %v12604_v30 = vunpack.i.h.bf16 %v14388_v34 }
 0x170   :  { %v1359_v45 = vpop.f32.mrf.mxu2  ;;  %v1379_v6 = vpop.f32.mrf.mxu3  ;;  %3281 = vmatpush.msrb.mxu0 %v3081_v42  ;;  %v12608_v46 = vunpack.i.l.bf16 %v12607_v20 }
 0x171   :  { %v14421_v43 = vadd.f32 %v1359_v45, %v14259_v49  ;;  %v14423_v0 = vadd.f32 %v1379_v6, %v1092_v19  ;;  %v14425_v29 = vpop.f32.mrf.mxu1  ;;  %v715_v49 = vadd.f32 %v14107_v35, %v13966_v8  ;;  %v14445_v42 = vpop.permute.xlu0 %12621  ;;  %v14449_v19 = vpack.i.bf16 %v14154_v18, %v14090_v10 }
 0x172   :  { %v14453_v8 = vpack.i.bf16 %v14140_v28, %v14131_v2  ;;  %v12785_v45 = vpack.i.bf16 %v14131_v2, %v14244_v39  ;;  %v12613_v18 = vunpack.i.l.bf16 %v12612_v9  ;;  %v3086_v20 = vsel %vm3072_vm8, %v12609_v63, %v12604_v30 }
 0x173   :  { %v14427_v53 = vpop.f32.mrf.mxu0  ;;  %v1096_v35 = vadd.f32 %v14270_v47, %v715_v49  ;;  %v1085_v49 = vadd.f32 %v14169_v55, %v14015_v5  ;;  %v12800_v55 = vpack.i.bf16 %v14332_v14, %v14140_v28 }
 0x174   :  { %12012 = vmatmul.msk.f32.vlgmr.msra.gmra.mxu1 %vm110_vm1, %v14395_v31  ;;  %12791 = vrot.lane.b32.xlu1 %v14449_v19, %s13287_s11 }
 0x175   :  { %12013 = vmatmul.msk.f32.vlgmr.msra.gmra.mxu2 %vm110_vm1, %v14395_v31  ;;  %12014 = vmatmul.msk.f32.vlgmr.msrb.gmra.mxu3 %vm110_vm1, %v14395_v31 }
 0x176   :  { %12015 = vmatmul.msk.f32.vlgmr.msra.gmra.mxu0 %vm110_vm1, %v14395_v31  ;;  %3301 = vmatpush.msra.mxu1 %v3082_v7  ;;  %v12614_v7 = vunpack.i.h.bf16 %v12612_v9 }
 0x177   :  { %3321 = vmatpush.msra.mxu2 %v3083_v22  ;;  %3341 = vmatpush.msrb.mxu3 %v3084_v54  ;;  %v12623_v22 = vunpack.i.l.bf16 %v14445_v42  ;;  %v14479_v54 = vpop.permute.xlu1 %12626 }
 0x178   :  { %v1439_v6 = vpop.f32.mrf.mxu2  ;;  %v1459_v58 = vpop.f32.mrf.mxu3  ;;  %3361 = vmatpush.msra.mxu0 %v3085_v59  ;;  %12751 = vrot.lane.b32.xlu2 %v14453_v8, %s13286_s5  ;;  %v3456_v9 = vsel %vm3455_vm9, %v12613_v18, %v12614_v7 }
 0x179   :  { %v14462_v60 = vadd.f32 %v1439_v6, %v14301_v36  ;;  %v14464_v47 = vadd.f32 %v1459_v58, %v1096_v35  ;;  %v14466_v34 = vpop.f32.mrf.mxu1  ;;  %12786 = vrot.lane.b32.xlu0 %v12785_v45, %s13287_s11  ;;  %v3087_v36 = vsel %vm3072_vm8, %v12604_v30, %v12608_v46  ;;  %v3457_v63 = vsel %vm3455_vm9, %v12614_v7, %v12623_v22  ;;  %v14490_v59 = vpop.permute.xlu2 %12631  ;;  %v14495_v35 = vld [vmem:[%s19816_s0 + $0x78] sm:$0xff] }
 0x17a   :  { %v14499_v5 = vpack.i.bf16 %v14332_v14, %v14495_v35  ;;  %v1465_v30 = vadd.f32 %v14306_v52, %v1085_v49  ;;  %v12618_v45 = vunpack.i.l.bf16 %v14434_v24  ;;  %v12619_v46 = vunpack.i.h.bf16 %v14434_v24 }
 0x17b   :  { %v14472_v39 = vpop.f32.mrf.mxu0  ;;  %v12624_v7 = vunpack.i.h.bf16 %v14445_v42  ;;  %vm6902_vm8 = vcmask 236544  }
 0x17c   :  { %12016 = vmatmul.msk.f32.vlgmr.msrb.gmra.mxu1 %vm110_vm1, %v14395_v31  ;;  %12806 = vrot.lane.b32.xlu1 %v14003_v17, %s13288_s18  ;;  %v3458_v42 = vsel %vm3455_vm9, %v12623_v22, %v12618_v45  ;;  %v3459_v17 = vsel %vm3455_vm9, %v12618_v45, %v12619_v46  ;;  %v12629_v45 = vunpack.i.h.bf16 %v14479_v54 }
 0x17d   :  { %12017 = vmatmul.msk.f32.vlgmr.msrb.gmra.mxu2 %vm110_vm1, %v14395_v31  ;;  %12018 = vmatmul.msk.f32.vlgmr.msra.gmra.mxu3 %vm110_vm1, %v14395_v31 }
 0x17e   :  { %12019 = vmatmul.msk.f32.vlgmr.msrb.gmra.mxu0 %vm110_vm1, %v14395_v31  ;;  %3381 = vmatpush.msrb.mxu1 %v3086_v20  ;;  %v12633_v20 = vunpack.i.l.bf16 %v14490_v59 }
 0x17f   :  { %3401 = vmatpush.msrb.mxu2 %v3087_v36  ;;  %3504 = vmatpush.msra.mxu3 %v3456_v9  ;;  %v12637_v36 = vpop.permute.xlu0 %12636  ;;  %v1089_v9 = vadd.f32 %v14210_v37, %v14059_v38  ;;  %v12642_v22 = vpop.permute.xlu1 %12641  ;;  %v12628_v38 = vunpack.i.l.bf16 %v14479_v54  ;;  %v14560_v54 = vld [vmem:[%s19817_s1 + $0x48] sm:$0xff] }
 0x180   :  { %v1599_v6 = vpop.f32.mrf.mxu2  ;;  %v1619_v58 = vpop.f32.mrf.mxu3  ;;  %3524 = vmatpush.msrb.mxu0 %v3457_v63  ;;  %12766 = vrot.lane.b32.xlu2 %v14499_v5, %s13286_s5  ;;  %v3461_v49 = vsel %vm3455_vm9, %v12624_v7, %v12633_v20  ;;  %v14538_v63 = vpack.i.bf16 %v14044_v25, %v14194_v33 }
 0x181   :  { %v14510_v18 = vadd.f32 %v1599_v6, %v14349_v1  ;;  %v14512_v28 = vadd.f32 %v1619_v58, %v1465_v30  ;;  %v14514_v52 = vpop.f32.mrf.mxu1  ;;  %12801 = vrot.lane.b32.xlu0 %v12800_v55, %s13287_s11  ;;  %v3460_v1 = vsel %vm3455_vm9, %v12619_v46, %v12624_v7  ;;  %v1469_v55 = vadd.f32 %v14358_v27, %v1089_v9  ;;  %v12647_v7 = vpop.permute.xlu2 %12646 }
 0x182   :  { %v12634_v6 = vunpack.i.h.bf16 %v14490_v59  ;;  %v12643_v27 = vunpack.i.l.bf16 %v12642_v22  ;;  %v3463_v59 = vsel %vm3455_vm9, %v12628_v38, %v12629_v45 }
 0x183   :  { %v14520_v24 = vpop.f32.mrf.mxu0 }
 0x184   :  { %12020 = vmatmul.msk.f32.vlgmr.msra.gmra.mxu1 %vm110_vm1, %v14395_v31  ;;  %12821 = vrot.lane.b32.xlu1 %v14053_v16, %s13288_s18  ;;  %v3464_v46 = vsel %vm3455_vm9, %v12629_v45, %v12634_v6 }
 0x185   :  { %12021 = vmatmul.msk.f32.vlgmr.msra.gmra.mxu2 %vm110_vm1, %v14395_v31  ;;  %12022 = vmatmul.msk.f32.vlgmr.msrb.gmra.mxu3 %vm110_vm1, %v14395_v31 }
 0x186   :  { %12023 = vmatmul.msk.f32.vlgmr.msra.gmra.mxu0 %vm110_vm1, %v14395_v31  ;;  %3544 = vmatpush.msra.mxu1 %v3458_v42  ;;  %v3465_v42 = vsel %vm3455_vm9, %v12634_v6, %v12643_v27  ;;  %v14610_v6 = vpack.i.bf16 %v14145_v50, %v14008_v13 }
 0x187   :  { %3564 = vmatpush.msra.mxu2 %v3459_v17  ;;  %3584 = vmatpush.msrb.mxu3 %v3460_v1  ;;  %v12638_v1 = vunpack.i.l.bf16 %v12637_v36 }
 0x188   :  { %v1679_v37 = vpop.f32.mrf.mxu2  ;;  %v1699_v30 = vpop.f32.mrf.mxu3  ;;  %3604 = vmatpush.msra.mxu0 %v3461_v49  ;;  %12781 = vrot.lane.b32.xlu2 %v14538_v63, %s13287_s11  ;;  %v12639_v49 = vunpack.i.h.bf16 %v12637_v36 }
 0x189   :  { %v14547_v58 = vadd.f32 %v1679_v37, %v14382_v56  ;;  %v14549_v25 = vadd.f32 %v1699_v30, %v1469_v55  ;;  %v14551_v33 = vpop.f32.mrf.mxu1  ;;  %12816 = vrot.lane.b32.xlu0 %v13447_v23, %s13288_s18  ;;  %v3462_v56 = vsel %vm3455_vm9, %v12633_v20, %v12628_v38  ;;  %v1093_v23 = vadd.f32 %v14261_v48, %v14102_v41  ;;  %v12652_v20 = vpop.permute.xlu0 %12651 }
 0x18a   :  { %v12644_v48 = vunpack.i.h.bf16 %v12642_v22  ;;  %v12653_v37 = vunpack.i.l.bf16 %v12652_v20  ;;  %v3466_v22 = vsel %vm3455_vm9, %v12643_v27, %v12638_v1  ;;  %v14597_v36 = vpop.permute.xlu1 %12656  ;;  %v1462_v30 = vadd.f32 %v14303_v21, %v14165_v62  ;;  %v12662_v45 = vpop.permute.xlu2 %12661 }
 0x18b   :  { %v14562_v16 = vpop.f32.mrf.mxu0  ;;  %v1473_v17 = vadd.f32 %v14390_v32, %v1093_v23  ;;  %v12654_v62 = vunpack.i.h.bf16 %v12652_v20  ;;  %v12658_v23 = vunpack.i.l.bf16 %v14597_v36 }
 0x18c   :  { %12024 = vmatmul.msk.f32.vlgmr.msrb.gmra.mxu1 %vm110_vm1, %v14395_v31  ;;  %12836 = vrot.lane.b32.xlu1 %v14149_v51, %s13288_s18  ;;  %v3467_v51 = vsel %vm3455_vm9, %v12638_v1, %v12639_v49  ;;  %v1842_v27 = vadd.f32 %v14427_v53, %v1462_v30  ;;  %v12664_v53 = vunpack.i.h.bf16 %v12662_v45 }
 0x18d   :  { %12025 = vmatmul.msk.f32.vlgmr.msrb.gmra.mxu2 %vm110_vm1, %v14395_v31  ;;  %12027 = vmatmul.msk.f32.vlgmr.msra.gmra.mxu3 %vm110_vm1, %v14560_v54  ;;  %v3470_v20 = vsel %vm3455_vm9, %v12653_v37, %v12654_v62 }
 0x18e   :  { %12028 = vmatmul.msk.f32.vlgmr.msrb.gmra.mxu0 %vm110_vm1, %v14560_v54  ;;  %3624 = vmatpush.msrb.mxu1 %v3462_v56 }
 0x18f   :  { %3644 = vmatpush.msrb.mxu2 %v3463_v59  ;;  %3664 = vmatpush.msra.mxu3 %v3464_v46  ;;  %v12649_v59 = vunpack.i.h.bf16 %v12647_v7  ;;  %v12648_v46 = vunpack.i.l.bf16 %v12647_v7 }
 0x190   :  { %v1759_v9 = vpop.f32.mrf.mxu2  ;;  %v1779_v41 = vpop.f32.mrf.mxu3  ;;  %3684 = vmatpush.msrb.mxu0 %v3465_v42  ;;  %12796 = vrot.lane.b32.xlu2 %v14610_v6, %s13287_s11 }
 0x191   :  { %v14582_v31 = vadd.f32 %v1759_v9, %v14423_v0  ;;  %v14584_v55 = vadd.f32 %v1779_v41, %v1473_v17  ;;  %v14586_v38 = vpop.f32.mrf.mxu1  ;;  %12831 = vrot.lane.b32.xlu0 %v13465_v26, %s13288_s18  ;;  %v3468_v0 = vsel %vm3455_vm9, %v12639_v49, %v12644_v48  ;;  %v3469_v26 = vsel %vm3455_vm9, %v12644_v48, %v12653_v37  ;;  %v12667_v1 = vpop.permute.xlu0 %12666 }
 0x192   :  { %v3840_v17 = vsel %vm3838_vm10, %v12649_v59, %v12658_v23  ;;  %v1466_v9 = vadd.f32 %v14351_v11, %v14206_v3  ;;  %v12672_v41 = vpop.permute.xlu1 %12671  ;;  %v14643_v48 = vpack.i.bf16 %v14495_v35, %v14327_v40  ;;  %v12659_v3 = vunpack.i.h.bf16 %v14597_v36  ;;  %v19834_v36 = vld [vmem:[#allocation6_spill] sm:$0xff] }
 0x193   :  { %v14590_v32 = vpop.f32.mrf.mxu0  ;;  %vm7285_vm9 = vcmask 228352  }
 0x194   :  { %12029 = vmatmul.msk.f32.vlgmr.msra.gmra.mxu1 %vm110_vm1, %v14560_v54  ;;  %12851 = vrot.lane.b32.xlu1 %v14198_v12, %s13289_s17  ;;  %v3841_v12 = vsel %vm3838_vm10, %v12658_v23, %v12664_v53  ;;  %v1846_v49 = vadd.f32 %v14472_v39, %v1466_v9  ;;  %v12674_v39 = vunpack.i.h.bf16 %v12672_v41  ;;  %v3842_v62 = vsel %vm3838_vm10, %v12664_v53, %v12659_v3 }
 0x195   :  { %12030 = vmatmul.msk.f32.vlgmr.msra.gmra.mxu2 %vm110_vm1, %v14560_v54  ;;  %12031 = vmatmul.msk.f32.vlgmr.msrb.gmra.mxu3 %vm110_vm1, %v14560_v54 }
 0x196   :  { %12032 = vmatmul.msk.f32.vlgmr.msra.gmra.mxu0 %vm110_vm1, %v14560_v54  ;;  %3704 = vmatpush.msra.mxu1 %v3466_v22  ;;  %v12663_v22 = vunpack.i.l.bf16 %v12662_v45  ;;  %v14660_v45 = vpop.permute.xlu2 %12676 }
 0x197   :  { %3724 = vmatpush.msra.mxu2 %v3467_v51  ;;  %3744 = vmatpush.msrb.mxu3 %v3468_v0  ;;  %v12668_v51 = vunpack.i.l.bf16 %v12667_v1  ;;  %v12678_v9 = vunpack.i.l.bf16 %v14660_v45 }
 0x198   :  { %v1839_v21 = vpop.f32.mrf.mxu2  ;;  %v1974_v56 = vpop.f32.mrf.mxu3  ;;  %3764 = vmatpush.msra.mxu0 %v3469_v26  ;;  %12811 = vrot.lane.b32.xlu2 %v14643_v48, %s13287_s11 }
 0x199   :  { %v14617_v42 = vadd.f32 %v1839_v21, %v14464_v47  ;;  %v14619_v13 = vadd.f32 %v1974_v56, %v1842_v27  ;;  %v14621_v50 = vpop.f32.mrf.mxu1  ;;  %v3839_v47 = vsel %vm3838_vm10, %v12648_v46, %v12649_v59  ;;  %12846 = vrot.lane.b32.xlu0 %v14643_v48, %s13288_s18  ;;  %v3844_v21 = vsel %vm3838_vm10, %v12663_v22, %v12668_v51  ;;  %v19835_v56 = vld [vmem:[#allocation7_spill] sm:$0xff]  ;;  %v12682_v23 = vpop.permute.xlu0 %12681 }
 0x19a   :  { %v1470_v59 = vadd.f32 %v14384_v44, %v19835_v56  ;;  %v3845_v46 = vsel %vm3838_vm10, %v12668_v51, %v12674_v39 }
 0x19b   :  { %v14625_v7 = vpop.f32.mrf.mxu0 }
 0x19c   :  { %12033 = vmatmul.msk.f32.vlgmr.msrb.gmra.mxu1 %vm110_vm1, %v14560_v54  ;;  %12866 = vrot.lane.b32.xlu1 %v19834_v36, %s13289_s17  ;;  %v1850_v53 = vadd.f32 %v14520_v24, %v1470_v59  ;;  %v14694_v24 = vld [vmem:[%s19817_s1 + $0x50] sm:$0xff] }
 0x19d   :  { %12034 = vmatmul.msk.f32.vlgmr.msrb.gmra.mxu2 %vm110_vm1, %v14560_v54  ;;  %12035 = vmatmul.msk.f32.vlgmr.msra.gmra.mxu3 %vm110_vm1, %v14560_v54 }
 0x19e   :  { %12036 = vmatmul.msk.f32.vlgmr.msrb.gmra.mxu0 %vm110_vm1, %v14560_v54  ;;  %3784 = vmatpush.msrb.mxu1 %v3470_v20  ;;  %v12669_v20 = vunpack.i.h.bf16 %v12667_v1  ;;  %v12687_v1 = vpop.permute.xlu1 %12686  ;;  %v14703_v36 = vpop.permute.xlu2 %12691 }
 0x19f   :  { %3887 = vmatpush.msrb.mxu2 %v3839_v47  ;;  %3907 = vmatpush.msra.mxu3 %v3840_v17  ;;  %v12673_v17 = vunpack.i.l.bf16 %v12672_v41  ;;  %v12688_v56 = vunpack.i.l.bf16 %v12687_v1 }
 0x1a0   :  { %v2034_v11 = vpop.f32.mrf.mxu2  ;;  %v2054_v37 = vpop.f32.mrf.mxu3  ;;  %3927 = vmatpush.msrb.mxu0 %v3841_v12 }
 0x1a1   :  { %v14650_v0 = vadd.f32 %v2034_v11, %v14512_v28  ;;  %v14652_v30 = vadd.f32 %v2054_v37, %v1846_v49  ;;  %v14654_v26 = vpop.f32.mrf.mxu1  ;;  %v3843_v28 = vsel %vm3838_vm10, %v12659_v3, %v12663_v22  ;;  %v12684_v11 = vunpack.i.h.bf16 %v12682_v23  ;;  %v19836_v37 = vld [vmem:[#allocation3_spill] sm:$0xff] }
 0x1a2   :  { %12861 = vrot.lane.b32.xlu0 %v19836_v37, %s13289_s17  ;;  %v3847_v22 = vsel %vm3838_vm10, %v12669_v20, %v12673_v17  ;;  %v3848_v51 = vsel %vm3838_vm10, %v12673_v17, %v12678_v9  ;;  %v12693_v37 = vunpack.i.l.bf16 %v14703_v36 }
 0x1a3   :  { %v14662_v27 = vpop.f32.mrf.mxu0 }
 0x1a4   :  { %12037 = vmatmul.msk.f32.vlgmr.msra.gmra.mxu1 %vm110_vm1, %v14560_v54  ;;  %12881 = vrot.lane.b32.xlu1 %v14336_v57, %s13289_s17  ;;  %v1474_v57 = vadd.f32 %v14425_v29, %v14299_v61  ;;  %v12679_v61 = vunpack.i.h.bf16 %v14660_v45  ;;  %v12697_v45 = vpop.permute.xlu0 %12696 }
 0x1a5   :  { %12038 = vmatmul.msk.f32.vlgmr.msra.gmra.mxu2 %vm110_vm1, %v14560_v54  ;;  %12039 = vmatmul.msk.f32.vlgmr.msrb.gmra.mxu3 %vm110_vm1, %v14560_v54 }
 0x1a6   :  { %12040 = vmatmul.msk.f32.vlgmr.msra.gmra.mxu0 %vm110_vm1, %v14560_v54  ;;  %3947 = vmatpush.msra.mxu1 %v3842_v62  ;;  %v1854_v62 = vadd.f32 %v14562_v16, %v1474_v57  ;;  %v19837_v16 = vld [vmem:[#allocation4_spill] sm:$0xff]  ;;  %v12699_v57 = vunpack.i.h.bf16 %v12697_v45 }
 0x1a7   :  { %3967 = vmatpush.msra.mxu2 %v3843_v28  ;;  %3987 = vmatpush.msrb.mxu3 %v3844_v21  ;;  %v12683_v21 = vunpack.i.l.bf16 %v12682_v23  ;;  %v3850_v23 = vsel %vm3838_vm10, %v12684_v11, %v12679_v61 }
 0x1a8   :  { %v2114_v47 = vpop.f32.mrf.mxu2  ;;  %v2134_v44 = vpop.f32.mrf.mxu3  ;;  %4007 = vmatpush.msra.mxu0 %v3845_v46 }
 0x1a9   :  { %v14681_v12 = vadd.f32 %v2114_v47, %v14549_v25  ;;  %v14683_v49 = vadd.f32 %v2134_v44, %v1850_v53  ;;  %v14685_v3 = vpop.f32.mrf.mxu1  ;;  %v3846_v25 = vsel %vm3838_vm10, %v12674_v39, %v12669_v20  ;;  %v3849_v39 = vsel %vm3838_vm10, %v12678_v9, %v12684_v11  ;;  %v12707_v9 = vpop.permute.xlu2 %12706  ;;  %v14750_v11 = vld [vmem:[%s19816_s0 + $0x58] sm:$0xff] }
 0x1aa   :  { %12876 = vrot.lane.b32.xlu0 %v19837_v16, %s13289_s17  ;;  %v3851_v20 = vsel %vm3838_vm10, %v12679_v61, %v12683_v21  ;;  %v12702_v47 = vpop.permute.xlu1 %12701  ;;  %v1843_v44 = vadd.f32 %v14466_v34, %v14347_v4  ;;  %v14754_v4 = vpack.i.bf16 %v14750_v11, %v14332_v14  ;;  %v19838_v61 = vld [vmem:[#allocation5_spill] sm:$0xff] }
 0x1ab   :  { %v14696_v41 = vpop.f32.mrf.mxu0 }
 0x1ac   :  { %12041 = vmatmul.msk.f32.vlgmr.msrb.gmra.mxu1 %vm110_vm1, %v14560_v54  ;;  %v14716_v54 = vpack.i.bf16 %v14131_v2, %v14090_v10  ;;  %v12689_v2 = vunpack.i.h.bf16 %v12687_v1  ;;  %v2258_v34 = vadd.f32 %v14590_v32, %v1843_v44  ;;  %v12698_v1 = vunpack.i.l.bf16 %v12697_v45 }
 0x1ad   :  { %12043 = vmatmul.msk.f32.vlgmr.msrb.gmra.mxu2 %vm110_vm1, %v14694_v24  ;;  %12044 = vmatmul.msk.f32.vlgmr.msra.gmra.mxu3 %vm110_vm1, %v14694_v24 }
 0x1ae   :  { %12045 = vmatmul.msk.f32.vlgmr.msrb.gmra.mxu0 %vm110_vm1, %v14694_v24  ;;  %4027 = vmatpush.msrb.mxu1 %v3846_v25  ;;  %v3853_v17 = vsel %vm3838_vm10, %v12688_v56, %v12689_v2 }
 0x1af   :  { %4047 = vmatpush.msrb.mxu2 %v3847_v22  ;;  %4067 = vmatpush.msra.mxu3 %v3848_v51  ;;  %v12694_v51 = vunpack.i.h.bf16 %v14703_v36  ;;  %v4222_v36 = vsel %vm4221_vm11, %v12698_v1, %v12693_v37  ;;  %v19839_v1 = vld [vmem:[#allocation8_spill] sm:$0xff] }
 0x1b0   :  { %v2194_v29 = vpop.f32.mrf.mxu2  ;;  %v2214_v28 = vpop.f32.mrf.mxu3  ;;  %4087 = vmatpush.msrb.mxu0 %v3849_v39  ;;  %12826 = vrot.lane.b32.xlu2 %v14716_v54, %s13288_s18 }
 0x1b1   :  { %v14723_v59 = vadd.f32 %v2194_v29, %v14584_v55  ;;  %v14725_v46 = vadd.f32 %v2214_v28, %v1854_v62  ;;  %v14727_v10 = vpop.f32.mrf.mxu1  ;;  %v3852_v55 = vsel %vm3838_vm10, %v12683_v21, %v12688_v56  ;;  %v12708_v62 = vunpack.i.l.bf16 %v12707_v9  ;;  %v12712_v21 = vpop.permute.xlu0 %12711 }
 0x1b2   :  { %12891 = vrot.lane.b32.xlu0 %v19838_v61, %s13290_s30  ;;  %v4223_v28 = vsel %vm4221_vm11, %v12693_v37, %v12694_v51  ;;  %v1847_v56 = vadd.f32 %v14514_v52, %v14380_v15  ;;  %v12717_v16 = vpop.permute.xlu1 %12716  ;;  %v12704_v52 = vunpack.i.h.bf16 %v12702_v47  ;;  %v14828_v61 = vld [vmem:[%s19816_s0 + $0x18] sm:$0xff] }
 0x1b3   :  { %v14731_v53 = vpop.f32.mrf.mxu0  ;;  %v4225_v2 = vsel %vm4221_vm11, %v12699_v57, %v12708_v62  ;;  %v12718_v37 = vunpack.i.l.bf16 %v12717_v16 }
 0x1b4   :  { %12046 = vmatmul.msk.f32.vlgmr.msra.gmra.mxu1 %vm110_vm1, %v14694_v24  ;;  %v2262_v45 = vadd.f32 %v14625_v7, %v1847_v56 }
 0x1b5   :  { %12047 = vmatmul.msk.f32.vlgmr.msra.gmra.mxu2 %vm110_vm1, %v14694_v24  ;;  %12048 = vmatmul.msk.f32.vlgmr.msrb.gmra.mxu3 %vm110_vm1, %v14694_v24 }
 0x1b6   :  { %12049 = vmatmul.msk.f32.vlgmr.msra.gmra.mxu0 %vm110_vm1, %v14694_v24  ;;  %4107 = vmatpush.msra.mxu1 %v3850_v23  ;;  %v12703_v23 = vunpack.i.l.bf16 %v12702_v47 }
 0x1b7   :  { %4127 = vmatpush.msra.mxu2 %v3851_v20  ;;  %4147 = vmatpush.msrb.mxu3 %v3852_v55  ;;  %v12709_v55 = vunpack.i.h.bf16 %v12707_v9  ;;  %v14803_v9 = vpop.permute.xlu2 %12721 }
 0x1b8   :  { %v2357_v25 = vpop.f32.mrf.mxu2  ;;  %v2377_v22 = vpop.f32.mrf.mxu3  ;;  %4167 = vmatpush.msra.mxu0 %v3853_v17  ;;  %12841 = vrot.lane.b32.xlu2 %v14754_v4, %s13288_s18  ;;  %v4227_v47 = vsel %vm4221_vm11, %v12703_v23, %v12704_v52 }
 0x1b9   :  { %v14762_v14 = vadd.f32 %v2357_v25, %v14619_v13  ;;  %v14764_v39 = vadd.f32 %v2377_v22, %v2258_v34  ;;  %v14766_v32 = vpop.f32.mrf.mxu1  ;;  %v4224_v13 = vsel %vm4221_vm11, %v12694_v51, %v12699_v57  ;;  %v4226_v25 = vsel %vm4221_vm11, %v12708_v62, %v12703_v23  ;;  %v12727_v57 = vpop.permute.xlu0 %12726  ;;  %v13244_v62 = vld [vmem:[%s19816_s0] sm:$0xff] }
 0x1ba   :  { %12906 = vrot.lane.b32.xlu0 %v19839_v1, %s13290_s30  ;;  %v1851_v22 = vadd.f32 %v14551_v33, %v14421_v43  ;;  %v4229_v51 = vsel %vm4221_vm11, %v12709_v55, %v12718_v37  ;;  %v14820_v43 = vld [vmem:[%s19816_s0 + $0x8] sm:$0xff]  ;;  %v14857_v1 = vpop.permute.xlu1 %12731 }
 0x1bb   :  { %v14770_v29 = vpop.f32.mrf.mxu0  ;;  %v14823_v33 = vpack.i.bf16 %v14820_v43, %v13244_v62 }
 0x1bc   :  { %12050 = vmatmul.msk.f32.vlgmr.msrb.gmra.mxu1 %vm110_vm1, %v14694_v24 }
 0x1bd   :  { %12051 = vmatmul.msk.f32.vlgmr.msrb.gmra.mxu2 %vm110_vm1, %v14694_v24  ;;  %12052 = vmatmul.msk.f32.vlgmr.msra.gmra.mxu3 %vm110_vm1, %v14694_v24 }
 0x1be   :  { %12053 = vmatmul.msk.f32.vlgmr.msrb.gmra.mxu0 %vm110_vm1, %v14694_v24  ;;  %4270 = vmatpush.msrb.mxu1 %v4222_v36  ;;  %v2266_v36 = vadd.f32 %v14662_v27, %v1851_v22  ;;  %v14846_v27 = vld [vmem:[%s19817_s1 + $0x58] sm:$0xff] }
 0x1bf   :  { %4290 = vmatpush.msrb.mxu2 %v4223_v28  ;;  %4310 = vmatpush.msra.mxu3 %v4224_v13  ;;  %v12713_v28 = vunpack.i.l.bf16 %v12712_v21 }
 0x1c0   :  { %v2437_v20 = vpop.f32.mrf.mxu2  ;;  %v2457_v15 = vpop.f32.mrf.mxu3  ;;  %4330 = vmatpush.msrb.mxu0 %v4225_v2  ;;  %v12719_v2 = vunpack.i.h.bf16 %v12717_v16  ;;  %12896 = vrot.lane.b32.xlu1 %v14823_v33, %s13290_s30 }
 0x1c1   :  { %v14788_v44 = vadd.f32 %v2437_v20, %v14652_v30  ;;  %v14790_v17 = vadd.f32 %v2457_v15, %v2262_v45  ;;  %v14792_v34 = vpop.f32.mrf.mxu1  ;;  %v4228_v30 = vsel %vm4221_vm11, %v12704_v52, %v12709_v55  ;;  %v12714_v45 = vunpack.i.h.bf16 %v12712_v21 }
 0x1c2   :  { %v12728_v52 = vunpack.i.l.bf16 %v12727_v57  ;;  %v4230_v16 = vsel %vm4221_vm11, %v12718_v37, %v12713_v28 }
 0x1c3   :  { %v14796_v7 = vpop.f32.mrf.mxu0  ;;  %v4232_v55 = vsel %vm4221_vm11, %v12714_v45, %v12719_v2 }
 0x1c4   :  { %12054 = vmatmul.msk.f32.vlgmr.msra.gmra.mxu1 %vm110_vm1, %v14694_v24  ;;  %v4233_v37 = vsel %vm4221_vm11, %v12719_v2, %v12728_v52 }
 0x1c5   :  { %12055 = vmatmul.msk.f32.vlgmr.msra.gmra.mxu2 %vm110_vm1, %v14694_v24  ;;  %12056 = vmatmul.msk.f32.vlgmr.msrb.gmra.mxu3 %vm110_vm1, %v14694_v24 }
 0x1c6   :  { %12057 = vmatmul.msk.f32.vlgmr.msra.gmra.mxu0 %vm110_vm1, %v14694_v24  ;;  %4350 = vmatpush.msra.mxu1 %v4226_v25  ;;  %v14831_v24 = vpack.i.bf16 %v14828_v61, %v13244_v62  ;;  %v1855_v25 = vadd.f32 %v14586_v38, %v14462_v60  ;;  %v14876_v60 = vld [vmem:[%s19816_s0 + $0x48] sm:$0xff] }
 0x1c7   :  { %4370 = vmatpush.msra.mxu2 %v4227_v47  ;;  %4390 = vmatpush.msrb.mxu3 %v4228_v30  ;;  %v12737_v47 = vpop.permute.xlu2 %12736  ;;  %v14871_v30 = vld [vmem:[%s19816_s0 + $0x50] sm:$0xff] }
 0x1c8   :  { %v2517_v13 = vpop.f32.mrf.mxu2  ;;  %v2537_v56 = vpop.f32.mrf.mxu3  ;;  %4410 = vmatpush.msra.mxu0 %v4229_v51  ;;  %12856 = vrot.lane.b32.xlu2 %v14831_v24, %s13289_s17  ;;  %v14880_v38 = vpack.i.bf16 %v14871_v30, %v14876_v60  ;;  %v2270_v22 = vadd.f32 %v14696_v41, %v1855_v25  ;;  %v12723_v51 = vunpack.i.l.bf16 %v14803_v9  ;;  %v12739_v41 = vunpack.i.h.bf16 %v12737_v47 }
 0x1c9   :  { %v14837_v23 = vadd.f32 %v2517_v13, %v14683_v49  ;;  %v14839_v20 = vadd.f32 %v2537_v56, %v2266_v36  ;;  %v14841_v15 = vpop.f32.mrf.mxu1  ;;  %v4231_v49 = vsel %vm4221_vm11, %v12713_v28, %v12714_v45  ;;  %v12724_v28 = vunpack.i.h.bf16 %v14803_v9  ;;  %12911 = vrot.lane.b32.xlu1 %v14453_v8, %s13290_s30 }
 0x1ca   :  { %v12729_v13 = vunpack.i.h.bf16 %v12727_v57  ;;  %v4234_v9 = vsel %vm4221_vm11, %v12728_v52, %v12723_v51  ;;  %v12742_v57 = vpop.permute.xlu0 %12741  ;;  %v12747_v52 = vpop.permute.xlu1 %12746 }
 0x1cb   :  { %v14850_v21 = vpop.f32.mrf.mxu0  ;;  %v4235_v8 = vsel %vm4221_vm11, %v12723_v51, %v12724_v28 }
 0x1cc   :  { %12059 = vmatmul.msk.f32.vlgmr.msrb.gmra.mxu1 %vm110_vm1, %v14846_v27 }
 0x1cd   :  { %12060 = vmatmul.msk.f32.vlgmr.msrb.gmra.mxu2 %vm110_vm1, %v14846_v27  ;;  %12061 = vmatmul.msk.f32.vlgmr.msra.gmra.mxu3 %vm110_vm1, %v14846_v27 }
 0x1ce   :  { %12062 = vmatmul.msk.f32.vlgmr.msrb.gmra.mxu0 %vm110_vm1, %v14846_v27  ;;  %4430 = vmatpush.msrb.mxu1 %v4230_v16  ;;  %v12738_v16 = vunpack.i.l.bf16 %v12737_v47  ;;  %v12733_v47 = vunpack.i.l.bf16 %v14857_v1 }
 0x1cf   :  { %4450 = vmatpush.msrb.mxu2 %v4231_v49  ;;  %4470 = vmatpush.msra.mxu3 %v4232_v55  ;;  %v2259_v55 = vadd.f32 %v14621_v50, %v14510_v18 }
 0x1d0   :  { %v2597_v62 = vpop.f32.mrf.mxu2  ;;  %v2617_v36 = vpop.f32.mrf.mxu3  ;;  %4490 = vmatpush.msrb.mxu0 %v4233_v37  ;;  %12871 = vrot.lane.b32.xlu2 %v14880_v38, %s13289_s17  ;;  %v4605_v25 = vsel %vm4604_vm12, %v12738_v16, %v12739_v41  ;;  %v14915_v37 = vld [vmem:[%s19816_s0 + $0x60] sm:$0xff] }
 0x1d1   :  { %v14888_v56 = vadd.f32 %v2597_v62, %v14725_v46  ;;  %v14890_v2 = vadd.f32 %v2617_v36, %v2270_v22  ;;  %v14892_v45 = vpop.f32.mrf.mxu1  ;;  %v4236_v46 = vsel %vm4221_vm11, %v12724_v28, %v12729_v13  ;;  %v14919_v18 = vpack.i.bf16 %v14495_v35, %v14915_v37  ;;  %12926 = vrot.lane.b32.xlu1 %v14499_v5, %s13290_s30 }
 0x1d2   :  { %v2642_v50 = vadd.f32 %v14731_v53, %v2259_v55  ;;  %v12734_v62 = vunpack.i.h.bf16 %v14857_v1  ;;  %v12743_v36 = vunpack.i.l.bf16 %v12742_v57  ;;  %v12749_v53 = vunpack.i.h.bf16 %v12747_v52  ;;  %v14935_v16 = vpop.permute.xlu2 %12751 }
 0x1d3   :  { %v14896_v49 = vpop.f32.mrf.mxu0  ;;  %v4606_v1 = vsel %vm4604_vm12, %v12739_v41, %v12733_v47  ;;  %v12757_v41 = vpop.permute.xlu0 %12756  ;;  %v12920_v55 = vpack.i.bf16 %v14327_v40, %v14915_v37 }
 0x1d4   :  { %12063 = vmatmul.msk.f32.vlgmr.msra.gmra.mxu1 %vm110_vm1, %v14846_v27  ;;  %v4607_v5 = vsel %vm4604_vm12, %v12733_v47, %v12734_v62  ;;  %v12748_v47 = vunpack.i.l.bf16 %v12747_v52  ;;  %v12759_v40 = vunpack.i.h.bf16 %v12757_v41  ;;  %v14974_v52 = vld [vmem:[%s19817_s1 + $0x60] sm:$0xff] }
 0x1d5   :  { %12064 = vmatmul.msk.f32.vlgmr.msra.gmra.mxu2 %vm110_vm1, %v14846_v27  ;;  %12065 = vmatmul.msk.f32.vlgmr.msrb.gmra.mxu3 %vm110_vm1, %v14846_v27 }
 0x1d6   :  { %12066 = vmatmul.msk.f32.vlgmr.msra.gmra.mxu0 %vm110_vm1, %v14846_v27  ;;  %4510 = vmatpush.msra.mxu1 %v4234_v9 }
 0x1d7   :  { %4530 = vmatpush.msra.mxu2 %v4235_v8  ;;  %4550 = vmatpush.msrb.mxu3 %v4236_v46  ;;  %v2263_v8 = vadd.f32 %v14654_v26, %v14547_v58  ;;  %v4609_v46 = vsel %vm4604_vm12, %v12743_v36, %v12749_v53 }
 0x1d8   :  { %v2760_v22 = vpop.f32.mrf.mxu2  ;;  %v2780_v51 = vpop.f32.mrf.mxu3  ;;  %4653 = vmatpush.msra.mxu0 %v4605_v25  ;;  %12886 = vrot.lane.b32.xlu2 %v14919_v18, %s13289_s17 }
 0x1d9   :  { %v14927_v28 = vadd.f32 %v2760_v22, %v14764_v39  ;;  %v14929_v35 = vadd.f32 %v2780_v51, %v2642_v50  ;;  %v14931_v13 = vpop.f32.mrf.mxu1  ;;  %v4608_v39 = vsel %vm4604_vm12, %v12734_v62, %v12743_v36  ;;  %v2646_v25 = vadd.f32 %v14770_v29, %v2263_v8  ;;  %12921 = vrot.lane.b32.xlu0 %v12920_v55, %s13290_s30  ;;  %v14967_v29 = vpop.permute.xlu1 %12761  ;;  %v14995_v8 = vld [vmem:[%s19816_s0 + $0x20] sm:$0xff] }
 0x1da   :  { %v12744_v50 = vunpack.i.h.bf16 %v12742_v57  ;;  %v12753_v22 = vunpack.i.l.bf16 %v14935_v16  ;;  %12941 = vrot.lane.b32.xlu1 %v14538_v63, %s13291_s24  ;;  %v2267_v63 = vadd.f32 %v14685_v3, %v14582_v31  ;;  %v15000_v31 = vld [vmem:[%s19816_s0 + $0x30] sm:$0xff] }
 0x1db   :  { %v14937_v9 = vpop.f32.mrf.mxu0  ;;  %v12900_v3 = vpack.i.bf16 %v15000_v31, %v14995_v8 }
 0x1dc   :  { %12067 = vmatmul.msk.f32.vlgmr.msrb.gmra.mxu1 %vm110_vm1, %v14846_v27 }
 0x1dd   :  { %12068 = vmatmul.msk.f32.vlgmr.msrb.gmra.mxu2 %vm110_vm1, %v14846_v27  ;;  %12069 = vmatmul.msk.f32.vlgmr.msra.gmra.mxu3 %vm110_vm1, %v14846_v27 }
 0x1de   :  { %12070 = vmatmul.msk.f32.vlgmr.msrb.gmra.mxu0 %vm110_vm1, %v14846_v27  ;;  %4673 = vmatpush.msrb.mxu1 %v4606_v1  ;;  %v4611_v1 = vsel %vm4604_vm12, %v12744_v50, %v12748_v47 }
 0x1df   :  { %4693 = vmatpush.msrb.mxu2 %v4607_v5  ;;  %4713 = vmatpush.msra.mxu3 %v4608_v39  ;;  %v4612_v5 = vsel %vm4604_vm12, %v12748_v47, %v12753_v22  ;;  %v14981_v39 = vpop.permute.xlu2 %12766 }
 0x1e0   :  { %v2840_v58 = vpop.f32.mrf.mxu2  ;;  %v2860_v26 = vpop.f32.mrf.mxu3  ;;  %4733 = vmatpush.msrb.mxu0 %v4609_v46  ;;  %v12754_v46 = vunpack.i.h.bf16 %v14935_v16  ;;  %12901 = vrot.lane.b32.xlu2 %v12900_v3, %s13290_s30  ;;  %v19840_v16 = vld [vmem:[#allocation9_spill] sm:$0xff]  ;;  %v12915_v3 = vpack.i.bf16 %v14876_v60, %v14750_v11 }
 0x1e1   :  { %v14959_v51 = vadd.f32 %v2840_v58, %v14790_v17  ;;  %v14961_v62 = vadd.f32 %v2860_v26, %v2646_v25  ;;  %v14963_v36 = vpop.f32.mrf.mxu1  ;;  %v4610_v17 = vsel %vm4604_vm12, %v12749_v53, %v12744_v50  ;;  %v4613_v53 = vsel %vm4604_vm12, %v12753_v22, %v12759_v40  ;;  %12936 = vrot.lane.b32.xlu0 %v19840_v16, %s13291_s24 }
 0x1e2   :  { %v12758_v50 = vunpack.i.l.bf16 %v12757_v41  ;;  %v12763_v58 = vunpack.i.l.bf16 %v14967_v29  ;;  %12956 = vrot.lane.b32.xlu1 %v14610_v6, %s13291_s24  ;;  %v12772_v41 = vpop.permute.xlu0 %12771 }
 0x1e3   :  { %v14969_v57 = vpop.f32.mrf.mxu0 }
 0x1e4   :  { %12071 = vmatmul.msk.f32.vlgmr.msra.gmra.mxu1 %vm110_vm1, %v14846_v27 }
 0x1e5   :  { %12072 = vmatmul.msk.f32.vlgmr.msra.gmra.mxu2 %vm110_vm1, %v14846_v27  ;;  %12073 = vmatmul.msk.f32.vlgmr.msrb.gmra.mxu3 %vm110_vm1, %v14846_v27  ;;  %v2650_v27 = vadd.f32 %v14796_v7, %v2267_v63  ;;  %v12769_v7 = vunpack.i.h.bf16 %v14981_v39  ;;  %v15027_v63 = vpop.permute.xlu1 %12776 }
 0x1e6   :  { %12075 = vmatmul.msk.f32.vlgmr.msra.gmra.mxu0 %vm110_vm1, %v14974_v52  ;;  %4753 = vmatpush.msra.mxu1 %v4610_v17 }
 0x1e7   :  { %4773 = vmatpush.msra.mxu2 %v4611_v1  ;;  %4793 = vmatpush.msrb.mxu3 %v4612_v5  ;;  %v4614_v1 = vsel %vm4604_vm12, %v12759_v40, %v12754_v46  ;;  %v4616_v5 = vsel %vm4604_vm12, %v12758_v50, %v12763_v58  ;;  %v4617_v6 = vsel %vm4604_vm12, %v12763_v58, %v12769_v7  ;;  %v12782_v40 = vpop.permute.xlu2 %12781 }
 0x1e8   :  { %v2920_v55 = vpop.f32.mrf.mxu2  ;;  %v2940_v25 = vpop.f32.mrf.mxu3  ;;  %4813 = vmatpush.msra.mxu0 %v4613_v53  ;;  %v2271_v53 = vadd.f32 %v14727_v10, %v14617_v42  ;;  %v12764_v42 = vunpack.i.h.bf16 %v14967_v29  ;;  %12916 = vrot.lane.b32.xlu2 %v12915_v3, %s13290_s30  ;;  %s13292_s30 = smov 29  }
 0x1e9   :  { %v15009_v26 = vadd.f32 %v2920_v55, %v14839_v20  ;;  %v15011_v47 = vadd.f32 %v2940_v25, %v2650_v27  ;;  %v15013_v22 = vpop.f32.mrf.mxu1  ;;  %v4615_v20 = vsel %vm4604_vm12, %v12754_v46, %v12758_v50  ;;  %v12768_v55 = vunpack.i.l.bf16 %v14981_v39  ;;  %12951 = vrot.lane.b32.xlu0 %v14449_v19, %s13291_s24 }
 0x1ea   :  { %v2654_v27 = vadd.f32 %v14850_v21, %v2271_v53  ;;  %v12774_v25 = vunpack.i.h.bf16 %v12772_v41  ;;  %v12773_v50 = vunpack.i.l.bf16 %v12772_v41  ;;  %v12783_v21 = vunpack.i.l.bf16 %v12782_v40  ;;  %12971 = vrot.lane.b32.xlu1 %v14643_v48, %s13291_s24 }
 0x1eb   :  { %v15020_v17 = vpop.f32.mrf.mxu0  ;;  %v4618_v39 = vsel %vm4604_vm12, %v12769_v7, %v12764_v42  ;;  %v12779_v53 = vunpack.i.h.bf16 %v15027_v63 }
 0x1ec   :  { %12076 = vmatmul.msk.f32.vlgmr.msrb.gmra.mxu1 %vm110_vm1, %v14974_v52  ;;  %v4988_v41 = vsel %vm4987_vm13, %v12773_v50, %v12774_v25  ;;  %v4989_v19 = vsel %vm4987_vm13, %v12774_v25, %v12783_v21 }
 0x1ed   :  { %12077 = vmatmul.msk.f32.vlgmr.msrb.gmra.mxu2 %vm110_vm1, %v14974_v52  ;;  %12078 = vmatmul.msk.f32.vlgmr.msra.gmra.mxu3 %vm110_vm1, %v14974_v52  ;;  %v12792_v48 = vpop.permute.xlu1 %12791 }
 0x1ee   :  { %12079 = vmatmul.msk.f32.vlgmr.msrb.gmra.mxu0 %vm110_vm1, %v14974_v52  ;;  %4833 = vmatpush.msrb.mxu1 %v4614_v1  ;;  %v12787_v1 = vpop.permute.xlu0 %12786 }
 0x1ef   :  { %4853 = vmatpush.msrb.mxu2 %v4615_v20  ;;  %4873 = vmatpush.msra.mxu3 %v4616_v5  ;;  %v2643_v20 = vadd.f32 %v14766_v32, %v14650_v0  ;;  %v12778_v5 = vunpack.i.l.bf16 %v15027_v63  ;;  %v12788_v50 = vunpack.i.l.bf16 %v12787_v1 }
 0x1f0   :  { %v3000_v10 = vpop.f32.mrf.mxu2  ;;  %v3020_v46 = vpop.f32.mrf.mxu3  ;;  %4893 = vmatpush.msrb.mxu0 %v4617_v6  ;;  %v12784_v6 = vunpack.i.h.bf16 %v12782_v40  ;;  %12931 = vrot.lane.b32.xlu2 %v14823_v33, %s13291_s24 }
 0x1f1   :  { %v15045_v58 = vadd.f32 %v3000_v10, %v14890_v2  ;;  %v15047_v16 = vadd.f32 %v3020_v46, %v2654_v27  ;;  %v15049_v11 = vpop.f32.mrf.mxu1  ;;  %v4619_v2 = vsel %vm4604_vm12, %v12764_v42, %v12768_v55  ;;  %v3026_v7 = vadd.f32 %v14896_v49, %v2643_v20  ;;  %12966 = vrot.lane.b32.xlu0 %v14823_v33, %s13292_s30  ;;  %v15094_v46 = vpop.permute.xlu2 %12796 }
 0x1f2   :  { %v12793_v49 = vunpack.i.l.bf16 %v12792_v48  ;;  %12986 = vrot.lane.b32.xlu1 %v14716_v54, %s13292_s30  ;;  %v4990_v40 = vsel %vm4987_vm13, %v12783_v21, %v12778_v5  ;;  %v4992_v10 = vsel %vm4987_vm13, %v12779_v53, %v12784_v6  ;;  %v2647_v55 = vadd.f32 %v14792_v34, %v14681_v12 }
 0x1f3   :  { %v15055_v29 = vpop.f32.mrf.mxu0  ;;  %v12794_v34 = vunpack.i.h.bf16 %v12792_v48 }
 0x1f4   :  { %12080 = vmatmul.msk.f32.vlgmr.msra.gmra.mxu1 %vm110_vm1, %v14974_v52  ;;  %v4993_v54 = vsel %vm4987_vm13, %v12784_v6, %v12793_v49  ;;  %v3030_v25 = vadd.f32 %v14937_v9, %v2647_v55  ;;  %v15118_v9 = vld [vmem:[%s19817_s1 + $0x68] sm:$0xff]  ;;  %v12799_v55 = vunpack.i.h.bf16 %v15094_v46 }
 0x1f5   :  { %12081 = vmatmul.msk.f32.vlgmr.msra.gmra.mxu2 %vm110_vm1, %v14974_v52  ;;  %12082 = vmatmul.msk.f32.vlgmr.msrb.gmra.mxu3 %vm110_vm1, %v14974_v52 }
 0x1f6   :  { %12083 = vmatmul.msk.f32.vlgmr.msra.gmra.mxu0 %vm110_vm1, %v14974_v52  ;;  %4913 = vmatpush.msra.mxu1 %v4618_v39  ;;  %v12802_v33 = vpop.permute.xlu0 %12801  ;;  %v12789_v39 = vunpack.i.h.bf16 %v12787_v1  ;;  %v4994_v1 = vsel %vm4987_vm13, %v12793_v49, %v12788_v50 }
 0x1f7   :  { %4933 = vmatpush.msra.mxu2 %v4619_v2  ;;  %5036 = vmatpush.msrb.mxu3 %v4988_v41 }
 0x1f8   :  { %v3163_v0 = vpop.f32.mrf.mxu2  ;;  %v3183_v32 = vpop.f32.mrf.mxu3  ;;  %5056 = vmatpush.msra.mxu0 %v4989_v19  ;;  %v12803_v19 = vunpack.i.l.bf16 %v12802_v33  ;;  %v4996_v48 = vsel %vm4987_vm13, %v12789_v39, %v12794_v34 }
 0x1f9   :  { %v15077_v3 = vadd.f32 %v3163_v0, %v14929_v35  ;;  %v15079_v27 = vadd.f32 %v3183_v32, %v3026_v7  ;;  %v15081_v42 = vpop.f32.mrf.mxu1  ;;  %v4991_v35 = vsel %vm4987_vm13, %v12778_v5, %v12779_v53  ;;  %v15127_v5 = vpop.permute.xlu1 %12806  ;;  %v15141_v53 = vld [vmem:[%s19816_s0 + $0x40] sm:$0xff] }
 0x1fa   :  { %13001 = vrot.lane.b32.xlu1 %v14754_v4, %s13292_s30  ;;  %v2651_v4 = vadd.f32 %v14841_v15, %v14723_v59  ;;  %v4997_v0 = vsel %vm4987_vm13, %v12794_v34, %v12803_v19  ;;  %v12812_v32 = vpop.permute.xlu2 %12811  ;;  %v15146_v59 = vld [vmem:[%s19816_s0 + $0x38] sm:$0xff]  ;;  %v3023_v34 = vadd.f32 %v14892_v45, %v14762_v14 }
 0x1fb   :  { %v15087_v63 = vpop.f32.mrf.mxu0  ;;  %v12945_v15 = vpack.i.bf16 %v15141_v53, %v15146_v59 }
 0x1fc   :  { %12084 = vmatmul.msk.f32.vlgmr.msrb.gmra.mxu1 %vm110_vm1, %v14974_v52  ;;  %v3034_v49 = vadd.f32 %v14969_v57, %v2651_v4  ;;  %v12813_v57 = vunpack.i.l.bf16 %v12812_v32  ;;  %v3406_v45 = vadd.f32 %v15020_v17, %v3023_v34  ;;  %v12809_v4 = vunpack.i.h.bf16 %v15127_v5 }
 0x1fd   :  { %12085 = vmatmul.msk.f32.vlgmr.msrb.gmra.mxu2 %vm110_vm1, %v14974_v52  ;;  %12086 = vmatmul.msk.f32.vlgmr.msra.gmra.mxu3 %vm110_vm1, %v14974_v52 }
 0x1fe   :  { %12087 = vmatmul.msk.f32.vlgmr.msrb.gmra.mxu0 %vm110_vm1, %v14974_v52  ;;  %5076 = vmatpush.msrb.mxu1 %v4990_v40  ;;  %v12798_v40 = vunpack.i.l.bf16 %v15094_v46 }
 0x1ff   :  { %5096 = vmatpush.msrb.mxu2 %v4991_v35  ;;  %5116 = vmatpush.msra.mxu3 %v4992_v10 }
 0x200   :  { %v3243_v21 = vpop.f32.mrf.mxu2  ;;  %v3263_v12 = vpop.f32.mrf.mxu3  ;;  %5136 = vmatpush.msrb.mxu0 %v4993_v54  ;;  %v12804_v54 = vunpack.i.h.bf16 %v12802_v33  ;;  %12946 = vrot.lane.b32.xlu2 %v12945_v15, %s13291_s24  ;;  %v4998_v46 = vsel %vm4987_vm13, %v12803_v19, %v12798_v40  ;;  %v15190_v19 = vld [vmem:[%s19816_s0 + $0x68] sm:$0xff] }
 0x201   :  { %v15107_v2 = vadd.f32 %v3243_v21, %v14961_v62  ;;  %v15109_v41 = vadd.f32 %v3263_v12, %v3030_v25  ;;  %v15111_v20 = vpop.f32.mrf.mxu1  ;;  %v4995_v62 = vsel %vm4987_vm13, %v12788_v50, %v12789_v39  ;;  %v12817_v12 = vpop.permute.xlu0 %12816  ;;  %v12960_v14 = vpack.i.bf16 %v15190_v19, %v14871_v30 }
 0x202   :  { %13016 = vrot.lane.b32.xlu1 %v14831_v24, %s13293_s14  ;;  %v5000_v33 = vsel %vm4987_vm13, %v12799_v55, %v12804_v54  ;;  %v5001_v24 = vsel %vm4987_vm13, %v12804_v54, %v12813_v57  ;;  %v12822_v39 = vpop.permute.xlu1 %12821  ;;  %v12818_v15 = vunpack.i.l.bf16 %v12817_v12 }
 0x203   :  { %v15120_v7 = vpop.f32.mrf.mxu0  ;;  %v12824_v17 = vunpack.i.h.bf16 %v12822_v39 }
 0x204   :  { %12088 = vmatmul.msk.f32.vlgmr.msra.gmra.mxu1 %vm110_vm1, %v14974_v52 }
 0x205   :  { %12089 = vmatmul.msk.f32.vlgmr.msra.gmra.mxu2 %vm110_vm1, %v14974_v52  ;;  %12091 = vmatmul.msk.f32.vlgmr.msrb.gmra.mxu3 %vm110_vm1, %v15118_v9  ;;  %v15153_v52 = vld [vmem:[%s19816_s0 + $0x28] sm:$0xff] }
 0x206   :  { %12092 = vmatmul.msk.f32.vlgmr.msra.gmra.mxu0 %vm110_vm1, %v15118_v9  ;;  %5156 = vmatpush.msra.mxu1 %v4994_v1  ;;  %v12980_v6 = vpack.i.bf16 %v14828_v61, %v15153_v52  ;;  %v12814_v1 = vunpack.i.h.bf16 %v12812_v32 }
 0x207   :  { %5176 = vmatpush.msra.mxu2 %v4995_v62  ;;  %5196 = vmatpush.msrb.mxu3 %v4996_v48 }
 0x208   :  { %v3323_v35 = vpop.f32.mrf.mxu2  ;;  %v3343_v10 = vpop.f32.mrf.mxu3  ;;  %5216 = vmatpush.msra.mxu0 %v4997_v0  ;;  %12981 = vrot.lane.b32.xlu0 %v12980_v6, %s13292_s30  ;;  %v12808_v0 = vunpack.i.l.bf16 %v15127_v5  ;;  %v5002_v5 = vsel %vm4987_vm13, %v12813_v57, %v12814_v1  ;;  %v12995_v57 = vpack.i.bf16 %v14915_v37, %v14871_v30  ;;  %v3031_v1 = vadd.f32 %v14963_v36, %v14837_v23 }
 0x209   :  { %v15162_v25 = vadd.f32 %v3323_v35, %v15011_v47  ;;  %v15164_v50 = vadd.f32 %v3343_v10, %v3034_v49  ;;  %v15166_v61 = vpop.f32.mrf.mxu1  ;;  %v4999_v47 = vsel %vm4987_vm13, %v12798_v40, %v12799_v55  ;;  %12961 = vrot.lane.b32.xlu2 %v12960_v14, %s13291_s24  ;;  %v3027_v55 = vadd.f32 %v14931_v13, %v14788_v44  ;;  %v12832_v54 = vpop.permute.xlu0 %12831 }
 0x20a   :  { %13031 = vrot.lane.b32.xlu1 %v14880_v38, %s13293_s14  ;;  %v5371_v35 = vsel %vm5370_vm14, %v12808_v0, %v12809_v4  ;;  %v12827_v10 = vpop.permute.xlu2 %12826  ;;  %v5373_v38 = vsel %vm5370_vm14, %v12818_v15, %v12824_v17  ;;  %v12834_v30 = vunpack.i.h.bf16 %v12832_v54  ;;  %v15236_v37 = vpop.permute.xlu1 %12836 }
 0x20b   :  { %v15171_v21 = vpop.f32.mrf.mxu0  ;;  %v12828_v34 = vunpack.i.l.bf16 %v12827_v10  ;;  %v12829_v0 = vunpack.i.h.bf16 %v12827_v10 }
 0x20c   :  { %12093 = vmatmul.msk.f32.vlgmr.msrb.gmra.mxu1 %vm110_vm1, %v15118_v9 }
 0x20d   :  { %12094 = vmatmul.msk.f32.vlgmr.msrb.gmra.mxu2 %vm110_vm1, %v15118_v9  ;;  %12095 = vmatmul.msk.f32.vlgmr.msra.gmra.mxu3 %vm110_vm1, %v15118_v9 }
 0x20e   :  { %12096 = vmatmul.msk.f32.vlgmr.msrb.gmra.mxu0 %vm110_vm1, %v15118_v9  ;;  %5236 = vmatpush.msrb.mxu1 %v4998_v46  ;;  %v3410_v46 = vadd.f32 %v15055_v29, %v3027_v55 }
 0x20f   :  { %5256 = vmatpush.msrb.mxu2 %v4999_v47  ;;  %5276 = vmatpush.msra.mxu3 %v5000_v33  ;;  %v12819_v47 = vunpack.i.h.bf16 %v12817_v12  ;;  %v12823_v33 = vunpack.i.l.bf16 %v12822_v39 }
 0x210   :  { %v3403_v62 = vpop.f32.mrf.mxu2  ;;  %v3506_v48 = vpop.f32.mrf.mxu3  ;;  %5296 = vmatpush.msrb.mxu0 %v5001_v24  ;;  %12996 = vrot.lane.b32.xlu0 %v12995_v57, %s13292_s30  ;;  %v5378_v57 = vsel %vm5370_vm14, %v12834_v30, %v12829_v0 }
 0x211   :  { %v15199_v6 = vadd.f32 %v3403_v62, %v15047_v16  ;;  %v15201_v49 = vadd.f32 %v3506_v48, %v3406_v45  ;;  %v15203_v40 = vpop.f32.mrf.mxu1  ;;  %v5372_v16 = vsel %vm5370_vm14, %v12809_v4, %v12818_v15  ;;  %v5374_v12 = vsel %vm5370_vm14, %v12824_v17, %v12819_v47  ;;  %v15257_v48 = vld [vmem:[%s19816_s0 + $0x10] sm:$0xff]  ;;  %v12847_v10 = vpop.permute.xlu0 %12846 }
 0x212   :  { %13046 = vrot.lane.b32.xlu1 %v14919_v18, %s13293_s14  ;;  %v5376_v39 = vsel %vm5370_vm14, %v12823_v33, %v12828_v34  ;;  %v5377_v18 = vsel %vm5370_vm14, %v12828_v34, %v12834_v30  ;;  %v12842_v62 = vpop.permute.xlu2 %12841  ;;  %v12975_v23 = vpack.i.bf16 %v14995_v8, %v15257_v48  ;;  %v15263_v36 = vpack.i.bf16 %v15257_v48, %v14820_v43 }
 0x213   :  { %v15207_v32 = vpop.f32.mrf.mxu0  ;;  %v3414_v4 = vadd.f32 %v15087_v63, %v3031_v1  ;;  %v15280_v63 = vld [vmem:[%s19817_s1 + $0x70] sm:$0xff] }
 0x214   :  { %12097 = vmatmul.msk.f32.vlgmr.msra.gmra.mxu1 %vm110_vm1, %v15118_v9  ;;  %12976 = vrot.lane.b32.xlu2 %v12975_v23, %s13292_s30 }
 0x215   :  { %12098 = vmatmul.msk.f32.vlgmr.msra.gmra.mxu2 %vm110_vm1, %v15118_v9  ;;  %12099 = vmatmul.msk.f32.vlgmr.msrb.gmra.mxu3 %vm110_vm1, %v15118_v9 }
 0x216   :  { %12100 = vmatmul.msk.f32.vlgmr.msra.gmra.mxu0 %vm110_vm1, %v15118_v9  ;;  %5316 = vmatpush.msra.mxu1 %v5002_v5  ;;  %v12833_v5 = vunpack.i.l.bf16 %v12832_v54 }
 0x217   :  { %5419 = vmatpush.msra.mxu2 %v5371_v35  ;;  %5439 = vmatpush.msrb.mxu3 %v5372_v16  ;;  %v12838_v35 = vunpack.i.l.bf16 %v15236_v37 }
 0x218   :  { %v3566_v44 = vpop.f32.mrf.mxu2  ;;  %v3586_v13 = vpop.f32.mrf.mxu3  ;;  %5459 = vmatpush.msra.mxu0 %v5373_v38  ;;  %v12844_v38 = vunpack.i.h.bf16 %v12842_v62  ;;  %13011 = vrot.lane.b32.xlu0 %v15263_v36, %s13293_s14 }
 0x219   :  { %v15228_v24 = vadd.f32 %v3566_v44, %v15079_v27  ;;  %v15230_v14 = vadd.f32 %v3586_v13, %v3410_v46  ;;  %v15232_v45 = vpop.f32.mrf.mxu1  ;;  %v5375_v27 = vsel %vm5370_vm14, %v12819_v47, %v12823_v33  ;;  %v5380_v46 = vsel %vm5370_vm14, %v12833_v5, %v12838_v35  ;;  %v12852_v47 = vpop.permute.xlu1 %12851 }
 0x21a   :  { %v3035_v44 = vadd.f32 %v15013_v22, %v14888_v56  ;;  %v5381_v13 = vsel %vm5370_vm14, %v12838_v35, %v12844_v38  ;;  %v12839_v33 = vunpack.i.h.bf16 %v15236_v37  ;;  %v12990_v56 = vpack.i.bf16 %v15146_v59, %v14876_v60 }
 0x21b   :  { %v15238_v29 = vpop.f32.mrf.mxu0  ;;  %v13025_v22 = vpack.i.bf16 %v15146_v59, %v14995_v8  ;;  %v12849_v37 = vunpack.i.h.bf16 %v12847_v10  ;;  %v12853_v35 = vunpack.i.l.bf16 %v12852_v47 }
 0x21c   :  { %12101 = vmatmul.msk.f32.vlgmr.msrb.gmra.mxu1 %vm110_vm1, %v15118_v9  ;;  %12991 = vrot.lane.b32.xlu2 %v12990_v56, %s13292_s30  ;;  %v5382_v23 = vsel %vm5370_vm14, %v12844_v38, %v12839_v33 }
 0x21d   :  { %12102 = vmatmul.msk.f32.vlgmr.msrb.gmra.mxu2 %vm110_vm1, %v15118_v9  ;;  %12103 = vmatmul.msk.f32.vlgmr.msra.gmra.mxu3 %vm110_vm1, %v15118_v9 }
 0x21e   :  { %12104 = vmatmul.msk.f32.vlgmr.msrb.gmra.mxu0 %vm110_vm1, %v15118_v9  ;;  %5479 = vmatpush.msrb.mxu1 %v5374_v12  ;;  %v12843_v12 = vunpack.i.l.bf16 %v12842_v62 }
 0x21f   :  { %5499 = vmatpush.msrb.mxu2 %v5375_v27  ;;  %5519 = vmatpush.msra.mxu3 %v5376_v39  ;;  %v12848_v27 = vunpack.i.l.bf16 %v12847_v10  ;;  %v12854_v10 = vunpack.i.h.bf16 %v12852_v47 }
 0x220   :  { %v3646_v15 = vpop.f32.mrf.mxu2  ;;  %v3666_v17 = vpop.f32.mrf.mxu3  ;;  %5539 = vmatpush.msrb.mxu0 %v5377_v18  ;;  %13026 = vrot.lane.b32.xlu0 %v13025_v22, %s13293_s14 }
 0x221   :  { %v15269_v16 = vadd.f32 %v3646_v15, %v15109_v41  ;;  %v15271_v55 = vadd.f32 %v3666_v17, %v3414_v4  ;;  %v15273_v43 = vpop.f32.mrf.mxu1  ;;  %v5379_v41 = vsel %vm5370_vm14, %v12829_v0, %v12833_v5  ;;  %v5384_v62 = vsel %vm5370_vm14, %v12843_v12, %v12848_v27  ;;  %v12862_v4 = vpop.permute.xlu0 %12861 }
 0x222   :  { %v12857_v60 = vpop.permute.xlu2 %12856  ;;  %v3407_v0 = vadd.f32 %v15049_v11, %v14927_v28  ;;  %v5385_v15 = vsel %vm5370_vm14, %v12848_v27, %v12849_v37  ;;  %v12867_v17 = vpop.permute.xlu1 %12866  ;;  %v5755_v47 = vsel %vm5753_vm15, %v12853_v35, %v12854_v10  ;;  %v12863_v27 = vunpack.i.l.bf16 %v12862_v4 }
 0x223   :  { %v15282_v54 = vpop.f32.mrf.mxu0  ;;  %v12858_v38 = vunpack.i.l.bf16 %v12857_v60 }
 0x224   :  { %12105 = vmatmul.msk.f32.vlgmr.msra.gmra.mxu1 %vm110_vm1, %v15118_v9  ;;  %v3418_v9 = vadd.f32 %v15120_v7, %v3035_v44  ;;  %v3790_v5 = vadd.f32 %v15171_v21, %v3407_v0 }
 0x225   :  { %12107 = vmatmul.msk.f32.vlgmr.msra.gmra.mxu2 %vm110_vm1, %v15280_v63  ;;  %12108 = vmatmul.msk.f32.vlgmr.msrb.gmra.mxu3 %vm110_vm1, %v15280_v63  ;;  %v5754_v21 = vsel %vm5753_vm15, %v12858_v38, %v12853_v35 }
 0x226   :  { %12109 = vmatmul.msk.f32.vlgmr.msra.gmra.mxu0 %vm110_vm1, %v15280_v63  ;;  %5559 = vmatpush.msra.mxu1 %v5378_v57  ;;  %v12859_v57 = vunpack.i.h.bf16 %v12857_v60 }
 0x227   :  { %5579 = vmatpush.msra.mxu2 %v5379_v41  ;;  %5599 = vmatpush.msrb.mxu3 %v5380_v46 }
 0x228   :  { %v3726_v34 = vpop.f32.mrf.mxu2  ;;  %v3746_v30 = vpop.f32.mrf.mxu3  ;;  %5619 = vmatpush.msra.mxu0 %v5381_v13  ;;  %v12868_v13 = vunpack.i.l.bf16 %v12867_v17 }
 0x229   :  { %v15305_v39 = vadd.f32 %v3726_v34, %v15164_v50  ;;  %v15307_v1 = vadd.f32 %v3746_v30, %v3418_v9  ;;  %v15309_v7 = vpop.f32.mrf.mxu1  ;;  %v5383_v50 = vsel %vm5370_vm14, %v12839_v33, %v12843_v12  ;;  %v5756_v33 = vsel %vm5753_vm15, %v12854_v10, %v12859_v57  ;;  %v12877_v34 = vpop.permute.xlu0 %12876  ;;  %v15356_v30 = vld [vmem:[%s19816_s0 + $0x70] sm:$0xff] }
 0x22a   :  { %v12872_v56 = vpop.permute.xlu2 %12871  ;;  %v5757_v22 = vsel %vm5753_vm15, %v12859_v57, %v12868_v13  ;;  %v5758_v35 = vsel %vm5753_vm15, %v12868_v13, %v12863_v27  ;;  %v15384_v38 = vpop.permute.xlu1 %12881  ;;  %v13020_v10 = vpack.i.bf16 %v15000_v31, %v15153_v52  ;;  %v13040_v57 = vpack.i.bf16 %v15356_v30, %v15190_v19 }
 0x22b   :  { %v15313_v18 = vpop.f32.mrf.mxu0 }
 0x22c   :  { %12110 = vmatmul.msk.f32.vlgmr.msrb.gmra.mxu1 %vm110_vm1, %v15280_v63  ;;  %13041 = vrot.lane.b32.xlu0 %v13040_v57, %s13293_s14 }
 0x22d   :  { %12111 = vmatmul.msk.f32.vlgmr.msrb.gmra.mxu2 %vm110_vm1, %v15280_v63  ;;  %12112 = vmatmul.msk.f32.vlgmr.msra.gmra.mxu3 %vm110_vm1, %v15280_v63 }
 0x22e   :  { %12113 = vmatmul.msk.f32.vlgmr.msrb.gmra.mxu0 %vm110_vm1, %v15280_v63  ;;  %5639 = vmatpush.msrb.mxu1 %v5382_v23  ;;  %v12869_v23 = vunpack.i.h.bf16 %v12867_v17 }
 0x22f   :  { %5659 = vmatpush.msrb.mxu2 %v5383_v50  ;;  %5679 = vmatpush.msra.mxu3 %v5384_v62  ;;  %v12864_v50 = vunpack.i.h.bf16 %v12862_v4 }
 0x230   :  { %v3889_v28 = vpop.f32.mrf.mxu2  ;;  %v3909_v11 = vpop.f32.mrf.mxu3  ;;  %5699 = vmatpush.msrb.mxu0 %v5385_v15 }
 0x231   :  { %v15331_v41 = vadd.f32 %v3889_v28, %v15201_v49  ;;  %v15333_v46 = vadd.f32 %v3909_v11, %v3790_v5  ;;  %v15335_v44 = vpop.f32.mrf.mxu1  ;;  %v3411_v49 = vadd.f32 %v15081_v42, %v14959_v51  ;;  %v15361_v51 = vld [vmem:[%s19816_s0 + $0x78] sm:$0xff]  ;;  %v12878_v5 = vunpack.i.l.bf16 %v12877_v34 }
 0x232   :  { %v15365_v42 = vpack.i.bf16 %v15361_v51, %v15356_v30  ;;  %v5759_v4 = vsel %vm5753_vm15, %v12863_v27, %v12864_v50  ;;  %v5760_v17 = vsel %vm5753_vm15, %v12864_v50, %v12869_v23  ;;  %v12887_v11 = vpop.permute.xlu2 %12886  ;;  %v12897_v50 = vpop.permute.xlu1 %12896 }
 0x233   :  { %v15337_v9 = vpop.f32.mrf.mxu0  ;;  %v3794_v12 = vadd.f32 %v15207_v32, %v3411_v49  ;;  %v5761_v28 = vsel %vm5753_vm15, %v12869_v23, %v12878_v5 }
 0x234   :  { %12114 = vmatmul.msk.f32.vlgmr.msra.gmra.mxu1 %vm110_vm1, %v15280_v63  ;;  %13006 = vrot.lane.b32.xlu2 %v15365_v42, %s13292_s30 }
 0x235   :  { %12115 = vmatmul.msk.f32.vlgmr.msra.gmra.mxu2 %vm110_vm1, %v15280_v63  ;;  %12116 = vmatmul.msk.f32.vlgmr.msrb.gmra.mxu3 %vm110_vm1, %v15280_v63 }
 0x236   :  { %12117 = vmatmul.msk.f32.vlgmr.msra.gmra.mxu0 %vm110_vm1, %v15280_v63  ;;  %5802 = vmatpush.msra.mxu1 %v5754_v21 }
 0x237   :  { %5822 = vmatpush.msra.mxu2 %v5755_v47  ;;  %5842 = vmatpush.msrb.mxu3 %v5756_v33  ;;  %v12874_v47 = vunpack.i.h.bf16 %v12872_v56  ;;  %v12879_v33 = vunpack.i.h.bf16 %v12877_v34 }
 0x238   :  { %v3969_v37 = vpop.f32.mrf.mxu2  ;;  %v3989_v60 = vpop.f32.mrf.mxu3  ;;  %5862 = vmatpush.msra.mxu0 %v5757_v22 }
 0x239   :  { %v15371_v62 = vadd.f32 %v3969_v37, %v15230_v14  ;;  %v15373_v0 = vadd.f32 %v3989_v60, %v3794_v12  ;;  %v15375_v15 = vpop.f32.mrf.mxu1  ;;  %v3415_v14 = vadd.f32 %v15111_v20, %v15009_v26  ;;  %v12873_v20 = vunpack.i.l.bf16 %v12872_v56  ;;  %v12892_v37 = vpop.permute.xlu0 %12891 }
 0x23a   :  { %v12888_v12 = vunpack.i.l.bf16 %v12887_v11  ;;  %v5764_v27 = vsel %vm5753_vm15, %v12874_v47, %v12879_v33  ;;  %v3419_v60 = vadd.f32 %v15166_v61, %v15045_v58 }
 0x23b   :  { %v15377_v32 = vpop.f32.mrf.mxu0  ;;  %v3798_v26 = vadd.f32 %v15238_v29, %v3415_v14  ;;  %v15411_v29 = vld [vmem:[%s19817_s1 + $0x78] sm:$0xff]  ;;  %v5762_v34 = vsel %vm5753_vm15, %v12878_v5, %v12873_v20  ;;  %v12884_v14 = vunpack.i.h.bf16 %v15384_v38 }
 0x23c   :  { %12118 = vmatmul.msk.f32.vlgmr.msrb.gmra.mxu1 %vm110_vm1, %v15280_v63  ;;  %13021 = vrot.lane.b32.xlu2 %v13020_v10, %s13293_s14  ;;  %v5765_v23 = vsel %vm5753_vm15, %v12879_v33, %v12888_v12  ;;  %v15433_v5 = vld [vmem:[%s19816_s0 + $0x58] sm:$0xff]  ;;  %v3802_v61 = vadd.f32 %v15282_v54, %v3419_v60  ;;  %v12899_v54 = vunpack.i.h.bf16 %v12897_v50 }
 0x23d   :  { %12119 = vmatmul.msk.f32.vlgmr.msrb.gmra.mxu2 %vm110_vm1, %v15280_v63  ;;  %12120 = vmatmul.msk.f32.vlgmr.msra.gmra.mxu3 %vm110_vm1, %v15280_v63  ;;  %v13035_v58 = vpack.i.bf16 %v15433_v5, %v15141_v53 }
 0x23e   :  { %12121 = vmatmul.msk.f32.vlgmr.msrb.gmra.mxu0 %vm110_vm1, %v15280_v63  ;;  %5882 = vmatpush.msrb.mxu1 %v5758_v35  ;;  %v12883_v35 = vunpack.i.l.bf16 %v15384_v38 }
 0x23f   :  { %5902 = vmatpush.msrb.mxu2 %v5759_v4  ;;  %5922 = vmatpush.msra.mxu3 %v5760_v17 }
 0x240   :  { %v4049_v13 = vpop.f32.mrf.mxu2  ;;  %v4069_v21 = vpop.f32.mrf.mxu3  ;;  %5942 = vmatpush.msrb.mxu0 %v5761_v28  ;;  %v12889_v28 = vunpack.i.h.bf16 %v12887_v11  ;;  %v5767_v38 = vsel %vm5753_vm15, %v12883_v35, %v12884_v14 }
 0x241   :  { %v15402_v63 = vadd.f32 %v4049_v13, %v15271_v55  ;;  %v15404_v49 = vadd.f32 %v4069_v21, %v3798_v26  ;;  %v15406_v22 = vpop.f32.mrf.mxu1  ;;  %v5763_v55 = vsel %vm5753_vm15, %v12873_v20, %v12874_v47  ;;  %v12898_v20 = vunpack.i.l.bf16 %v12897_v50 }
 0x242   :  { %v5766_v21 = vsel %vm5753_vm15, %v12888_v12, %v12883_v35  ;;  %v5768_v11 = vsel %vm5753_vm15, %v12884_v14, %v12889_v28  ;;  %v3791_v47 = vadd.f32 %v15203_v40, %v15077_v3  ;;  %v12907_v12 = vpop.permute.xlu0 %12906  ;;  %v12894_v40 = vunpack.i.h.bf16 %v12892_v37 }
 0x243   :  { %v15414_v56 = vpop.f32.mrf.mxu0  ;;  %v6137_v33 = vsel %vm6136_vm6, %v12898_v20, %v12899_v54 }
 0x244   :  { %12123 = vmatmul.msk.f32.vlgmr.msra.gmra.mxu1 %vm110_vm1, %v15411_v29  ;;  %13036 = vrot.lane.b32.xlu2 %v13035_v58, %s13293_s14 }
 0x245   :  { %12124 = vmatmul.msk.f32.vlgmr.msra.gmra.mxu2 %vm110_vm1, %v15411_v29  ;;  %12125 = vmatmul.msk.f32.vlgmr.msrb.gmra.mxu3 %vm110_vm1, %v15411_v29 }
 0x246   :  { %12126 = vmatmul.msk.f32.vlgmr.msra.gmra.mxu0 %vm110_vm1, %v15411_v29  ;;  %5962 = vmatpush.msra.mxu1 %v5762_v34  ;;  %v4174_v34 = vadd.f32 %v15313_v18, %v3791_v47  ;;  %v15474_v18 = vpop.permute.xlu1 %12911 }
 0x247   :  { %5982 = vmatpush.msra.mxu2 %v5763_v55  ;;  %6002 = vmatpush.msrb.mxu3 %v5764_v27  ;;  %v12893_v55 = vunpack.i.l.bf16 %v12892_v37 }
 0x248   :  { %v4129_v4 = vpop.f32.mrf.mxu2  ;;  %v4149_v17 = vpop.f32.mrf.mxu3  ;;  %6022 = vmatpush.msra.mxu0 %v5765_v23 }
 0x249   :  { %v15442_v10 = vadd.f32 %v4129_v4, %v15307_v1  ;;  %v15444_v57 = vadd.f32 %v4149_v17, %v3802_v61  ;;  %v15446_v26 = vpop.f32.mrf.mxu1  ;;  %v12902_v1 = vpop.permute.xlu2 %12901  ;;  %v12909_v61 = vunpack.i.h.bf16 %v12907_v12  ;;  %v6138_v4 = vsel %vm6136_vm6, %v12899_v54, %v12893_v55 }
 0x24a   :  { %v12903_v60 = vunpack.i.l.bf16 %v12902_v1  ;;  %v6139_v37 = vsel %vm6136_vm6, %v12893_v55, %v12894_v40  ;;  %v12904_v20 = vunpack.i.h.bf16 %v12902_v1  ;;  %v15508_v1 = vld [vmem:[%s19817_s1 + $0x80] sm:$0xff] }
 0x24b   :  { %v15448_v13 = vpop.f32.mrf.mxu0  ;;  %v15501_v55 = vpop.permute.xlu0 %12921 }
 0x24c   :  { %12127 = vmatmul.msk.f32.vlgmr.msrb.gmra.mxu1 %vm110_vm1, %v15411_v29  ;;  %13051 = vrot.lane.b32.xlu2 %v15263_v36, %s13275_s23  ;;  %v6140_v17 = vsel %vm6136_vm6, %v12894_v40, %v12903_v60  ;;  %v6141_v14 = vsel %vm6136_vm6, %v12903_v60, %v12909_v61  ;;  %v3799_v40 = vadd.f32 %v15273_v43, %v15162_v25 }
 0x24d   :  { %12128 = vmatmul.msk.f32.vlgmr.msrb.gmra.mxu2 %vm110_vm1, %v15411_v29  ;;  %12129 = vmatmul.msk.f32.vlgmr.msra.gmra.mxu3 %vm110_vm1, %v15411_v29 }
 0x24e   :  { %12130 = vmatmul.msk.f32.vlgmr.msrb.gmra.mxu0 %vm110_vm1, %v15411_v29  ;;  %6042 = vmatpush.msrb.mxu1 %v5766_v21  ;;  %v4182_v43 = vadd.f32 %v15377_v32, %v3799_v40 }
 0x24f   :  { %6062 = vmatpush.msrb.mxu2 %v5767_v38  ;;  %6082 = vmatpush.msra.mxu3 %v5768_v11  ;;  %v12913_v38 = vunpack.i.l.bf16 %v15474_v18 }
 0x250   :  { %v4292_v27 = vpop.f32.mrf.mxu2  ;;  %v4312_v3 = vpop.f32.mrf.mxu3  ;;  %6185 = vmatpush.msrb.mxu0 %v6137_v33 }
 0x251   :  { %v15468_v23 = vadd.f32 %v4292_v27, %v15333_v46  ;;  %v15470_v50 = vadd.f32 %v4312_v3, %v4174_v34  ;;  %v15472_v58 = vpop.f32.mrf.mxu1  ;;  %v3795_v46 = vadd.f32 %v15232_v45, %v15107_v2  ;;  %v12917_v28 = vpop.permute.xlu2 %12916  ;;  %v12908_v45 = vunpack.i.l.bf16 %v12907_v12 }
 0x252   :  { %v12919_v34 = vunpack.i.h.bf16 %v12917_v28  ;;  %v6142_v12 = vsel %vm6136_vm6, %v12909_v61, %v12904_v20  ;;  %v12927_v3 = vpop.permute.xlu1 %12926  ;;  %v15527_v61 = vld [vmem:[%s19816_s0 + $0x18] sm:$0xff] }
 0x253   :  { %v15476_v35 = vpop.f32.mrf.mxu0  ;;  %v4178_v54 = vadd.f32 %v15337_v9, %v3795_v46  ;;  %v6144_v27 = vsel %vm6136_vm6, %v12908_v45, %v12913_v38  ;;  %v13060_v25 = vpack.i.bf16 %v15000_v31, %v15527_v61  ;;  %v12918_v46 = vunpack.i.l.bf16 %v12917_v28 }
 0x254   :  { %12131 = vmatmul.msk.f32.vlgmr.msra.gmra.mxu1 %vm110_vm1, %v15411_v29  ;;  %v6145_v60 = vsel %vm6136_vm6, %v12913_v38, %v12919_v34  ;;  %v12928_v40 = vunpack.i.l.bf16 %v12927_v3 }
 0x255   :  { %12132 = vmatmul.msk.f32.vlgmr.msra.gmra.mxu2 %vm110_vm1, %v15411_v29  ;;  %12133 = vmatmul.msk.f32.vlgmr.msrb.gmra.mxu3 %vm110_vm1, %v15411_v29 }
 0x256   :  { %12134 = vmatmul.msk.f32.vlgmr.msra.gmra.mxu0 %vm110_vm1, %v15411_v29  ;;  %6205 = vmatpush.msra.mxu1 %v6138_v4  ;;  %v12914_v4 = vunpack.i.h.bf16 %v15474_v18  ;;  %v12929_v18 = vunpack.i.h.bf16 %v12927_v3 }
 0x257   :  { %6225 = vmatpush.msra.mxu2 %v6139_v37  ;;  %6245 = vmatpush.msrb.mxu3 %v6140_v17 }
 0x258   :  { %v4372_v21 = vpop.f32.mrf.mxu2  ;;  %v4392_v2 = vpop.f32.mrf.mxu3  ;;  %6265 = vmatpush.msra.mxu0 %v6141_v14  ;;  %v12923_v14 = vunpack.i.l.bf16 %v15501_v55  ;;  %13061 = vrot.lane.b32.xlu1 %v13060_v25, %s13275_s23  ;;  %v6147_v28 = vsel %vm6136_vm6, %v12914_v4, %v12918_v46 }
 0x259   :  { %v15495_v11 = vadd.f32 %v4372_v21, %v15373_v0  ;;  %v15497_v47 = vadd.f32 %v4392_v2, %v4178_v54  ;;  %v15499_v33 = vpop.f32.mrf.mxu1  ;;  %v6143_v0 = vsel %vm6136_vm6, %v12904_v20, %v12908_v45  ;;  %v12932_v20 = vpop.permute.xlu2 %12931  ;;  %v3803_v2 = vadd.f32 %v15309_v7, %v15199_v6 }
 0x25a   :  { %v12937_v21 = vpop.permute.xlu0 %12936  ;;  %v6149_v45 = vsel %vm6136_vm6, %v12923_v14, %v12929_v18  ;;  %v12942_v38 = vpop.permute.xlu1 %12941  ;;  %v12933_v25 = vunpack.i.l.bf16 %v12932_v20 }
 0x25b   :  { %v15503_v9 = vpop.f32.mrf.mxu0  ;;  %v4186_v7 = vadd.f32 %v15414_v56, %v3803_v2  ;;  %v12944_v2 = vunpack.i.h.bf16 %v12942_v38 }
 0x25c   :  { %12135 = vmatmul.msk.f32.vlgmr.msrb.gmra.mxu1 %vm110_vm1, %v15411_v29 }
 0x25d   :  { %12136 = vmatmul.msk.f32.vlgmr.msrb.gmra.mxu2 %vm110_vm1, %v15411_v29  ;;  %12137 = vmatmul.msk.f32.vlgmr.msra.gmra.mxu3 %vm110_vm1, %v15411_v29  ;;  %v13055_v29 = vpack.i.bf16 %v15153_v52, %v14995_v8  ;;  %v6146_v52 = vsel %vm6136_vm6, %v12919_v34, %v12914_v4  ;;  %v15564_v34 = vld [vmem:[%s19816_s0 + $0x50] sm:$0xff] }
 0x25e   :  { %12139 = vmatmul.msk.f32.vlgmr.msrb.gmra.mxu0 %vm110_vm1, %v15508_v1  ;;  %6285 = vmatpush.msrb.mxu1 %v6142_v12  ;;  %v13070_v6 = vpack.i.bf16 %v15564_v34, %v15146_v59  ;;  %v12924_v12 = vunpack.i.h.bf16 %v15501_v55 }
 0x25f   :  { %6305 = vmatpush.msrb.mxu2 %v6143_v0  ;;  %6325 = vmatpush.msra.mxu3 %v6144_v27 }
 0x260   :  { %v4452_v37 = vpop.f32.mrf.mxu2  ;;  %v4472_v17 = vpop.f32.mrf.mxu3  ;;  %6345 = vmatpush.msrb.mxu0 %v6145_v60  ;;  %13056 = vrot.lane.b32.xlu0 %v13055_v29, %s13275_s23  ;;  %v12934_v60 = vunpack.i.h.bf16 %v12932_v20  ;;  %v6150_v55 = vsel %vm6136_vm6, %v12929_v18, %v12924_v12  ;;  %v6151_v3 = vsel %vm6136_vm6, %v12924_v12, %v12928_v40  ;;  %v15597_v20 = vld [vmem:[%s19816_s0 + $0x60] sm:$0xff]  ;;  %v4179_v40 = vadd.f32 %v15375_v15, %v15269_v16 }
 0x261   :  { %v15538_v54 = vadd.f32 %v4452_v37, %v15404_v49  ;;  %v15540_v31 = vadd.f32 %v4472_v17, %v4182_v43  ;;  %v15542_v32 = vpop.f32.mrf.mxu1  ;;  %v6148_v49 = vsel %vm6136_vm6, %v12918_v46, %v12923_v14  ;;  %v12943_v37 = vunpack.i.l.bf16 %v12942_v38  ;;  %v12947_v17 = vpop.permute.xlu2 %12946 }
 0x262   :  { %v4175_v46 = vadd.f32 %v15335_v44, %v15228_v24  ;;  %v12952_v18 = vpop.permute.xlu0 %12951  ;;  %v13075_v24 = vpack.i.bf16 %v15190_v19, %v15597_v20  ;;  %v12957_v38 = vpop.permute.xlu1 %12956  ;;  %v12949_v15 = vunpack.i.h.bf16 %v12947_v17 }
 0x263   :  { %v15545_v8 = vpop.f32.mrf.mxu0  ;;  %v6521_v14 = vsel %vm6519_vm7, %v12934_v60, %v12943_v37 }
 0x264   :  { %12140 = vmatmul.msk.f32.vlgmr.msra.gmra.mxu1 %vm110_vm1, %v15508_v1  ;;  %v4558_v44 = vadd.f32 %v15448_v13, %v4175_v46  ;;  %13076 = vrot.lane.b32.xlu1 %v13075_v24, %s13275_s23 }
 0x265   :  { %12141 = vmatmul.msk.f32.vlgmr.msra.gmra.mxu2 %vm110_vm1, %v15508_v1  ;;  %12142 = vmatmul.msk.f32.vlgmr.msrb.gmra.mxu3 %vm110_vm1, %v15508_v1 }
 0x266   :  { %12143 = vmatmul.msk.f32.vlgmr.msra.gmra.mxu0 %vm110_vm1, %v15508_v1  ;;  %6365 = vmatpush.msra.mxu1 %v6146_v52  ;;  %v12938_v52 = vunpack.i.l.bf16 %v12937_v21 }
 0x267   :  { %6385 = vmatpush.msra.mxu2 %v6147_v28  ;;  %6405 = vmatpush.msrb.mxu3 %v6148_v49 }
 0x268   :  { %v4532_v0 = vpop.f32.mrf.mxu2  ;;  %v4552_v27 = vpop.f32.mrf.mxu3  ;;  %6425 = vmatpush.msra.mxu0 %v6149_v45  ;;  %13071 = vrot.lane.b32.xlu0 %v13070_v6, %s13275_s23  ;;  %v12939_v45 = vunpack.i.h.bf16 %v12937_v21 }
 0x269   :  { %v15571_v43 = vadd.f32 %v4532_v0, %v15444_v57  ;;  %v15573_v4 = vadd.f32 %v4552_v27, %v4186_v7  ;;  %v15575_v29 = vpop.f32.mrf.mxu1  ;;  %v6520_v57 = vsel %vm6519_vm7, %v12933_v25, %v12934_v60  ;;  %v12953_v0 = vunpack.i.l.bf16 %v12952_v18  ;;  %v12962_v60 = vpop.permute.xlu2 %12961 }
 0x26a   :  { %v6522_v27 = vsel %vm6519_vm7, %v12943_v37, %v12938_v52  ;;  %v6523_v21 = vsel %vm6519_vm7, %v12938_v52, %v12939_v45  ;;  %v4562_v25 = vadd.f32 %v15476_v35, %v4179_v40  ;;  %v12948_v37 = vunpack.i.l.bf16 %v12947_v17  ;;  %v15641_v35 = vld [vmem:[%s19817_s1 + $0x88] sm:$0xff]  ;;  %v15650_v52 = vpop.permute.xlu0 %12966 }
 0x26b   :  { %v15578_v56 = vpop.f32.mrf.mxu0  ;;  %v12963_v24 = vunpack.i.l.bf16 %v12962_v60  ;;  %v12959_v40 = vunpack.i.h.bf16 %v12957_v38 }
 0x26c   :  { %12144 = vmatmul.msk.f32.vlgmr.msrb.gmra.mxu1 %vm110_vm1, %v15508_v1  ;;  %7984 = vrot.lane.b32.xlu1 %v15361_v51, %s13275_s23  ;;  %v6526_v17 = vsel %vm6519_vm7, %v12953_v0, %v12948_v37 }
 0x26d   :  { %12145 = vmatmul.msk.f32.vlgmr.msrb.gmra.mxu2 %vm110_vm1, %v15508_v1  ;;  %12146 = vmatmul.msk.f32.vlgmr.msra.gmra.mxu3 %vm110_vm1, %v15508_v1 }
 0x26e   :  { %12147 = vmatmul.msk.f32.vlgmr.msrb.gmra.mxu0 %vm110_vm1, %v15508_v1  ;;  %6445 = vmatpush.msrb.mxu1 %v6150_v55 }
 0x26f   :  { %6465 = vmatpush.msrb.mxu2 %v6151_v3  ;;  %6568 = vmatpush.msra.mxu3 %v6520_v57  ;;  %v12954_v3 = vunpack.i.h.bf16 %v12952_v18 }
 0x270   :  { %v4695_v28 = vpop.f32.mrf.mxu2  ;;  %v4715_v49 = vpop.f32.mrf.mxu3  ;;  %6588 = vmatpush.msrb.mxu0 %v6521_v14  ;;  %13086 = vrot.lane.b32.xlu0 %v15263_v36, %s13276_s20  ;;  %v6525_v36 = vsel %vm6519_vm7, %v12944_v2, %v12953_v0  ;;  %v12958_v0 = vunpack.i.l.bf16 %v12957_v38 }
 0x271   :  { %v15604_v6 = vadd.f32 %v4695_v28, %v15470_v50  ;;  %v15606_v7 = vadd.f32 %v4715_v49, %v4558_v44  ;;  %v15608_v12 = vpop.f32.mrf.mxu1  ;;  %v6524_v50 = vsel %vm6519_vm7, %v12939_v45, %v12944_v2  ;;  %v6528_v18 = vsel %vm6519_vm7, %v12949_v15, %v12954_v3  ;;  %v12972_v2 = vpop.permute.xlu1 %12971 }
 0x272   :  { %v4183_v28 = vadd.f32 %v15406_v22, %v15305_v39  ;;  %v6529_v49 = vsel %vm6519_vm7, %v12954_v3, %v12963_v24  ;;  %v15665_v39 = vld [vmem:[%s19816_s0 + $0x48] sm:$0xff]  ;;  %v4555_v3 = vadd.f32 %v15446_v26, %v15331_v41  ;;  %v12974_v26 = vunpack.i.h.bf16 %v12972_v2 }
 0x273   :  { %v15612_v13 = vpop.f32.mrf.mxu0  ;;  %v15669_v22 = vpack.i.bf16 %v15665_v39, %v15141_v53 }
 0x274   :  { %12148 = vmatmul.msk.f32.vlgmr.msra.gmra.mxu1 %vm110_vm1, %v15508_v1  ;;  %v4566_v45 = vadd.f32 %v15503_v9, %v4183_v28  ;;  %v15679_v9 = vld [vmem:[%s19816_s0 + $0x30] sm:$0xff]  ;;  %v4938_v41 = vadd.f32 %v15545_v8, %v4555_v3  ;;  %v13110_v3 = vpack.i.bf16 %v15190_v19, %v15433_v5 }
 0x275   :  { %12149 = vmatmul.msk.f32.vlgmr.msra.gmra.mxu2 %vm110_vm1, %v15508_v1  ;;  %12150 = vmatmul.msk.f32.vlgmr.msrb.gmra.mxu3 %vm110_vm1, %v15508_v1 }
 0x276   :  { %12151 = vmatmul.msk.f32.vlgmr.msra.gmra.mxu0 %vm110_vm1, %v15508_v1  ;;  %6608 = vmatpush.msra.mxu1 %v6522_v27 }
 0x277   :  { %6628 = vmatpush.msra.mxu2 %v6523_v21  ;;  %6648 = vmatpush.msrb.mxu3 %v6524_v50 }
 0x278   :  { %v4775_v55 = vpop.f32.mrf.mxu2  ;;  %v4795_v16 = vpop.f32.mrf.mxu3  ;;  %6668 = vmatpush.msra.mxu0 %v6525_v36  ;;  %v12964_v36 = vunpack.i.h.bf16 %v12962_v60  ;;  %13066 = vrot.lane.b32.xlu2 %v15669_v22, %s13275_s23 }
 0x279   :  { %v15632_v57 = vadd.f32 %v4775_v55, %v15497_v47  ;;  %v15634_v46 = vadd.f32 %v4795_v16, %v4562_v25  ;;  %v15636_v14 = vpop.f32.mrf.mxu1  ;;  %v6527_v47 = vsel %vm6519_vm7, %v12948_v37, %v12949_v15  ;;  %v12973_v55 = vunpack.i.l.bf16 %v12972_v2  ;;  %v15700_v60 = vpop.permute.xlu2 %12976 }
 0x27a   :  { %v6530_v15 = vsel %vm6519_vm7, %v12963_v24, %v12958_v0  ;;  %v6532_v38 = vsel %vm6519_vm7, %v12959_v40, %v12964_v36 }
 0x27b   :  { %v15643_v44 = vpop.f32.mrf.mxu0  ;;  %v6533_v24 = vsel %vm6519_vm7, %v12964_v36, %v12973_v55  ;;  %v15735_v36 = vpop.permute.xlu1 %12986 }
 0x27c   :  { %12152 = vmatmul.msk.f32.vlgmr.msrb.gmra.mxu1 %vm110_vm1, %v15508_v1 }
 0x27d   :  { %12153 = vmatmul.msk.f32.vlgmr.msrb.gmra.mxu2 %vm110_vm1, %v15508_v1  ;;  %12155 = vmatmul.msk.f32.vlgmr.msra.gmra.mxu3 %vm110_vm1, %v15641_v35  ;;  %v15674_v1 = vld [vmem:[%s19816_s0 + $0x20] sm:$0xff] }
 0x27e   :  { %12156 = vmatmul.msk.f32.vlgmr.msrb.gmra.mxu0 %vm110_vm1, %v15641_v35  ;;  %6688 = vmatpush.msrb.mxu1 %v6526_v17  ;;  %v13095_v27 = vpack.i.bf16 %v15674_v1, %v15679_v9  ;;  %v12982_v17 = vpop.permute.xlu0 %12981 }
 0x27f   :  { %6708 = vmatpush.msrb.mxu2 %v6527_v47  ;;  %6728 = vmatpush.msra.mxu3 %v6528_v18  ;;  %v13100_v47 = vpack.i.bf16 %v15665_v39, %v15146_v59  ;;  %v13080_v18 = vpack.i.bf16 %v15356_v30, %v15433_v5  ;;  %v12984_v2 = vunpack.i.h.bf16 %v12982_v17 }
 0x280   :  { %v4855_v21 = vpop.f32.mrf.mxu2  ;;  %v4875_v50 = vpop.f32.mrf.mxu3  ;;  %6748 = vmatpush.msrb.mxu0 %v6529_v49  ;;  %13096 = vrot.lane.b32.xlu0 %v13095_v27, %s13276_s20  ;;  %v12978_v27 = vunpack.i.l.bf16 %v15700_v60 }
 0x281   :  { %v15684_v53 = vadd.f32 %v4855_v21, %v15540_v31  ;;  %v15686_v25 = vadd.f32 %v4875_v50, %v4566_v45  ;;  %v15688_v37 = vpop.f32.mrf.mxu1  ;;  %v6531_v31 = vsel %vm6519_vm7, %v12958_v0, %v12959_v40  ;;  %v12969_v45 = vunpack.i.h.bf16 %v15650_v52  ;;  %13101 = vrot.lane.b32.xlu1 %v13100_v47, %s13276_s20  ;;  %13081 = vrot.lane.b32.xlu2 %v13080_v18, %s13275_s23 }
 0x282   :  { %v12968_v0 = vunpack.i.l.bf16 %v15650_v52  ;;  %v6534_v52 = vsel %vm6519_vm7, %v12973_v55, %v12974_v26  ;;  %v6905_v55 = vsel %vm6902_vm8, %v12978_v27, %v12984_v2  ;;  %v12983_v18 = vunpack.i.l.bf16 %v12982_v17 }
 0x283   :  { %v15693_v16 = vpop.f32.mrf.mxu0 }
 0x284   :  { %12157 = vmatmul.msk.f32.vlgmr.msra.gmra.mxu1 %vm110_vm1, %v15641_v35  ;;  %v6903_v40 = vsel %vm6902_vm8, %v12968_v0, %v12969_v45 }
 0x285   :  { %12158 = vmatmul.msk.f32.vlgmr.msra.gmra.mxu2 %vm110_vm1, %v15641_v35  ;;  %12159 = vmatmul.msk.f32.vlgmr.msrb.gmra.mxu3 %vm110_vm1, %v15641_v35 }
 0x286   :  { %12160 = vmatmul.msk.f32.vlgmr.msra.gmra.mxu0 %vm110_vm1, %v15641_v35  ;;  %6768 = vmatpush.msra.mxu1 %v6530_v15  ;;  %v4559_v15 = vadd.f32 %v15472_v58, %v15371_v62  ;;  %v12979_v58 = vunpack.i.h.bf16 %v15700_v60  ;;  %v15762_v60 = vpop.permute.xlu0 %12996 }
 0x287   :  { %6788 = vmatpush.msra.mxu2 %v6531_v31  ;;  %6808 = vmatpush.msrb.mxu3 %v6532_v38  ;;  %v12992_v31 = vpop.permute.xlu2 %12991  ;;  %v13115_v38 = vpack.i.bf16 %v15597_v20, %v15356_v30 }
 0x288   :  { %v4935_v28 = vpop.f32.mrf.mxu2  ;;  %v5038_v49 = vpop.f32.mrf.mxu3  ;;  %6828 = vmatpush.msra.mxu0 %v6533_v24  ;;  %v4942_v62 = vadd.f32 %v15578_v56, %v4559_v15  ;;  %v12994_v56 = vunpack.i.h.bf16 %v12992_v31  ;;  %13111 = vrot.lane.b32.xlu0 %v13110_v3, %s13276_s20  ;;  %v6906_v17 = vsel %vm6902_vm8, %v12984_v2, %v12979_v58  ;;  %v15783_v2 = vld [vmem:[%s19816_s0 + $0x28] sm:$0xff] }
 0x289   :  { %v15721_v59 = vadd.f32 %v4935_v28, %v15573_v4  ;;  %v15723_v21 = vadd.f32 %v5038_v49, %v4938_v41  ;;  %v15725_v8 = vpop.f32.mrf.mxu1  ;;  %v6904_v4 = vsel %vm6902_vm8, %v12969_v45, %v12978_v27  ;;  %v12988_v41 = vunpack.i.l.bf16 %v15735_v36  ;;  %13116 = vrot.lane.b32.xlu1 %v13115_v38, %s13276_s20  ;;  %v13002_v27 = vpop.permute.xlu1 %13001 }
 0x28a   :  { %v6907_v49 = vsel %vm6902_vm8, %v12979_v58, %v12983_v18  ;;  %v4563_v45 = vadd.f32 %v15499_v33, %v15402_v63  ;;  %v13090_v63 = vpack.i.bf16 %v15783_v2, %v15527_v61  ;;  %v13120_v33 = vpack.i.bf16 %v15527_v61, %v15257_v48 }
 0x28b   :  { %v15728_v50 = vpop.f32.mrf.mxu0  ;;  %v6909_v0 = vsel %vm6902_vm8, %v12988_v41, %v12994_v56  ;;  %v12998_v38 = vunpack.i.l.bf16 %v15762_v60 }
 0x28c   :  { %12161 = vmatmul.msk.f32.vlgmr.msrb.gmra.mxu1 %vm110_vm1, %v15641_v35  ;;  %13091 = vrot.lane.b32.xlu2 %v13090_v63, %s13276_s20 }
 0x28d   :  { %12162 = vmatmul.msk.f32.vlgmr.msrb.gmra.mxu2 %vm110_vm1, %v15641_v35  ;;  %12163 = vmatmul.msk.f32.vlgmr.msra.gmra.mxu3 %vm110_vm1, %v15641_v35 }
 0x28e   :  { %12164 = vmatmul.msk.f32.vlgmr.msrb.gmra.mxu0 %vm110_vm1, %v15641_v35  ;;  %6848 = vmatpush.msrb.mxu1 %v6534_v52  ;;  %v4946_v52 = vadd.f32 %v15612_v13, %v4563_v45  ;;  %v13004_v13 = vunpack.i.h.bf16 %v13002_v27 }
 0x28f   :  { %6951 = vmatpush.msrb.mxu2 %v6903_v40  ;;  %6971 = vmatpush.msra.mxu3 %v6904_v4  ;;  %v12989_v40 = vunpack.i.h.bf16 %v15735_v36  ;;  %v15804_v36 = vld [vmem:[%s19817_s1 + $0x90] sm:$0xff] }
 0x290   :  { %v5098_v24 = vpop.f32.mrf.mxu2  ;;  %v5118_v47 = vpop.f32.mrf.mxu3  ;;  %6991 = vmatpush.msrb.mxu0 %v6905_v55  ;;  %v12993_v55 = vunpack.i.l.bf16 %v12992_v31  ;;  %13121 = vrot.lane.b32.xlu0 %v13120_v33, %s13277_s21  ;;  %v13003_v33 = vunpack.i.l.bf16 %v13002_v27 }
 0x291   :  { %v15755_v26 = vadd.f32 %v5098_v24, %v15606_v7  ;;  %v15757_v30 = vadd.f32 %v5118_v47, %v4942_v62  ;;  %v15759_v19 = vpop.f32.mrf.mxu1  ;;  %v6908_v7 = vsel %vm6902_vm8, %v12983_v18, %v12988_v41  ;;  %v13007_v31 = vpop.permute.xlu2 %13006  ;;  %v6910_v24 = vsel %vm6902_vm8, %v12994_v56, %v12989_v40 }
 0x292   :  { %v6912_v47 = vsel %vm6902_vm8, %v12993_v55, %v12998_v38  ;;  %v15813_v18 = vpop.permute.xlu0 %13011  ;;  %v4567_v41 = vadd.f32 %v15542_v32, %v15442_v10  ;;  %v6913_v56 = vsel %vm6902_vm8, %v12998_v38, %v13004_v13  ;;  %v15834_v32 = vld [vmem:[%s19816_s0 + $0x40] sm:$0xff] }
 0x293   :  { %v15764_v28 = vpop.f32.mrf.mxu0  ;;  %v13135_v45 = vpack.i.bf16 %v15834_v32, %v15783_v2 }
 0x294   :  { %12165 = vmatmul.msk.f32.vlgmr.msra.gmra.mxu1 %vm110_vm1, %v15641_v35 }
 0x295   :  { %12166 = vmatmul.msk.f32.vlgmr.msra.gmra.mxu2 %vm110_vm1, %v15641_v35  ;;  %12167 = vmatmul.msk.f32.vlgmr.msrb.gmra.mxu3 %vm110_vm1, %v15641_v35 }
 0x296   :  { %12168 = vmatmul.msk.f32.vlgmr.msra.gmra.mxu0 %vm110_vm1, %v15641_v35  ;;  %7011 = vmatpush.msra.mxu1 %v6906_v17  ;;  %v13105_v17 = vpack.i.bf16 %v15834_v32, %v15564_v34 }
 0x297   :  { %7031 = vmatpush.msra.mxu2 %v6907_v49  ;;  %7051 = vmatpush.msrb.mxu3 %v6908_v7  ;;  %v4950_v49 = vadd.f32 %v15643_v44, %v4567_v41  ;;  %v12999_v7 = vunpack.i.h.bf16 %v15762_v60  ;;  %v13009_v60 = vunpack.i.h.bf16 %v13007_v31 }
 0x298   :  { %v5178_v4 = vpop.f32.mrf.mxu2  ;;  %v5198_v15 = vpop.f32.mrf.mxu3  ;;  %7071 = vmatpush.msra.mxu0 %v6909_v0  ;;  %13106 = vrot.lane.b32.xlu2 %v13105_v17, %s13276_s20  ;;  %v13014_v17 = vunpack.i.h.bf16 %v15813_v18 }
 0x299   :  { %v15794_v3 = vadd.f32 %v5178_v4, %v15634_v46  ;;  %v15796_v62 = vadd.f32 %v5198_v15, %v4946_v52  ;;  %v15798_v48 = vpop.f32.mrf.mxu1  ;;  %v6911_v46 = vsel %vm6902_vm8, %v12989_v40, %v12993_v55  ;;  %v13008_v52 = vunpack.i.l.bf16 %v13007_v31  ;;  %13136 = vrot.lane.b32.xlu0 %v13135_v45, %s13277_s21  ;;  %v13017_v15 = vpop.permute.xlu1 %13016 }
 0x29a   :  { %v6914_v27 = vsel %vm6902_vm8, %v13004_v13, %v12999_v7  ;;  %v4939_v31 = vadd.f32 %v15575_v29, %v15468_v23  ;;  %v13027_v13 = vpop.permute.xlu0 %13026  ;;  %v13013_v23 = vunpack.i.l.bf16 %v15813_v18  ;;  %v13018_v29 = vunpack.i.l.bf16 %v13017_v15 }
 0x29b   :  { %v15806_v58 = vpop.f32.mrf.mxu0  ;;  %v6916_v38 = vsel %vm6902_vm8, %v13003_v33, %v13008_v52  ;;  %v13028_v45 = vunpack.i.l.bf16 %v13027_v13 }
 0x29c   :  { %12169 = vmatmul.msk.f32.vlgmr.msrb.gmra.mxu1 %vm110_vm1, %v15641_v35  ;;  %v15827_v35 = vld [vmem:[%s19816_s0 + $0x8] sm:$0xff]  ;;  %v5322_v41 = vadd.f32 %v15693_v16, %v4939_v31 }
 0x29d   :  { %12171 = vmatmul.msk.f32.vlgmr.msrb.gmra.mxu2 %vm110_vm1, %v15804_v36  ;;  %12172 = vmatmul.msk.f32.vlgmr.msra.gmra.mxu3 %vm110_vm1, %v15804_v36  ;;  %v13125_v10 = vpack.i.bf16 %v15674_v1, %v15827_v35 }
 0x29e   :  { %12173 = vmatmul.msk.f32.vlgmr.msrb.gmra.mxu0 %vm110_vm1, %v15804_v36  ;;  %7091 = vmatpush.msrb.mxu1 %v6910_v24  ;;  %v13022_v24 = vpop.permute.xlu2 %13021 }
 0x29f   :  { %7111 = vmatpush.msrb.mxu2 %v6911_v46  ;;  %7131 = vmatpush.msra.mxu3 %v6912_v47  ;;  %v6917_v46 = vsel %vm6902_vm8, %v13008_v52, %v13009_v60  ;;  %v13140_v47 = vpack.i.bf16 %v15433_v5, %v15564_v34  ;;  %v4943_v52 = vadd.f32 %v15608_v12, %v15495_v11  ;;  %v13024_v12 = vunpack.i.h.bf16 %v13022_v24 }
 0x2a0   :  { %v5258_v0 = vpop.f32.mrf.mxu2  ;;  %v5278_v63 = vpop.f32.mrf.mxu3  ;;  %7151 = vmatpush.msrb.mxu0 %v6913_v56  ;;  %13126 = vrot.lane.b32.xlu1 %v13125_v10, %s13277_s21 }
 0x2a1   :  { %v15844_v40 = vadd.f32 %v5258_v0, %v15686_v25  ;;  %v15846_v4 = vadd.f32 %v5278_v63, %v4950_v49  ;;  %v15848_v44 = vpop.f32.mrf.mxu1  ;;  %v6915_v25 = vsel %vm6902_vm8, %v12999_v7, %v13003_v33  ;;  %v13019_v49 = vunpack.i.h.bf16 %v13017_v15  ;;  %8363 = vrot.lane.b32.xlu2 %v15361_v51, %s13276_s20  ;;  %13151 = vrot.lane.b32.xlu0 %v15365_v42, %s13277_s21  ;;  %v13032_v33 = vpop.permute.xlu1 %13031 }
 0x2a2   :  { %v7286_v0 = vsel %vm7285_vm9, %v13018_v29, %v13013_v23  ;;  %v5326_v60 = vadd.f32 %v15728_v50, %v4943_v52  ;;  %v13023_v15 = vunpack.i.l.bf16 %v13022_v24 }
 0x2a3   :  { %v15852_v55 = vpop.f32.mrf.mxu0  ;;  %v7288_v63 = vsel %vm7285_vm9, %v13014_v17, %v13019_v49  ;;  %v7289_v51 = vsel %vm7285_vm9, %v13019_v49, %v13028_v45  ;;  %v15943_v49 = vld [vmem:[%s19816_s0 + $0x10] sm:$0xff] }
 0x2a4   :  { %12174 = vmatmul.msk.f32.vlgmr.msra.gmra.mxu1 %vm110_vm1, %v15804_v36  ;;  %v7290_v24 = vsel %vm7285_vm9, %v13028_v45, %v13023_v15 }
 0x2a5   :  { %12175 = vmatmul.msk.f32.vlgmr.msra.gmra.mxu2 %vm110_vm1, %v15804_v36  ;;  %12176 = vmatmul.msk.f32.vlgmr.msrb.gmra.mxu3 %vm110_vm1, %v15804_v36 }
 0x2a6   :  { %12177 = vmatmul.msk.f32.vlgmr.msra.gmra.mxu0 %vm110_vm1, %v15804_v36  ;;  %7171 = vmatpush.msra.mxu1 %v6914_v27  ;;  %v13037_v42 = vpop.permute.xlu2 %13036 }
 0x2a7   :  { %7191 = vmatpush.msra.mxu2 %v6915_v25  ;;  %7211 = vmatpush.msrb.mxu3 %v6916_v38  ;;  %v13029_v25 = vunpack.i.h.bf16 %v13027_v13  ;;  %v15905_v38 = vld [vmem:[%s19816_s0 + $0x68] sm:$0xff]  ;;  %v7291_v13 = vsel %vm7285_vm9, %v13023_v15, %v13024_v12 }
 0x2a8   :  { %v5421_v56 = vpop.f32.mrf.mxu2  ;;  %v5441_v10 = vpop.f32.mrf.mxu3  ;;  %7231 = vmatpush.msra.mxu0 %v6917_v46  ;;  %13141 = vrot.lane.b32.xlu1 %v13140_v47, %s13277_s21  ;;  %v13038_v47 = vunpack.i.l.bf16 %v13037_v42 }
 0x2a9   :  { %v15875_v7 = vadd.f32 %v5421_v56, %v15723_v21  ;;  %v15877_v5 = vadd.f32 %v5441_v10, %v5322_v41  ;;  %v15879_v16 = vpop.f32.mrf.mxu1  ;;  %v7287_v21 = vsel %vm7285_vm9, %v13013_v23, %v13014_v17  ;;  %v7292_v23 = vsel %vm7285_vm9, %v13024_v12, %v13029_v25  ;;  %v13047_v56 = vpop.permute.xlu1 %13046 }
 0x2aa   :  { %v7293_v29 = vsel %vm7285_vm9, %v13029_v25, %v13038_v47  ;;  %v13033_v17 = vunpack.i.l.bf16 %v13032_v33  ;;  %v13048_v15 = vunpack.i.l.bf16 %v13047_v56  ;;  %v4951_v12 = vadd.f32 %v15688_v37, %v15571_v43 }
 0x2ab   :  { %v15885_v18 = vpop.f32.mrf.mxu0 }
 0x2ac   :  { %12178 = vmatmul.msk.f32.vlgmr.msrb.gmra.mxu1 %vm110_vm1, %v15804_v36 }
 0x2ad   :  { %12179 = vmatmul.msk.f32.vlgmr.msrb.gmra.mxu2 %vm110_vm1, %v15804_v36  ;;  %12180 = vmatmul.msk.f32.vlgmr.msra.gmra.mxu3 %vm110_vm1, %v15804_v36 }
 0x2ae   :  { %12181 = vmatmul.msk.f32.vlgmr.msrb.gmra.mxu0 %vm110_vm1, %v15804_v36  ;;  %7334 = vmatpush.msrb.mxu1 %v7286_v0  ;;  %v13034_v0 = vunpack.i.h.bf16 %v13032_v33 }
 0x2af   :  { %7354 = vmatpush.msrb.mxu2 %v7287_v21  ;;  %7374 = vmatpush.msra.mxu3 %v7288_v63  ;;  %v13039_v21 = vunpack.i.h.bf16 %v13037_v42  ;;  %v7294_v42 = vsel %vm7285_vm9, %v13038_v47, %v13033_v17  ;;  %v13145_v47 = vpack.i.bf16 %v15597_v20, %v15665_v39 }
 0x2b0   :  { %v5501_v27 = vpop.f32.mrf.mxu2  ;;  %v5521_v11 = vpop.f32.mrf.mxu3  ;;  %7394 = vmatpush.msrb.mxu0 %v7289_v51  ;;  %8738 = vrot.lane.b32.xlu1 %v15905_v38, %s13277_s21 }
 0x2b1   :  { %v15910_v31 = vadd.f32 %v5501_v27, %v15757_v30  ;;  %v15912_v50 = vadd.f32 %v5521_v11, %v5326_v60  ;;  %v15914_v46 = vpop.f32.mrf.mxu1  ;;  %v4947_v30 = vadd.f32 %v15636_v14, %v15538_v54  ;;  %v15936_v54 = vld [vmem:[%s19816_s0 + $0x38] sm:$0xff]  ;;  %v7296_v27 = vsel %vm7285_vm9, %v13034_v0, %v13039_v21  ;;  %v13042_v11 = vpop.permute.xlu0 %13041 }
 0x2b2   :  { %v13130_v14 = vpack.i.bf16 %v15936_v54, %v15679_v9  ;;  %v15959_v60 = vld [vmem:[%s19817_s1 + $0x98] sm:$0xff]  ;;  %v7297_v25 = vsel %vm7285_vm9, %v13039_v21, %v13048_v15  ;;  %v13043_v43 = vunpack.i.l.bf16 %v13042_v11 }
 0x2b3   :  { %v15916_v41 = vpop.f32.mrf.mxu0  ;;  %v5330_v10 = vadd.f32 %v15764_v28, %v4947_v30  ;;  %v13044_v30 = vunpack.i.h.bf16 %v13042_v11  ;;  %v13052_v11 = vpop.permute.xlu2 %13051 }
 0x2b4   :  { %12182 = vmatmul.msk.f32.vlgmr.msra.gmra.mxu1 %vm110_vm1, %v15804_v36  ;;  %13131 = vrot.lane.b32.xlu2 %v13130_v14, %s13277_s21  ;;  %v5323_v14 = vadd.f32 %v15725_v8, %v15604_v6 }
 0x2b5   :  { %12183 = vmatmul.msk.f32.vlgmr.msra.gmra.mxu2 %vm110_vm1, %v15804_v36  ;;  %12184 = vmatmul.msk.f32.vlgmr.msrb.gmra.mxu3 %vm110_vm1, %v15804_v36 }
 0x2b6   :  { %12185 = vmatmul.msk.f32.vlgmr.msra.gmra.mxu0 %vm110_vm1, %v15804_v36  ;;  %7414 = vmatpush.msra.mxu1 %v7290_v24  ;;  %v13160_v36 = vpack.i.bf16 %v15943_v49, %v15827_v35  ;;  %v5334_v24 = vadd.f32 %v15806_v58, %v4951_v12 }
 0x2b7   :  { %7434 = vmatpush.msra.mxu2 %v7291_v13  ;;  %7454 = vmatpush.msrb.mxu3 %v7292_v23  ;;  %v13049_v23 = vunpack.i.h.bf16 %v13047_v56  ;;  %v7298_v56 = vsel %vm7285_vm9, %v13048_v15, %v13043_v43 }
 0x2b8   :  { %v5581_v28 = vpop.f32.mrf.mxu2  ;;  %v5601_v45 = vpop.f32.mrf.mxu3  ;;  %7474 = vmatpush.msra.mxu0 %v7293_v29  ;;  %9101 = vrot.lane.b32.xlu1 %v15783_v2, %s13278_s22 }
 0x2b9   :  { %v15950_v63 = vadd.f32 %v5581_v28, %v15796_v62  ;;  %v15952_v52 = vadd.f32 %v5601_v45, %v5330_v10  ;;  %v15954_v51 = vpop.f32.mrf.mxu1  ;;  %13161 = vrot.lane.b32.xlu0 %v13160_v36, %s13278_s22  ;;  %v7295_v62 = vsel %vm7285_vm9, %v13033_v17, %v13034_v0  ;;  %v5706_v36 = vadd.f32 %v15852_v55, %v5323_v14 }
 0x2bb   :  { %v15963_v33 = vpop.f32.mrf.mxu0 }
 0x2bc   :  { %12187 = vmatmul.msk.f32.vlgmr.msrb.gmra.mxu1 %vm110_vm1, %v15959_v60  ;;  %13146 = vrot.lane.b32.xlu2 %v13145_v47, %s13277_s21  ;;  %v13053_v47 = vunpack.i.l.bf16 %v13052_v11 }
 0x2bd   :  { %12188 = vmatmul.msk.f32.vlgmr.msrb.gmra.mxu2 %vm110_vm1, %v15959_v60  ;;  %12189 = vmatmul.msk.f32.vlgmr.msra.gmra.mxu3 %vm110_vm1, %v15959_v60 }
 0x2be   :  { %12190 = vmatmul.msk.f32.vlgmr.msrb.gmra.mxu0 %vm110_vm1, %v15959_v60  ;;  %7494 = vmatpush.msrb.mxu1 %v7294_v42 }
 0x2bf   :  { %7514 = vmatpush.msrb.mxu2 %v7295_v62  ;;  %7534 = vmatpush.msra.mxu3 %v7296_v27 }
 0x2c0   :  { %v5661_v37 = vpop.f32.mrf.mxu2  ;;  %v5681_v13 = vpop.f32.mrf.mxu3  ;;  %7554 = vmatpush.msrb.mxu0 %v7297_v25  ;;  %13166 = vrot.lane.b32.xlu1 %v15669_v22, %s13278_s22  ;;  %v7299_v22 = vsel %vm7285_vm9, %v13043_v43, %v13044_v30  ;;  %v13054_v25 = vunpack.i.h.bf16 %v13052_v11 }
 0x2c1   :  { %v15985_v29 = vadd.f32 %v5661_v37, %v15846_v4  ;;  %v15987_v10 = vadd.f32 %v5681_v13, %v5334_v24  ;;  %v15989_v17 = vpop.f32.mrf.mxu1  ;;  %9105 = vrot.lane.b32.xlu0 %v15936_v54, %s13278_s22  ;;  %v7300_v4 = vsel %vm7285_vm9, %v13044_v30, %v13049_v23  ;;  %v5707_v13 = vadd.f32 %v15879_v16, %v15755_v26  ;;  %v13274_v30 = vld [vmem:[%s19816_s0 + $0x70] sm:$0xff] }
 0x2c3   :  { %v15994_v58 = vpop.f32.mrf.mxu0 }
 0x2c4   :  { %12191 = vmatmul.msk.f32.vlgmr.msra.gmra.mxu1 %vm110_vm1, %v15959_v60 }
 0x2c5   :  { %12192 = vmatmul.msk.f32.vlgmr.msra.gmra.mxu2 %vm110_vm1, %v15959_v60  ;;  %12193 = vmatmul.msk.f32.vlgmr.msrb.gmra.mxu3 %vm110_vm1, %v15959_v60 }
 0x2c6   :  { %12194 = vmatmul.msk.f32.vlgmr.msra.gmra.mxu0 %vm110_vm1, %v15959_v60  ;;  %7574 = vmatpush.msra.mxu1 %v7298_v56  ;;  %v6090_v56 = vadd.f32 %v15994_v58, %v5707_v13 }
 0x2c7   :  { %7594 = vmatpush.msra.mxu2 %v7299_v22  ;;  %7614 = vmatpush.msrb.mxu3 %v7300_v4 }
 0x2c8   :  { %v5824_v28 = vpop.f32.mrf.mxu2  ;;  %v5844_v45 = vpop.f32.mrf.mxu3  ;;  %7654 = vmatpush.msra.mxu0 %v15827_v35  ;;  %9117 = vrot.lane.b32.xlu1 %v15905_v38, %s13278_s22  ;;  %v5327_v35 = vadd.f32 %v15759_v19, %v15632_v57 }
 0x2c9   :  { %v16014_v6 = vadd.f32 %v5824_v28, %v15877_v5  ;;  %v16016_v8 = vadd.f32 %v5844_v45, %v5706_v36  ;;  %v16018_v0 = vpop.f32.mrf.mxu1  ;;  %9111 = vrot.lane.b32.xlu0 %v15564_v34, %s13278_s22  ;;  %v13155_v5 = vpack.i.bf16 %v15674_v1, %v15527_v61 }
 0x2ca   :  { %v5710_v21 = vadd.f32 %v15885_v18, %v5327_v35  ;;  %v13272_v18 = vld [vmem:[%s19816_s0 + $0x78] sm:$0xff] }
 0x2cb   :  { %v16022_v55 = vpop.f32.mrf.mxu0  ;;  %13156 = vrot.lane.b32.xlu2 %v13155_v5, %s13278_s22 }
 0x2cc   :  { %12195 = vmatmul.msk.f32.vlgmr.msrb.gmra.mxu1 %vm110_vm1, %v15959_v60 }
 0x2cd   :  { %12196 = vmatmul.msk.f32.vlgmr.msrb.gmra.mxu2 %vm110_vm1, %v15959_v60  ;;  %12197 = vmatmul.msk.f32.vlgmr.msra.gmra.mxu3 %vm110_vm1, %v15959_v60 }
 0x2ce   :  { %12198 = vmatmul.msk.f32.vlgmr.msrb.gmra.mxu0 %vm110_vm1, %v15959_v60  ;;  %7674 = vmatpush.msrb.mxu1 %v15943_v49 }
 0x2cf   :  { %7694 = vmatpush.msrb.mxu2 %v15527_v61  ;;  %7714 = vmatpush.msra.mxu3 %v15674_v1  ;;  %v16058_v1 = vld [vmem:[%s19817_s1 + $0xa0] sm:$0xff] }
 0x2d0   :  { %v5904_v57 = vpop.f32.mrf.mxu2  ;;  %v5924_v19 = vpop.f32.mrf.mxu3  ;;  %7734 = vmatpush.msrb.mxu0 %v15783_v2  ;;  %v5331_v2 = vadd.f32 %v15798_v48, %v15684_v53 }
 0x2d1   :  { %v16043_v15 = vadd.f32 %v5904_v57, %v15912_v50  ;;  %v16045_v42 = vadd.f32 %v5924_v19, %v5710_v21  ;;  %v16047_v49 = vpop.f32.mrf.mxu1  ;;  %9121 = vrot.lane.b32.xlu0 %v13272_v18, %s13278_s22 }
 0x2d2   :  { %v5714_v50 = vadd.f32 %v15916_v41, %v5331_v2 }
 0x2d3   :  { %v16053_v61 = vpop.f32.mrf.mxu0  ;;  %9103 = vrot.lane.b32.xlu2 %v15679_v9, %s13278_s22 }
 0x2d4   :  { %12199 = vmatmul.msk.f32.vlgmr.msra.gmra.mxu1 %vm110_vm1, %v15959_v60 }
 0x2d5   :  { %12200 = vmatmul.msk.f32.vlgmr.msra.gmra.mxu2 %vm110_vm1, %v15959_v60  ;;  %12201 = vmatmul.msk.f32.vlgmr.msrb.gmra.mxu3 %vm110_vm1, %v15959_v60 }
 0x2d6   :  { %12203 = vmatmul.msk.f32.vlgmr.msra.gmra.mxu0 %vm110_vm1, %v16058_v1  ;;  %7754 = vmatpush.msra.mxu1 %v15679_v9  ;;  %v13062_v9 = vpop.permute.xlu1 %13061 }
 0x2d7   :  { %7774 = vmatpush.msra.mxu2 %v15936_v54  ;;  %7794 = vmatpush.msrb.mxu3 %v15834_v32  ;;  %v13057_v32 = vpop.permute.xlu0 %13056  ;;  %v13273_v54 = vld [vmem:[%s19816_s0 + $0x58] sm:$0xff]  ;;  %v13063_v37 = vunpack.i.l.bf16 %v13062_v9  ;;  %v13064_v4 = vunpack.i.h.bf16 %v13062_v9 }
 0x2d8   :  { %v5984_v62 = vpop.f32.mrf.mxu2  ;;  %v6004_v27 = vpop.f32.mrf.mxu3  ;;  %7814 = vmatpush.msra.mxu0 %v15665_v39  ;;  %v5335_v39 = vadd.f32 %v15848_v44, %v15721_v59  ;;  %v13058_v26 = vunpack.i.l.bf16 %v13057_v32  ;;  %v13059_v14 = vunpack.i.h.bf16 %v13057_v32 }
 0x2d9   :  { %v16078_v53 = vadd.f32 %v5984_v62, %v15952_v52  ;;  %v16080_v48 = vadd.f32 %v6004_v27, %v5714_v50  ;;  %v16082_v60 = vpop.f32.mrf.mxu1  ;;  %v13170_v52 = vpack.i.bf16 %v15597_v20, %v13273_v54  ;;  %v7987_v23 = vsel %vm80_vm0, %v13054_v25, %v13063_v37 }
 0x2da   :  { %v5718_v59 = vadd.f32 %v15963_v33, %v5335_v39  ;;  %v7988_v58 = vsel %vm80_vm0, %v13063_v37, %v13058_v26  ;;  %v7989_v21 = vsel %vm80_vm0, %v13058_v26, %v13059_v14  ;;  %v7990_v57 = vsel %vm80_vm0, %v13059_v14, %v13064_v4 }
 0x2db   :  { %v16084_v41 = vpop.f32.mrf.mxu0  ;;  %13171 = vrot.lane.b32.xlu2 %v13170_v52, %s13278_s22 }
 0x2dc   :  { %12204 = vmatmul.msk.f32.vlgmr.msrb.gmra.mxu1 %vm110_vm1, %v16058_v1 }
 0x2dd   :  { %12205 = vmatmul.msk.f32.vlgmr.msrb.gmra.mxu2 %vm110_vm1, %v16058_v1  ;;  %12206 = vmatmul.msk.f32.vlgmr.msra.gmra.mxu3 %vm110_vm1, %v16058_v1 }
 0x2de   :  { %12207 = vmatmul.msk.f32.vlgmr.msrb.gmra.mxu0 %vm110_vm1, %v16058_v1  ;;  %7834 = vmatpush.msrb.mxu1 %v15564_v34  ;;  %v13077_v62 = vpop.permute.xlu1 %13076 }
 0x2df   :  { %7854 = vmatpush.msrb.mxu2 %v13273_v54  ;;  %7874 = vmatpush.msra.mxu3 %v15597_v20  ;;  %v7986_v20 = vsel %vm80_vm0, %v13053_v47, %v13054_v25  ;;  %v5715_v25 = vadd.f32 %v15954_v51, %v15844_v40  ;;  %v13079_v51 = vunpack.i.h.bf16 %v13077_v62 }
 0x2e0   :  { %v6064_v44 = vpop.f32.mrf.mxu2  ;;  %v6084_v12 = vpop.f32.mrf.mxu3  ;;  %7894 = vmatpush.msrb.mxu0 %v15905_v38 }
 0x2e1   :  { %v16106_v34 = vadd.f32 %v6064_v44, %v15987_v10  ;;  %v16108_v24 = vadd.f32 %v6084_v12, %v5718_v59  ;;  %v16110_v43 = vpop.f32.mrf.mxu1  ;;  %v13067_v38 = vpop.permute.xlu2 %13066  ;;  %v6098_v37 = vadd.f32 %v16053_v61, %v5715_v25 }
 0x2e2   :  { %v13072_v10 = vpop.permute.xlu0 %13071  ;;  %v13068_v50 = vunpack.i.l.bf16 %v13067_v38  ;;  %v13069_v27 = vunpack.i.h.bf16 %v13067_v38 }
 0x2e3   :  { %v16112_v33 = vpop.f32.mrf.mxu0  ;;  %9119 = vrot.lane.b32.xlu2 %v13274_v30, %s13278_s22  ;;  %v13073_v35 = vunpack.i.l.bf16 %v13072_v10  ;;  %v13074_v11 = vunpack.i.h.bf16 %v13072_v10 }
 0x2e4   :  { %12208 = vmatmul.msk.f32.vlgmr.msra.gmra.mxu1 %vm110_vm1, %v16058_v1 }
 0x2e5   :  { %12209 = vmatmul.msk.f32.vlgmr.msra.gmra.mxu2 %vm110_vm1, %v16058_v1  ;;  %12210 = vmatmul.msk.f32.vlgmr.msrb.gmra.mxu3 %vm110_vm1, %v16058_v1  ;;  %v7991_v19 = vsel %vm80_vm0, %v13064_v4, %v13073_v35  ;;  %v7992_v59 = vsel %vm80_vm0, %v13073_v35, %v13068_v50  ;;  %v7994_v44 = vsel %vm80_vm0, %v13069_v27, %v13074_v11 }
 0x2e6   :  { %12211 = vmatmul.msk.f32.vlgmr.msra.gmra.mxu0 %vm110_vm1, %v16058_v1  ;;  %7914 = vmatpush.msra.mxu1 %v13274_v30  ;;  %v7985_v10 = vpop.permute.xlu1 %7984 }
 0x2e7   :  { %7934 = vmatpush.msra.mxu2 %v13272_v18  ;;  %8033 = vmatpush.msrb.mxu3 %v7986_v20  ;;  %v13078_v20 = vunpack.i.l.bf16 %v13077_v62 }
 0x2e8   :  { %v6227_v16 = vpop.f32.mrf.mxu2  ;;  %v6247_v22 = vpop.f32.mrf.mxu3  ;;  %8053 = vmatpush.msra.mxu0 %v7987_v23 }
 0x2e9   :  { %v16132_v36 = vadd.f32 %v6227_v16, %v16016_v8  ;;  %v16134_v28 = vadd.f32 %v6247_v22, %v6090_v56  ;;  %v16136_v45 = vpop.f32.mrf.mxu1  ;;  %v5711_v8 = vadd.f32 %v15914_v46, %v15794_v3  ;;  %v13082_v18 = vpop.permute.xlu2 %13081  ;;  %v7997_v26 = vsel %vm80_vm0, %v13078_v20, %v13079_v51 }
 0x2ea   :  { %v13083_v54 = vunpack.i.l.bf16 %v13082_v18  ;;  %v13087_v12 = vpop.permute.xlu0 %13086  ;;  %v13084_v40 = vunpack.i.h.bf16 %v13082_v18 }
 0x2eb   :  { %v16138_v5 = vpop.f32.mrf.mxu0  ;;  %v6094_v2 = vadd.f32 %v16022_v55, %v5711_v8  ;;  %v16165_v55 = vld [vmem:[%s19817_s1 + $0xa8] sm:$0xff] }
 0x2ec   :  { %12212 = vmatmul.msk.f32.vlgmr.msrb.gmra.mxu1 %vm110_vm1, %v16058_v1  ;;  %v7995_v47 = vsel %vm80_vm0, %v13074_v11, %v13083_v54  ;;  %v7996_v61 = vsel %vm80_vm0, %v13083_v54, %v13078_v20  ;;  %v7998_v16 = vsel %vm80_vm0, %v13079_v51, %v13084_v40  ;;  %v7999_v4 = vsel %vm80_vm0, %v13084_v40, %v7985_v10 }
 0x2ed   :  { %12213 = vmatmul.msk.f32.vlgmr.msrb.gmra.mxu2 %vm110_vm1, %v16058_v1  ;;  %12214 = vmatmul.msk.f32.vlgmr.msra.gmra.mxu3 %vm110_vm1, %v16058_v1 }
 0x2ee   :  { %12215 = vmatmul.msk.f32.vlgmr.msrb.gmra.mxu0 %vm110_vm1, %v16058_v1  ;;  %8073 = vmatpush.msrb.mxu1 %v7988_v58 }
 0x2ef   :  { %8093 = vmatpush.msrb.mxu2 %v7989_v21  ;;  %8113 = vmatpush.msra.mxu3 %v7990_v57 }
 0x2f0   :  { %v6307_v3 = vpop.f32.mrf.mxu2  ;;  %v6327_v46 = vpop.f32.mrf.mxu3  ;;  %8133 = vmatpush.msrb.mxu0 %v7991_v19 }
 0x2f1   :  { %v16156_v32 = vadd.f32 %v6307_v3, %v16045_v42  ;;  %v16158_v39 = vadd.f32 %v6327_v46, %v6094_v2  ;;  %v16160_v9 = vpop.f32.mrf.mxu1  ;;  %v7993_v42 = vsel %vm80_vm0, %v13068_v50, %v13069_v27  ;;  %v13092_v22 = vpop.permute.xlu2 %13091  ;;  %v6091_v46 = vadd.f32 %v16018_v0, %v15910_v31 }
 0x2f2   :  { %v13097_v14 = vpop.permute.xlu0 %13096  ;;  %v13093_v57 = vunpack.i.l.bf16 %v13092_v22  ;;  %v13094_v54 = vunpack.i.h.bf16 %v13092_v22 }
 0x2f3   :  { %v16167_v52 = vpop.f32.mrf.mxu0  ;;  %v13099_v2 = vunpack.i.h.bf16 %v13097_v14  ;;  %v13102_v3 = vpop.permute.xlu1 %13101  ;;  %v6474_v11 = vadd.f32 %v16112_v33, %v6091_v46  ;;  %v13098_v0 = vunpack.i.l.bf16 %v13097_v14 }
 0x2f4   :  { %12216 = vmatmul.msk.f32.vlgmr.msra.gmra.mxu1 %vm110_vm1, %v16058_v1 }
 0x2f5   :  { %12217 = vmatmul.msk.f32.vlgmr.msra.gmra.mxu2 %vm110_vm1, %v16058_v1  ;;  %12219 = vmatmul.msk.f32.vlgmr.msrb.gmra.mxu3 %vm110_vm1, %v16165_v55  ;;  %v8368_v33 = vsel %vm749_vm2, %v13099_v2, %v13094_v54 }
 0x2f6   :  { %12220 = vmatmul.msk.f32.vlgmr.msra.gmra.mxu0 %vm110_vm1, %v16165_v55  ;;  %8153 = vmatpush.msra.mxu1 %v7992_v59 }
 0x2f7   :  { %8173 = vmatpush.msra.mxu2 %v7993_v42  ;;  %8193 = vmatpush.msrb.mxu3 %v7994_v44  ;;  %v13103_v42 = vunpack.i.l.bf16 %v13102_v3 }
 0x2f8   :  { %v6387_v38 = vpop.f32.mrf.mxu2  ;;  %v6407_v13 = vpop.f32.mrf.mxu3  ;;  %8213 = vmatpush.msra.mxu0 %v7995_v47 }
 0x2f9   :  { %v16185_v1 = vadd.f32 %v6387_v38, %v16080_v48  ;;  %v16187_v23 = vadd.f32 %v6407_v13, %v6098_v37  ;;  %v16189_v30 = vpop.f32.mrf.mxu1  ;;  %v6087_v48 = vadd.f32 %v15989_v17, %v15875_v7  ;;  %v13089_v7 = vunpack.i.h.bf16 %v13087_v12  ;;  %v13107_v27 = vpop.permute.xlu2 %13106 }
 0x2fa   :  { %v13088_v17 = vunpack.i.l.bf16 %v13087_v12  ;;  %v13109_v47 = vunpack.i.h.bf16 %v13107_v27  ;;  %v13112_v37 = vpop.permute.xlu0 %13111  ;;  %v8369_v38 = vsel %vm749_vm2, %v13094_v54, %v13098_v0  ;;  %v8370_v13 = vsel %vm749_vm2, %v13098_v0, %v13103_v42 }
 0x2fb   :  { %v16191_v56 = vpop.f32.mrf.mxu0  ;;  %v6470_v35 = vadd.f32 %v16084_v41, %v6087_v48  ;;  %v8366_v62 = vsel %vm749_vm2, %v13089_v7, %v13093_v57  ;;  %v13117_v51 = vpop.permute.xlu1 %13116 }
 0x2fc   :  { %12221 = vmatmul.msk.f32.vlgmr.msrb.gmra.mxu1 %vm110_vm1, %v16165_v55  ;;  %v8365_v41 = vsel %vm749_vm2, %v13088_v17, %v13089_v7  ;;  %v8371_v40 = vsel %vm749_vm2, %v13103_v42, %v13109_v47  ;;  %v13119_v14 = vunpack.i.h.bf16 %v13117_v51 }
 0x2fd   :  { %12222 = vmatmul.msk.f32.vlgmr.msrb.gmra.mxu2 %vm110_vm1, %v16165_v55  ;;  %12223 = vmatmul.msk.f32.vlgmr.msra.gmra.mxu3 %vm110_vm1, %v16165_v55 }
 0x2fe   :  { %12224 = vmatmul.msk.f32.vlgmr.msrb.gmra.mxu0 %vm110_vm1, %v16165_v55  ;;  %8233 = vmatpush.msrb.mxu1 %v7996_v61  ;;  %v13104_v61 = vunpack.i.h.bf16 %v13102_v3 }
 0x2ff   :  { %8253 = vmatpush.msrb.mxu2 %v7997_v26  ;;  %8273 = vmatpush.msra.mxu3 %v7998_v16  ;;  %v13113_v16 = vunpack.i.l.bf16 %v13112_v37 }
 0x300   :  { %v6467_v58 = vpop.f32.mrf.mxu2  ;;  %v6570_v21 = vpop.f32.mrf.mxu3  ;;  %8293 = vmatpush.msrb.mxu0 %v7999_v4 }
 0x301   :  { %v16209_v8 = vadd.f32 %v6467_v58, %v16108_v24  ;;  %v16211_v19 = vadd.f32 %v6570_v21, %v6470_v35  ;;  %v16213_v18 = vpop.f32.mrf.mxu1  ;;  %v8367_v24 = vsel %vm749_vm2, %v13093_v57, %v13099_v2  ;;  %v8364_v35 = vpop.permute.xlu2 %8363  ;;  %v8372_v21 = vsel %vm749_vm2, %v13109_v47, %v13104_v61 }
 0x302   :  { %v13122_v17 = vpop.permute.xlu0 %13121  ;;  %v6099_v57 = vadd.f32 %v16082_v60, %v15985_v29  ;;  %v8375_v2 = vsel %vm749_vm2, %v13113_v16, %v13119_v14  ;;  %v13118_v29 = vunpack.i.l.bf16 %v13117_v51 }
 0x303   :  { %v16215_v50 = vpop.f32.mrf.mxu0  ;;  %v13123_v47 = vunpack.i.l.bf16 %v13122_v17 }
 0x304   :  { %12225 = vmatmul.msk.f32.vlgmr.msra.gmra.mxu1 %vm110_vm1, %v16165_v55 }
 0x305   :  { %12226 = vmatmul.msk.f32.vlgmr.msra.gmra.mxu2 %vm110_vm1, %v16165_v55  ;;  %12227 = vmatmul.msk.f32.vlgmr.msrb.gmra.mxu3 %vm110_vm1, %v16165_v55 }
 0x306   :  { %12228 = vmatmul.msk.f32.vlgmr.msra.gmra.mxu0 %vm110_vm1, %v16165_v55  ;;  %8313 = vmatpush.msra.mxu1 %v7985_v10 }
 0x307   :  { %8412 = vmatpush.msra.mxu2 %v8365_v41  ;;  %8432 = vmatpush.msrb.mxu3 %v8366_v62  ;;  %v13114_v41 = vunpack.i.h.bf16 %v13112_v37 }
 0x308   :  { %v6630_v59 = vpop.f32.mrf.mxu2  ;;  %v6650_v31 = vpop.f32.mrf.mxu3  ;;  %8452 = vmatpush.msra.mxu0 %v8367_v24 }
 0x309   :  { %v16232_v44 = vadd.f32 %v6630_v59, %v16134_v28  ;;  %v16234_v12 = vadd.f32 %v6650_v31, %v6474_v11  ;;  %v16236_v25 = vpop.f32.mrf.mxu1  ;;  %v6095_v28 = vadd.f32 %v16047_v49, %v15950_v63  ;;  %v13108_v49 = vunpack.i.l.bf16 %v13107_v27 }
 0x30a   :  { %v8376_v11 = vsel %vm749_vm2, %v13119_v14, %v13114_v41  ;;  %v8377_v54 = vsel %vm749_vm2, %v13114_v41, %v13118_v29 }
 0x30b   :  { %v16238_v20 = vpop.f32.mrf.mxu0  ;;  %v6478_v10 = vadd.f32 %v16138_v5, %v6095_v28  ;;  %v16265_v5 = vld [vmem:[%s19817_s1 + $0xb0] sm:$0xff]  ;;  %v8374_v7 = vsel %vm749_vm2, %v13108_v49, %v13113_v16  ;;  %v13137_v0 = vpop.permute.xlu0 %13136 }
 0x30c   :  { %12229 = vmatmul.msk.f32.vlgmr.msrb.gmra.mxu1 %vm110_vm1, %v16165_v55  ;;  %v13138_v51 = vunpack.i.l.bf16 %v13137_v0 }
 0x30d   :  { %12230 = vmatmul.msk.f32.vlgmr.msrb.gmra.mxu2 %vm110_vm1, %v16165_v55  ;;  %12231 = vmatmul.msk.f32.vlgmr.msra.gmra.mxu3 %vm110_vm1, %v16165_v55 }
 0x30e   :  { %12232 = vmatmul.msk.f32.vlgmr.msrb.gmra.mxu0 %vm110_vm1, %v16165_v55  ;;  %8472 = vmatpush.msrb.mxu1 %v8368_v33  ;;  %v13132_v31 = vpop.permute.xlu2 %13131 }
 0x30f   :  { %8492 = vmatpush.msrb.mxu2 %v8369_v38  ;;  %8512 = vmatpush.msra.mxu3 %v8370_v13  ;;  %v13133_v14 = vunpack.i.l.bf16 %v13132_v31 }
 0x310   :  { %v6710_v26 = vpop.f32.mrf.mxu2  ;;  %v6730_v63 = vpop.f32.mrf.mxu3  ;;  %8532 = vmatpush.msrb.mxu0 %v8371_v40 }
 0x311   :  { %v16256_v22 = vadd.f32 %v6710_v26, %v16158_v39  ;;  %v16258_v48 = vadd.f32 %v6730_v63, %v6478_v10  ;;  %v16260_v4 = vpop.f32.mrf.mxu1  ;;  %v8373_v39 = vsel %vm749_vm2, %v13104_v61, %v13108_v49 }
 0x312   :  { %v13127_v59 = vpop.permute.xlu1 %13126 }
 0x313   :  { %v16267_v58 = vpop.f32.mrf.mxu0  ;;  %v13128_v37 = vunpack.i.l.bf16 %v13127_v59 }
 0x314   :  { %12233 = vmatmul.msk.f32.vlgmr.msra.gmra.mxu1 %vm110_vm1, %v16165_v55  ;;  %v6482_v55 = vadd.f32 %v16167_v52, %v6099_v57  ;;  %v8378_v52 = vsel %vm749_vm2, %v13118_v29, %v8364_v35  ;;  %vm10658_vm2 = vcmask 744448  }
 0x315   :  { %12235 = vmatmul.msk.f32.vlgmr.msra.gmra.mxu2 %vm110_vm1, %v16265_v5  ;;  %12236 = vmatmul.msk.f32.vlgmr.msrb.gmra.mxu3 %vm110_vm1, %v16265_v5 }
 0x316   :  { %12237 = vmatmul.msk.f32.vlgmr.msra.gmra.mxu0 %vm110_vm1, %v16265_v5  ;;  %8552 = vmatpush.msra.mxu1 %v8372_v21  ;;  %v13147_v49 = vpop.permute.xlu2 %13146  ;;  %v13134_v21 = vunpack.i.h.bf16 %v13132_v31 }
 0x317   :  { %8572 = vmatpush.msra.mxu2 %v8373_v39  ;;  %8592 = vmatpush.msrb.mxu3 %v8374_v7  ;;  %v13139_v39 = vunpack.i.h.bf16 %v13137_v0  ;;  %v16362_v0 = vld [vmem:[%s19817_s1 + $0xb8] sm:$0xff] }
 0x318   :  { %v6790_v62 = vpop.f32.mrf.mxu2  ;;  %v6810_v3 = vpop.f32.mrf.mxu3  ;;  %8612 = vmatpush.msra.mxu0 %v8375_v2  ;;  %v13148_v2 = vunpack.i.l.bf16 %v13147_v49  ;;  %v8749_v41 = vsel %vm1129_vm3, %v13133_v14, %v13134_v21 }
 0x319   :  { %v16285_v60 = vadd.f32 %v6790_v62, %v16187_v23  ;;  %v16287_v46 = vadd.f32 %v6810_v3, %v6482_v55  ;;  %v16289_v24 = vpop.f32.mrf.mxu1  ;;  %v6471_v23 = vadd.f32 %v16110_v43, %v16014_v6  ;;  %v13124_v6 = vunpack.i.h.bf16 %v13122_v17  ;;  %v13152_v3 = vpop.permute.xlu0 %13151 }
 0x31a   :  { %v13129_v43 = vunpack.i.h.bf16 %v13127_v59  ;;  %v8750_v62 = vsel %vm1129_vm3, %v13134_v21, %v13139_v39 }
 0x31b   :  { %19841 = vst [vmem:[#allocation6_spill] sm:$0xff] %v16285_v60  ;;  %v16291_v27 = vpop.f32.mrf.mxu0  ;;  %v6854_v42 = vadd.f32 %v16191_v56, %v6471_v23  ;;  %v8744_v56 = vsel %vm1129_vm3, %v13128_v37, %v13123_v47  ;;  %v8745_v61 = vsel %vm1129_vm3, %v13123_v47, %v13124_v6 }
 0x31c   :  { %19842 = vst [vmem:[#allocation7_spill] sm:$0xff] %v16287_v46  ;;  %12238 = vmatmul.msk.f32.vlgmr.msrb.gmra.mxu1 %vm110_vm1, %v16265_v5  ;;  %v8746_v26 = vsel %vm1129_vm3, %v13124_v6, %v13129_v43  ;;  %v8747_v63 = vsel %vm1129_vm3, %v13129_v43, %v13138_v51 }
 0x31d   :  { %12239 = vmatmul.msk.f32.vlgmr.msrb.gmra.mxu2 %vm110_vm1, %v16265_v5  ;;  %12240 = vmatmul.msk.f32.vlgmr.msra.gmra.mxu3 %vm110_vm1, %v16265_v5 }
 0x31e   :  { %12241 = vmatmul.msk.f32.vlgmr.msrb.gmra.mxu0 %vm110_vm1, %v16265_v5  ;;  %8632 = vmatpush.msrb.mxu1 %v8376_v11 }
 0x31f   :  { %8652 = vmatpush.msrb.mxu2 %v8377_v54  ;;  %8672 = vmatpush.msra.mxu3 %v8378_v52  ;;  %v13149_v54 = vunpack.i.h.bf16 %v13147_v49  ;;  %v9470_v49 = vld [vmem:[%s19818_s2] sm:$0xff] }
 0x320   :  { %v6953_v33 = vpop.f32.mrf.mxu2  ;;  %v6973_v38 = vpop.f32.mrf.mxu3  ;;  %8692 = vmatpush.msrb.mxu0 %v8364_v35 }
 0x321   :  { %v16308_v13 = vadd.f32 %v6953_v33, %v16211_v19  ;;  %v16310_v28 = vadd.f32 %v6973_v38, %v6854_v42  ;;  %v16312_v40 = vpop.f32.mrf.mxu1  ;;  %v6475_v19 = vadd.f32 %v16136_v45, %v16043_v15  ;;  %v13142_v35 = vpop.permute.xlu1 %13141 }
 0x322   :  { %v13143_v29 = vunpack.i.l.bf16 %v13142_v35  ;;  %v13144_v59 = vunpack.i.h.bf16 %v13142_v35 }
 0x323   :  { %v16314_v10 = vpop.f32.mrf.mxu0  ;;  %v6858_v16 = vadd.f32 %v16215_v50, %v6475_v19  ;;  %v8748_v50 = vsel %vm1129_vm3, %v13138_v51, %v13133_v14 }
 0x324   :  { %12242 = vmatmul.msk.f32.vlgmr.msra.gmra.mxu1 %vm110_vm1, %v16265_v5  ;;  %v8752_v47 = vsel %vm1129_vm3, %v13148_v2, %v13143_v29  ;;  %v8753_v33 = vsel %vm1129_vm3, %v13143_v29, %v13144_v59 }
 0x325   :  { %12243 = vmatmul.msk.f32.vlgmr.msra.gmra.mxu2 %vm110_vm1, %v16265_v5  ;;  %12244 = vmatmul.msk.f32.vlgmr.msrb.gmra.mxu3 %vm110_vm1, %v16265_v5  ;;  %v13157_v37 = vpop.permute.xlu2 %13156 }
 0x326   :  { %12245 = vmatmul.msk.f32.vlgmr.msra.gmra.mxu0 %vm110_vm1, %v16265_v5  ;;  %8791 = vmatpush.msra.mxu1 %v8744_v56  ;;  %v13154_v56 = vunpack.i.h.bf16 %v13152_v3 }
 0x327   :  { %8811 = vmatpush.msra.mxu2 %v8745_v61  ;;  %8831 = vmatpush.msrb.mxu3 %v8746_v26  ;;  %v13153_v61 = vunpack.i.l.bf16 %v13152_v3  ;;  %v13159_v3 = vunpack.i.h.bf16 %v13157_v37 }
 0x328   :  { %v7033_v15 = vpop.f32.mrf.mxu2  ;;  %v7053_v45 = vpop.f32.mrf.mxu3  ;;  %8851 = vmatpush.msra.mxu0 %v8747_v63 }
 0x329   :  { %v16332_v7 = vadd.f32 %v7033_v15, %v16234_v12  ;;  %v16334_v17 = vadd.f32 %v7053_v45, %v6858_v16  ;;  %v16336_v57 = vpop.f32.mrf.mxu1  ;;  %v8751_v12 = vsel %vm1129_vm3, %v13139_v39, %v13148_v2  ;;  %v13294_v16 = vmov 0  }
 0x32a   :  { %13175 = vset.pattern.permute.xlu1 %v13294_v16  ;;  %13226 = vset.pattern.permute.xlu0 %v13294_v16  ;;  %v8757_v45 = vsel %vm1129_vm3, %v13153_v61, %v13154_v56  ;;  %v13158_v2 = vunpack.i.l.bf16 %v13157_v37 }
 0x32b   :  { %v16338_v55 = vpop.f32.mrf.mxu0  ;;  %v13162_v6 = vpop.permute.xlu0 %13161  ;;  %9473 = vperm.xlu1 %13175, %v9470_v49  }
 0x32c   :  { %12246 = vmatmul.msk.f32.vlgmr.msrb.gmra.mxu1 %vm110_vm1, %v16265_v5  ;;  %v13164_v19 = vunpack.i.h.bf16 %v13162_v6  ;;  %v13163_v63 = vunpack.i.l.bf16 %v13162_v6 }
 0x32d   :  { %12247 = vmatmul.msk.f32.vlgmr.msrb.gmra.mxu2 %vm110_vm1, %v16265_v5  ;;  %12248 = vmatmul.msk.f32.vlgmr.msra.gmra.mxu3 %vm110_vm1, %v16265_v5  ;;  %v9104_v39 = vpop.permute.xlu2 %9103 }
 0x32e   :  { %12249 = vmatmul.msk.f32.vlgmr.msrb.gmra.mxu0 %vm110_vm1, %v16265_v5  ;;  %8871 = vmatpush.msrb.mxu1 %v8748_v50  ;;  %v8739_v5 = vpop.permute.xlu1 %8738  ;;  %v9123_v21 = vsel %vm1509_vm4, %v13163_v63, %v13164_v19  ;;  %v12266_v63 = vld [vmem:[%s19817_s1 + $0xc0] sm:$0xff] }
 0x32f   :  { %8891 = vmatpush.msrb.mxu2 %v8749_v41  ;;  %8911 = vmatpush.msra.mxu3 %v8750_v62  ;;  %v8755_v38 = vsel %vm1129_vm3, %v13149_v54, %v8739_v5  ;;  %v8756_v15 = vsel %vm1129_vm3, %v8739_v5, %v13153_v61 }
 0x330   :  { %v7113_v11 = vpop.f32.mrf.mxu2  ;;  %v16352_v52 = vpop.f32.mrf.mxu3  ;;  %8931 = vmatpush.msrb.mxu0 %v8751_v12 }
 0x331   :  { %v16355_v31 = vadd.f32 %v7113_v11, %v16258_v48  ;;  %v16357_v23 = vpop.f32.mrf.mxu1  ;;  %v8754_v48 = vsel %vm1129_vm3, %v13144_v59, %v13149_v54  ;;  %v9124_v11 = vsel %vm1509_vm4, %v13164_v19, %v13158_v2  ;;  %v9125_v59 = vsel %vm1509_vm4, %v13158_v2, %v13159_v3 }
 0x332   :  { %19843 = vst [vmem:[#allocation3_spill] sm:$0xff] %v16357_v23 }
 0x333   :  { %v16364_v42 = vpop.f32.mrf.mxu0  ;;  %v9106_v50 = vpop.permute.xlu0 %9105 }
 0x334   :  { %12251 = vmatmul.msk.f32.vlgmr.msra.gmra.mxu1 %vm110_vm1, %v16362_v0  ;;  %v9128_v49 = vsel %vm1509_vm4, %v9104_v39, %v9106_v50 }
 0x335   :  { %12252 = vmatmul.msk.f32.vlgmr.msra.gmra.mxu2 %vm110_vm1, %v16362_v0  ;;  %12253 = vmatmul.msk.f32.vlgmr.msrb.gmra.mxu3 %vm110_vm1, %v16362_v0  ;;  %v13172_v37 = vpop.permute.xlu2 %13171 }
 0x336   :  { %12254 = vmatmul.msk.f32.vlgmr.msra.gmra.mxu0 %vm110_vm1, %v16362_v0  ;;  %8951 = vmatpush.msra.mxu1 %v8752_v47  ;;  %v9102_v35 = vpop.permute.xlu1 %9101  ;;  %v13174_v2 = vunpack.i.h.bf16 %v13172_v37 }
 0x337   :  { %8971 = vmatpush.msra.mxu2 %v8753_v33  ;;  %8991 = vmatpush.msrb.mxu3 %v8754_v48  ;;  %v9126_v54 = vsel %vm1509_vm4, %v13159_v3, %v9102_v35  ;;  %v9127_v5 = vsel %vm1509_vm4, %v9102_v35, %v9104_v39 }
 0x338   :  { %v16378_v43 = vpop.f32.mrf.mxu2  ;;  %v16380_v51 = vpop.f32.mrf.mxu3  ;;  %9011 = vmatpush.msra.mxu0 %v8755_v38 }
 0x339   :  { %19844 = vst [vmem:[#allocation4_spill] sm:$0xff] %v16378_v43  ;;  %v16382_v26 = vpop.f32.mrf.mxu1 }
 0x33a   :  { %19845 = vst [vmem:[#allocation5_spill] sm:$0xff] %v16380_v51 }
 0x33b   :  { %v16387_v14 = vpop.f32.mrf.mxu0  ;;  %v9112_v61 = vpop.permute.xlu0 %9111 }
 0x33c   :  { %12255 = vmatmul.msk.f32.vlgmr.msrb.gmra.mxu1 %vm110_vm1, %v16362_v0 }
 0x33d   :  { %12256 = vmatmul.msk.f32.vlgmr.msrb.gmra.mxu2 %vm110_vm1, %v16362_v0  ;;  %12257 = vmatmul.msk.f32.vlgmr.msra.gmra.mxu3 %vm110_vm1, %v16362_v0 }
 0x33e   :  { %12258 = vmatmul.msk.f32.vlgmr.msrb.gmra.mxu0 %vm110_vm1, %v16362_v0  ;;  %9071 = vmatpush.msra.mxu3 %v13154_v56  ;;  %v13167_v47 = vpop.permute.xlu1 %13166 }
 0x33f   :  { %9031 = vmatpush.msrb.mxu1 %v8756_v15  ;;  %9051 = vmatpush.msrb.mxu2 %v8757_v45  ;;  %v13169_v38 = vunpack.i.h.bf16 %v13167_v47  ;;  %v13168_v6 = vunpack.i.l.bf16 %v13167_v47  ;;  %v13173_v45 = vunpack.i.l.bf16 %v13172_v37 }
 0x340   :  { %v16400_v41 = vpop.f32.mrf.mxu2  ;;  %v16402_v62 = vpop.f32.mrf.mxu3  ;;  %9170 = vmatpush.msrb.mxu0 %v9123_v21 }
 0x341   :  { %v16404_v12 = vpop.f32.mrf.mxu1  ;;  %v9129_v16 = vsel %vm1509_vm4, %v9106_v50, %v13168_v6  ;;  %v9130_v35 = vsel %vm1509_vm4, %v13168_v6, %v13169_v38  ;;  %v9131_v15 = vsel %vm1509_vm4, %v13169_v38, %v9112_v61 }
 0x343   :  { %v16406_v29 = vpop.f32.mrf.mxu0  ;;  %v9122_v37 = vpop.permute.xlu0 %9121 }
 0x344   :  { %19846 = vst [vmem:[#allocation8_spill] sm:$0xff] %v16406_v29  ;;  %12259 = vmatmul.msk.f32.vlgmr.msra.gmra.mxu1 %vm110_vm1, %v16362_v0 }
 0x345   :  { %12260 = vmatmul.msk.f32.vlgmr.msra.gmra.mxu2 %vm110_vm1, %v16362_v0  ;;  %12261 = vmatmul.msk.f32.vlgmr.msrb.gmra.mxu3 %vm110_vm1, %v16362_v0 }
 0x346   :  { %12262 = vmatmul.msk.f32.vlgmr.msra.gmra.mxu0 %vm110_vm1, %v16362_v0  ;;  %9190 = vmatpush.msra.mxu1 %v9124_v11  ;;  %v9118_v3 = vpop.permute.xlu1 %9117  ;;  %v9120_v11 = vpop.permute.xlu2 %9119 }
 0x347   :  { %9210 = vmatpush.msra.mxu2 %v9125_v59  ;;  %9230 = vmatpush.msrb.mxu3 %v9126_v54  ;;  %v9134_v59 = vsel %vm1509_vm4, %v13174_v2, %v9118_v3  ;;  %v9135_v47 = vsel %vm1509_vm4, %v9118_v3, %v9120_v11 }
 0x348   :  { %v16420_v33 = vpop.f32.mrf.mxu2  ;;  %v16422_v48 = vpop.f32.mrf.mxu3  ;;  %9250 = vmatpush.msra.mxu0 %v9127_v5  ;;  %v9133_v5 = vsel %vm1509_vm4, %v13173_v45, %v13174_v2 }
 0x349   :  { %19847 = vst [vmem:[#allocation9_spill] sm:$0xff] %v16422_v48  ;;  %v16424_v56 = vpop.f32.mrf.mxu1 }
 0x34b   :  { %v16426_v19 = vpop.f32.mrf.mxu0 }
 0x34c   :  { %19848 = vst [vmem:[#allocation10_spill] sm:$0xff] %v16426_v19  ;;  %12263 = vmatmul.msk.f32.vlgmr.msrb.gmra.mxu1 %vm110_vm1, %v16362_v0 }
 0x34d   :  { %12264 = vmatmul.msk.f32.vlgmr.msrb.gmra.mxu2 %vm110_vm1, %v16362_v0  ;;  %12265 = vmatmul.msk.f32.vlgmr.msra.gmra.mxu3 %vm110_vm1, %v16362_v0  ;;  %v9132_v0 = vsel %vm1509_vm4, %v9112_v61, %v13173_v45 }
 0x34e   :  { %12267 = vmatmul.msk.f32.vlgmr.msrb.gmra.mxu0 %vm110_vm1, %v12266_v63  ;;  %9270 = vmatpush.msrb.mxu1 %v9128_v49 }
 0x34f   :  { %9290 = vmatpush.msrb.mxu2 %v9129_v16  ;;  %9310 = vmatpush.msra.mxu3 %v9130_v35  ;;  %v9136_v16 = vsel %vm1509_vm4, %v9120_v11, %v9122_v37 }
 0x350   :  { %v16442_v21 = vpop.f32.mrf.mxu2  ;;  %v16444_v39 = vpop.f32.mrf.mxu3  ;;  %9330 = vmatpush.msrb.mxu0 %v9131_v15 }
 0x351   :  { %19849 = vst [vmem:[#allocation11_spill] sm:$0xff] %v16442_v21  ;;  %v16446_v50 = vpop.f32.mrf.mxu1 }
 0x352   :  { %19850 = vst [vmem:[#allocation12_spill] sm:$0xff] %v16446_v50 }
 0x353   :  { %v16448_v54 = vpop.f32.mrf.mxu0 }
 0x354   :  { %12268 = vmatmul.msk.f32.vlgmr.msra.gmra.mxu1 %vm110_vm1, %v12266_v63 }
 0x355   :  { %12269 = vmatmul.msk.f32.vlgmr.msra.gmra.mxu2 %vm110_vm1, %v12266_v63  ;;  %12270 = vmatmul.msk.f32.vlgmr.msrb.gmra.mxu3 %vm110_vm1, %v12266_v63 }
 0x356   :  { %12271 = vmatmul.msk.f32.vlgmr.msra.gmra.mxu0 %vm110_vm1, %v12266_v63  ;;  %9350 = vmatpush.msra.mxu1 %v9132_v0 }
 0x357   :  { %9370 = vmatpush.msra.mxu2 %v9133_v5  ;;  %9390 = vmatpush.msrb.mxu3 %v9134_v59 }
 0x358   :  { %v16458_v38 = vpop.f32.mrf.mxu2  ;;  %v7616_v6 = vpop.f32.mrf.mxu3  ;;  %9410 = vmatpush.msra.mxu0 %v9135_v47 }
 0x359   :  { %19851 = vst [vmem:[#allocation13_spill] sm:$0xff] %v16458_v38  ;;  %v16460_v61 = vpop.f32.mrf.mxu1 }
 0x35b   :  { %v16462_v49 = vpop.f32.mrf.mxu0 }
 0x35c   :  { %12272 = vmatmul.msk.f32.vlgmr.msrb.gmra.mxu1 %vm110_vm1, %v12266_v63 }
 0x35d   :  { %12273 = vmatmul.msk.f32.vlgmr.msrb.gmra.mxu2 %vm110_vm1, %v12266_v63  ;;  %12274 = vmatmul.msk.f32.vlgmr.msra.gmra.mxu3 %vm110_vm1, %v12266_v63 }
 0x35e   :  { %12275 = vmatmul.msk.f32.vlgmr.msrb.gmra.mxu0 %vm110_vm1, %v12266_v63  ;;  %9430 = vmatpush.msrb.mxu1 %v9136_v16 }
 0x35f   :  { %9450 = vmatpush.msrb.mxu2 %v9122_v37 }
 0x360   :  { %v16469_v35 = vpop.f32.mrf.mxu2  ;;  %v16471_v15 = vpop.f32.mrf.mxu3 }
 0x361   :  { %v16473_v45 = vpop.f32.mrf.mxu1 }
 0x363   :  { %v16475_v2 = vpop.f32.mrf.mxu0 }
 0x364   :  { %19852 = vst [vmem:[#allocation14_spill] sm:$0xff] %v16475_v2  ;;  %12276 = vmatmul.msk.f32.vlgmr.msra.gmra.mxu1 %vm110_vm1, %v12266_v63 }
 0x365   :  { %12277 = vmatmul.msk.f32.vlgmr.msra.gmra.mxu2 %vm110_vm1, %v12266_v63  ;;  %12278 = vmatmul.msk.f32.vlgmr.msrb.gmra.mxu3 %vm110_vm1, %v12266_v63 }
 0x366   :  { %12279 = vmatmul.msk.f32.vlgmr.msra.gmra.mxu0 %vm110_vm1, %v12266_v63 }
 0x368   :  { %v16481_v3 = vpop.f32.mrf.mxu2  ;;  %v16483_v11 = vpop.f32.mrf.mxu3 }
 0x369   :  { %19853 = vst [vmem:[#allocation15_spill] sm:$0xff] %v16481_v3  ;;  %v16485_v0 = vpop.f32.mrf.mxu1 }
 0x36a   :  { %19854 = vst [vmem:[#allocation16_spill] sm:$0xff] %v16483_v11 }
 0x36b   :  { %19855 = vst [vmem:[#allocation17_spill] sm:$0xff] %v16485_v0  ;;  %v16487_v59 = vpop.f32.mrf.mxu0 }
 0x36c   :  { %19856 = vst [vmem:[#allocation18_spill] sm:$0xff] %v16487_v59  ;;  %12280 = vmatmul.msk.f32.vlgmr.msrb.gmra.mxu1 %vm110_vm1, %v12266_v63 }
 0x36d   :  { %12281 = vmatmul.msk.f32.vlgmr.msrb.gmra.mxu2 %vm110_vm1, %v12266_v63 }
 0x370   :  { %v7856_v5 = vpop.f32.mrf.mxu2  ;;  %v16491_v47 = vpop.f32.mrf.mxu3 }
 0x371   :  { %19857 = vst [vmem:[#allocation19_spill] sm:$0xff] %v16491_v47  ;;  %v16493_v37 = vpop.f32.mrf.mxu1 }
 0x372   :  { %19858 = vst [vmem:[#allocation20_spill] sm:$0xff] %v16493_v37 }
 0x373   :  { %v16495_v16 = vpop.f32.mrf.mxu0 }
 0x378   :  { %v7936_v38 = vpop.f32.mrf.mxu2  ;;  %v8035_v19 = vpop.f32.mrf.mxu3 }
 0x379   :  { %v16497_v51 = vpop.f32.mrf.mxu1 }
 0x37a   :  { %19859 = vst [vmem:[#allocation21_spill] sm:$0xff] %v16497_v51 }
 0x37b   :  { %v16499_v50 = vpop.f32.mrf.mxu0 }
 0x37c   :  { %19860 = vst [vmem:[#allocation22_spill] sm:$0xff] %v16499_v50 }
 0x380   :  { %v16501_v0 = vpop.f32.mrf.mxu2  ;;  %v16503_v59 = vpop.f32.mrf.mxu3 }
 0x381   :  { %19861 = vst [vmem:[#allocation23_spill] sm:$0xff] %v16501_v0  ;;  %v16505_v11 = vpop.f32.mrf.mxu1 }
 0x382   :  { %19862 = vst [vmem:[#allocation24_spill] sm:$0xff] %v16505_v11 }
 0x383   :  { %v16507_v63 = vpop.f32.mrf.mxu0 }
 0x384   :  { %19863 = vst [vmem:[#allocation25_spill] sm:$0xff] %v16507_v63  ;;  %v6863_v63 = vadd.f32 %v16260_v4, %v16185_v1 }
 0x386   :  { %v7246_v11 = vadd.f32 %v16338_v55, %v6863_v63 }
 0x388   :  { %v16509_v3 = vpop.f32.mrf.mxu2  ;;  %v16511_v47 = vpop.f32.mrf.mxu3 }
 0x389   :  { %19864 = vst [vmem:[#allocation26_spill] sm:$0xff] %v16509_v3  ;;  %v8235_v37 = vpop.f32.mrf.mxu1 }
 0x38a   :  { %19865 = vst [vmem:[#allocation27_spill] sm:$0xff] %v16511_v47 }
 0x38b   :  { %v16513_v21 = vpop.f32.mrf.mxu0 }
 0x38c   :  { %19866 = vst [vmem:[#allocation28_spill] sm:$0xff] %v16513_v21  ;;  %v7629_v21 = vadd.f32 %v16444_v39, %v7246_v11 }
 0x38e   :  { %v7949_v47 = vadd.f32 %v7856_v5, %v7629_v21 }
 0x390   :  { %v16515_v48 = vpop.f32.mrf.mxu2  ;;  %v16517_v29 = vpop.f32.mrf.mxu3  ;;  %v8328_v0 = vadd.f32 %v8235_v37, %v7949_v47 }
 0x391   :  { %19867 = vst [vmem:[#allocation29_spill] sm:$0xff] %v16515_v48  ;;  %v8315_v43 = vpop.f32.mrf.mxu1 }
 0x392   :  { %19868 = vst [vmem:[#allocation30_spill] sm:$0xff] %v16517_v29 }
 0x393   :  { %v16519_v46 = vpop.f32.mrf.mxu0 }
 0x394   :  { %19869 = vst [vmem:[#allocation31_spill] sm:$0xff] %v16519_v46  ;;  %v6867_v46 = vadd.f32 %v16289_v24, %v16209_v8 }
 0x396   :  { %v7250_v51 = vadd.f32 %v16364_v42, %v6867_v46 }
 0x398   :  { %v8414_v23 = vpop.f32.mrf.mxu2  ;;  %v8434_v60 = vpop.f32.mrf.mxu3  ;;  %v7633_v4 = vadd.f32 %v7616_v6, %v7250_v51 }
 0x399   :  { %v16521_v50 = vpop.f32.mrf.mxu1 }
 0x39a   :  { %19870 = vst [vmem:[#allocation32_spill] sm:$0xff] %v16521_v50 }
 0x39b   :  { %v16525_v3 = vpop.f32.mrf.mxu0 }
 0x39c   :  { %19871 = vst [vmem:[#allocation33_spill] sm:$0xff] %v16525_v3  ;;  %v7953_v3 = vadd.f32 %v7936_v38, %v7633_v4 }
 0x39e   :  { %v8332_v11 = vadd.f32 %v8315_v43, %v7953_v3  ;;  %v7619_v3 = vadd.f32 %v16382_v26, %v16308_v13 }
 0x3a0   :  { %v8494_v48 = vpop.f32.mrf.mxu2  ;;  %v16529_v2 = vpop.f32.mrf.mxu3  ;;  %v7939_v37 = vadd.f32 %v16448_v54, %v7619_v3  ;;  %v6855_v54 = vadd.f32 %v16213_v18, %v16132_v36  ;;  %v6483_v18 = vadd.f32 %v16189_v30, %v16106_v34 }
 0x3a1   :  { %v16531_v29 = vpop.f32.mrf.mxu1  ;;  %v16580_v3 = vpop.permute.xlu1 %9473 }
 0x3a2   :  { %19872 = vst [vmem:[#allocation34_spill] sm:$0xff] %v16531_v29  ;;  %v8318_v4 = vadd.f32 %v8035_v19, %v7939_v37  ;;  %v7238_v37 = vadd.f32 %v16291_v27, %v6855_v54  ;;  %v6866_v34 = vadd.f32 %v16267_v58, %v6483_v18  ;;  %v19877_v58 = vld [vmem:[#allocation21_spill] sm:$0xff]  ;;  %v19883_v54 = vld [vmem:[#allocation7_spill] sm:$0xff] }
 0x3a3   :  { %v8614_v50 = vpop.f32.mrf.mxu0 }
 0x3a4   :  { %v16536_v1 = vadd.f32 %v8614_v50, %v8328_v0 }
 0x3a6   :  { %19873 = vst [vmem:[#allocation35_spill] sm:$0xff] %v16536_v1 }
 0x3a8   :  { %v16538_v55 = vpop.f32.mrf.mxu2  ;;  %v16540_v39 = vpop.f32.mrf.mxu3 }
 0x3a9   :  { %v16542_v21 = vpop.f32.mrf.mxu1 }
 0x3aa   :  { %19874 = vst [vmem:[#allocation36_spill] sm:$0xff] %v16542_v21  ;;  %v7623_v21 = vadd.f32 %v16404_v12, %v16332_v7  ;;  %v6479_v7 = vadd.f32 %v16160_v9, %v16078_v53  ;;  %v7624_v53 = vadd.f32 %v16420_v33, %v16334_v17 }
 0x3ab   :  { %v8694_v5 = vpop.f32.mrf.mxu0 }
 0x3ac   :  { %v16544_v63 = vadd.f32 %v8694_v5, %v8332_v11  ;;  %v7620_v11 = vadd.f32 %v16400_v41, %v16310_v28  ;;  %v8697_v5 = vadd.f32 %v8414_v23, %v8318_v4  ;;  %v7943_v28 = vadd.f32 %v16462_v49, %v7623_v21 }
 0x3ad   :  { %v7239_v4 = vadd.f32 %v16312_v40, %v16232_v44  ;;  %v6859_v49 = vadd.f32 %v16236_v25, %v16156_v32  ;;  %v6862_v44 = vadd.f32 %v16238_v20, %v6479_v7  ;;  %v7627_v20 = vadd.f32 %v16424_v56, %v16355_v31 }
 0x3ae   :  { %19875 = vst [vmem:[#allocation37_spill] sm:$0xff] %v16544_v63  ;;  %v7940_v13 = vadd.f32 %v16460_v61, %v7620_v11  ;;  %v8322_v12 = vadd.f32 %v16503_v59, %v7943_v28  ;;  %v7944_v17 = vadd.f32 %v16473_v45, %v7624_v53  ;;  %v19879_v11 = vld [vmem:[#allocation14_spill] sm:$0xff]  ;;  %v19886_v28 = vld [vmem:[#allocation32_spill] sm:$0xff]  ;;  %v19890_v53 = vld [vmem:[#allocation11_spill] sm:$0xff] }
 0x3af   :  { %v7622_v27 = vadd.f32 %v16387_v14, %v7239_v4  ;;  %v7242_v30 = vadd.f32 %v16314_v10, %v6859_v49  ;;  %v7245_v21 = vadd.f32 %v16352_v52, %v6862_v44  ;;  %v19878_v10 = vld [vmem:[#allocation23_spill] sm:$0xff]  ;;  %v19881_v45 = vld [vmem:[#allocation6_spill] sm:$0xff]  ;;  %v19889_v49 = vld [vmem:[#allocation9_spill] sm:$0xff] }
 0x3b0   :  { %v16546_v29 = vpop.f32.mrf.mxu2  ;;  %v16548_v8 = vpop.f32.mrf.mxu3  ;;  %v8319_v23 = vadd.f32 %v16495_v16, %v7940_v13  ;;  %v7621_v16 = vadd.f32 %v16402_v62, %v7238_v37  ;;  %v8701_v9 = vadd.f32 %v8494_v48, %v8322_v12  ;;  %v7243_v48 = vadd.f32 %v16336_v57, %v16256_v22  ;;  %v19884_v22 = vld [vmem:[#allocation4_spill] sm:$0xff]  ;;  %v19885_v52 = vld [vmem:[#allocation31_spill] sm:$0xff] }
 0x3b1   :  { %19876 = vst [vmem:[#allocation38_spill] sm:$0xff] %v16548_v8  ;;  %v8793_v24 = vpop.f32.mrf.mxu1  ;;  %v7942_v25 = vadd.f32 %v16471_v15, %v7622_v27  ;;  %v7947_v15 = vadd.f32 %v19879_v11, %v7627_v20  ;;  %v7248_v57 = vadd.f32 %v19884_v22, %v19883_v54  ;;  %v7625_v27 = vadd.f32 %v19889_v49, %v7242_v30  ;;  %v19899_v22 = vld [vmem:[#allocation33_spill] sm:$0xff] }
 0x3b2   :  { %v9076_v26 = vadd.f32 %v8793_v24, %v8697_v5  ;;  %v8698_v61 = vadd.f32 %v8434_v60, %v8319_v23  ;;  %v7941_v32 = vadd.f32 %v16469_v35, %v7621_v16  ;;  %v19880_v5 = vld [vmem:[#allocation22_spill] sm:$0xff] }
 0x3b3   :  { %v16550_v46 = vpop.f32.mrf.mxu0  ;;  %v8323_v13 = vadd.f32 %v19880_v5, %v7944_v17  ;;  %v19892_v17 = vld [vmem:[#allocation16_spill] sm:$0xff] }
 0x3b4   :  { %v8320_v24 = vadd.f32 %v19877_v58, %v7941_v32 }
 0x3b5   :  { %v8702_v4 = vadd.f32 %v16529_v2, %v8323_v13  ;;  %v19897_v13 = vld [vmem:[#allocation18_spill] sm:$0xff] }
 0x3b8   :  { %v8813_v42 = vpop.f32.mrf.mxu2  ;;  %v16552_v51 = vpop.f32.mrf.mxu3 }
 0x3b9   :  { %v8873_v50 = vpop.f32.mrf.mxu1  ;;  %v9077_v60 = vadd.f32 %v8813_v42, %v8698_v61  ;;  %v8321_v42 = vadd.f32 %v19878_v10, %v7942_v25  ;;  %v19888_v61 = vld [vmem:[#allocation8_spill] sm:$0xff] }
 0x3ba   :  { %v9080_v62 = vadd.f32 %v8873_v50, %v8701_v9  ;;  %v19882_v50 = vld [vmem:[#allocation3_spill] sm:$0xff]  ;;  %v7626_v18 = vadd.f32 %v19888_v61, %v7243_v48  ;;  %v7628_v9 = vadd.f32 %v19890_v53, %v7245_v21  ;;  %v19895_v10 = vld [vmem:[#allocation24_spill] sm:$0xff] }
 0x3bb   :  { %v16554_v38 = vpop.f32.mrf.mxu0  ;;  %v8700_v23 = vadd.f32 %v19886_v28, %v8321_v42  ;;  %v19896_v42 = vld [vmem:[#allocation26_spill] sm:$0xff] }
 0x3bd   :  { %v9079_v16 = vadd.f32 %v16550_v46, %v8700_v23  ;;  %v19893_v46 = vld [vmem:[#allocation12_spill] sm:$0xff]  ;;  %v19901_v23 = vld [vmem:[#allocation5_spill] sm:$0xff] }
 0x3be   :  { %v7631_v58 = vadd.f32 %v19893_v46, %v7248_v57 }
 0x3c0   :  { %v16556_v6 = vpop.f32.mrf.mxu2  ;;  %v16558_v0 = vpop.f32.mrf.mxu3 }
 0x3c1   :  { %v16560_v43 = vpop.f32.mrf.mxu1  ;;  %v9081_v2 = vadd.f32 %v16556_v6, %v8702_v4 }
 0x3c3   :  { %v16564_v47 = vpop.f32.mrf.mxu0 }
 0x3c8   :  { %v16569_v63 = vpop.f32.mrf.mxu2  ;;  %v16571_v1 = vpop.f32.mrf.mxu3 }
 0x3c9   :  { %v16573_v8 = vpop.f32.mrf.mxu1 }
 0x3cb   :  { %v9172_v19 = vpop.f32.mrf.mxu0 }
 0x3cc   :  { %v9455_v41 = vadd.f32 %v9172_v19, %v9076_v26  ;;  %v7247_v26 = vadd.f32 %v19882_v50, %v19881_v45  ;;  %v8699_v19 = vadd.f32 %v19885_v52, %v8320_v24  ;;  %v19898_v45 = vld [vmem:[#allocation25_spill] sm:$0xff]  ;;  %v19900_v52 = vld [vmem:[#allocation34_spill] sm:$0xff] }
 0x3ce   :  { %v16591_v36 = vadd.f32 %v16580_v3, %v9455_v41  ;;  %v19887_v41 = vld [vmem:[#allocation27_spill] sm:$0xff]  ;;  %v9078_v44 = vadd.f32 %v16552_v51, %v8699_v19  ;;  %v19894_v51 = vld [vmem:[#allocation17_spill] sm:$0xff] }
 0x3cf   :  { %v8326_v37 = vadd.f32 %v19887_v41, %v7947_v15  ;;  %v7948_v24 = vadd.f32 %v19894_v51, %v7628_v9  ;;  %v7249_v41 = vadd.f32 %v19901_v23, %v6866_v34 }
 0x3d0   :  { %v16602_v40 = vpop.f32.mrf.mxu2  ;;  %v16604_v59 = vpop.f32.mrf.mxu3 }
 0x3d1   :  { %v9192_v14 = vpop.f32.mrf.mxu1  ;;  %v8327_v50 = vadd.f32 %v19898_v45, %v7948_v24  ;;  %v19909_v24 = vld [vmem:[#allocation36_spill] sm:$0xff] }
 0x3d2   :  { %v9456_v33 = vadd.f32 %v9192_v14, %v9077_v60  ;;  %v8705_v60 = vadd.f32 %v16538_v55, %v8326_v37  ;;  %v19891_v14 = vld [vmem:[#allocation15_spill] sm:$0xff]  ;;  %v19902_v37 = vld [vmem:[#allocation30_spill] sm:$0xff] }
 0x3d3   :  { %v9252_v35 = vpop.f32.mrf.mxu0  ;;  %v7945_v20 = vadd.f32 %v19891_v14, %v7625_v27  ;;  %v19906_v14 = vld [vmem:[#allocation20_spill] sm:$0xff] }
 0x3d4   :  { %v16621_v31 = vadd.f32 %v16580_v3, %v9456_v33  ;;  %v9459_v56 = vadd.f32 %v9252_v35, %v9080_v62  ;;  %v7946_v62 = vadd.f32 %v19892_v17, %v7626_v18  ;;  %v9084_v21 = vadd.f32 %v16560_v43, %v8705_v60  ;;  %v19903_v18 = vld [vmem:[#allocation10_spill] sm:$0xff] }
 0x3d5   :  { %v8324_v6 = vadd.f32 %v19895_v10, %v7945_v20  ;;  %v7630_v49 = vadd.f32 %v19903_v18, %v7247_v26 }
 0x3d6   :  { %v16632_v7 = vadd.f32 %v16580_v3, %v9459_v56  ;;  %v13176_v12 = vpack.i.bf16 %v16621_v31, %v16591_v36  ;;  %v8325_v35 = vadd.f32 %v19896_v42, %v7946_v62  ;;  %v7951_v56 = vadd.f32 %v19897_v13, %v7631_v58  ;;  %v19907_v62 = vld [vmem:[#allocation29_spill] sm:$0xff] }
 0x3d7   :  { %v8703_v57 = vadd.f32 %v19899_v22, %v8324_v6 }
 0x3d8   :  { %v9212_v32 = vpop.f32.mrf.mxu2  ;;  %v9232_v25 = vpop.f32.mrf.mxu3  ;;  %13177 = vrot.lane.b32.xlu2 %v13176_v12, %s13275_s23  ;;  %v8704_v19 = vadd.f32 %v19900_v52, %v8325_v35  ;;  %v8330_v4 = vadd.f32 %v19902_v37, %v7951_v56  ;;  %v8706_v12 = vadd.f32 %v16540_v39, %v8327_v50  ;;  %v19905_v39 = vld [vmem:[#allocation19_spill] sm:$0xff] }
 0x3d9   :  { %v9457_v33 = vadd.f32 %v9212_v32, %v9078_v44  ;;  %v9458_v30 = vadd.f32 %v9232_v25, %v9079_v16  ;;  %v9272_v48 = vpop.f32.mrf.mxu1  ;;  %v9082_v16 = vadd.f32 %v16558_v0, %v8703_v57  ;;  %v19904_v44 = vld [vmem:[#allocation13_spill] sm:$0xff]  ;;  %v7950_v32 = vadd.f32 %v19905_v39, %v7630_v49 }
 0x3da   :  { %v9460_v55 = vadd.f32 %v9272_v48, %v9081_v2  ;;  %v9083_v27 = vadd.f32 %v16554_v38, %v8704_v19  ;;  %v7632_v53 = vadd.f32 %v19904_v44, %v7249_v41  ;;  %v8709_v9 = vadd.f32 %v16546_v29, %v8330_v4  ;;  %v19908_v48 = vld [vmem:[#allocation28_spill] sm:$0xff] }
 0x3db   :  { %v16652_v11 = vadd.f32 %v16580_v3, %v9457_v33  ;;  %v16655_v15 = vadd.f32 %v16580_v3, %v9458_v30  ;;  %v9332_v5 = vpop.f32.mrf.mxu0  ;;  %v9085_v34 = vadd.f32 %v16569_v63, %v8706_v12  ;;  %v8329_v33 = vadd.f32 %v19907_v62, %v7950_v32  ;;  %v9902_v44 = vld [vmem:[%s19819_s3 + $0x5e0] sm:$0xff] }
 0x3dc   :  { %v16660_v54 = vadd.f32 %v16580_v3, %v9460_v55  ;;  %v9463_v43 = vadd.f32 %v9332_v5, %v9084_v21  ;;  %v7952_v0 = vadd.f32 %v19906_v14, %v7632_v53  ;;  %v9088_v20 = vadd.f32 %v16573_v8, %v8709_v9  ;;  %v19910_v55 = vld [vmem:[#allocation38_spill] sm:$0xff]  ;;  %v19911_v5 = vld [vmem:[#allocation35_spill] sm:$0xff]  ;;  %v9966_v53 = vld [vmem:[%s19819_s3 + $0x7e0] sm:$0xff]  ;;  %10715 = vmatpush.msra.mxu1 %v9902_v44 }
 0x3dd   :  { %9540 = vrot.lane.b32.xlu0 %v16652_v11, %s13275_s23  ;;  %v13181_v28 = vpack.i.bf16 %v16632_v7, %v16655_v15  ;;  %v8708_v21 = vadd.f32 %v19909_v24, %v8329_v33  ;;  %v9086_v13 = vadd.f32 %v16571_v1, %v19911_v5  ;;  %10735 = vmatpush.msra.mxu2 %v9966_v53  ;;  %v9962_v32 = vld [vmem:[%s19819_s3 + $0x7c0] sm:$0xff] }
 0x3de   :  { %v16672_v61 = vadd.f32 %v16580_v3, %v9463_v43  ;;  %v8331_v46 = vadd.f32 %v19908_v48, %v7952_v0  ;;  %v9958_v62 = vld [vmem:[%s19819_s3 + $0x7a0] sm:$0xff] }
 0x3df   :  { %13182 = vrot.lane.b32.xlu1 %v13181_v28, %s13275_s23  ;;  %v9087_v35 = vadd.f32 %v16564_v47, %v8708_v21  ;;  %v19912_v28 = vld [vmem:[#allocation37_spill] sm:$0xff]  ;;  %10736 = vmatpush.msra.mxu2 %v9962_v32  ;;  %v9758_v48 = vld [vmem:[%s19819_s3 + $0x160] sm:$0xff] }
 0x3e0   :  { %v9292_v60 = vpop.f32.mrf.mxu2  ;;  %v9312_v2 = vpop.f32.mrf.mxu3  ;;  %9546 = vrot.lane.b32.xlu2 %v16660_v54, %s13275_s23  ;;  %v8710_v10 = vadd.f32 %v19910_v55, %v8331_v46  ;;  %v9090_v23 = vadd.f32 %v16604_v59, %v19912_v28  ;;  %v9774_v59 = vld [vmem:[%s19819_s3 + $0x1e0] sm:$0xff] }
 0x3e1   :  { %v9461_v26 = vadd.f32 %v9292_v60, %v9082_v16  ;;  %v9462_v25 = vadd.f32 %v9312_v2, %v9083_v27  ;;  %v9352_v38 = vpop.f32.mrf.mxu1  ;;  %v9770_v27 = vld [vmem:[%s19819_s3 + $0x1c0] sm:$0xff]  ;;  %10675 = vmatpush.msra.mxu3 %v9774_v59  ;;  %10737 = vmatpush.msra.mxu2 %v9958_v62 }
 0x3e2   :  { %v9464_v17 = vadd.f32 %v9352_v38, %v9085_v34  ;;  %v9089_v56 = vadd.f32 %v16602_v40, %v8710_v10  ;;  %v9766_v34 = vld [vmem:[%s19819_s3 + $0x1a0] sm:$0xff] }
 0x3e3   :  { %v16688_v29 = vadd.f32 %v16580_v3, %v9461_v26  ;;  %v16691_v63 = vadd.f32 %v16580_v3, %v9462_v25  ;;  %v9412_v30 = vpop.f32.mrf.mxu0  ;;  %v9834_v60 = vld [vmem:[%s19819_s3 + $0x3c0] sm:$0xff]  ;;  %10676 = vmatpush.msra.mxu3 %v9770_v27 }
 0x3e4   :  { %v16695_v58 = vadd.f32 %v16580_v3, %v9464_v17  ;;  %v9467_v51 = vadd.f32 %v9412_v30, %v9088_v20  ;;  %v9898_v2 = vld [vmem:[%s19819_s3 + $0x5c0] sm:$0xff] }
 0x3e5   :  { %v13186_v8 = vpack.i.bf16 %v16691_v63, %v16688_v29  ;;  %v9830_v26 = vld [vmem:[%s19819_s3 + $0x3a0] sm:$0xff]  ;;  %10716 = vmatpush.msra.mxu1 %v9898_v2  ;;  %10677 = vmatpush.msra.mxu3 %v9766_v34 }
 0x3e6   :  { %v16702_v6 = vadd.f32 %v16580_v3, %v9467_v51  ;;  %v13191_v42 = vpack.i.bf16 %v16695_v58, %v16672_v61  ;;  %v9762_v20 = vld [vmem:[%s19819_s3 + $0x180] sm:$0xff] }
 0x3e7   :  { %13187 = vrot.lane.b32.xlu0 %v13186_v8, %s13275_s23  ;;  %v9894_v17 = vld [vmem:[%s19819_s3 + $0x5a0] sm:$0xff]  ;;  %10678 = vmatpush.msra.mxu3 %v9762_v20 }
 0x3e8   :  { %v9372_v45 = vpop.f32.mrf.mxu2  ;;  %v9392_v50 = vpop.f32.mrf.mxu3  ;;  %13192 = vrot.lane.b32.xlu1 %v13191_v42, %s13275_s23  ;;  %10717 = vmatpush.msra.mxu1 %v9894_v17  ;;  %v9890_v46 = vld [vmem:[%s19819_s3 + $0x580] sm:$0xff] }
 0x3e9   :  { %v9465_v43 = vadd.f32 %v9372_v45, %v9086_v13  ;;  %v9466_v22 = vadd.f32 %v9392_v50, %v9087_v35  ;;  %v9432_v57 = vpop.f32.mrf.mxu1  ;;  %v9954_v8 = vld [vmem:[%s19819_s3 + $0x780] sm:$0xff]  ;;  %10679 = vmatpush.msra.mxu3 %v9758_v48 }
 0x3ea   :  { %v9468_v52 = vadd.f32 %v9432_v57, %v9089_v56  ;;  %v9754_v35 = vld [vmem:[%s19819_s3 + $0x140] sm:$0xff]  ;;  %10718 = vmatpush.msra.mxu1 %v9890_v46  ;;  %10738 = vmatpush.msra.mxu2 %v9954_v8 }
 0x3eb   :  { %v16713_v19 = vadd.f32 %v16580_v3, %v9465_v43  ;;  %v16716_v47 = vadd.f32 %v16580_v3, %v9466_v22  ;;  %v9822_v5 = vld [vmem:[%s19819_s3 + $0x360] sm:$0xff]  ;;  %10680 = vmatpush.msra.mxu3 %v9754_v35 }
 0x3ec   :  { %v16719_v1 = vadd.f32 %v16580_v3, %v9468_v52  ;;  %v9950_v13 = vld [vmem:[%s19819_s3 + $0x760] sm:$0xff] }
 0x3ed   :  { %v13196_v40 = vpack.i.bf16 %v16716_v47, %v16713_v19  ;;  %v9818_v56 = vld [vmem:[%s19819_s3 + $0x340] sm:$0xff]  ;;  %10739 = vmatpush.msra.mxu2 %v9950_v13 }
 0x3ee   :  { %v9882_v45 = vld [vmem:[%s19819_s3 + $0x540] sm:$0xff] }
 0x3ef   :  { %9560 = vrot.lane.b32.xlu0 %v16702_v6, %s13275_s23  ;;  %13197 = vrot.lane.b32.xlu2 %v13196_v40, %s13275_s23  ;;  %v9746_v22 = vld [vmem:[%s19819_s3 + $0x100] sm:$0xff] }
 0x3f0   :  { %v9452_v41 = vpop.f32.mrf.mxu2  ;;  %v9946_v57 = vld [vmem:[%s19819_s3 + $0x740] sm:$0xff] }
 0x3f1   :  { %v9469_v37 = vadd.f32 %v9452_v41, %v9090_v23  ;;  %10740 = vmatpush.msra.mxu2 %v9946_v57  ;;  %v9878_v59 = vld [vmem:[%s19819_s3 + $0x520] sm:$0xff] }
 0x3f2   :  { %v9942_v27 = vld [vmem:[%s19819_s3 + $0x720] sm:$0xff] }
 0x3f3   :  { %v9490_v4 = vadd.f32 %v16580_v3, %v9469_v37  ;;  %v9838_v3 = vld [vmem:[%s19819_s3 + $0x3e0] sm:$0xff]  ;;  %10741 = vmatpush.msra.mxu2 %v9942_v27 }
 0x3f4   :  { %10695 = vmatpush.msrb.mxu0 %v9838_v3  ;;  %v9742_v37 = vld [vmem:[%s19819_s3 + $0xe0] sm:$0xff] }
 0x3f5   :  { %9505 = vst.msk [vmem:[#allocation2 + $0x70] sm:$0xff] %vm1509_vm4, %v9490_v4  ;;  %v9814_v4 = vld [vmem:[%s19819_s3 + $0x320] sm:$0xff] }
 0x3f6   :  { %10696 = vmatpush.msrb.mxu0 %v9834_v60  ;;  %v9738_v53 = vld [vmem:[%s19819_s3 + $0xc0] sm:$0xff] }
 0x3f7   :  { %9562 = vrot.lane.b32.xlu2 %v16719_v1, %s13275_s23  ;;  %v9870_v17 = vld [vmem:[%s19819_s3 + $0x4e0] sm:$0xff] }
 0x3f8   :  { %10697 = vmatpush.msrb.mxu0 %v9830_v26  ;;  %v9934_v62 = vld [vmem:[%s19819_s3 + $0x6e0] sm:$0xff] }
 0x3f9   :  { %v9866_v48 = vld [vmem:[%s19819_s3 + $0x4c0] sm:$0xff] }
 0x3fa   :  { %v9926_v35 = vld [vmem:[%s19819_s3 + $0x6a0] sm:$0xff] }
 0x3fb   :  { %v9858_v13 = vld [vmem:[%s19819_s3 + $0x480] sm:$0xff] }
 0x3fc   :  { %v9918_v57 = vld [vmem:[%s19819_s3 + $0x660] sm:$0xff] }
 0x3fd   :  { %v9906_v27 = vld [vmem:[%s19819_s3 + $0x600] sm:$0xff] }
 0x432   :  { %v13178_v12 = vpop.permute.xlu2 %13177 }
 0x433   :  { %v13180_v18 = vunpack.i.h.bf16 %v13178_v12  ;;  %v13179_v49 = vunpack.i.l.bf16 %v13178_v12 }
 0x435   :  { %v9566_v16 = vsel %vm80_vm0, %v13179_v49, %v13180_v18  ;;  %v16849_v49 = vld [vmem:[#allocation2 + $0x70] sm:$0xff] }
 0x436   :  { %v16767_v38 = vmax.f32 %v16591_v36, %v9566_v16 }
 0x43a   :  { %v16764_v25 = vpop.permute.xlu2 %9546 }
 0x449   :  { %v13198_v50 = vpop.permute.xlu2 %13197 }
 0x44a   :  { %v13199_v12 = vunpack.i.l.bf16 %v13198_v50  ;;  %v13200_v32 = vunpack.i.h.bf16 %v13198_v50  ;;  %v9790_v50 = vld [vmem:[%s19819_s3 + $0x260] sm:$0xff] }
 0x44f   :  { %v9541_v9 = vpop.permute.xlu0 %9540 }
 0x450   :  { %v9567_v39 = vsel %vm80_vm0, %v13180_v18, %v9541_v9 }
 0x451   :  { %v16770_v14 = vmax.f32 %v16621_v31, %v9567_v39  ;;  %v13183_v0 = vpop.permute.xlu1 %13182  ;;  %v9826_v31 = vld [vmem:[%s19819_s3 + $0x380] sm:$0xff] }
 0x452   :  { %v13185_v36 = vunpack.i.h.bf16 %v13183_v0  ;;  %v13184_v33 = vunpack.i.l.bf16 %v13183_v0  ;;  %10698 = vmatpush.msrb.mxu0 %v9826_v31  ;;  %v9874_v39 = vld [vmem:[%s19819_s3 + $0x500] sm:$0xff] }
 0x453   :  { %v13201_v30 = vpack.i.bf16 %v16770_v14, %v16767_v38  ;;  %v9734_v0 = vld [vmem:[%s19819_s3 + $0xa0] sm:$0xff] }
 0x454   :  { %v9568_v51 = vsel %vm80_vm0, %v9541_v9, %v13184_v33  ;;  %v9569_v24 = vsel %vm80_vm0, %v13184_v33, %v13185_v36  ;;  %v9570_v21 = vsel %vm80_vm0, %v13185_v36, %v16764_v25  ;;  %10699 = vmatpush.msrb.mxu0 %v9822_v5  ;;  %v9810_v9 = vld [vmem:[%s19819_s3 + $0x300] sm:$0xff]  ;;  %v9576_v33 = vsel %vm80_vm0, %v13199_v12, %v13200_v32 }
 0x455   :  { %v16800_v55 = vmax.f32 %v16652_v11, %v9568_v51  ;;  %v16803_v10 = vmax.f32 %v16655_v15, %v9569_v24  ;;  %v16806_v42 = vmax.f32 %v16632_v7, %v9570_v21  ;;  %13202 = vrot.lane.b32.xlu1 %v13201_v30, %s13279_s26  ;;  %v9886_v11 = vld [vmem:[%s19819_s3 + $0x560] sm:$0xff]  ;;  %v16937_v8 = vmax.f32 %v16713_v19, %v9576_v33 }
 0x456   :  { %v9750_v15 = vld [vmem:[%s19819_s3 + $0x120] sm:$0xff]  ;;  %10719 = vmatpush.msra.mxu1 %v9886_v11  ;;  %10700 = vmatpush.msrb.mxu0 %v9818_v56  ;;  %v16945_v11 = vpop.permute.xlu2 %9562 }
 0x457   :  { %9633 = vrot.lane.b32.xlu2 %v16806_v42, %s13279_s26  ;;  %v13206_v7 = vpack.i.bf16 %v16803_v10, %v16800_v55  ;;  %10681 = vmatpush.msra.mxu3 %v9750_v15  ;;  %v9802_v30 = vld [vmem:[%s19819_s3 + $0x2c0] sm:$0xff] }
 0x458   :  { %10720 = vmatpush.msra.mxu1 %v9882_v45  ;;  %10701 = vmatpush.msrb.mxu0 %v9814_v4  ;;  %v9930_v51 = vld [vmem:[%s19819_s3 + $0x6c0] sm:$0xff] }
 0x459   :  { %v13188_v43 = vpop.permute.xlu0 %13187  ;;  %13207 = vrot.lane.b32.xlu0 %v13206_v7, %s13279_s26  ;;  %10682 = vmatpush.msra.mxu3 %v9746_v22  ;;  %v9726_v24 = vld [vmem:[%s19819_s3 + $0x60] sm:$0xff] }
 0x45a   :  { %v13190_v52 = vunpack.i.h.bf16 %v13188_v43  ;;  %v13189_v40 = vunpack.i.l.bf16 %v13188_v43  ;;  %v13193_v28 = vpop.permute.xlu1 %13192  ;;  %10721 = vmatpush.msra.mxu1 %v9878_v59  ;;  %10702 = vmatpush.msrb.mxu0 %v9810_v9  ;;  %v9798_v21 = vld [vmem:[%s19819_s3 + $0x2a0] sm:$0xff] }
 0x45b   :  { %v13195_v23 = vunpack.i.h.bf16 %v13193_v28  ;;  %v13194_v41 = vunpack.i.l.bf16 %v13193_v28  ;;  %10683 = vmatpush.msra.mxu3 %v9742_v37  ;;  %v9722_v5 = vld [vmem:[%s19819_s3 + $0x40] sm:$0xff] }
 0x45c   :  { %v9571_v18 = vsel %vm80_vm0, %v16764_v25, %v13189_v40  ;;  %v9572_v16 = vsel %vm80_vm0, %v13189_v40, %v13190_v52  ;;  %10722 = vmatpush.msra.mxu1 %v9874_v39  ;;  %v9794_v7 = vld [vmem:[%s19819_s3 + $0x280] sm:$0xff] }
 0x45d   :  { %v9573_v3 = vsel %vm80_vm0, %v13190_v52, %v13194_v41  ;;  %v9574_v44 = vsel %vm80_vm0, %v13194_v41, %v13195_v23  ;;  %9564 = vrot.lane.b32.xlu1 %v16849_v49, %s13275_s23  ;;  %v16869_v34 = vmax.f32 %v16660_v54, %v9571_v18  ;;  %v9575_v60 = vsel %vm80_vm0, %v13195_v23, %v13199_v12  ;;  %v9938_v54 = vld [vmem:[%s19819_s3 + $0x700] sm:$0xff] }
 0x45e   :  { %v16873_v2 = vmax.f32 %v16691_v63, %v9573_v3  ;;  %v16879_v26 = vmax.f32 %v16672_v61, %v9574_v44  ;;  %v16882_v25 = vmax.f32 %v16695_v58, %v9575_v60  ;;  %10684 = vmatpush.msra.mxu3 %v9738_v53  ;;  %v9806_v61 = vld [vmem:[%s19819_s3 + $0x2e0] sm:$0xff]  ;;  %v16896_v58 = vmax.f32 %v16688_v29, %v9572_v16 }
 0x45f   :  { %10742 = vmatpush.msra.mxu2 %v9938_v54  ;;  %v9730_v29 = vld [vmem:[%s19819_s3 + $0x80] sm:$0xff]  ;;  %10703 = vmatpush.msrb.mxu0 %v9806_v61 }
 0x460   :  { %v13211_v63 = vpack.i.bf16 %v16873_v2, %v16869_v34  ;;  %9643 = vrot.lane.b32.xlu2 %v16882_v25, %s13279_s26  ;;  %v13216_v31 = vpack.i.bf16 %v16896_v58, %v16879_v26  ;;  %10685 = vmatpush.msra.mxu3 %v9734_v0  ;;  %v9922_v56 = vld [vmem:[%s19819_s3 + $0x680] sm:$0xff] }
 0x461   :  { %v9561_v20 = vpop.permute.xlu0 %9560  ;;  %10723 = vmatpush.msra.mxu1 %v9870_v17  ;;  %10743 = vmatpush.msra.mxu2 %v9934_v62  ;;  %v9718_v45 = vld [vmem:[%s19819_s3 + $0x20] sm:$0xff] }
 0x462   :  { %v9577_v36 = vsel %vm80_vm0, %v13200_v32, %v9561_v20  ;;  %13212 = vrot.lane.b32.xlu0 %v13211_v63, %s13279_s26  ;;  %10686 = vmatpush.msra.mxu3 %v9730_v29  ;;  %v9578_v19 = vsel %vm80_vm0, %v9561_v20, %v16945_v11  ;;  %v9854_v43 = vld [vmem:[%s19819_s3 + $0x460] sm:$0xff] }
 0x463   :  { %v16921_v46 = vmax.f32 %v16716_v47, %v9577_v36  ;;  %v9862_v47 = vld [vmem:[%s19819_s3 + $0x4a0] sm:$0xff]  ;;  %10704 = vmatpush.msrb.mxu0 %v9802_v30  ;;  %10724 = vmatpush.msra.mxu1 %v9866_v48  ;;  %v16971_v22 = vmax.f32 %v16702_v6, %v9578_v19 }
 0x464   :  { %10744 = vmatpush.msra.mxu2 %v9930_v51  ;;  %10687 = vmatpush.msra.mxu3 %v9726_v24  ;;  %v9714_v52 = vld [vmem:[%s19819_s3] sm:$0xff] }
 0x465   :  { %13217 = vrot.lane.b32.xlu1 %v13216_v31, %s13279_s26  ;;  %v13221_v15 = vpack.i.bf16 %v16921_v46, %v16937_v8  ;;  %10705 = vmatpush.msrb.mxu0 %v9798_v21  ;;  %v9786_v40 = vld [vmem:[%s19819_s3 + $0x240] sm:$0xff] }
 0x466   :  { %10725 = vmatpush.msra.mxu1 %v9862_v47  ;;  %10745 = vmatpush.msra.mxu2 %v9926_v35  ;;  %v9850_v6 = vld [vmem:[%s19819_s3 + $0x440] sm:$0xff] }
 0x467   :  { %10688 = vmatpush.msra.mxu3 %v9722_v5  ;;  %10706 = vmatpush.msrb.mxu0 %v9794_v7  ;;  %v9914_v28 = vld [vmem:[%s19819_s3 + $0x640] sm:$0xff] }
 0x468   :  { %10726 = vmatpush.msra.mxu1 %v9858_v13  ;;  %10746 = vmatpush.msra.mxu2 %v9922_v56  ;;  %v10030_v23 = vld [vmem:[%s19819_s3 + $0x9e0] sm:$0xff] }
 0x469   :  { %10689 = vmatpush.msra.mxu3 %v9718_v45  ;;  %10707 = vmatpush.msrb.mxu0 %v9790_v50  ;;  %v9782_v41 = vld [vmem:[%s19819_s3 + $0x220] sm:$0xff] }
 0x46a   :  { %13222 = vrot.lane.b32.xlu0 %v13221_v15, %s13279_s26  ;;  %10727 = vmatpush.msra.mxu1 %v9854_v43  ;;  %v9846_v37 = vld [vmem:[%s19819_s3 + $0x420] sm:$0xff] }
 0x46b   :  { %10747 = vmatpush.msra.mxu2 %v9918_v57  ;;  %10690 = vmatpush.msra.mxu3 %v9714_v52  ;;  %v9910_v4 = vld [vmem:[%s19819_s3 + $0x620] sm:$0xff] }
 0x46c   :  { %10708 = vmatpush.msrb.mxu0 %v9786_v40  ;;  %10728 = vmatpush.msra.mxu1 %v9850_v6  ;;  %v10026_v12 = vld [vmem:[%s19819_s3 + $0x9c0] sm:$0xff] }
 0x46d   :  { %9649 = vrot.lane.b32.xlu1 %v16971_v22, %s13279_s26  ;;  %10748 = vmatpush.msra.mxu2 %v9914_v28  ;;  %v9778_v18 = vld [vmem:[%s19819_s3 + $0x200] sm:$0xff] }
 0x46e   :  { %10755 = vmatpush.msrb.mxu3 %v10030_v23  ;;  %10709 = vmatpush.msrb.mxu0 %v9782_v41  ;;  %v9842_v59 = vld [vmem:[%s19819_s3 + $0x400] sm:$0xff] }
 0x46f   :  { %10729 = vmatpush.msra.mxu1 %v9846_v37  ;;  %10749 = vmatpush.msra.mxu2 %v9910_v4  ;;  %v10022_v16 = vld [vmem:[%s19819_s3 + $0x9a0] sm:$0xff] }
 0x470   :  { %10756 = vmatpush.msrb.mxu3 %v10026_v12  ;;  %10710 = vmatpush.msrb.mxu0 %v9778_v18  ;;  %v10094_v3 = vld [vmem:[%s19819_s3 + $0xbe0] sm:$0xff] }
 0x471   :  { %10730 = vmatpush.msra.mxu1 %v9842_v59  ;;  %10750 = vmatpush.msra.mxu2 %v9906_v27  ;;  %v10158_v44 = vld [vmem:[%s19819_s3 + $0xde0] sm:$0xff] }
 0x472   :  { %v10222_v53 = vld [vmem:[%s19819_s3 + $0xfe0] sm:$0xff]  ;;  %10757 = vmatpush.msrb.mxu3 %v10022_v16  ;;  %10775 = vmatpush.msra.mxu0 %v10094_v3 }
 0x473   :  { %v10018_v9 = vld [vmem:[%s19819_s3 + $0x980] sm:$0xff]  ;;  %10795 = vmatpush.msrb.mxu1 %v10158_v44  ;;  %10815 = vmatpush.msrb.mxu2 %v10222_v53 }
 0x474   :  { %v10090_v60 = vld [vmem:[%s19819_s3 + $0xbc0] sm:$0xff]  ;;  %10758 = vmatpush.msrb.mxu3 %v10018_v9 }
 0x475   :  { %v10154_v39 = vld [vmem:[%s19819_s3 + $0xdc0] sm:$0xff]  ;;  %10776 = vmatpush.msra.mxu0 %v10090_v60 }
 0x476   :  { %v10218_v32 = vld [vmem:[%s19819_s3 + $0xfc0] sm:$0xff]  ;;  %10796 = vmatpush.msrb.mxu1 %v10154_v39 }
 0x477   :  { %v10014_v54 = vld [vmem:[%s19819_s3 + $0x960] sm:$0xff]  ;;  %10816 = vmatpush.msrb.mxu2 %v10218_v32 }
 0x478   :  { %v10086_v63 = vld [vmem:[%s19819_s3 + $0xba0] sm:$0xff]  ;;  %10759 = vmatpush.msrb.mxu3 %v10014_v54 }
 0x479   :  { %v10150_v0 = vld [vmem:[%s19819_s3 + $0xda0] sm:$0xff]  ;;  %10777 = vmatpush.msra.mxu0 %v10086_v63 }
 0x47a   :  { %v10214_v61 = vld [vmem:[%s19819_s3 + $0xfa0] sm:$0xff]  ;;  %10797 = vmatpush.msrb.mxu1 %v10150_v0 }
 0x47b   :  { %v10010_v20 = vld [vmem:[%s19819_s3 + $0x940] sm:$0xff]  ;;  %10817 = vmatpush.msrb.mxu2 %v10214_v61 }
 0x47c   :  { %v10082_v17 = vld [vmem:[%s19819_s3 + $0xb80] sm:$0xff]  ;;  %10760 = vmatpush.msrb.mxu3 %v10010_v20 }
 0x47d   :  { %v10146_v62 = vld [vmem:[%s19819_s3 + $0xd80] sm:$0xff]  ;;  %10778 = vmatpush.msra.mxu0 %v10082_v17 }
 0x47e   :  { %v10210_v36 = vld [vmem:[%s19819_s3 + $0xf80] sm:$0xff]  ;;  %10798 = vmatpush.msrb.mxu1 %v10146_v62 }
 0x47f   :  { %10818 = vmatpush.msrb.mxu2 %v10210_v36  ;;  %v10006_v29 = vld [vmem:[%s19819_s3 + $0x920] sm:$0xff] }
 0x480   :  { %v10078_v33 = vld [vmem:[%s19819_s3 + $0xb60] sm:$0xff]  ;;  %10761 = vmatpush.msrb.mxu3 %v10006_v29 }
 0x481   :  { %v10142_v31 = vld [vmem:[%s19819_s3 + $0xd60] sm:$0xff]  ;;  %10779 = vmatpush.msra.mxu0 %v10078_v33 }
 0x482   :  { %v10206_v30 = vld [vmem:[%s19819_s3 + $0xf60] sm:$0xff]  ;;  %10799 = vmatpush.msrb.mxu1 %v10142_v31 }
 0x483   :  { %v10002_v48 = vld [vmem:[%s19819_s3 + $0x900] sm:$0xff]  ;;  %10819 = vmatpush.msrb.mxu2 %v10206_v30 }
 0x484   :  { %v10074_v51 = vld [vmem:[%s19819_s3 + $0xb40] sm:$0xff]  ;;  %10762 = vmatpush.msrb.mxu3 %v10002_v48 }
 0x485   :  { %v10138_v24 = vld [vmem:[%s19819_s3 + $0xd40] sm:$0xff]  ;;  %10780 = vmatpush.msra.mxu0 %v10074_v51 }
 0x486   :  { %v10202_v21 = vld [vmem:[%s19819_s3 + $0xf40] sm:$0xff]  ;;  %10800 = vmatpush.msrb.mxu1 %v10138_v24 }
 0x487   :  { %v9998_v47 = vld [vmem:[%s19819_s3 + $0x8e0] sm:$0xff]  ;;  %10820 = vmatpush.msrb.mxu2 %v10202_v21 }
 0x488   :  { %v10070_v35 = vld [vmem:[%s19819_s3 + $0xb20] sm:$0xff]  ;;  %10763 = vmatpush.msrb.mxu3 %v9998_v47 }
 0x489   :  { %v10134_v5 = vld [vmem:[%s19819_s3 + $0xd20] sm:$0xff]  ;;  %10781 = vmatpush.msra.mxu0 %v10070_v35 }
 0x48a   :  { %v10198_v7 = vld [vmem:[%s19819_s3 + $0xf20] sm:$0xff]  ;;  %10801 = vmatpush.msrb.mxu1 %v10134_v5 }
 0x48b   :  { %v9994_v19 = vld [vmem:[%s19819_s3 + $0x8c0] sm:$0xff]  ;;  %10821 = vmatpush.msrb.mxu2 %v10198_v7 }
 0x48c   :  { %v10066_v15 = vld [vmem:[%s19819_s3 + $0xb00] sm:$0xff]  ;;  %10764 = vmatpush.msrb.mxu3 %v9994_v19 }
 0x48d   :  { %v10130_v13 = vld [vmem:[%s19819_s3 + $0xd00] sm:$0xff]  ;;  %10782 = vmatpush.msra.mxu0 %v10066_v15 }
 0x48e   :  { %v10194_v56 = vld [vmem:[%s19819_s3 + $0xf00] sm:$0xff]  ;;  %10802 = vmatpush.msrb.mxu1 %v10130_v13 }
 0x48f   :  { %v9990_v45 = vld [vmem:[%s19819_s3 + $0x8a0] sm:$0xff]  ;;  %10822 = vmatpush.msrb.mxu2 %v10194_v56 }
 0x490   :  { %v10062_v50 = vld [vmem:[%s19819_s3 + $0xae0] sm:$0xff]  ;;  %10765 = vmatpush.msrb.mxu3 %v9990_v45 }
 0x491   :  { %v10126_v43 = vld [vmem:[%s19819_s3 + $0xce0] sm:$0xff]  ;;  %10783 = vmatpush.msra.mxu0 %v10062_v50 }
 0x492   :  { %v10190_v57 = vld [vmem:[%s19819_s3 + $0xee0] sm:$0xff]  ;;  %10803 = vmatpush.msrb.mxu1 %v10126_v43 }
 0x493   :  { %v9986_v52 = vld [vmem:[%s19819_s3 + $0x880] sm:$0xff]  ;;  %10823 = vmatpush.msrb.mxu2 %v10190_v57 }
 0x494   :  { %v10058_v40 = vld [vmem:[%s19819_s3 + $0xac0] sm:$0xff]  ;;  %10766 = vmatpush.msrb.mxu3 %v9986_v52 }
 0x495   :  { %v10122_v6 = vld [vmem:[%s19819_s3 + $0xcc0] sm:$0xff]  ;;  %10784 = vmatpush.msra.mxu0 %v10058_v40 }
 0x496   :  { %v10186_v28 = vld [vmem:[%s19819_s3 + $0xec0] sm:$0xff]  ;;  %10804 = vmatpush.msrb.mxu1 %v10122_v6 }
 0x497   :  { %10824 = vmatpush.msrb.mxu2 %v10186_v28  ;;  %v9982_v23 = vld [vmem:[%s19819_s3 + $0x860] sm:$0xff] }
 0x498   :  { %v10054_v41 = vld [vmem:[%s19819_s3 + $0xaa0] sm:$0xff]  ;;  %10767 = vmatpush.msrb.mxu3 %v9982_v23 }
 0x499   :  { %v10118_v37 = vld [vmem:[%s19819_s3 + $0xca0] sm:$0xff]  ;;  %10785 = vmatpush.msra.mxu0 %v10054_v41 }
 0x49a   :  { %v10182_v4 = vld [vmem:[%s19819_s3 + $0xea0] sm:$0xff]  ;;  %10805 = vmatpush.msrb.mxu1 %v10118_v37 }
 0x49b   :  { %10825 = vmatpush.msrb.mxu2 %v10182_v4  ;;  %v9978_v12 = vld [vmem:[%s19819_s3 + $0x840] sm:$0xff] }
 0x49c   :  { %v10050_v18 = vld [vmem:[%s19819_s3 + $0xa80] sm:$0xff]  ;;  %10768 = vmatpush.msrb.mxu3 %v9978_v12 }
 0x49d   :  { %v10114_v59 = vld [vmem:[%s19819_s3 + $0xc80] sm:$0xff]  ;;  %10786 = vmatpush.msra.mxu0 %v10050_v18 }
 0x49e   :  { %v10178_v27 = vld [vmem:[%s19819_s3 + $0xe80] sm:$0xff]  ;;  %10806 = vmatpush.msrb.mxu1 %v10114_v59 }
 0x49f   :  { %10826 = vmatpush.msrb.mxu2 %v10178_v27  ;;  %v9974_v16 = vld [vmem:[%s19819_s3 + $0x820] sm:$0xff] }
 0x4a0   :  { %v10046_v3 = vld [vmem:[%s19819_s3 + $0xa60] sm:$0xff]  ;;  %10769 = vmatpush.msrb.mxu3 %v9974_v16 }
 0x4a1   :  { %v10110_v44 = vld [vmem:[%s19819_s3 + $0xc60] sm:$0xff]  ;;  %10787 = vmatpush.msra.mxu0 %v10046_v3 }
 0x4a2   :  { %v10174_v53 = vld [vmem:[%s19819_s3 + $0xe60] sm:$0xff]  ;;  %10807 = vmatpush.msrb.mxu1 %v10110_v44 }
 0x4a3   :  { %10827 = vmatpush.msrb.mxu2 %v10174_v53  ;;  %v9970_v9 = vld [vmem:[%s19819_s3 + $0x800] sm:$0xff] }
 0x4a4   :  { %v10042_v60 = vld [vmem:[%s19819_s3 + $0xa40] sm:$0xff]  ;;  %10770 = vmatpush.msrb.mxu3 %v9970_v9 }
 0x4a5   :  { %v10106_v39 = vld [vmem:[%s19819_s3 + $0xc40] sm:$0xff]  ;;  %10788 = vmatpush.msra.mxu0 %v10042_v60 }
 0x4a6   :  { %v10170_v32 = vld [vmem:[%s19819_s3 + $0xe40] sm:$0xff]  ;;  %10808 = vmatpush.msrb.mxu1 %v10106_v39 }
 0x4a7   :  { %10828 = vmatpush.msrb.mxu2 %v10170_v32  ;;  %v10038_v54 = vld [vmem:[%s19819_s3 + $0xa20] sm:$0xff] }
 0x4a8   :  { %v10102_v63 = vld [vmem:[%s19819_s3 + $0xc20] sm:$0xff]  ;;  %10789 = vmatpush.msra.mxu0 %v10038_v54 }
 0x4a9   :  { %v10166_v0 = vld [vmem:[%s19819_s3 + $0xe20] sm:$0xff]  ;;  %10809 = vmatpush.msrb.mxu1 %v10102_v63 }
 0x4aa   :  { %v10034_v61 = vld [vmem:[%s19819_s3 + $0xa00] sm:$0xff]  ;;  %10829 = vmatpush.msrb.mxu2 %v10166_v0 }
 0x4ab   :  { %v10098_v20 = vld [vmem:[%s19819_s3 + $0xc00] sm:$0xff]  ;;  %10790 = vmatpush.msra.mxu0 %v10034_v61 }
 0x4ac   :  { %v10162_v17 = vld [vmem:[%s19819_s3 + $0xe00] sm:$0xff]  ;;  %10810 = vmatpush.msrb.mxu1 %v10098_v20 }
 0x4ad   :  { %10830 = vmatpush.msrb.mxu2 %v10162_v17  ;;  %v10286_v47 = vld [vmem:[%s19819_s3 + $0x11e0] sm:$0xff] }
 0x4ae   :  { %v10282_v56 = vld [vmem:[%s19819_s3 + $0x11c0] sm:$0xff] }
 0x4af   :  { %v10414_v57 = vld [vmem:[%s19819_s3 + $0x15e0] sm:$0xff] }
 0x4b0   :  { %v10410_v52 = vld [vmem:[%s19819_s3 + $0x15c0] sm:$0xff] }
 0x4b1   :  { %v9634_v24 = vpop.permute.xlu2 %9633  ;;  %v10474_v6 = vld [vmem:[%s19819_s3 + $0x17c0] sm:$0xff] }
 0x4b2   :  { %v10274_v23 = vld [vmem:[%s19819_s3 + $0x1180] sm:$0xff] }
 0x4b3   :  { %v10346_v41 = vld [vmem:[%s19819_s3 + $0x13c0] sm:$0xff] }
 0x4b4   :  { %v10406_v37 = vld [vmem:[%s19819_s3 + $0x15a0] sm:$0xff] }
 0x4b5   :  { %v10470_v4 = vld [vmem:[%s19819_s3 + $0x17a0] sm:$0xff] }
 0x4b6   :  { %v10270_v59 = vld [vmem:[%s19819_s3 + $0x1160] sm:$0xff] }
 0x4b7   :  { %v10342_v27 = vld [vmem:[%s19819_s3 + $0x13a0] sm:$0xff] }
 0x4b8   :  { %v10402_v9 = vld [vmem:[%s19819_s3 + $0x1580] sm:$0xff] }
 0x4b9   :  { %v10266_v60 = vld [vmem:[%s19819_s3 + $0x1140] sm:$0xff] }
 0x4ba   :  { %v10466_v63 = vld [vmem:[%s19819_s3 + $0x1780] sm:$0xff] }
 0x4bb   :  { %v10398_v0 = vld [vmem:[%s19819_s3 + $0x1560] sm:$0xff] }
 0x4bc   :  { %v10262_v17 = vld [vmem:[%s19819_s3 + $0x1120] sm:$0xff] }
 0x4c7   :  { %v13203_v62 = vpop.permute.xlu1 %13202 }
 0x4c8   :  { %v13205_v36 = vunpack.i.h.bf16 %v13203_v62  ;;  %v13204_v29 = vunpack.i.l.bf16 %v13203_v62  ;;  %v10334_v62 = vld [vmem:[%s19819_s3 + $0x1360] sm:$0xff] }
 0x4ca   :  { %v9655_v33 = vsel %vm1923_vm5, %v13204_v29, %v13205_v36 }
 0x4cb   :  { %v9684_v31 = vmax.f32 %v16767_v38, %v9655_v33  ;;  %v13208_v30 = vpop.permute.xlu0 %13207  ;;  %v10330_v33 = vld [vmem:[%s19819_s3 + $0x1340] sm:$0xff] }
 0x4cc   :  { %v13210_v48 = vunpack.i.h.bf16 %v13208_v30  ;;  %v13209_v51 = vunpack.i.l.bf16 %v13208_v30  ;;  %v10258_v30 = vld [vmem:[%s19819_s3 + $0x1100] sm:$0xff] }
 0x4cd   :  { %v17202_v21 = vmax.f32 %v9684_v31, 0.0 }
 0x4ce   :  { %v9656_v35 = vsel %vm1923_vm5, %v13205_v36, %v13209_v51  ;;  %v9657_v5 = vsel %vm1923_vm5, %v13209_v51, %v13210_v48  ;;  %v9658_v7 = vsel %vm1923_vm5, %v13210_v48, %v9634_v24  ;;  %v10390_v51 = vld [vmem:[%s19819_s3 + $0x1520] sm:$0xff] }
 0x4cf   :  { %v9685_v19 = vmax.f32 %v16770_v14, %v9656_v35  ;;  %v9686_v38 = vmax.f32 %v16800_v55, %v9657_v5  ;;  %v9687_v15 = vmax.f32 %v16803_v10, %v9658_v7  ;;  %v9565_v13 = vpop.permute.xlu1 %9564  ;;  %10691 = vmatmul.f32.vlgmr.msra.gmra.mxu3 %v17202_v21  ;;  %v10254_v35 = vld [vmem:[%s19819_s3 + $0x10e0] sm:$0xff] }
 0x4d0   :  { %v9579_v45 = vsel %vm80_vm0, %v16945_v11, %v9565_v13  ;;  %v17220_v50 = vmax.f32 %v16849_v49, %v9565_v13  ;;  %10835 = vmatpush.msra.mxu3 %v10286_v47  ;;  %v10478_v11 = vld [vmem:[%s19819_s3 + $0x17e0] sm:$0xff]  ;;  %vm10662_vm0 = vcmask 1042432  }
 0x4d1   :  { %v17222_v43 = vmax.f32 %v9685_v19, 0.0  ;;  %v17224_v14 = vmax.f32 %v9686_v38, 0.0  ;;  %v17226_v55 = vmax.f32 %v9687_v15, 0.0  ;;  %v17229_v10 = vmax.f32 %v16719_v1, %v9579_v45  ;;  %v10278_v1 = vld [vmem:[%s19819_s3 + $0x11a0] sm:$0xff] }
 0x4d2   :  { %10836 = vmatpush.msra.mxu3 %v10282_v56  ;;  %9653 = vrot.lane.b32.xlu0 %v17220_v50, %s13279_s26  ;;  %v10350_v49 = vld [vmem:[%s19819_s3 + $0x13e0] sm:$0xff] }
 0x4d3   :  { %10731 = vmatmul.f32.vlgmr.msra.gmra.mxu1 %v17224_v14  ;;  %10751 = vmatmul.f32.vlgmr.msra.gmra.mxu2 %v17226_v55  ;;  %v10454_v47 = vld [vmem:[%s19819_s3 + $0x1720] sm:$0xff] }
 0x4d4   :  { %10875 = vmatpush.msra.mxu1 %v10414_v57  ;;  %10895 = vmatpush.msra.mxu2 %v10478_v11  ;;  %v13213_v40 = vpop.permute.xlu0 %13212  ;;  %v10326_v5 = vld [vmem:[%s19819_s3 + $0x1320] sm:$0xff] }
 0x4d5   :  { %9651 = vrot.lane.b32.xlu2 %v17229_v10, %s13279_s26  ;;  %10711 = vmatmul.f32.vlgmr.msrb.gmra.mxu0 %v17222_v43  ;;  %v13214_v28 = vunpack.i.l.bf16 %v13213_v40  ;;  %v13215_v16 = vunpack.i.h.bf16 %v13213_v40  ;;  %v10386_v7 = vld [vmem:[%s19819_s3 + $0x1500] sm:$0xff] }
 0x4d6   :  { %10837 = vmatpush.msra.mxu3 %v10278_v1  ;;  %10855 = vmatpush.msrb.mxu0 %v10350_v49  ;;  %v10250_v19 = vld [vmem:[%s19819_s3 + $0x10c0] sm:$0xff] }
 0x4d7   :  { %10876 = vmatpush.msra.mxu1 %v10410_v52  ;;  %v9659_v12 = vsel %vm1923_vm5, %v9634_v24, %v13214_v28  ;;  %10896 = vmatpush.msra.mxu2 %v10474_v6  ;;  %v17269_v18 = vpop.permute.xlu1 %13217  ;;  %v10450_v38 = vld [vmem:[%s19819_s3 + $0x1700] sm:$0xff] }
 0x4d8   :  { %v9688_v3 = vmax.f32 %v16806_v42, %v9659_v12  ;;  %10838 = vmatpush.msra.mxu3 %v10274_v23  ;;  %10856 = vmatpush.msrb.mxu0 %v10346_v41  ;;  %v13220_v44 = vunpack.i.h.bf16 %v17269_v18  ;;  %v13219_v53 = vunpack.i.l.bf16 %v17269_v18  ;;  %v10338_v42 = vld [vmem:[%s19819_s3 + $0x1380] sm:$0xff] }
 0x4d9   :  { %10877 = vmatpush.msra.mxu1 %v10406_v37  ;;  %10897 = vmatpush.msra.mxu2 %v10470_v4  ;;  %v10322_v15 = vld [vmem:[%s19819_s3 + $0x1300] sm:$0xff] }
 0x4da   :  { %v9660_v39 = vsel %vm1923_vm5, %v13214_v28, %v13220_v44  ;;  %v9661_v32 = vsel %vm1923_vm5, %v13220_v44, %v13215_v16  ;;  %v9662_v54 = vsel %vm1923_vm5, %v13215_v16, %v13219_v53  ;;  %10839 = vmatpush.msra.mxu3 %v10270_v59  ;;  %10857 = vmatpush.msrb.mxu0 %v10342_v27  ;;  %v17308_v36 = vmax.f32 %v9688_v3, 0.0  ;;  %v10382_v13 = vld [vmem:[%s19819_s3 + $0x14e0] sm:$0xff]  ;;  %v9644_v28 = vpop.permute.xlu2 %9643 }
 0x4db   :  { %v9689_v61 = vmax.f32 %v16869_v34, %v9660_v39  ;;  %v9690_v20 = vmax.f32 %v16896_v58, %v9661_v32  ;;  %10878 = vmatpush.msra.mxu1 %v10402_v9  ;;  %v9691_v29 = vmax.f32 %v16873_v2, %v9662_v54  ;;  %v10462_v34 = vld [vmem:[%s19819_s3 + $0x1760] sm:$0xff]  ;;  %10898 = vmatpush.msra.mxu2 %v10466_v63 }
 0x4dc   :  { %10840 = vmatpush.msra.mxu3 %v10266_v60  ;;  %10858 = vmatpush.msrb.mxu0 %v10338_v42  ;;  %v10394_v58 = vld [vmem:[%s19819_s3 + $0x1540] sm:$0xff]  ;;  %v13223_v1 = vpop.permute.xlu0 %13222  ;;  %v9663_v37 = vsel %vm1923_vm5, %v13219_v53, %v9644_v28 }
 0x4dd   :  { %10879 = vmatpush.msra.mxu1 %v10398_v0  ;;  %v17320_v31 = vmax.f32 %v9689_v61, 0.0  ;;  %v10458_v2 = vld [vmem:[%s19819_s3 + $0x1740] sm:$0xff]  ;;  %v17328_v48 = vmax.f32 %v9690_v20, 0.0  ;;  %10899 = vmatpush.msra.mxu2 %v10462_v34  ;;  %v17333_v24 = vmax.f32 %v9691_v29, 0.0  ;;  %v13225_v4 = vunpack.i.h.bf16 %v13223_v1 }
 0x4de   :  { %10841 = vmatpush.msra.mxu3 %v10262_v17  ;;  %10859 = vmatpush.msrb.mxu0 %v10334_v62  ;;  %v10246_v56 = vld [vmem:[%s19819_s3 + $0x10a0] sm:$0xff]  ;;  %v13224_v12 = vunpack.i.l.bf16 %v13223_v1  ;;  %v9692_v9 = vmax.f32 %v16879_v26, %v9663_v37 }
 0x4df   :  { %10880 = vmatpush.msra.mxu1 %v10394_v58  ;;  %10771 = vmatmul.f32.vlgmr.msrb.gmra.mxu3 %v17308_v36  ;;  %v10446_v45 = vld [vmem:[%s19819_s3 + $0x16e0] sm:$0xff]  ;;  %v17408_v3 = vpop.permute.xlu1 %9649 }
 0x4e0   :  { %10860 = vmatpush.msrb.mxu0 %v10330_v33  ;;  %10900 = vmatpush.msra.mxu2 %v10458_v2  ;;  %v10318_v57 = vld [vmem:[%s19819_s3 + $0x12e0] sm:$0xff]  ;;  %v9665_v39 = vsel %vm1923_vm5, %v13224_v12, %v13225_v4  ;;  %v9664_v54 = vsel %vm1923_vm5, %v9644_v28, %v13224_v12  ;;  %v9666_v63 = vsel %vm1923_vm5, %v13225_v4, %v17408_v3  ;;  %v17442_v17 = vmax.f32 %v9692_v9, 0.0  ;;  %v9759_v28 = vld [vmem:[%s19819_s3 + $0x168] sm:$0xff] }
 0x4e1   :  { %10842 = vmatpush.msra.mxu3 %v10258_v30  ;;  %10881 = vmatpush.msra.mxu1 %v10390_v51  ;;  %v10378_v11 = vld [vmem:[%s19819_s3 + $0x14c0] sm:$0xff]  ;;  %v9694_v62 = vmax.f32 %v16937_v8, %v9665_v39  ;;  %v9693_v58 = vmax.f32 %v16882_v25, %v9664_v54  ;;  %v9695_v33 = vmax.f32 %v16921_v46, %v9666_v63  ;;  %v9755_v4 = vld [vmem:[%s19819_s3 + $0x148] sm:$0xff] }
 0x4e2   :  { %10791 = vmatmul.f32.vlgmr.msra.gmra.mxu0 %v17320_v31  ;;  %10901 = vmatpush.msra.mxu2 %v10454_v47  ;;  %v10242_v49 = vld [vmem:[%s19819_s3 + $0x1080] sm:$0xff]  ;;  %v9747_v9 = vld [vmem:[%s19819_s3 + $0x108] sm:$0xff] }
 0x4e3   :  { %10811 = vmatmul.f32.vlgmr.msrb.gmra.mxu1 %v17328_v48  ;;  %10831 = vmatmul.f32.vlgmr.msrb.gmra.mxu2 %v17333_v24  ;;  %v10442_v52 = vld [vmem:[%s19819_s3 + $0x16c0] sm:$0xff]  ;;  %v17469_v51 = vmax.f32 %v9694_v62, 0.0  ;;  %v17471_v47 = vmax.f32 %v9693_v58, 0.0 }
 0x4e4   :  { %10843 = vmatpush.msra.mxu3 %v10254_v35  ;;  %10861 = vmatpush.msrb.mxu0 %v10326_v5  ;;  %v10314_v40 = vld [vmem:[%s19819_s3 + $0x12c0] sm:$0xff]  ;;  %v17473_v35 = vmax.f32 %v9695_v33, 0.0  ;;  %v9775_v5 = vld [vmem:[%s19819_s3 + $0x1e8] sm:$0xff] }
 0x4e5   :  { %10882 = vmatpush.msra.mxu1 %v10386_v7  ;;  %10902 = vmatpush.msra.mxu2 %v10450_v38  ;;  %v10374_v6 = vld [vmem:[%s19819_s3 + $0x14a0] sm:$0xff]  ;;  %v9771_v38 = vld [vmem:[%s19819_s3 + $0x1c8] sm:$0xff] }
 0x4e6   :  { %10844 = vmatpush.msra.mxu3 %v10250_v19  ;;  %10862 = vmatpush.msrb.mxu0 %v10322_v15  ;;  %v10238_v23 = vld [vmem:[%s19819_s3 + $0x1060] sm:$0xff] }
 0x4e7   :  { %10883 = vmatpush.msra.mxu1 %v10382_v13  ;;  %10903 = vmatpush.msra.mxu2 %v10446_v45  ;;  %v10438_v41 = vld [vmem:[%s19819_s3 + $0x16a0] sm:$0xff]  ;;  %v9767_v45 = vld [vmem:[%s19819_s3 + $0x1a8] sm:$0xff] }
 0x4e8   :  { %10845 = vmatpush.msra.mxu3 %v10246_v56  ;;  %10863 = vmatpush.msrb.mxu0 %v10318_v57  ;;  %v10310_v59 = vld [vmem:[%s19819_s3 + $0x12a0] sm:$0xff] }
 0x4e9   :  { %10884 = vmatpush.msra.mxu1 %v10378_v11  ;;  %10904 = vmatpush.msra.mxu2 %v10442_v52  ;;  %v10370_v27 = vld [vmem:[%s19819_s3 + $0x1480] sm:$0xff] }
 0x4ea   :  { %10846 = vmatpush.msra.mxu3 %v10242_v49  ;;  %10864 = vmatpush.msrb.mxu0 %v10314_v40  ;;  %v10234_v18 = vld [vmem:[%s19819_s3 + $0x1040] sm:$0xff]  ;;  %v9763_v49 = vld [vmem:[%s19819_s3 + $0x188] sm:$0xff] }
 0x4eb   :  { %10885 = vmatpush.msra.mxu1 %v10374_v6  ;;  %v10434_v16 = vld [vmem:[%s19819_s3 + $0x1680] sm:$0xff]  ;;  %10905 = vmatpush.msra.mxu2 %v10438_v41 }
 0x4ec   :  { %10847 = vmatpush.msra.mxu3 %v10238_v23  ;;  %v10306_v44 = vld [vmem:[%s19819_s3 + $0x1280] sm:$0xff]  ;;  %10865 = vmatpush.msrb.mxu0 %v10310_v59 }
 0x4ed   :  { %v10366_v53 = vld [vmem:[%s19819_s3 + $0x1460] sm:$0xff]  ;;  %10886 = vmatpush.msra.mxu1 %v10370_v27  ;;  %10906 = vmatpush.msra.mxu2 %v10434_v16 }
 0x4ee   :  { %v10230_v60 = vld [vmem:[%s19819_s3 + $0x1020] sm:$0xff]  ;;  %10848 = vmatpush.msra.mxu3 %v10234_v18  ;;  %10866 = vmatpush.msrb.mxu0 %v10306_v44  ;;  %v9751_v18 = vld [vmem:[%s19819_s3 + $0x128] sm:$0xff] }
 0x4ef   :  { %v10430_v42 = vld [vmem:[%s19819_s3 + $0x1660] sm:$0xff]  ;;  %10887 = vmatpush.msra.mxu1 %v10366_v53 }
 0x4f0   :  { %v10302_v32 = vld [vmem:[%s19819_s3 + $0x1260] sm:$0xff]  ;;  %10849 = vmatpush.msra.mxu3 %v10230_v60  ;;  %10907 = vmatpush.msra.mxu2 %v10430_v42 }
 0x4f1   :  { %v10362_v26 = vld [vmem:[%s19819_s3 + $0x1440] sm:$0xff]  ;;  %10867 = vmatpush.msrb.mxu0 %v10302_v32  ;;  %v9743_v32 = vld [vmem:[%s19819_s3 + $0xe8] sm:$0xff] }
 0x4f2   :  { %v10226_v0 = vld [vmem:[%s19819_s3 + $0x1000] sm:$0xff]  ;;  %10888 = vmatpush.msra.mxu1 %v10362_v26 }
 0x4f3   :  { %v10426_v61 = vld [vmem:[%s19819_s3 + $0x1640] sm:$0xff]  ;;  %10850 = vmatpush.msra.mxu3 %v10226_v0  ;;  %v9739_v0 = vld [vmem:[%s19819_s3 + $0xc8] sm:$0xff] }
 0x4f4   :  { %v10298_v20 = vld [vmem:[%s19819_s3 + $0x1240] sm:$0xff]  ;;  %10908 = vmatpush.msra.mxu2 %v10426_v61  ;;  %10851 = vmatmul.f32.vlgmr.msra.gmra.mxu3 %v17442_v17 }
 0x4f5   :  { %v10358_v29 = vld [vmem:[%s19819_s3 + $0x1420] sm:$0xff]  ;;  %10868 = vmatpush.msrb.mxu0 %v10298_v20 }
 0x4f6   :  { %v10422_v34 = vld [vmem:[%s19819_s3 + $0x1620] sm:$0xff]  ;;  %10889 = vmatpush.msra.mxu1 %v10358_v29  ;;  %v9735_v29 = vld [vmem:[%s19819_s3 + $0xa8] sm:$0xff] }
 0x4f7   :  { %v10294_v8 = vld [vmem:[%s19819_s3 + $0x1220] sm:$0xff]  ;;  %10909 = vmatpush.msra.mxu2 %v10422_v34 }
 0x4f8   :  { %v10542_v2 = vld [vmem:[%s19819_s3 + $0x19e0] sm:$0xff]  ;;  %10869 = vmatpush.msrb.mxu0 %v10294_v8  ;;  %v9731_v8 = vld [vmem:[%s19819_s3 + $0x88] sm:$0xff] }
 0x4f9   :  { %v10354_v30 = vld [vmem:[%s19819_s3 + $0x1400] sm:$0xff]  ;;  %10915 = vmatpush.msrb.mxu3 %v10542_v2 }
 0x4fa   :  { %v10418_v25 = vld [vmem:[%s19819_s3 + $0x1600] sm:$0xff]  ;;  %10890 = vmatpush.msra.mxu1 %v10354_v30 }
 0x4fb   :  { %v10290_v46 = vld [vmem:[%s19819_s3 + $0x1200] sm:$0xff]  ;;  %10910 = vmatpush.msra.mxu2 %v10418_v25  ;;  %10891 = vmatmul.f32.vlgmr.msra.gmra.mxu1 %v17469_v51 }
 0x4fc   :  { %v10538_v7 = vld [vmem:[%s19819_s3 + $0x19c0] sm:$0xff]  ;;  %10870 = vmatpush.msrb.mxu0 %v10290_v46  ;;  %10911 = vmatmul.f32.vlgmr.msra.gmra.mxu2 %v17473_v35  ;;  %v9727_v46 = vld [vmem:[%s19819_s3 + $0x68] sm:$0xff] }
 0x4fd   :  { %v10606_v19 = vld [vmem:[%s19819_s3 + $0x1be0] sm:$0xff]  ;;  %10871 = vmatmul.f32.vlgmr.msrb.gmra.mxu0 %v17471_v47  ;;  %10975 = vmatpush.msrb.mxu2 %v9775_v5 }
 0x4fe   :  { %v10534_v15 = vld [vmem:[%s19819_s3 + $0x19a0] sm:$0xff]  ;;  %10916 = vmatpush.msrb.mxu3 %v10538_v7  ;;  %10935 = vmatpush.msra.mxu0 %v10606_v19 }
 0x4ff   :  { %v10602_v13 = vld [vmem:[%s19819_s3 + $0x1bc0] sm:$0xff]  ;;  %10976 = vmatpush.msrb.mxu2 %v9771_v38  ;;  %v9723_v38 = vld [vmem:[%s19819_s3 + $0x48] sm:$0xff] }
 0x500   :  { %v10654_v56 = vld [vmem:[%s19819_s3 + $0x1d60] sm:$0x7]  ;;  %10917 = vmatpush.msrb.mxu3 %v10534_v15  ;;  %10936 = vmatpush.msra.mxu0 %v10602_v13 }
 0x501   :  { %v10530_v57 = vld [vmem:[%s19819_s3 + $0x1980] sm:$0xff]  ;;  %12282 = vmatpush.msk.msrb.mxu1 %vm10662_vm0, %v10654_v56  ;;  %10977 = vmatpush.msrb.mxu2 %v9767_v45  ;;  %v9839_v56 = vld [vmem:[%s19819_s3 + $0x3e8] sm:$0xff] }
 0x502   :  { %v10598_v11 = vld [vmem:[%s19819_s3 + $0x1ba0] sm:$0xff]  ;;  %10918 = vmatpush.msrb.mxu3 %v10530_v57  ;;  %v9719_v45 = vld [vmem:[%s19819_s3 + $0x28] sm:$0xff] }
 0x503   :  { %v10650_v1 = vld [vmem:[%s19819_s3 + $0x1d40] sm:$0xff]  ;;  %10937 = vmatpush.msra.mxu0 %v10598_v11  ;;  %10978 = vmatpush.msrb.mxu2 %v9763_v49  ;;  %v9903_v11 = vld [vmem:[%s19819_s3 + $0x5e8] sm:$0xff] }
 0x504   :  { %v10526_v52 = vld [vmem:[%s19819_s3 + $0x1960] sm:$0xff]  ;;  %10960 = vmatpush.msrb.mxu1 %v10650_v1  ;;  %v9835_v49 = vld [vmem:[%s19819_s3 + $0x3c8] sm:$0xff] }
 0x505   :  { %v10594_v40 = vld [vmem:[%s19819_s3 + $0x1b80] sm:$0xff]  ;;  %10919 = vmatpush.msrb.mxu3 %v10526_v52  ;;  %10979 = vmatpush.msrb.mxu2 %v9759_v28  ;;  %v9715_v52 = vld [vmem:[%s19819_s3 + $0x8] sm:$0xff] }
 0x506   :  { %v10646_v6 = vld [vmem:[%s19819_s3 + $0x1d20] sm:$0xff]  ;;  %10938 = vmatpush.msra.mxu0 %v10594_v40  ;;  %v9899_v40 = vld [vmem:[%s19819_s3 + $0x5c8] sm:$0xff] }
 0x507   :  { %v10522_v23 = vld [vmem:[%s19819_s3 + $0x1940] sm:$0xff]  ;;  %10961 = vmatpush.msrb.mxu1 %v10646_v6  ;;  %10980 = vmatpush.msrb.mxu2 %v9755_v4  ;;  %v9831_v6 = vld [vmem:[%s19819_s3 + $0x3a8] sm:$0xff] }
 0x508   :  { %v10590_v41 = vld [vmem:[%s19819_s3 + $0x1b60] sm:$0xff]  ;;  %10920 = vmatpush.msrb.mxu3 %v10522_v23  ;;  %v10031_v28 = vld [vmem:[%s19819_s3 + $0x9e8] sm:$0xff] }
 0x509   :  { %v10642_v37 = vld [vmem:[%s19819_s3 + $0x1d00] sm:$0xff]  ;;  %10939 = vmatpush.msra.mxu0 %v10590_v41  ;;  %10981 = vmatpush.msrb.mxu2 %v9751_v18  ;;  %v9895_v41 = vld [vmem:[%s19819_s3 + $0x5a8] sm:$0xff] }
 0x50a   :  { %v10518_v12 = vld [vmem:[%s19819_s3 + $0x1920] sm:$0xff]  ;;  %10962 = vmatpush.msrb.mxu1 %v10642_v37  ;;  %v9967_v37 = vld [vmem:[%s19819_s3 + $0x7e8] sm:$0xff] }
 0x50b   :  { %v10586_v59 = vld [vmem:[%s19819_s3 + $0x1b40] sm:$0xff]  ;;  %10921 = vmatpush.msrb.mxu3 %v10518_v12  ;;  %10982 = vmatpush.msrb.mxu2 %v9747_v9  ;;  %v10027_v4 = vld [vmem:[%s19819_s3 + $0x9c8] sm:$0xff] }
 0x50c   :  { %v10638_v27 = vld [vmem:[%s19819_s3 + $0x1ce0] sm:$0xff]  ;;  %10940 = vmatpush.msra.mxu0 %v10586_v59  ;;  %v9827_v12 = vld [vmem:[%s19819_s3 + $0x388] sm:$0xff] }
 0x50d   :  { %v10514_v16 = vld [vmem:[%s19819_s3 + $0x1900] sm:$0xff]  ;;  %10963 = vmatpush.msrb.mxu1 %v10638_v27  ;;  %10983 = vmatpush.msrb.mxu2 %v9743_v32  ;;  %v9891_v59 = vld [vmem:[%s19819_s3 + $0x588] sm:$0xff] }
 0x50e   :  { %v10582_v44 = vld [vmem:[%s19819_s3 + $0x1b20] sm:$0xff]  ;;  %10922 = vmatpush.msrb.mxu3 %v10514_v16  ;;  %v9963_v27 = vld [vmem:[%s19819_s3 + $0x7c8] sm:$0xff] }
 0x50f   :  { %v10634_v53 = vld [vmem:[%s19819_s3 + $0x1cc0] sm:$0xff]  ;;  %10941 = vmatpush.msra.mxu0 %v10582_v44  ;;  %10984 = vmatpush.msrb.mxu2 %v9739_v0  ;;  %v10023_v18 = vld [vmem:[%s19819_s3 + $0x9a8] sm:$0xff] }
 0x510   :  { %v10510_v60 = vld [vmem:[%s19819_s3 + $0x18e0] sm:$0xff]  ;;  %10964 = vmatpush.msrb.mxu1 %v10634_v53  ;;  %v9823_v16 = vld [vmem:[%s19819_s3 + $0x368] sm:$0xff] }
 0x511   :  { %v10578_v42 = vld [vmem:[%s19819_s3 + $0x1b00] sm:$0xff]  ;;  %10923 = vmatpush.msrb.mxu3 %v10510_v60  ;;  %10985 = vmatpush.msrb.mxu2 %v9735_v29  ;;  %v9887_v44 = vld [vmem:[%s19819_s3 + $0x568] sm:$0xff] }
 0x512   :  { %v10630_v39 = vld [vmem:[%s19819_s3 + $0x1ca0] sm:$0xff]  ;;  %10942 = vmatpush.msra.mxu0 %v10578_v42  ;;  %v9959_v53 = vld [vmem:[%s19819_s3 + $0x7a8] sm:$0xff] }
 0x513   :  { %v10506_v26 = vld [vmem:[%s19819_s3 + $0x18c0] sm:$0xff]  ;;  %10965 = vmatpush.msrb.mxu1 %v10630_v39  ;;  %10986 = vmatpush.msrb.mxu2 %v9731_v8  ;;  %v10019_v9 = vld [vmem:[%s19819_s3 + $0x988] sm:$0xff] }
 0x514   :  { %v10574_v54 = vld [vmem:[%s19819_s3 + $0x1ae0] sm:$0xff]  ;;  %10924 = vmatpush.msrb.mxu3 %v10506_v26  ;;  %v9819_v60 = vld [vmem:[%s19819_s3 + $0x348] sm:$0xff] }
 0x515   :  { %v10626_v63 = vld [vmem:[%s19819_s3 + $0x1c80] sm:$0xff]  ;;  %10943 = vmatpush.msra.mxu0 %v10574_v54  ;;  %10987 = vmatpush.msrb.mxu2 %v9727_v46  ;;  %v9883_v42 = vld [vmem:[%s19819_s3 + $0x548] sm:$0xff] }
 0x516   :  { %v10502_v61 = vld [vmem:[%s19819_s3 + $0x18a0] sm:$0xff]  ;;  %10966 = vmatpush.msrb.mxu1 %v10626_v63  ;;  %v9955_v39 = vld [vmem:[%s19819_s3 + $0x788] sm:$0xff] }
 0x517   :  { %v10570_v20 = vld [vmem:[%s19819_s3 + $0x1ac0] sm:$0xff]  ;;  %10925 = vmatpush.msrb.mxu3 %v10502_v61  ;;  %10988 = vmatpush.msrb.mxu2 %v9723_v38  ;;  %v10015_v32 = vld [vmem:[%s19819_s3 + $0x968] sm:$0xff] }
 0x518   :  { %v10622_v62 = vld [vmem:[%s19819_s3 + $0x1c60] sm:$0xff]  ;;  %10944 = vmatpush.msra.mxu0 %v10570_v20  ;;  %v9815_v26 = vld [vmem:[%s19819_s3 + $0x328] sm:$0xff] }
 0x519   :  { %v10498_v34 = vld [vmem:[%s19819_s3 + $0x1880] sm:$0xff]  ;;  %10967 = vmatpush.msrb.mxu1 %v10622_v62  ;;  %10989 = vmatpush.msrb.mxu2 %v9719_v45  ;;  %v9879_v54 = vld [vmem:[%s19819_s3 + $0x528] sm:$0xff] }
 0x51a   :  { %v10566_v58 = vld [vmem:[%s19819_s3 + $0x1aa0] sm:$0xff]  ;;  %10926 = vmatpush.msrb.mxu3 %v10498_v34  ;;  %v9951_v63 = vld [vmem:[%s19819_s3 + $0x768] sm:$0xff] }
 0x51b   :  { %v10618_v33 = vld [vmem:[%s19819_s3 + $0x1c40] sm:$0xff]  ;;  %10945 = vmatpush.msra.mxu0 %v10566_v58  ;;  %10990 = vmatpush.msrb.mxu2 %v9715_v52  ;;  %v10011_v0 = vld [vmem:[%s19819_s3 + $0x948] sm:$0xff] }
 0x51c   :  { %v10494_v2 = vld [vmem:[%s19819_s3 + $0x1860] sm:$0xff]  ;;  %10968 = vmatpush.msrb.mxu1 %v10618_v33  ;;  %10991 = vmatmul.f32.vlgmr.msrb.gmra.mxu2 %v17202_v21  ;;  %v9811_v61 = vld [vmem:[%s19819_s3 + $0x308] sm:$0xff] }
 0x51d   :  { %v10562_v30 = vld [vmem:[%s19819_s3 + $0x1a80] sm:$0xff]  ;;  %10927 = vmatpush.msrb.mxu3 %v10494_v2  ;;  %11055 = vmatpush.msra.mxu2 %v10031_v28  ;;  %v9875_v20 = vld [vmem:[%s19819_s3 + $0x508] sm:$0xff] }
 0x51e   :  { %v10614_v25 = vld [vmem:[%s19819_s3 + $0x1c20] sm:$0xff]  ;;  %10946 = vmatpush.msra.mxu0 %v10562_v30  ;;  %v9947_v62 = vld [vmem:[%s19819_s3 + $0x748] sm:$0xff] }
 0x51f   :  { %v10490_v5 = vld [vmem:[%s19819_s3 + $0x1840] sm:$0xff]  ;;  %10969 = vmatpush.msrb.mxu1 %v10614_v25  ;;  %11056 = vmatpush.msra.mxu2 %v10027_v4  ;;  %v10007_v29 = vld [vmem:[%s19819_s3 + $0x928] sm:$0xff] }
 0x520   :  { %v10558_v7 = vld [vmem:[%s19819_s3 + $0x1a60] sm:$0xff]  ;;  %10928 = vmatpush.msrb.mxu3 %v10490_v5  ;;  %v9807_v34 = vld [vmem:[%s19819_s3 + $0x2e8] sm:$0xff] }
 0x521   :  { %v10610_v19 = vld [vmem:[%s19819_s3 + $0x1c00] sm:$0xff]  ;;  %10947 = vmatpush.msra.mxu0 %v10558_v7  ;;  %11057 = vmatpush.msra.mxu2 %v10023_v18  ;;  %v9871_v58 = vld [vmem:[%s19819_s3 + $0x4e8] sm:$0xff] }
 0x522   :  { %v10486_v15 = vld [vmem:[%s19819_s3 + $0x1820] sm:$0xff]  ;;  %10970 = vmatpush.msrb.mxu1 %v10610_v19  ;;  %v9943_v33 = vld [vmem:[%s19819_s3 + $0x728] sm:$0xff] }
 0x523   :  { %v10554_v13 = vld [vmem:[%s19819_s3 + $0x1a40] sm:$0xff]  ;;  %10929 = vmatpush.msrb.mxu3 %v10486_v15  ;;  %11058 = vmatpush.msra.mxu2 %v10019_v9  ;;  %v10003_v8 = vld [vmem:[%s19819_s3 + $0x908] sm:$0xff] }
 0x524   :  { %v10482_v57 = vld [vmem:[%s19819_s3 + $0x1800] sm:$0xff]  ;;  %10995 = vmatpush.msra.mxu1 %v9839_v56  ;;  %10948 = vmatpush.msra.mxu0 %v10554_v13  ;;  %v9803_v2 = vld [vmem:[%s19819_s3 + $0x2c8] sm:$0xff] }
 0x525   :  { %v10550_v1 = vld [vmem:[%s19819_s3 + $0x1a20] sm:$0xff]  ;;  %10930 = vmatpush.msrb.mxu3 %v10482_v57  ;;  %11059 = vmatpush.msra.mxu2 %v10015_v32  ;;  %v9867_v30 = vld [vmem:[%s19819_s3 + $0x4c8] sm:$0xff] }
 0x526   :  { %10996 = vmatpush.msra.mxu1 %v9835_v49  ;;  %10949 = vmatpush.msra.mxu0 %v10550_v1  ;;  %v10546_v23 = vld [vmem:[%s19819_s3 + $0x1a00] sm:$0xff]  ;;  %v9939_v25 = vld [vmem:[%s19819_s3 + $0x708] sm:$0xff] }
 0x527   :  { %11015 = vmatpush.msra.mxu3 %v9903_v11  ;;  %11060 = vmatpush.msra.mxu2 %v10011_v0  ;;  %v9999_v46 = vld [vmem:[%s19819_s3 + $0x8e8] sm:$0xff] }
 0x528   :  { %10997 = vmatpush.msra.mxu1 %v9831_v6  ;;  %10950 = vmatpush.msra.mxu0 %v10546_v23  ;;  %v9799_v5 = vld [vmem:[%s19819_s3 + $0x2a8] sm:$0xff] }
 0x529   :  { %11016 = vmatpush.msra.mxu3 %v9899_v40  ;;  %11061 = vmatpush.msra.mxu2 %v10007_v29  ;;  %v9863_v7 = vld [vmem:[%s19819_s3 + $0x4a8] sm:$0xff] }
 0x52a   :  { %11035 = vmatpush.msrb.mxu0 %v9967_v37  ;;  %10998 = vmatpush.msra.mxu1 %v9827_v12  ;;  %v9935_v19 = vld [vmem:[%s19819_s3 + $0x6e8] sm:$0xff] }
 0x52b   :  { %11017 = vmatpush.msra.mxu3 %v9895_v41  ;;  %11062 = vmatpush.msra.mxu2 %v10003_v8  ;;  %v9995_v38 = vld [vmem:[%s19819_s3 + $0x8c8] sm:$0xff] }
 0x52c   :  { %11036 = vmatpush.msrb.mxu0 %v9963_v27  ;;  %10999 = vmatpush.msra.mxu1 %v9823_v16  ;;  %v9795_v15 = vld [vmem:[%s19819_s3 + $0x288] sm:$0xff] }
 0x52d   :  { %11018 = vmatpush.msra.mxu3 %v9891_v59  ;;  %11063 = vmatpush.msra.mxu2 %v9999_v46  ;;  %v9859_v13 = vld [vmem:[%s19819_s3 + $0x488] sm:$0xff] }
 0x52e   :  { %11037 = vmatpush.msrb.mxu0 %v9959_v53  ;;  %11000 = vmatpush.msra.mxu1 %v9819_v60  ;;  %v9931_v56 = vld [vmem:[%s19819_s3 + $0x6c8] sm:$0xff] }
 0x52f   :  { %11019 = vmatpush.msra.mxu3 %v9887_v44  ;;  %v9991_v45 = vld [vmem:[%s19819_s3 + $0x8a8] sm:$0xff]  ;;  %11064 = vmatpush.msra.mxu2 %v9995_v38  ;;  %v17819_v41 = vpop.permute.xlu2 %9651 }
 0x530   :  { %11038 = vmatpush.msrb.mxu0 %v9955_v39  ;;  %11001 = vmatpush.msra.mxu1 %v9815_v26  ;;  %v9791_v57 = vld [vmem:[%s19819_s3 + $0x268] sm:$0xff]  ;;  %v9667_v59 = vsel %vm1923_vm5, %v17408_v3, %v17819_v41 }
 0x531   :  { %11020 = vmatpush.msra.mxu3 %v9883_v42  ;;  %v9855_v11 = vld [vmem:[%s19819_s3 + $0x468] sm:$0xff]  ;;  %11065 = vmatpush.msra.mxu2 %v9991_v45  ;;  %v9696_v18 = vmax.f32 %v16971_v22, %v9667_v59 }
 0x532   :  { %11039 = vmatpush.msrb.mxu0 %v9951_v63  ;;  %11002 = vmatpush.msra.mxu1 %v9811_v61  ;;  %v9927_v1 = vld [vmem:[%s19819_s3 + $0x6a8] sm:$0xff] }
 0x533   :  { %11021 = vmatpush.msra.mxu3 %v9879_v54  ;;  %v9987_v49 = vld [vmem:[%s19819_s3 + $0x888] sm:$0xff]  ;;  %v17846_v53 = vmax.f32 %v9696_v18, 0.0 }
 0x534   :  { %11040 = vmatpush.msrb.mxu0 %v9947_v62  ;;  %11003 = vmatpush.msra.mxu1 %v9807_v34  ;;  %v9787_v52 = vld [vmem:[%s19819_s3 + $0x248] sm:$0xff] }
 0x535   :  { %11022 = vmatpush.msra.mxu3 %v9875_v20  ;;  %v9851_v40 = vld [vmem:[%s19819_s3 + $0x448] sm:$0xff]  ;;  %11066 = vmatpush.msra.mxu2 %v9987_v49 }
 0x536   :  { %11041 = vmatpush.msrb.mxu0 %v9943_v33  ;;  %11004 = vmatpush.msra.mxu1 %v9803_v2  ;;  %v9923_v6 = vld [vmem:[%s19819_s3 + $0x688] sm:$0xff] }
 0x537   :  { %11023 = vmatpush.msra.mxu3 %v9871_v58  ;;  %v9983_v28 = vld [vmem:[%s19819_s3 + $0x868] sm:$0xff] }
 0x538   :  { %11042 = vmatpush.msrb.mxu0 %v9939_v25  ;;  %11005 = vmatpush.msra.mxu1 %v9799_v5  ;;  %v9783_v23 = vld [vmem:[%s19819_s3 + $0x228] sm:$0xff] }
 0x539   :  { %11024 = vmatpush.msra.mxu3 %v9867_v30  ;;  %v9847_v37 = vld [vmem:[%s19819_s3 + $0x428] sm:$0xff]  ;;  %11067 = vmatpush.msra.mxu2 %v9983_v28 }
 0x53a   :  { %11043 = vmatpush.msrb.mxu0 %v9935_v19  ;;  %11006 = vmatpush.msra.mxu1 %v9795_v15  ;;  %v9919_v4 = vld [vmem:[%s19819_s3 + $0x668] sm:$0xff] }
 0x53b   :  { %11025 = vmatpush.msra.mxu3 %v9863_v7  ;;  %v9979_v12 = vld [vmem:[%s19819_s3 + $0x848] sm:$0xff] }
 0x53c   :  { %11044 = vmatpush.msrb.mxu0 %v9931_v56  ;;  %11007 = vmatpush.msra.mxu1 %v9791_v57  ;;  %v9779_v27 = vld [vmem:[%s19819_s3 + $0x208] sm:$0xff] }
 0x53d   :  { %11026 = vmatpush.msra.mxu3 %v9859_v13  ;;  %v9843_v16 = vld [vmem:[%s19819_s3 + $0x408] sm:$0xff]  ;;  %11068 = vmatpush.msra.mxu2 %v9979_v12 }
 0x53e   :  { %11045 = vmatpush.msrb.mxu0 %v9927_v1  ;;  %11008 = vmatpush.msra.mxu1 %v9787_v52  ;;  %v9915_v44 = vld [vmem:[%s19819_s3 + $0x648] sm:$0xff] }
 0x53f   :  { %11027 = vmatpush.msra.mxu3 %v9855_v11  ;;  %v9975_v3 = vld [vmem:[%s19819_s3 + $0x828] sm:$0xff] }
 0x540   :  { %11046 = vmatpush.msrb.mxu0 %v9923_v6  ;;  %11009 = vmatpush.msra.mxu1 %v9783_v23  ;;  %v10159_v22 = vld [vmem:[%s19819_s3 + $0xde8] sm:$0xff] }
 0x541   :  { %11028 = vmatpush.msra.mxu3 %v9851_v40  ;;  %v9911_v9 = vld [vmem:[%s19819_s3 + $0x628] sm:$0xff]  ;;  %11069 = vmatpush.msra.mxu2 %v9975_v3 }
 0x542   :  { %11047 = vmatpush.msrb.mxu0 %v9919_v4  ;;  %11010 = vmatpush.msra.mxu1 %v9779_v27  ;;  %v9971_v60 = vld [vmem:[%s19819_s3 + $0x808] sm:$0xff] }
 0x543   :  { %11029 = vmatpush.msra.mxu3 %v9847_v37  ;;  %v10155_v42 = vld [vmem:[%s19819_s3 + $0xdc8] sm:$0xff]  ;;  %11070 = vmatpush.msra.mxu2 %v9971_v60 }
 0x544   :  { %11048 = vmatpush.msrb.mxu0 %v9915_v44  ;;  %10931 = vmatmul.f32.vlgmr.msrb.gmra.mxu3 %v17846_v53  ;;  %v10287_v39 = vld [vmem:[%s19819_s3 + $0x11e8] sm:$0xff]  ;;  %v9654_v25 = vpop.permute.xlu0 %9653 }
 0x545   :  { %11030 = vmatpush.msra.mxu3 %v9843_v16  ;;  %v9907_v32 = vld [vmem:[%s19819_s3 + $0x608] sm:$0xff]  ;;  %11071 = vmatmul.f32.vlgmr.msra.gmra.mxu2 %v17308_v36  ;;  %v9668_v46 = vsel %vm1923_vm5, %v17819_v41, %v9654_v25  ;;  %v9698_v5 = vmax.f32 %v17220_v50, %v9654_v25 }
 0x546   :  { %11049 = vmatpush.msrb.mxu0 %v9911_v9  ;;  %v10151_v26 = vld [vmem:[%s19819_s3 + $0xda8] sm:$0xff]  ;;  %11135 = vmatpush.msrb.mxu2 %v10287_v39  ;;  %v9697_v38 = vmax.f32 %v17229_v10, %v9668_v46 }
 0x547   :  { %11095 = vmatpush.msrb.mxu3 %v10159_v22  ;;  %v10283_v54 = vld [vmem:[%s19819_s3 + $0x11c8] sm:$0xff]  ;;  %v17921_v15 = vmax.f32 %v9698_v5, 0.0 }
 0x548   :  { %v10147_v63 = vld [vmem:[%s19819_s3 + $0xd88] sm:$0xff]  ;;  %11050 = vmatpush.msrb.mxu0 %v9907_v32  ;;  %11136 = vmatpush.msrb.mxu2 %v10283_v54  ;;  %v17932_v45 = vmax.f32 %v9697_v38, 0.0 }
 0x549   :  { %11096 = vmatpush.msrb.mxu3 %v10155_v42  ;;  %v10279_v0 = vld [vmem:[%s19819_s3 + $0x11a8] sm:$0xff]  ;;  %12283 = vmatmul.msk.f32.vlgmr.msrb.gmra.mxu1 %vm10658_vm2, %v17921_v15 }
 0x54a   :  { %v10143_v61 = vld [vmem:[%s19819_s3 + $0xd68] sm:$0xff]  ;;  %11137 = vmatpush.msrb.mxu2 %v10279_v0  ;;  %10951 = vmatmul.f32.vlgmr.msra.gmra.mxu0 %v17932_v45 }
 0x54b   :  { %11097 = vmatpush.msrb.mxu3 %v10151_v26  ;;  %v10275_v20 = vld [vmem:[%s19819_s3 + $0x1188] sm:$0xff] }
 0x54c   :  { %11031 = vmatmul.f32.vlgmr.msra.gmra.mxu3 %v17224_v14  ;;  %v10139_v62 = vld [vmem:[%s19819_s3 + $0xd48] sm:$0xff]  ;;  %11138 = vmatpush.msrb.mxu2 %v10275_v20 }
 0x54d   :  { %11098 = vmatpush.msrb.mxu3 %v10147_v63  ;;  %v10271_v29 = vld [vmem:[%s19819_s3 + $0x1168] sm:$0xff] }
 0x54e   :  { %v10135_v34 = vld [vmem:[%s19819_s3 + $0xd28] sm:$0xff]  ;;  %11139 = vmatpush.msrb.mxu2 %v10271_v29 }
 0x54f   :  { %11099 = vmatpush.msrb.mxu3 %v10143_v61  ;;  %v10267_v58 = vld [vmem:[%s19819_s3 + $0x1148] sm:$0xff] }
 0x550   :  { %v10131_v33 = vld [vmem:[%s19819_s3 + $0xd08] sm:$0xff]  ;;  %11140 = vmatpush.msrb.mxu2 %v10267_v58 }
 0x551   :  { %11100 = vmatpush.msrb.mxu3 %v10139_v62  ;;  %v10263_v8 = vld [vmem:[%s19819_s3 + $0x1128] sm:$0xff]  ;;  %11011 = vmatmul.f32.vlgmr.msra.gmra.mxu1 %v17222_v43 }
 0x552   :  { %v10127_v2 = vld [vmem:[%s19819_s3 + $0xce8] sm:$0xff]  ;;  %11141 = vmatpush.msrb.mxu2 %v10263_v8  ;;  %11051 = vmatmul.f32.vlgmr.msrb.gmra.mxu0 %v17226_v55 }
 0x553   :  { %11101 = vmatpush.msrb.mxu3 %v10135_v34  ;;  %v10259_v30 = vld [vmem:[%s19819_s3 + $0x1108] sm:$0xff] }
 0x554   :  { %v10123_v7 = vld [vmem:[%s19819_s3 + $0xcc8] sm:$0xff]  ;;  %11142 = vmatpush.msrb.mxu2 %v10259_v30 }
 0x555   :  { %11102 = vmatpush.msrb.mxu3 %v10131_v33  ;;  %v10255_v19 = vld [vmem:[%s19819_s3 + $0x10e8] sm:$0xff] }
 0x556   :  { %v10119_v13 = vld [vmem:[%s19819_s3 + $0xca8] sm:$0xff]  ;;  %11143 = vmatpush.msrb.mxu2 %v10255_v19 }
 0x557   :  { %11103 = vmatpush.msrb.mxu3 %v10127_v2  ;;  %v10095_v50 = vld [vmem:[%s19819_s3 + $0xbe8] sm:$0xff] }
 0x558   :  { %v10251_v56 = vld [vmem:[%s19819_s3 + $0x10c8] sm:$0xff]  ;;  %11075 = vmatpush.msrb.mxu1 %v10095_v50 }
 0x559   :  { %11104 = vmatpush.msrb.mxu3 %v10123_v7  ;;  %v10115_v10 = vld [vmem:[%s19819_s3 + $0xc88] sm:$0xff]  ;;  %11144 = vmatpush.msrb.mxu2 %v10251_v56 }
 0x55a   :  { %v10223_v57 = vld [vmem:[%s19819_s3 + $0xfe8] sm:$0xff] }
 0x55b   :  { %v10247_v11 = vld [vmem:[%s19819_s3 + $0x10a8] sm:$0xff]  ;;  %11105 = vmatpush.msrb.mxu3 %v10119_v13  ;;  %11115 = vmatpush.msra.mxu0 %v10223_v57 }
 0x55c   :  { %v10091_v1 = vld [vmem:[%s19819_s3 + $0xbc8] sm:$0xff]  ;;  %11145 = vmatpush.msrb.mxu2 %v10247_v11 }
 0x55d   :  { %v10111_v49 = vld [vmem:[%s19819_s3 + $0xc68] sm:$0xff]  ;;  %11106 = vmatpush.msrb.mxu3 %v10115_v10  ;;  %11076 = vmatpush.msrb.mxu1 %v10091_v1 }
 0x55e   :  { %v10219_v52 = vld [vmem:[%s19819_s3 + $0xfc8] sm:$0xff] }
 0x55f   :  { %v10243_v40 = vld [vmem:[%s19819_s3 + $0x1088] sm:$0xff]  ;;  %11107 = vmatpush.msrb.mxu3 %v10111_v49  ;;  %11116 = vmatpush.msra.mxu0 %v10219_v52 }
 0x560   :  { %v10087_v6 = vld [vmem:[%s19819_s3 + $0xba8] sm:$0xff]  ;;  %11146 = vmatpush.msrb.mxu2 %v10243_v40 }
 0x561   :  { %v10107_v28 = vld [vmem:[%s19819_s3 + $0xc48] sm:$0xff]  ;;  %11077 = vmatpush.msrb.mxu1 %v10087_v6 }
 0x562   :  { %v10215_v23 = vld [vmem:[%s19819_s3 + $0xfa8] sm:$0xff]  ;;  %11108 = vmatpush.msrb.mxu3 %v10107_v28 }
 0x563   :  { %v10239_v41 = vld [vmem:[%s19819_s3 + $0x1068] sm:$0xff]  ;;  %11117 = vmatpush.msra.mxu0 %v10215_v23 }
 0x564   :  { %v10083_v37 = vld [vmem:[%s19819_s3 + $0xb88] sm:$0xff]  ;;  %11147 = vmatpush.msrb.mxu2 %v10239_v41 }
 0x565   :  { %v10103_v4 = vld [vmem:[%s19819_s3 + $0xc28] sm:$0xff]  ;;  %11078 = vmatpush.msrb.mxu1 %v10083_v37 }
 0x566   :  { %v10211_v12 = vld [vmem:[%s19819_s3 + $0xf88] sm:$0xff]  ;;  %11109 = vmatpush.msrb.mxu3 %v10103_v4 }
 0x567   :  { %v10235_v59 = vld [vmem:[%s19819_s3 + $0x1048] sm:$0xff]  ;;  %11118 = vmatpush.msra.mxu0 %v10211_v12 }
 0x568   :  { %v10079_v27 = vld [vmem:[%s19819_s3 + $0xb68] sm:$0xff]  ;;  %11148 = vmatpush.msrb.mxu2 %v10235_v59 }
 0x569   :  { %v10099_v18 = vld [vmem:[%s19819_s3 + $0xc08] sm:$0xff]  ;;  %11079 = vmatpush.msrb.mxu1 %v10079_v27 }
 0x56a   :  { %v10231_v16 = vld [vmem:[%s19819_s3 + $0x1028] sm:$0xff]  ;;  %11110 = vmatpush.msrb.mxu3 %v10099_v18 }
 0x56b   :  { %v10207_v44 = vld [vmem:[%s19819_s3 + $0xf68] sm:$0xff]  ;;  %11149 = vmatpush.msrb.mxu2 %v10231_v16  ;;  %11111 = vmatmul.f32.vlgmr.msrb.gmra.mxu3 %v17328_v48 }
 0x56c   :  { %v10227_v3 = vld [vmem:[%s19819_s3 + $0x1008] sm:$0xff]  ;;  %11119 = vmatpush.msra.mxu0 %v10207_v44 }
 0x56d   :  { %v10415_v22 = vld [vmem:[%s19819_s3 + $0x15e8] sm:$0xff]  ;;  %11150 = vmatpush.msrb.mxu2 %v10227_v3 }
 0x56e   :  { %v10075_v9 = vld [vmem:[%s19819_s3 + $0xb48] sm:$0xff]  ;;  %11175 = vmatpush.msra.mxu3 %v10415_v22  ;;  %11151 = vmatmul.f32.vlgmr.msrb.gmra.mxu2 %v17442_v17 }
 0x56f   :  { %v10543_v60 = vld [vmem:[%s19819_s3 + $0x19e8] sm:$0xff]  ;;  %11080 = vmatpush.msrb.mxu1 %v10075_v9 }
 0x570   :  { %v10203_v42 = vld [vmem:[%s19819_s3 + $0xf48] sm:$0xff]  ;;  %11215 = vmatpush.msra.mxu2 %v10543_v60 }
 0x571   :  { %v10411_v39 = vld [vmem:[%s19819_s3 + $0x15c8] sm:$0xff]  ;;  %11120 = vmatpush.msra.mxu0 %v10203_v42 }
 0x572   :  { %v10071_v32 = vld [vmem:[%s19819_s3 + $0xb28] sm:$0xff]  ;;  %11176 = vmatpush.msra.mxu3 %v10411_v39 }
 0x573   :  { %v10539_v26 = vld [vmem:[%s19819_s3 + $0x19c8] sm:$0xff]  ;;  %11081 = vmatpush.msrb.mxu1 %v10071_v32 }
 0x574   :  { %v10199_v54 = vld [vmem:[%s19819_s3 + $0xf28] sm:$0xff]  ;;  %11216 = vmatpush.msra.mxu2 %v10539_v26 }
 0x575   :  { %v10407_v63 = vld [vmem:[%s19819_s3 + $0x15a8] sm:$0xff]  ;;  %11121 = vmatpush.msra.mxu0 %v10199_v54 }
 0x576   :  { %v10067_v0 = vld [vmem:[%s19819_s3 + $0xb08] sm:$0xff]  ;;  %11177 = vmatpush.msra.mxu3 %v10407_v63 }
 0x577   :  { %v10535_v61 = vld [vmem:[%s19819_s3 + $0x19a8] sm:$0xff]  ;;  %11082 = vmatpush.msrb.mxu1 %v10067_v0 }
 0x578   :  { %v10195_v20 = vld [vmem:[%s19819_s3 + $0xf08] sm:$0xff]  ;;  %11217 = vmatpush.msra.mxu2 %v10535_v61 }
 0x579   :  { %v10403_v62 = vld [vmem:[%s19819_s3 + $0x1588] sm:$0xff]  ;;  %11122 = vmatpush.msra.mxu0 %v10195_v20 }
 0x57a   :  { %v10063_v29 = vld [vmem:[%s19819_s3 + $0xae8] sm:$0xff]  ;;  %11178 = vmatpush.msra.mxu3 %v10403_v62 }
 0x57b   :  { %v10531_v34 = vld [vmem:[%s19819_s3 + $0x1988] sm:$0xff]  ;;  %11083 = vmatpush.msrb.mxu1 %v10063_v29 }
 0x57c   :  { %v10191_v58 = vld [vmem:[%s19819_s3 + $0xee8] sm:$0xff]  ;;  %11218 = vmatpush.msra.mxu2 %v10531_v34  ;;  %v9840_v34 = vld [vmem:[%s19819_s3 + $0x3f0] sm:$0xff] }
 0x57d   :  { %v10399_v33 = vld [vmem:[%s19819_s3 + $0x1568] sm:$0xff]  ;;  %11123 = vmatpush.msra.mxu0 %v10191_v58 }
 0x57e   :  { %v10059_v8 = vld [vmem:[%s19819_s3 + $0xac8] sm:$0xff]  ;;  %11179 = vmatpush.msra.mxu3 %v10399_v33 }
 0x57f   :  { %v10527_v2 = vld [vmem:[%s19819_s3 + $0x1968] sm:$0xff]  ;;  %11084 = vmatpush.msrb.mxu1 %v10059_v8  ;;  %v9836_v8 = vld [vmem:[%s19819_s3 + $0x3d0] sm:$0xff] }
 0x580   :  { %v10187_v30 = vld [vmem:[%s19819_s3 + $0xec8] sm:$0xff]  ;;  %11219 = vmatpush.msra.mxu2 %v10527_v2 }
 0x581   :  { %v10395_v25 = vld [vmem:[%s19819_s3 + $0x1548] sm:$0xff]  ;;  %11124 = vmatpush.msra.mxu0 %v10187_v30 }
 0x582   :  { %v10055_v46 = vld [vmem:[%s19819_s3 + $0xaa8] sm:$0xff]  ;;  %11180 = vmatpush.msra.mxu3 %v10395_v25 }
 0x583   :  { %v10523_v5 = vld [vmem:[%s19819_s3 + $0x1948] sm:$0xff]  ;;  %11085 = vmatpush.msrb.mxu1 %v10055_v46  ;;  %v9832_v46 = vld [vmem:[%s19819_s3 + $0x3b0] sm:$0xff] }
 0x584   :  { %v10183_v7 = vld [vmem:[%s19819_s3 + $0xea8] sm:$0xff]  ;;  %11220 = vmatpush.msra.mxu2 %v10523_v5 }
 0x585   :  { %v10391_v19 = vld [vmem:[%s19819_s3 + $0x1528] sm:$0xff]  ;;  %11125 = vmatpush.msra.mxu0 %v10183_v7 }
 0x586   :  { %v10051_v38 = vld [vmem:[%s19819_s3 + $0xa88] sm:$0xff]  ;;  %11181 = vmatpush.msra.mxu3 %v10391_v19 }
 0x587   :  { %v10519_v13 = vld [vmem:[%s19819_s3 + $0x1928] sm:$0xff]  ;;  %11086 = vmatpush.msrb.mxu1 %v10051_v38  ;;  %v9828_v38 = vld [vmem:[%s19819_s3 + $0x390] sm:$0xff] }
 0x588   :  { %v10179_v50 = vld [vmem:[%s19819_s3 + $0xe88] sm:$0xff]  ;;  %11221 = vmatpush.msra.mxu2 %v10519_v13 }
 0x589   :  { %v10387_v56 = vld [vmem:[%s19819_s3 + $0x1508] sm:$0xff]  ;;  %11126 = vmatpush.msra.mxu0 %v10179_v50 }
 0x58a   :  { %v10047_v10 = vld [vmem:[%s19819_s3 + $0xa68] sm:$0xff]  ;;  %11182 = vmatpush.msra.mxu3 %v10387_v56 }
 0x58b   :  { %v10515_v57 = vld [vmem:[%s19819_s3 + $0x1908] sm:$0xff]  ;;  %11087 = vmatpush.msrb.mxu1 %v10047_v10  ;;  %v9824_v10 = vld [vmem:[%s19819_s3 + $0x370] sm:$0xff] }
 0x58c   :  { %v10175_v11 = vld [vmem:[%s19819_s3 + $0xe68] sm:$0xff]  ;;  %11222 = vmatpush.msra.mxu2 %v10515_v57 }
 0x58d   :  { %v10383_v1 = vld [vmem:[%s19819_s3 + $0x14e8] sm:$0xff]  ;;  %11127 = vmatpush.msra.mxu0 %v10175_v11 }
 0x58e   :  { %v10043_v49 = vld [vmem:[%s19819_s3 + $0xa48] sm:$0xff]  ;;  %11183 = vmatpush.msra.mxu3 %v10383_v1 }
 0x58f   :  { %v10511_v52 = vld [vmem:[%s19819_s3 + $0x18e8] sm:$0xff]  ;;  %11088 = vmatpush.msrb.mxu1 %v10043_v49  ;;  %v9820_v49 = vld [vmem:[%s19819_s3 + $0x350] sm:$0xff] }
 0x590   :  { %v10171_v40 = vld [vmem:[%s19819_s3 + $0xe48] sm:$0xff]  ;;  %11223 = vmatpush.msra.mxu2 %v10511_v52 }
 0x591   :  { %v10379_v6 = vld [vmem:[%s19819_s3 + $0x14c8] sm:$0xff]  ;;  %11128 = vmatpush.msra.mxu0 %v10171_v40 }
 0x592   :  { %v10039_v28 = vld [vmem:[%s19819_s3 + $0xa28] sm:$0xff]  ;;  %11184 = vmatpush.msra.mxu3 %v10379_v6 }
 0x593   :  { %v10507_v23 = vld [vmem:[%s19819_s3 + $0x18c8] sm:$0xff]  ;;  %11089 = vmatpush.msrb.mxu1 %v10039_v28  ;;  %v9816_v28 = vld [vmem:[%s19819_s3 + $0x330] sm:$0xff] }
 0x594   :  { %v10167_v41 = vld [vmem:[%s19819_s3 + $0xe28] sm:$0xff]  ;;  %11224 = vmatpush.msra.mxu2 %v10507_v23 }
 0x595   :  { %v10375_v37 = vld [vmem:[%s19819_s3 + $0x14a8] sm:$0xff]  ;;  %11129 = vmatpush.msra.mxu0 %v10167_v41 }
 0x596   :  { %v10035_v4 = vld [vmem:[%s19819_s3 + $0xa08] sm:$0xff]  ;;  %11185 = vmatpush.msra.mxu3 %v10375_v37 }
 0x597   :  { %v10503_v12 = vld [vmem:[%s19819_s3 + $0x18a8] sm:$0xff]  ;;  %11090 = vmatpush.msrb.mxu1 %v10035_v4  ;;  %v9812_v4 = vld [vmem:[%s19819_s3 + $0x310] sm:$0xff] }
 0x598   :  { %v10163_v59 = vld [vmem:[%s19819_s3 + $0xe08] sm:$0xff]  ;;  %11225 = vmatpush.msra.mxu2 %v10503_v12  ;;  %11091 = vmatmul.f32.vlgmr.msrb.gmra.mxu1 %v17320_v31 }
 0x599   :  { %v10351_v27 = vld [vmem:[%s19819_s3 + $0x13e8] sm:$0xff]  ;;  %11130 = vmatpush.msra.mxu0 %v10163_v59 }
 0x59a   :  { %v10499_v18 = vld [vmem:[%s19819_s3 + $0x1888] sm:$0xff]  ;;  %11155 = vmatpush.msra.mxu1 %v10351_v27  ;;  %11131 = vmatmul.f32.vlgmr.msra.gmra.mxu0 %v17333_v24 }
 0x59b   :  { %v10371_v16 = vld [vmem:[%s19819_s3 + $0x1488] sm:$0xff]  ;;  %11226 = vmatpush.msra.mxu2 %v10499_v18  ;;  %v9808_v18 = vld [vmem:[%s19819_s3 + $0x2f0] sm:$0xff] }
 0x59c   :  { %v10347_v44 = vld [vmem:[%s19819_s3 + $0x13c8] sm:$0xff]  ;;  %11186 = vmatpush.msra.mxu3 %v10371_v16 }
 0x59d   :  { %v10495_v3 = vld [vmem:[%s19819_s3 + $0x1868] sm:$0xff]  ;;  %11156 = vmatpush.msra.mxu1 %v10347_v44 }
 0x59e   :  { %v10479_v22 = vld [vmem:[%s19819_s3 + $0x17e8] sm:$0xff]  ;;  %11227 = vmatpush.msra.mxu2 %v10495_v3 }
 0x59f   :  { %v10367_v9 = vld [vmem:[%s19819_s3 + $0x1468] sm:$0xff]  ;;  %11195 = vmatpush.msrb.mxu0 %v10479_v22  ;;  %v9804_v22 = vld [vmem:[%s19819_s3 + $0x2d0] sm:$0xff] }
 0x5a0   :  { %v10343_v60 = vld [vmem:[%s19819_s3 + $0x13a8] sm:$0xff]  ;;  %11187 = vmatpush.msra.mxu3 %v10367_v9 }
 0x5a1   :  { %v10491_v42 = vld [vmem:[%s19819_s3 + $0x1848] sm:$0xff]  ;;  %11157 = vmatpush.msra.mxu1 %v10343_v60 }
 0x5a2   :  { %v10475_v39 = vld [vmem:[%s19819_s3 + $0x17c8] sm:$0xff]  ;;  %11228 = vmatpush.msra.mxu2 %v10491_v42 }
 0x5a3   :  { %v10363_v32 = vld [vmem:[%s19819_s3 + $0x1448] sm:$0xff]  ;;  %11196 = vmatpush.msrb.mxu0 %v10475_v39  ;;  %v9800_v39 = vld [vmem:[%s19819_s3 + $0x2b0] sm:$0xff] }
 0x5a4   :  { %v10339_v26 = vld [vmem:[%s19819_s3 + $0x1388] sm:$0xff]  ;;  %11188 = vmatpush.msra.mxu3 %v10363_v32 }
 0x5a5   :  { %v10487_v54 = vld [vmem:[%s19819_s3 + $0x1828] sm:$0xff]  ;;  %11158 = vmatpush.msra.mxu1 %v10339_v26 }
 0x5a6   :  { %v10471_v63 = vld [vmem:[%s19819_s3 + $0x17a8] sm:$0xff]  ;;  %11229 = vmatpush.msra.mxu2 %v10487_v54 }
 0x5a7   :  { %v10359_v0 = vld [vmem:[%s19819_s3 + $0x1428] sm:$0xff]  ;;  %11197 = vmatpush.msrb.mxu0 %v10471_v63  ;;  %v9796_v63 = vld [vmem:[%s19819_s3 + $0x290] sm:$0xff] }
 0x5a8   :  { %v10335_v61 = vld [vmem:[%s19819_s3 + $0x1368] sm:$0xff]  ;;  %11189 = vmatpush.msra.mxu3 %v10359_v0 }
 0x5a9   :  { %v10483_v20 = vld [vmem:[%s19819_s3 + $0x1808] sm:$0xff]  ;;  %11159 = vmatpush.msra.mxu1 %v10335_v61 }
 0x5aa   :  { %v10467_v62 = vld [vmem:[%s19819_s3 + $0x1788] sm:$0xff]  ;;  %11230 = vmatpush.msra.mxu2 %v10483_v20  ;;  %v9792_v20 = vld [vmem:[%s19819_s3 + $0x270] sm:$0xff] }
 0x5ab   :  { %v10355_v29 = vld [vmem:[%s19819_s3 + $0x1408] sm:$0xff]  ;;  %11198 = vmatpush.msrb.mxu0 %v10467_v62  ;;  %11231 = vmatmul.f32.vlgmr.msra.gmra.mxu2 %v17846_v53 }
 0x5ac   :  { %v10463_v58 = vld [vmem:[%s19819_s3 + $0x1768] sm:$0xff]  ;;  %11190 = vmatpush.msra.mxu3 %v10355_v29  ;;  %11295 = vmatpush.msrb.mxu2 %v9840_v34  ;;  %v9776_v34 = vld [vmem:[%s19819_s3 + $0x1f0] sm:$0xff] }
 0x5ad   :  { %v10655_v33 = vld [vmem:[%s19819_s3 + $0x1d68] sm:$0x7]  ;;  %11191 = vmatmul.f32.vlgmr.msra.gmra.mxu3 %v17469_v51  ;;  %11199 = vmatpush.msrb.mxu0 %v10463_v58  ;;  %v9788_v58 = vld [vmem:[%s19819_s3 + $0x250] sm:$0xff] }
 0x5ae   :  { %v10331_v2 = vld [vmem:[%s19819_s3 + $0x1348] sm:$0xff]  ;;  %12284 = vmatpush.msk.msrb.mxu3 %vm10662_vm0, %v10655_v33  ;;  %11296 = vmatpush.msrb.mxu2 %v9836_v8  ;;  %v9904_v33 = vld [vmem:[%s19819_s3 + $0x5f0] sm:$0xff] }
 0x5af   :  { %v10459_v30 = vld [vmem:[%s19819_s3 + $0x1748] sm:$0xff]  ;;  %11160 = vmatpush.msra.mxu1 %v10331_v2  ;;  %v9772_v2 = vld [vmem:[%s19819_s3 + $0x1d0] sm:$0xff] }
 0x5b0   :  { %v10651_v25 = vld [vmem:[%s19819_s3 + $0x1d48] sm:$0xff]  ;;  %11200 = vmatpush.msrb.mxu0 %v10459_v30  ;;  %11297 = vmatpush.msrb.mxu2 %v9832_v46  ;;  %v9784_v30 = vld [vmem:[%s19819_s3 + $0x230] sm:$0xff] }
 0x5b1   :  { %v10327_v5 = vld [vmem:[%s19819_s3 + $0x1328] sm:$0xff]  ;;  %11260 = vmatpush.msrb.mxu3 %v10651_v25  ;;  %v9900_v25 = vld [vmem:[%s19819_s3 + $0x5d0] sm:$0xff] }
 0x5b2   :  { %v10455_v7 = vld [vmem:[%s19819_s3 + $0x1728] sm:$0xff]  ;;  %11161 = vmatpush.msra.mxu1 %v10327_v5  ;;  %11298 = vmatpush.msrb.mxu2 %v9828_v38  ;;  %v9768_v5 = vld [vmem:[%s19819_s3 + $0x1b0] sm:$0xff] }
 0x5b3   :  { %v10647_v19 = vld [vmem:[%s19819_s3 + $0x1d28] sm:$0xff]  ;;  %11201 = vmatpush.msrb.mxu0 %v10455_v7  ;;  %v9780_v7 = vld [vmem:[%s19819_s3 + $0x210] sm:$0xff] }
 0x5b4   :  { %v10323_v13 = vld [vmem:[%s19819_s3 + $0x1308] sm:$0xff]  ;;  %11261 = vmatpush.msrb.mxu3 %v10647_v19  ;;  %11299 = vmatpush.msrb.mxu2 %v9824_v10  ;;  %v9896_v19 = vld [vmem:[%s19819_s3 + $0x5b0] sm:$0xff] }
 0x5b5   :  { %v10451_v50 = vld [vmem:[%s19819_s3 + $0x1708] sm:$0xff]  ;;  %11162 = vmatpush.msra.mxu1 %v10323_v13  ;;  %v10096_v13 = vld [vmem:[%s19819_s3 + $0xbf0] sm:$0xff] }
 0x5b6   :  { %v10643_v56 = vld [vmem:[%s19819_s3 + $0x1d08] sm:$0xff]  ;;  %11202 = vmatpush.msrb.mxu0 %v10451_v50  ;;  %11300 = vmatpush.msrb.mxu2 %v9820_v49  ;;  %v9764_v50 = vld [vmem:[%s19819_s3 + $0x190] sm:$0xff] }
 0x5b7   :  { %v10319_v57 = vld [vmem:[%s19819_s3 + $0x12e8] sm:$0xff]  ;;  %11262 = vmatpush.msrb.mxu3 %v10643_v56  ;;  %v9892_v56 = vld [vmem:[%s19819_s3 + $0x590] sm:$0xff] }
 0x5b8   :  { %v10447_v11 = vld [vmem:[%s19819_s3 + $0x16e8] sm:$0xff]  ;;  %11163 = vmatpush.msra.mxu1 %v10319_v57  ;;  %11301 = vmatpush.msrb.mxu2 %v9816_v28  ;;  %v10092_v57 = vld [vmem:[%s19819_s3 + $0xbd0] sm:$0xff] }
 0x5b9   :  { %v10639_v1 = vld [vmem:[%s19819_s3 + $0x1ce8] sm:$0xff]  ;;  %11203 = vmatpush.msrb.mxu0 %v10447_v11  ;;  %v9760_v11 = vld [vmem:[%s19819_s3 + $0x170] sm:$0xff] }
 0x5ba   :  { %v10315_v52 = vld [vmem:[%s19819_s3 + $0x12c8] sm:$0xff]  ;;  %11263 = vmatpush.msrb.mxu3 %v10639_v1  ;;  %11302 = vmatpush.msrb.mxu2 %v9812_v4  ;;  %v9888_v1 = vld [vmem:[%s19819_s3 + $0x570] sm:$0xff] }
 0x5bb   :  { %v10443_v40 = vld [vmem:[%s19819_s3 + $0x16c8] sm:$0xff]  ;;  %11164 = vmatpush.msra.mxu1 %v10315_v52  ;;  %v10088_v52 = vld [vmem:[%s19819_s3 + $0xbb0] sm:$0xff] }
 0x5bc   :  { %v10635_v6 = vld [vmem:[%s19819_s3 + $0x1cc8] sm:$0xff]  ;;  %11204 = vmatpush.msrb.mxu0 %v10443_v40  ;;  %11303 = vmatpush.msrb.mxu2 %v9808_v18  ;;  %v9756_v40 = vld [vmem:[%s19819_s3 + $0x150] sm:$0xff]  ;;  %v10712_v18 = vpop.f32.mrf.mxu0 }
 0x5bd   :  { %v10311_v23 = vld [vmem:[%s19819_s3 + $0x12a8] sm:$0xff]  ;;  %11264 = vmatpush.msrb.mxu3 %v10635_v6  ;;  %v9884_v6 = vld [vmem:[%s19819_s3 + $0x550] sm:$0xff] }
 0x5be   :  { %v10439_v41 = vld [vmem:[%s19819_s3 + $0x16a8] sm:$0xff]  ;;  %11165 = vmatpush.msra.mxu1 %v10311_v23  ;;  %11304 = vmatpush.msrb.mxu2 %v9804_v22  ;;  %v10084_v23 = vld [vmem:[%s19819_s3 + $0xb90] sm:$0xff] }
 0x5bf   :  { %v10631_v37 = vld [vmem:[%s19819_s3 + $0x1ca8] sm:$0xff]  ;;  %11205 = vmatpush.msrb.mxu0 %v10439_v41  ;;  %v9752_v41 = vld [vmem:[%s19819_s3 + $0x130] sm:$0xff] }
 0x5c0   :  { %v10307_v12 = vld [vmem:[%s19819_s3 + $0x1288] sm:$0xff]  ;;  %11265 = vmatpush.msrb.mxu3 %v10631_v37  ;;  %11305 = vmatpush.msrb.mxu2 %v9800_v39  ;;  %v10692_v37 = vpop.f32.mrf.mxu3  ;;  %v9880_v4 = vld [vmem:[%s19819_s3 + $0x530] sm:$0xff] }
 0x5c1   :  { %v10435_v59 = vld [vmem:[%s19819_s3 + $0x1688] sm:$0xff]  ;;  %11166 = vmatpush.msra.mxu1 %v10307_v12  ;;  %v10076_v22 = vld [vmem:[%s19819_s3 + $0xb50] sm:$0xff] }
 0x5c2   :  { %v10627_v27 = vld [vmem:[%s19819_s3 + $0x1c88] sm:$0xff]  ;;  %11206 = vmatpush.msrb.mxu0 %v10435_v59  ;;  %11306 = vmatpush.msrb.mxu2 %v9796_v63  ;;  %v10080_v59 = vld [vmem:[%s19819_s3 + $0xb70] sm:$0xff] }
 0x5c3   :  { %v10303_v16 = vld [vmem:[%s19819_s3 + $0x1268] sm:$0xff]  ;;  %11266 = vmatpush.msrb.mxu3 %v10627_v27  ;;  %v9748_v27 = vld [vmem:[%s19819_s3 + $0x110] sm:$0xff] }
 0x5c4   :  { %v10431_v44 = vld [vmem:[%s19819_s3 + $0x1668] sm:$0xff]  ;;  %11167 = vmatpush.msra.mxu1 %v10303_v16  ;;  %11307 = vmatpush.msrb.mxu2 %v9792_v20  ;;  %v9876_v16 = vld [vmem:[%s19819_s3 + $0x510] sm:$0xff] }
 0x5c5   :  { %v10623_v3 = vld [vmem:[%s19819_s3 + $0x1c68] sm:$0xff]  ;;  %11207 = vmatpush.msrb.mxu0 %v10431_v44  ;;  %v10072_v39 = vld [vmem:[%s19819_s3 + $0xb30] sm:$0xff] }
 0x5c6   :  { %v10299_v9 = vld [vmem:[%s19819_s3 + $0x1248] sm:$0xff]  ;;  %11267 = vmatpush.msrb.mxu3 %v10623_v3  ;;  %11308 = vmatpush.msrb.mxu2 %v9788_v58  ;;  %v10713_v3 = vadd.f32 %v10712_v18, %v10692_v37  ;;  %v9736_v20 = vld [vmem:[%s19819_s3 + $0xb0] sm:$0xff] }
 0x5c7   :  { %v10427_v60 = vld [vmem:[%s19819_s3 + $0x1648] sm:$0xff]  ;;  %11168 = vmatpush.msra.mxu1 %v10299_v9  ;;  %v9744_v9 = vld [vmem:[%s19819_s3 + $0xf0] sm:$0xff] }
 0x5c8   :  { %v10619_v42 = vld [vmem:[%s19819_s3 + $0x1c48] sm:$0xff]  ;;  %11208 = vmatpush.msrb.mxu0 %v10427_v60  ;;  %11309 = vmatpush.msrb.mxu2 %v9784_v30  ;;  %v9872_v60 = vld [vmem:[%s19819_s3 + $0x4f0] sm:$0xff] }
 0x5c9   :  { %v10295_v32 = vld [vmem:[%s19819_s3 + $0x1228] sm:$0xff]  ;;  %11268 = vmatpush.msrb.mxu3 %v10619_v42  ;;  %v10064_v58 = vld [vmem:[%s19819_s3 + $0xaf0] sm:$0xff] }
 0x5ca   :  { %v10423_v26 = vld [vmem:[%s19819_s3 + $0x1628] sm:$0xff]  ;;  %11169 = vmatpush.msra.mxu1 %v10295_v32  ;;  %11310 = vmatpush.msrb.mxu2 %v9780_v7  ;;  %v9740_v32 = vld [vmem:[%s19819_s3 + $0xd0] sm:$0xff] }
 0x5cb   :  { %v10615_v54 = vld [vmem:[%s19819_s3 + $0x1c28] sm:$0xff]  ;;  %11209 = vmatpush.msrb.mxu0 %v10423_v26  ;;  %11311 = vmatmul.f32.vlgmr.msrb.gmra.mxu2 %v17222_v43  ;;  %v10732_v26 = vpop.f32.mrf.mxu1  ;;  %v9856_v7 = vld [vmem:[%s19819_s3 + $0x470] sm:$0xff] }
 0x5cc   :  { %v10291_v0 = vld [vmem:[%s19819_s3 + $0x1208] sm:$0xff]  ;;  %11269 = vmatpush.msrb.mxu3 %v10615_v54  ;;  %11375 = vmatpush.msra.mxu2 %v10096_v13  ;;  %v9868_v54 = vld [vmem:[%s19819_s3 + $0x4d0] sm:$0xff] }
 0x5cd   :  { %v10419_v61 = vld [vmem:[%s19819_s3 + $0x1608] sm:$0xff]  ;;  %11170 = vmatpush.msra.mxu1 %v10291_v0  ;;  %v10733_v0 = vadd.f32 %v10732_v26, %v10713_v3  ;;  %v10056_v13 = vld [vmem:[%s19819_s3 + $0xab0] sm:$0xff] }
 0x5ce   :  { %v10607_v62 = vld [vmem:[%s19819_s3 + $0x1be8] sm:$0xff]  ;;  %11171 = vmatmul.f32.vlgmr.msra.gmra.mxu1 %v17471_v47  ;;  %11210 = vmatpush.msrb.mxu0 %v10419_v61  ;;  %v10068_v61 = vld [vmem:[%s19819_s3 + $0xb10] sm:$0xff] }
 0x5cf   :  { %v10611_v29 = vld [vmem:[%s19819_s3 + $0x1c08] sm:$0xff]  ;;  %11235 = vmatpush.msrb.mxu1 %v10607_v62  ;;  %11211 = vmatmul.f32.vlgmr.msrb.gmra.mxu0 %v17473_v35  ;;  %v10752_v62 = vpop.f32.mrf.mxu2  ;;  %v9964_v18 = vld [vmem:[%s19819_s3 + $0x7d0] sm:$0xff] }
 0x5d0   :  { %11270 = vmatpush.msrb.mxu3 %v10611_v29  ;;  %v10603_v8 = vld [vmem:[%s19819_s3 + $0x1bc8] sm:$0xff]  ;;  %11275 = vmatpush.msra.mxu0 %v9776_v34  ;;  %v9864_v29 = vld [vmem:[%s19819_s3 + $0x4b0] sm:$0xff] }
 0x5d1   :  { %12285 = vmatmul.msk.f32.vlgmr.msrb.gmra.mxu3 %vm10658_vm2, %v17921_v15  ;;  %v10599_v46 = vld [vmem:[%s19819_s3 + $0x1ba8] sm:$0xff]  ;;  %11236 = vmatpush.msrb.mxu1 %v10603_v8  ;;  %v10772_v8 = vpop.f32.mrf.mxu3  ;;  %v10156_v3 = vld [vmem:[%s19819_s3 + $0xdd0] sm:$0xff] }
 0x5d2   :  { %11315 = vmatpush.msra.mxu3 %v9904_v33  ;;  %11276 = vmatpush.msra.mxu0 %v9772_v2  ;;  %v10595_v38 = vld [vmem:[%s19819_s3 + $0x1b88] sm:$0xff]  ;;  %v9732_v33 = vld [vmem:[%s19819_s3 + $0x90] sm:$0xff] }
 0x5d3   :  { %11237 = vmatpush.msrb.mxu1 %v10599_v46  ;;  %v10591_v10 = vld [vmem:[%s19819_s3 + $0x1b68] sm:$0xff]  ;;  %11376 = vmatpush.msra.mxu2 %v10092_v57  ;;  %v9860_v2 = vld [vmem:[%s19819_s3 + $0x490] sm:$0xff]  ;;  %v10812_v37 = vpop.f32.mrf.mxu1 }
 0x5d4   :  { %11316 = vmatpush.msra.mxu3 %v9900_v25  ;;  %11277 = vmatpush.msra.mxu0 %v9768_v5  ;;  %v10587_v49 = vld [vmem:[%s19819_s3 + $0x1b48] sm:$0xff]  ;;  %v10753_v25 = vadd.f32 %v10752_v62, %v10733_v0  ;;  %v10060_v46 = vld [vmem:[%s19819_s3 + $0xad0] sm:$0xff] }
 0x5d5   :  { %11238 = vmatpush.msrb.mxu1 %v10595_v38  ;;  %v10583_v28 = vld [vmem:[%s19819_s3 + $0x1b28] sm:$0xff]  ;;  %11377 = vmatpush.msra.mxu2 %v10088_v52  ;;  %v9728_v5 = vld [vmem:[%s19819_s3 + $0x70] sm:$0xff] }
 0x5d6   :  { %11317 = vmatpush.msra.mxu3 %v9896_v19  ;;  %11278 = vmatpush.msra.mxu0 %v9764_v50  ;;  %v10579_v12 = vld [vmem:[%s19819_s3 + $0x1b08] sm:$0xff]  ;;  %v10773_v38 = vadd.f32 %v10772_v8, %v10753_v25  ;;  %v9724_v50 = vld [vmem:[%s19819_s3 + $0x50] sm:$0xff] }
 0x5d7   :  { %11239 = vmatpush.msrb.mxu1 %v10591_v10  ;;  %11378 = vmatpush.msra.mxu2 %v10084_v23  ;;  %v10575_v44 = vld [vmem:[%s19819_s3 + $0x1ae8] sm:$0xff]  ;;  %v10052_v57 = vld [vmem:[%s19819_s3 + $0xa90] sm:$0xff] }
 0x5d8   :  { %11318 = vmatpush.msra.mxu3 %v9892_v56  ;;  %11279 = vmatpush.msra.mxu0 %v9760_v11  ;;  %v10571_v42 = vld [vmem:[%s19819_s3 + $0x1ac8] sm:$0xff]  ;;  %v9852_v56 = vld [vmem:[%s19819_s3 + $0x450] sm:$0xff] }
 0x5d9   :  { %11240 = vmatpush.msrb.mxu1 %v10587_v49  ;;  %11379 = vmatpush.msra.mxu2 %v10080_v59  ;;  %v10567_v63 = vld [vmem:[%s19819_s3 + $0x1aa8] sm:$0xff]  ;;  %v9720_v11 = vld [vmem:[%s19819_s3 + $0x30] sm:$0xff] }
 0x5da   :  { %11319 = vmatpush.msra.mxu3 %v9888_v1  ;;  %11280 = vmatpush.msra.mxu0 %v9756_v40  ;;  %v10563_v34 = vld [vmem:[%s19819_s3 + $0x1a88] sm:$0xff]  ;;  %v10792_v1 = vpop.f32.mrf.mxu0  ;;  %v9848_v49 = vld [vmem:[%s19819_s3 + $0x430] sm:$0xff] }
 0x5db   :  { %11241 = vmatpush.msrb.mxu1 %v10583_v28  ;;  %11380 = vmatpush.msra.mxu2 %v10076_v22  ;;  %v10559_v30 = vld [vmem:[%s19819_s3 + $0x1a68] sm:$0xff]  ;;  %v10793_v40 = vadd.f32 %v10792_v1, %v10773_v38  ;;  %v9716_v28 = vld [vmem:[%s19819_s3 + $0x10] sm:$0xff]  ;;  %v10832_v22 = vpop.f32.mrf.mxu2  ;;  %v10892_v38 = vpop.f32.mrf.mxu1 }
 0x5dc   :  { %11320 = vmatpush.msra.mxu3 %v9884_v6  ;;  %11281 = vmatpush.msra.mxu0 %v9752_v41  ;;  %v10555_v19 = vld [vmem:[%s19819_s3 + $0x1a48] sm:$0xff]  ;;  %v10048_v6 = vld [vmem:[%s19819_s3 + $0xa70] sm:$0xff] }
 0x5dd   :  { %11242 = vmatpush.msrb.mxu1 %v10579_v12  ;;  %11381 = vmatpush.msra.mxu2 %v10072_v39  ;;  %v10551_v10 = vld [vmem:[%s19819_s3 + $0x1a28] sm:$0xff]  ;;  %v9844_v23 = vld [vmem:[%s19819_s3 + $0x410] sm:$0xff]  ;;  %v10813_v12 = vadd.f32 %v10812_v37, %v10793_v40 }
 0x5de   :  { %11321 = vmatpush.msra.mxu3 %v9880_v4  ;;  %11282 = vmatpush.msra.mxu0 %v9748_v27  ;;  %v10547_v52 = vld [vmem:[%s19819_s3 + $0x1a08] sm:$0xff]  ;;  %v9968_v41 = vld [vmem:[%s19819_s3 + $0x7f0] sm:$0xff] }
 0x5df   :  { %11243 = vmatpush.msrb.mxu1 %v10575_v44  ;;  %11382 = vmatpush.msra.mxu2 %v10068_v61  ;;  %v10032_v4 = vld [vmem:[%s19819_s3 + $0x9f0] sm:$0xff]  ;;  %v10833_v39 = vadd.f32 %v10832_v22, %v10813_v12 }
 0x5e0   :  { %11322 = vmatpush.msra.mxu3 %v9876_v16  ;;  %11283 = vmatpush.msra.mxu0 %v9744_v9  ;;  %v10044_v59 = vld [vmem:[%s19819_s3 + $0xa50] sm:$0xff]  ;;  %v10852_v9 = vpop.f32.mrf.mxu3 }
 0x5e1   :  { %11244 = vmatpush.msrb.mxu1 %v10571_v42  ;;  %11383 = vmatpush.msra.mxu2 %v10064_v58  ;;  %v10160_v27 = vld [vmem:[%s19819_s3 + $0xdf0] sm:$0xff] }
 0x5e2   :  { %11323 = vmatpush.msra.mxu3 %v9872_v60  ;;  %11284 = vmatpush.msra.mxu0 %v9740_v32  ;;  %v10028_v16 = vld [vmem:[%s19819_s3 + $0x9d0] sm:$0xff]  ;;  %v10872_v58 = vpop.f32.mrf.mxu0 }
 0x5e3   :  { %11245 = vmatpush.msrb.mxu1 %v10567_v63  ;;  %11384 = vmatpush.msra.mxu2 %v10060_v46  ;;  %v10040_v44 = vld [vmem:[%s19819_s3 + $0xa30] sm:$0xff]  ;;  %v10853_v63 = vadd.f32 %v10852_v9, %v10833_v39  ;;  %v10912_v40 = vpop.f32.mrf.mxu2 }
 0x5e4   :  { %11324 = vmatpush.msra.mxu3 %v9868_v54  ;;  %11285 = vmatpush.msra.mxu0 %v9736_v20  ;;  %v9960_v60 = vld [vmem:[%s19819_s3 + $0x7b0] sm:$0xff] }
 0x5e5   :  { %11246 = vmatpush.msrb.mxu1 %v10563_v34  ;;  %11385 = vmatpush.msra.mxu2 %v10056_v13  ;;  %v10024_v42 = vld [vmem:[%s19819_s3 + $0x9b0] sm:$0xff] }
 0x5e6   :  { %11325 = vmatpush.msra.mxu3 %v9864_v29  ;;  %11286 = vmatpush.msra.mxu0 %v9732_v33  ;;  %v10036_v32 = vld [vmem:[%s19819_s3 + $0xa10] sm:$0xff] }
 0x5e7   :  { %11247 = vmatpush.msrb.mxu1 %v10559_v30  ;;  %11386 = vmatpush.msra.mxu2 %v10052_v57  ;;  %v10152_v26 = vld [vmem:[%s19819_s3 + $0xdb0] sm:$0xff] }
 0x5e8   :  { %11326 = vmatpush.msra.mxu3 %v9860_v2  ;;  %11287 = vmatpush.msra.mxu0 %v9728_v5  ;;  %v9956_v54 = vld [vmem:[%s19819_s3 + $0x790] sm:$0xff]  ;;  %v10873_v2 = vadd.f32 %v10872_v58, %v10853_v63 }
 0x5e9   :  { %11248 = vmatpush.msrb.mxu1 %v10555_v19  ;;  %11387 = vmatpush.msra.mxu2 %v10048_v6  ;;  %v10352_v0 = vld [vmem:[%s19819_s3 + $0x13f0] sm:$0xff]  ;;  %v10932_v6 = vpop.f32.mrf.mxu3 }
 0x5ea   :  { %11327 = vmatpush.msra.mxu3 %v9856_v7  ;;  %11288 = vmatpush.msra.mxu0 %v9724_v50  ;;  %v10020_v61 = vld [vmem:[%s19819_s3 + $0x990] sm:$0xff]  ;;  %v10952_v22 = vpop.f32.mrf.mxu0 }
 0x5eb   :  { %11249 = vmatpush.msrb.mxu1 %v10551_v10  ;;  %11388 = vmatpush.msra.mxu2 %v10044_v59  ;;  %v10148_v20 = vld [vmem:[%s19819_s3 + $0xd90] sm:$0xff] }
 0x5ec   :  { %11328 = vmatpush.msra.mxu3 %v9852_v56  ;;  %11289 = vmatpush.msra.mxu0 %v9720_v11  ;;  %v9952_v62 = vld [vmem:[%s19819_s3 + $0x770] sm:$0xff]  ;;  %v10893_v56 = vadd.f32 %v10892_v38, %v10873_v2 }
 0x5ed   :  { %11250 = vmatpush.msrb.mxu1 %v10547_v52  ;;  %11389 = vmatpush.msra.mxu2 %v10040_v44  ;;  %v10348_v29 = vld [vmem:[%s19819_s3 + $0x13d0] sm:$0xff] }
 0x5ee   :  { %11329 = vmatpush.msra.mxu3 %v9848_v49  ;;  %11251 = vmatmul.f32.vlgmr.msrb.gmra.mxu1 %v17932_v45  ;;  %v10016_v34 = vld [vmem:[%s19819_s3 + $0x970] sm:$0xff] }
 0x5ef   :  { %11290 = vmatpush.msra.mxu0 %v9716_v28  ;;  %11335 = vmatpush.msra.mxu1 %v9968_v41  ;;  %v10144_v33 = vld [vmem:[%s19819_s3 + $0xd70] sm:$0xff]  ;;  %v10913_v41 = vadd.f32 %v10912_v40, %v10893_v56 }
 0x5f0   :  { %11330 = vmatpush.msra.mxu3 %v9844_v23  ;;  %11291 = vmatmul.f32.vlgmr.msra.gmra.mxu0 %v17202_v21  ;;  %v9948_v8 = vld [vmem:[%s19819_s3 + $0x750] sm:$0xff] }
 0x5f1   :  { %11331 = vmatmul.f32.vlgmr.msra.gmra.mxu3 %v17224_v14  ;;  %11355 = vmatpush.msrb.mxu0 %v10032_v4  ;;  %v10344_v30 = vld [vmem:[%s19819_s3 + $0x13b0] sm:$0xff] }
 0x5f2   :  { %11395 = vmatpush.msrb.mxu3 %v10160_v27  ;;  %11336 = vmatpush.msra.mxu1 %v9964_v18  ;;  %v10012_v25 = vld [vmem:[%s19819_s3 + $0x950] sm:$0xff]  ;;  %v10933_v27 = vadd.f32 %v10932_v6, %v10913_v41 }
 0x5f3   :  { %11356 = vmatpush.msrb.mxu0 %v10028_v16  ;;  %11390 = vmatpush.msra.mxu2 %v10036_v32  ;;  %v10140_v46 = vld [vmem:[%s19819_s3 + $0xd50] sm:$0xff] }
 0x5f4   :  { %11396 = vmatpush.msrb.mxu3 %v10156_v3  ;;  %11337 = vmatpush.msra.mxu1 %v9960_v60  ;;  %v9944_v5 = vld [vmem:[%s19819_s3 + $0x730] sm:$0xff] }
 0x5f5   :  { %11357 = vmatpush.msrb.mxu0 %v10024_v42  ;;  %11391 = vmatmul.f32.vlgmr.msra.gmra.mxu2 %v17320_v31  ;;  %v10340_v7 = vld [vmem:[%s19819_s3 + $0x1390] sm:$0xff]  ;;  %v10953_v42 = vadd.f32 %v10952_v22, %v10933_v27 }
 0x5f6   :  { %11397 = vmatpush.msrb.mxu3 %v10152_v26  ;;  %11338 = vmatpush.msra.mxu1 %v9956_v54  ;;  %v10008_v19 = vld [vmem:[%s19819_s3 + $0x930] sm:$0xff]  ;;  %v10972_v26 = vpop.f32.mrf.mxu1 }
 0x5f7   :  { %11455 = vmatpush.msrb.mxu2 %v10352_v0  ;;  %11358 = vmatpush.msrb.mxu0 %v10020_v61  ;;  %v10136_v13 = vld [vmem:[%s19819_s3 + $0xd30] sm:$0xff]  ;;  %v10973_v0 = vadd.f32 %v10972_v26, %v10953_v42 }
 0x5f8   :  { %11398 = vmatpush.msrb.mxu3 %v10148_v20  ;;  %11339 = vmatpush.msra.mxu1 %v9952_v62  ;;  %v9940_v50 = vld [vmem:[%s19819_s3 + $0x710] sm:$0xff] }
 0x5f9   :  { %11456 = vmatpush.msrb.mxu2 %v10348_v29  ;;  %11359 = vmatpush.msrb.mxu0 %v10016_v34  ;;  %v10336_v10 = vld [vmem:[%s19819_s3 + $0x1370] sm:$0xff]  ;;  %11875 = vst [vmem:[%s19820_s4] sm:$0xff] %v10973_v0 }
 0x5fa   :  { %11399 = vmatpush.msrb.mxu3 %v10144_v33  ;;  %11340 = vmatpush.msra.mxu1 %v9948_v8  ;;  %v10004_v57 = vld [vmem:[%s19819_s3 + $0x910] sm:$0xff] }
 0x5fb   :  { %11457 = vmatpush.msrb.mxu2 %v10344_v30  ;;  %11360 = vmatpush.msrb.mxu0 %v10012_v25  ;;  %v10132_v11 = vld [vmem:[%s19819_s3 + $0xd10] sm:$0xff] }
 0x5fc   :  { %11400 = vmatpush.msrb.mxu3 %v10140_v46  ;;  %11341 = vmatpush.msra.mxu1 %v9944_v5  ;;  %v9936_v1 = vld [vmem:[%s19819_s3 + $0x6f0] sm:$0xff] }
 0x5fd   :  { %11458 = vmatpush.msrb.mxu2 %v10340_v7  ;;  %11361 = vmatpush.msrb.mxu0 %v10008_v19  ;;  %v10332_v49 = vld [vmem:[%s19819_s3 + $0x1350] sm:$0xff] }
 0x5fe   :  { %11401 = vmatpush.msrb.mxu3 %v10136_v13  ;;  %11342 = vmatpush.msra.mxu1 %v9940_v50  ;;  %v10000_v52 = vld [vmem:[%s19819_s3 + $0x8f0] sm:$0xff] }
 0x5ff   :  { %11459 = vmatpush.msrb.mxu2 %v10336_v10  ;;  %11362 = vmatpush.msrb.mxu0 %v10004_v57  ;;  %v10128_v28 = vld [vmem:[%s19819_s3 + $0xcf0] sm:$0xff] }
 0x600   :  { %v9932_v23 = vld [vmem:[%s19819_s3 + $0x6d0] sm:$0xff]  ;;  %11402 = vmatpush.msrb.mxu3 %v10132_v11  ;;  %11343 = vmatpush.msra.mxu1 %v9936_v1 }
 0x601   :  { %v10328_v37 = vld [vmem:[%s19819_s3 + $0x1330] sm:$0xff]  ;;  %11460 = vmatpush.msrb.mxu2 %v10332_v49  ;;  %11363 = vmatpush.msrb.mxu0 %v10000_v52 }
 0x602   :  { %v9996_v4 = vld [vmem:[%s19819_s3 + $0x8d0] sm:$0xff]  ;;  %11403 = vmatpush.msrb.mxu3 %v10128_v28  ;;  %11344 = vmatpush.msra.mxu1 %v9932_v23 }
 0x603   :  { %v10124_v12 = vld [vmem:[%s19819_s3 + $0xcd0] sm:$0xff]  ;;  %11461 = vmatpush.msrb.mxu2 %v10328_v37  ;;  %11364 = vmatpush.msrb.mxu0 %v9996_v4 }
 0x604   :  { %v9928_v59 = vld [vmem:[%s19819_s3 + $0x6b0] sm:$0xff]  ;;  %11404 = vmatpush.msrb.mxu3 %v10124_v12 }
 0x605   :  { %v10324_v18 = vld [vmem:[%s19819_s3 + $0x1310] sm:$0xff]  ;;  %11345 = vmatpush.msra.mxu1 %v9928_v59 }
 0x606   :  { %v9992_v16 = vld [vmem:[%s19819_s3 + $0x8b0] sm:$0xff]  ;;  %11462 = vmatpush.msrb.mxu2 %v10324_v18 }
 0x607   :  { %v10120_v44 = vld [vmem:[%s19819_s3 + $0xcb0] sm:$0xff]  ;;  %11365 = vmatpush.msrb.mxu0 %v9992_v16 }
 0x608   :  { %v9924_v3 = vld [vmem:[%s19819_s3 + $0x690] sm:$0xff]  ;;  %11405 = vmatpush.msrb.mxu3 %v10120_v44 }
 0x609   :  { %v10320_v9 = vld [vmem:[%s19819_s3 + $0x12f0] sm:$0xff]  ;;  %11346 = vmatpush.msra.mxu1 %v9924_v3 }
 0x60a   :  { %v9988_v60 = vld [vmem:[%s19819_s3 + $0x890] sm:$0xff]  ;;  %11463 = vmatpush.msrb.mxu2 %v10320_v9 }
 0x60b   :  { %v10116_v39 = vld [vmem:[%s19819_s3 + $0xc90] sm:$0xff]  ;;  %11366 = vmatpush.msrb.mxu0 %v9988_v60 }
 0x60c   :  { %v9920_v32 = vld [vmem:[%s19819_s3 + $0x670] sm:$0xff]  ;;  %11406 = vmatpush.msrb.mxu3 %v10116_v39 }
 0x60d   :  { %v10316_v54 = vld [vmem:[%s19819_s3 + $0x12d0] sm:$0xff]  ;;  %11347 = vmatpush.msra.mxu1 %v9920_v32 }
 0x60e   :  { %v9984_v63 = vld [vmem:[%s19819_s3 + $0x870] sm:$0xff]  ;;  %11464 = vmatpush.msrb.mxu2 %v10316_v54 }
 0x60f   :  { %v10112_v61 = vld [vmem:[%s19819_s3 + $0xc70] sm:$0xff]  ;;  %11367 = vmatpush.msrb.mxu0 %v9984_v63 }
 0x610   :  { %v9916_v20 = vld [vmem:[%s19819_s3 + $0x650] sm:$0xff]  ;;  %11407 = vmatpush.msrb.mxu3 %v10112_v61 }
 0x611   :  { %v10312_v62 = vld [vmem:[%s19819_s3 + $0x12b0] sm:$0xff]  ;;  %11348 = vmatpush.msra.mxu1 %v9916_v20 }
 0x612   :  { %v9980_v29 = vld [vmem:[%s19819_s3 + $0x850] sm:$0xff]  ;;  %11465 = vmatpush.msrb.mxu2 %v10312_v62 }
 0x613   :  { %v10108_v34 = vld [vmem:[%s19819_s3 + $0xc50] sm:$0xff]  ;;  %11368 = vmatpush.msrb.mxu0 %v9980_v29 }
 0x614   :  { %v9912_v58 = vld [vmem:[%s19819_s3 + $0x630] sm:$0xff]  ;;  %11408 = vmatpush.msrb.mxu3 %v10108_v34 }
 0x615   :  { %v10308_v33 = vld [vmem:[%s19819_s3 + $0x1290] sm:$0xff]  ;;  %11349 = vmatpush.msra.mxu1 %v9912_v58 }
 0x616   :  { %v9976_v8 = vld [vmem:[%s19819_s3 + $0x830] sm:$0xff]  ;;  %11466 = vmatpush.msrb.mxu2 %v10308_v33 }
 0x617   :  { %v10104_v2 = vld [vmem:[%s19819_s3 + $0xc30] sm:$0xff]  ;;  %11369 = vmatpush.msrb.mxu0 %v9976_v8 }
 0x618   :  { %v9908_v30 = vld [vmem:[%s19819_s3 + $0x610] sm:$0xff]  ;;  %11409 = vmatpush.msrb.mxu3 %v10104_v2 }
 0x619   :  { %v10304_v25 = vld [vmem:[%s19819_s3 + $0x1270] sm:$0xff]  ;;  %11350 = vmatpush.msra.mxu1 %v9908_v30 }
 0x61a   :  { %v9972_v46 = vld [vmem:[%s19819_s3 + $0x810] sm:$0xff]  ;;  %11467 = vmatpush.msrb.mxu2 %v10304_v25  ;;  %11351 = vmatmul.f32.vlgmr.msra.gmra.mxu1 %v17226_v55 }
 0x61b   :  { %v10100_v5 = vld [vmem:[%s19819_s3 + $0xc10] sm:$0xff]  ;;  %11370 = vmatpush.msrb.mxu0 %v9972_v46 }
 0x61c   :  { %v10224_v7 = vld [vmem:[%s19819_s3 + $0xff0] sm:$0xff]  ;;  %11410 = vmatpush.msrb.mxu3 %v10100_v5  ;;  %11371 = vmatmul.f32.vlgmr.msrb.gmra.mxu0 %v17308_v36 }
 0x61d   :  { %v10288_v19 = vld [vmem:[%s19819_s3 + $0x11f0] sm:$0xff]  ;;  %11415 = vmatpush.msrb.mxu1 %v10224_v7  ;;  %11411 = vmatmul.f32.vlgmr.msrb.gmra.mxu3 %v17328_v48 }
 0x61e   :  { %v10300_v38 = vld [vmem:[%s19819_s3 + $0x1250] sm:$0xff]  ;;  %11435 = vmatpush.msra.mxu0 %v10288_v19 }
 0x61f   :  { %v10416_v13 = vld [vmem:[%s19819_s3 + $0x15f0] sm:$0xff]  ;;  %11468 = vmatpush.msrb.mxu2 %v10300_v38 }
 0x620   :  { %v10220_v50 = vld [vmem:[%s19819_s3 + $0xfd0] sm:$0xff]  ;;  %11475 = vmatpush.msra.mxu3 %v10416_v13 }
 0x621   :  { %v10284_v56 = vld [vmem:[%s19819_s3 + $0x11d0] sm:$0xff]  ;;  %11416 = vmatpush.msrb.mxu1 %v10220_v50 }
 0x622   :  { %v10296_v10 = vld [vmem:[%s19819_s3 + $0x1230] sm:$0xff]  ;;  %11436 = vmatpush.msra.mxu0 %v10284_v56 }
 0x623   :  { %v10412_v57 = vld [vmem:[%s19819_s3 + $0x15d0] sm:$0xff]  ;;  %11469 = vmatpush.msrb.mxu2 %v10296_v10 }
 0x624   :  { %v10216_v11 = vld [vmem:[%s19819_s3 + $0xfb0] sm:$0xff]  ;;  %11476 = vmatpush.msra.mxu3 %v10412_v57 }
 0x625   :  { %v10280_v1 = vld [vmem:[%s19819_s3 + $0x11b0] sm:$0xff]  ;;  %11417 = vmatpush.msrb.mxu1 %v10216_v11 }
 0x626   :  { %v10292_v49 = vld [vmem:[%s19819_s3 + $0x1210] sm:$0xff]  ;;  %11437 = vmatpush.msra.mxu0 %v10280_v1 }
 0x627   :  { %v10408_v52 = vld [vmem:[%s19819_s3 + $0x15b0] sm:$0xff]  ;;  %11470 = vmatpush.msrb.mxu2 %v10292_v49 }
 0x628   :  { %v10212_v40 = vld [vmem:[%s19819_s3 + $0xf90] sm:$0xff]  ;;  %11477 = vmatpush.msra.mxu3 %v10408_v52  ;;  %11471 = vmatmul.f32.vlgmr.msrb.gmra.mxu2 %v17471_v47 }
 0x629   :  { %v10608_v6 = vld [vmem:[%s19819_s3 + $0x1bf0] sm:$0xff]  ;;  %11418 = vmatpush.msrb.mxu1 %v10212_v40 }
 0x62a   :  { %v10276_v28 = vld [vmem:[%s19819_s3 + $0x1190] sm:$0xff]  ;;  %11535 = vmatpush.msra.mxu2 %v10608_v6 }
 0x62b   :  { %v10404_v23 = vld [vmem:[%s19819_s3 + $0x1590] sm:$0xff]  ;;  %11438 = vmatpush.msra.mxu0 %v10276_v28 }
 0x62c   :  { %v10208_v41 = vld [vmem:[%s19819_s3 + $0xf70] sm:$0xff]  ;;  %11478 = vmatpush.msra.mxu3 %v10404_v23 }
 0x62d   :  { %v10604_v37 = vld [vmem:[%s19819_s3 + $0x1bd0] sm:$0xff]  ;;  %11419 = vmatpush.msrb.mxu1 %v10208_v41 }
 0x62e   :  { %v10272_v4 = vld [vmem:[%s19819_s3 + $0x1170] sm:$0xff]  ;;  %11536 = vmatpush.msra.mxu2 %v10604_v37 }
 0x62f   :  { %v10400_v12 = vld [vmem:[%s19819_s3 + $0x1570] sm:$0xff]  ;;  %11439 = vmatpush.msra.mxu0 %v10272_v4 }
 0x630   :  { %v10204_v59 = vld [vmem:[%s19819_s3 + $0xf50] sm:$0xff]  ;;  %11479 = vmatpush.msra.mxu3 %v10400_v12 }
 0x631   :  { %v10600_v27 = vld [vmem:[%s19819_s3 + $0x1bb0] sm:$0xff]  ;;  %11420 = vmatpush.msrb.mxu1 %v10204_v59 }
 0x632   :  { %v10268_v18 = vld [vmem:[%s19819_s3 + $0x1150] sm:$0xff]  ;;  %11537 = vmatpush.msra.mxu2 %v10600_v27 }
 0x633   :  { %v10396_v16 = vld [vmem:[%s19819_s3 + $0x1550] sm:$0xff]  ;;  %11440 = vmatpush.msra.mxu0 %v10268_v18 }
 0x634   :  { %v10200_v44 = vld [vmem:[%s19819_s3 + $0xf30] sm:$0xff]  ;;  %11480 = vmatpush.msra.mxu3 %v10396_v16 }
 0x635   :  { %v10596_v3 = vld [vmem:[%s19819_s3 + $0x1b90] sm:$0xff]  ;;  %11421 = vmatpush.msrb.mxu1 %v10200_v44 }
 0x636   :  { %v10264_v22 = vld [vmem:[%s19819_s3 + $0x1130] sm:$0xff]  ;;  %11538 = vmatpush.msra.mxu2 %v10596_v3 }
 0x637   :  { %v10392_v9 = vld [vmem:[%s19819_s3 + $0x1530] sm:$0xff]  ;;  %11441 = vmatpush.msra.mxu0 %v10264_v22 }
 0x638   :  { %v10196_v60 = vld [vmem:[%s19819_s3 + $0xf10] sm:$0xff]  ;;  %11481 = vmatpush.msra.mxu3 %v10392_v9 }
 0x639   :  { %v10592_v42 = vld [vmem:[%s19819_s3 + $0x1b70] sm:$0xff]  ;;  %11422 = vmatpush.msrb.mxu1 %v10196_v60  ;;  %v9905_v60 = vld [vmem:[%s19819_s3 + $0x5f8] sm:$0xff] }
 0x63a   :  { %v10260_v39 = vld [vmem:[%s19819_s3 + $0x1110] sm:$0xff]  ;;  %11539 = vmatpush.msra.mxu2 %v10592_v42 }
 0x63b   :  { %v10388_v32 = vld [vmem:[%s19819_s3 + $0x1510] sm:$0xff]  ;;  %11442 = vmatpush.msra.mxu0 %v10260_v39 }
 0x63c   :  { %v10192_v26 = vld [vmem:[%s19819_s3 + $0xef0] sm:$0xff]  ;;  %11482 = vmatpush.msra.mxu3 %v10388_v32 }
 0x63d   :  { %v10588_v54 = vld [vmem:[%s19819_s3 + $0x1b50] sm:$0xff]  ;;  %11423 = vmatpush.msrb.mxu1 %v10192_v26  ;;  %v9901_v26 = vld [vmem:[%s19819_s3 + $0x5d8] sm:$0xff] }
 0x63e   :  { %v10256_v63 = vld [vmem:[%s19819_s3 + $0x10f0] sm:$0xff]  ;;  %11540 = vmatpush.msra.mxu2 %v10588_v54 }
 0x63f   :  { %v10384_v0 = vld [vmem:[%s19819_s3 + $0x14f0] sm:$0xff]  ;;  %11443 = vmatpush.msra.mxu0 %v10256_v63 }
 0x640   :  { %v10188_v61 = vld [vmem:[%s19819_s3 + $0xed0] sm:$0xff]  ;;  %11483 = vmatpush.msra.mxu3 %v10384_v0 }
 0x641   :  { %v10584_v20 = vld [vmem:[%s19819_s3 + $0x1b30] sm:$0xff]  ;;  %11424 = vmatpush.msrb.mxu1 %v10188_v61  ;;  %v9897_v61 = vld [vmem:[%s19819_s3 + $0x5b8] sm:$0xff] }
 0x642   :  { %v10252_v62 = vld [vmem:[%s19819_s3 + $0x10d0] sm:$0xff]  ;;  %11541 = vmatpush.msra.mxu2 %v10584_v20 }
 0x643   :  { %v10380_v29 = vld [vmem:[%s19819_s3 + $0x14d0] sm:$0xff]  ;;  %11444 = vmatpush.msra.mxu0 %v10252_v62 }
 0x644   :  { %v10184_v34 = vld [vmem:[%s19819_s3 + $0xeb0] sm:$0xff]  ;;  %11484 = vmatpush.msra.mxu3 %v10380_v29 }
 0x645   :  { %v10580_v58 = vld [vmem:[%s19819_s3 + $0x1b10] sm:$0xff]  ;;  %11425 = vmatpush.msrb.mxu1 %v10184_v34  ;;  %v11012_v34 = vpop.f32.mrf.mxu1 }
 0x646   :  { %v10248_v33 = vld [vmem:[%s19819_s3 + $0x10b0] sm:$0xff]  ;;  %11542 = vmatpush.msra.mxu2 %v10580_v58  ;;  %v9893_v58 = vld [vmem:[%s19819_s3 + $0x598] sm:$0xff] }
 0x647   :  { %v10376_v8 = vld [vmem:[%s19819_s3 + $0x14b0] sm:$0xff]  ;;  %11445 = vmatpush.msra.mxu0 %v10248_v33 }
 0x648   :  { %v10180_v2 = vld [vmem:[%s19819_s3 + $0xe90] sm:$0xff]  ;;  %11485 = vmatpush.msra.mxu3 %v10376_v8 }
 0x649   :  { %v10576_v30 = vld [vmem:[%s19819_s3 + $0x1af0] sm:$0xff]  ;;  %11426 = vmatpush.msrb.mxu1 %v10180_v2 }
 0x64a   :  { %v10244_v25 = vld [vmem:[%s19819_s3 + $0x1090] sm:$0xff]  ;;  %11543 = vmatpush.msra.mxu2 %v10576_v30  ;;  %v10992_v30 = vpop.f32.mrf.mxu2 }
 0x64b   :  { %v10372_v46 = vld [vmem:[%s19819_s3 + $0x1490] sm:$0xff]  ;;  %11446 = vmatpush.msra.mxu0 %v10244_v25  ;;  %v9889_v25 = vld [vmem:[%s19819_s3 + $0x578] sm:$0xff] }
 0x64c   :  { %v10176_v5 = vld [vmem:[%s19819_s3 + $0xe70] sm:$0xff]  ;;  %11486 = vmatpush.msra.mxu3 %v10372_v46 }
 0x64d   :  { %v10572_v7 = vld [vmem:[%s19819_s3 + $0x1ad0] sm:$0xff]  ;;  %11427 = vmatpush.msrb.mxu1 %v10176_v5  ;;  %v11013_v5 = vadd.f32 %v11012_v34, %v10992_v30  ;;  %v9841_v30 = vld [vmem:[%s19819_s3 + $0x3f8] sm:$0xff] }
 0x64e   :  { %v10240_v19 = vld [vmem:[%s19819_s3 + $0x1070] sm:$0xff]  ;;  %11544 = vmatpush.msra.mxu2 %v10572_v7 }
 0x64f   :  { %v10368_v38 = vld [vmem:[%s19819_s3 + $0x1470] sm:$0xff]  ;;  %11447 = vmatpush.msra.mxu0 %v10240_v19 }
 0x650   :  { %v10172_v13 = vld [vmem:[%s19819_s3 + $0xe50] sm:$0xff]  ;;  %11487 = vmatpush.msra.mxu3 %v10368_v38  ;;  %v9885_v38 = vld [vmem:[%s19819_s3 + $0x558] sm:$0xff] }
 0x651   :  { %v10568_v50 = vld [vmem:[%s19819_s3 + $0x1ab0] sm:$0xff]  ;;  %11428 = vmatpush.msrb.mxu1 %v10172_v13 }
 0x652   :  { %v10236_v56 = vld [vmem:[%s19819_s3 + $0x1050] sm:$0xff]  ;;  %11545 = vmatpush.msra.mxu2 %v10568_v50 }
 0x653   :  { %v10364_v10 = vld [vmem:[%s19819_s3 + $0x1450] sm:$0xff]  ;;  %11448 = vmatpush.msra.mxu0 %v10236_v56 }
 0x654   :  { %v10168_v57 = vld [vmem:[%s19819_s3 + $0xe30] sm:$0xff]  ;;  %11488 = vmatpush.msra.mxu3 %v10364_v10  ;;  %v11032_v10 = vpop.f32.mrf.mxu3 }
 0x655   :  { %v10564_v11 = vld [vmem:[%s19819_s3 + $0x1a90] sm:$0xff]  ;;  %11429 = vmatpush.msrb.mxu1 %v10168_v57  ;;  %v9881_v57 = vld [vmem:[%s19819_s3 + $0x538] sm:$0xff] }
 0x656   :  { %v10232_v1 = vld [vmem:[%s19819_s3 + $0x1030] sm:$0xff]  ;;  %11546 = vmatpush.msra.mxu2 %v10564_v11 }
 0x657   :  { %v10360_v49 = vld [vmem:[%s19819_s3 + $0x1430] sm:$0xff]  ;;  %11449 = vmatpush.msra.mxu0 %v10232_v1  ;;  %v11033_v1 = vadd.f32 %v11032_v10, %v11013_v5  ;;  %v9849_v5 = vld [vmem:[%s19819_s3 + $0x438] sm:$0xff] }
 0x658   :  { %v10164_v52 = vld [vmem:[%s19819_s3 + $0xe10] sm:$0xff]  ;;  %11489 = vmatpush.msra.mxu3 %v10360_v49  ;;  %v9833_v10 = vld [vmem:[%s19819_s3 + $0x3b8] sm:$0xff] }
 0x659   :  { %v10560_v40 = vld [vmem:[%s19819_s3 + $0x1a70] sm:$0xff]  ;;  %11430 = vmatpush.msrb.mxu1 %v10164_v52 }
 0x65a   :  { %v10228_v6 = vld [vmem:[%s19819_s3 + $0x1010] sm:$0xff]  ;;  %11547 = vmatpush.msra.mxu2 %v10560_v40  ;;  %11431 = vmatmul.f32.vlgmr.msrb.gmra.mxu1 %v17333_v24  ;;  %v9877_v40 = vld [vmem:[%s19819_s3 + $0x518] sm:$0xff] }
 0x65b   :  { %v10356_v28 = vld [vmem:[%s19819_s3 + $0x1410] sm:$0xff]  ;;  %11450 = vmatpush.msra.mxu0 %v10228_v6 }
 0x65c   :  { %v10480_v23 = vld [vmem:[%s19819_s3 + $0x17f0] sm:$0xff]  ;;  %11490 = vmatpush.msra.mxu3 %v10356_v28  ;;  %11451 = vmatmul.f32.vlgmr.msra.gmra.mxu0 %v17442_v17  ;;  %v11112_v34 = vpop.f32.mrf.mxu3 }
 0x65d   :  { %v10544_v41 = vld [vmem:[%s19819_s3 + $0x19f0] sm:$0xff]  ;;  %11495 = vmatpush.msra.mxu1 %v10480_v23  ;;  %11491 = vmatmul.f32.vlgmr.msra.gmra.mxu3 %v17469_v51 }
 0x65e   :  { %v10556_v37 = vld [vmem:[%s19819_s3 + $0x1a50] sm:$0xff]  ;;  %11515 = vmatpush.msrb.mxu0 %v10544_v41  ;;  %v11052_v41 = vpop.f32.mrf.mxu0 }
 0x65f   :  { %v10656_v4 = vld [vmem:[%s19819_s3 + $0x1d70] sm:$0x7]  ;;  %11548 = vmatpush.msra.mxu2 %v10556_v37  ;;  %v9873_v37 = vld [vmem:[%s19819_s3 + $0x4f8] sm:$0xff] }
 0x660   :  { %v10476_v12 = vld [vmem:[%s19819_s3 + $0x17d0] sm:$0xff]  ;;  %12286 = vmatpush.msk.msrb.mxu3 %vm10662_vm0, %v10656_v4 }
 0x661   :  { %v10540_v59 = vld [vmem:[%s19819_s3 + $0x19d0] sm:$0xff]  ;;  %11496 = vmatpush.msra.mxu1 %v10476_v12  ;;  %v11053_v12 = vadd.f32 %v11052_v41, %v11033_v1  ;;  %v10157_v41 = vld [vmem:[%s19819_s3 + $0xdd8] sm:$0xff] }
 0x662   :  { %v10552_v27 = vld [vmem:[%s19819_s3 + $0x1a30] sm:$0xff]  ;;  %11516 = vmatpush.msrb.mxu0 %v10540_v59 }
 0x663   :  { %v10652_v18 = vld [vmem:[%s19819_s3 + $0x1d50] sm:$0xff]  ;;  %11549 = vmatpush.msra.mxu2 %v10552_v27 }
 0x664   :  { %v10472_v16 = vld [vmem:[%s19819_s3 + $0x17b0] sm:$0xff]  ;;  %11560 = vmatpush.msrb.mxu3 %v10652_v18  ;;  %v9869_v18 = vld [vmem:[%s19819_s3 + $0x4d8] sm:$0xff] }
 0x665   :  { %v10536_v44 = vld [vmem:[%s19819_s3 + $0x19b0] sm:$0xff]  ;;  %11497 = vmatpush.msra.mxu1 %v10472_v16  ;;  %v9969_v16 = vld [vmem:[%s19819_s3 + $0x7f8] sm:$0xff] }
 0x666   :  { %v10548_v3 = vld [vmem:[%s19819_s3 + $0x1a10] sm:$0xff]  ;;  %11517 = vmatpush.msrb.mxu0 %v10536_v44 }
 0x667   :  { %v10648_v22 = vld [vmem:[%s19819_s3 + $0x1d30] sm:$0xff]  ;;  %11550 = vmatpush.msra.mxu2 %v10548_v3  ;;  %v11072_v3 = vpop.f32.mrf.mxu2 }
 0x668   :  { %v10468_v9 = vld [vmem:[%s19819_s3 + $0x1790] sm:$0xff]  ;;  %11561 = vmatpush.msrb.mxu3 %v10648_v22  ;;  %11551 = vmatmul.f32.vlgmr.msra.gmra.mxu2 %v17932_v45  ;;  %v11092_v22 = vpop.f32.mrf.mxu1 }
 0x669   :  { %v10532_v42 = vld [vmem:[%s19819_s3 + $0x1990] sm:$0xff]  ;;  %11498 = vmatpush.msra.mxu1 %v10468_v9  ;;  %11615 = vmatpush.msrb.mxu2 %v9905_v60  ;;  %v9865_v60 = vld [vmem:[%s19819_s3 + $0x4b8] sm:$0xff] }
 0x66a   :  { %v10644_v39 = vld [vmem:[%s19819_s3 + $0x1d10] sm:$0xff]  ;;  %11518 = vmatpush.msrb.mxu0 %v10532_v42  ;;  %v11073_v42 = vadd.f32 %v11072_v3, %v11053_v12  ;;  %v9937_v12 = vld [vmem:[%s19819_s3 + $0x6f8] sm:$0xff] }
 0x66b   :  { %v10464_v32 = vld [vmem:[%s19819_s3 + $0x1770] sm:$0xff]  ;;  %11562 = vmatpush.msrb.mxu3 %v10644_v39  ;;  %11616 = vmatpush.msrb.mxu2 %v9901_v26  ;;  %v9965_v39 = vld [vmem:[%s19819_s3 + $0x7d8] sm:$0xff] }
 0x66c   :  { %v10528_v54 = vld [vmem:[%s19819_s3 + $0x1970] sm:$0xff]  ;;  %11499 = vmatpush.msra.mxu1 %v10464_v32  ;;  %v10149_v3 = vld [vmem:[%s19819_s3 + $0xd98] sm:$0xff] }
 0x66d   :  { %v10640_v63 = vld [vmem:[%s19819_s3 + $0x1cf0] sm:$0xff]  ;;  %11519 = vmatpush.msrb.mxu0 %v10528_v54  ;;  %11617 = vmatpush.msrb.mxu2 %v9897_v61  ;;  %v9861_v54 = vld [vmem:[%s19819_s3 + $0x498] sm:$0xff] }
 0x66e   :  { %v10460_v0 = vld [vmem:[%s19819_s3 + $0x1750] sm:$0xff]  ;;  %11563 = vmatpush.msrb.mxu3 %v10640_v63  ;;  %v11093_v63 = vadd.f32 %v11092_v22, %v11073_v42  ;;  %v9817_v22 = vld [vmem:[%s19819_s3 + $0x338] sm:$0xff] }
 0x66f   :  { %v10524_v20 = vld [vmem:[%s19819_s3 + $0x1950] sm:$0xff]  ;;  %11500 = vmatpush.msra.mxu1 %v10460_v0  ;;  %11618 = vmatpush.msrb.mxu2 %v9893_v58  ;;  %v9961_v0 = vld [vmem:[%s19819_s3 + $0x7b8] sm:$0xff]  ;;  %v11152_v1 = vpop.f32.mrf.mxu2 }
 0x670   :  { %v10636_v62 = vld [vmem:[%s19819_s3 + $0x1cd0] sm:$0xff]  ;;  %11520 = vmatpush.msrb.mxu0 %v10524_v20  ;;  %v9749_v42 = vld [vmem:[%s19819_s3 + $0x118] sm:$0xff] }
 0x671   :  { %v10456_v29 = vld [vmem:[%s19819_s3 + $0x1730] sm:$0xff]  ;;  %11564 = vmatpush.msrb.mxu3 %v10636_v62  ;;  %11619 = vmatpush.msrb.mxu2 %v9889_v25  ;;  %v9857_v62 = vld [vmem:[%s19819_s3 + $0x478] sm:$0xff] }
 0x672   :  { %v10520_v33 = vld [vmem:[%s19819_s3 + $0x1930] sm:$0xff]  ;;  %11501 = vmatpush.msra.mxu1 %v10456_v29  ;;  %v9957_v29 = vld [vmem:[%s19819_s3 + $0x798] sm:$0xff] }
 0x673   :  { %v10632_v8 = vld [vmem:[%s19819_s3 + $0x1cb0] sm:$0xff]  ;;  %11521 = vmatpush.msrb.mxu0 %v10520_v33  ;;  %11620 = vmatpush.msrb.mxu2 %v9885_v38  ;;  %v9777_v33 = vld [vmem:[%s19819_s3 + $0x1f8] sm:$0xff] }
 0x674   :  { %v10452_v2 = vld [vmem:[%s19819_s3 + $0x1710] sm:$0xff]  ;;  %11565 = vmatpush.msrb.mxu3 %v10632_v8  ;;  %v11113_v8 = vadd.f32 %v11112_v34, %v11093_v63  ;;  %v9953_v25 = vld [vmem:[%s19819_s3 + $0x778] sm:$0xff] }
 0x675   :  { %v10516_v46 = vld [vmem:[%s19819_s3 + $0x1910] sm:$0xff]  ;;  %11502 = vmatpush.msra.mxu1 %v10452_v2  ;;  %11621 = vmatpush.msrb.mxu2 %v9881_v57  ;;  %v9853_v2 = vld [vmem:[%s19819_s3 + $0x458] sm:$0xff] }
 0x676   :  { %v10628_v7 = vld [vmem:[%s19819_s3 + $0x1c90] sm:$0xff]  ;;  %11522 = vmatpush.msrb.mxu0 %v10516_v46  ;;  %v9773_v46 = vld [vmem:[%s19819_s3 + $0x1d8] sm:$0xff] }
 0x677   :  { %v10448_v19 = vld [vmem:[%s19819_s3 + $0x16f0] sm:$0xff]  ;;  %11566 = vmatpush.msrb.mxu3 %v10628_v7  ;;  %11622 = vmatpush.msrb.mxu2 %v9877_v40  ;;  %v11132_v7 = vpop.f32.mrf.mxu0  ;;  %v9949_v38 = vld [vmem:[%s19819_s3 + $0x758] sm:$0xff] }
 0x678   :  { %v10512_v13 = vld [vmem:[%s19819_s3 + $0x18f0] sm:$0xff]  ;;  %11503 = vmatpush.msra.mxu1 %v10448_v19  ;;  %v9837_v19 = vld [vmem:[%s19819_s3 + $0x3d8] sm:$0xff] }
 0x679   :  { %v10624_v50 = vld [vmem:[%s19819_s3 + $0x1c70] sm:$0xff]  ;;  %11523 = vmatpush.msrb.mxu0 %v10512_v13  ;;  %11623 = vmatpush.msrb.mxu2 %v9873_v37  ;;  %v11133_v13 = vadd.f32 %v11132_v7, %v11113_v8  ;;  %v9945_v57 = vld [vmem:[%s19819_s3 + $0x738] sm:$0xff] }
 0x67a   :  { %v10444_v56 = vld [vmem:[%s19819_s3 + $0x16d0] sm:$0xff]  ;;  %11567 = vmatpush.msrb.mxu3 %v10624_v50  ;;  %v9769_v50 = vld [vmem:[%s19819_s3 + $0x1b8] sm:$0xff] }
 0x67b   :  { %v10508_v11 = vld [vmem:[%s19819_s3 + $0x18d0] sm:$0xff]  ;;  %11504 = vmatpush.msra.mxu1 %v10444_v56  ;;  %11624 = vmatpush.msrb.mxu2 %v9869_v18  ;;  %v9845_v56 = vld [vmem:[%s19819_s3 + $0x418] sm:$0xff] }
 0x67c   :  { %v10620_v49 = vld [vmem:[%s19819_s3 + $0x1c50] sm:$0xff]  ;;  %11524 = vmatpush.msrb.mxu0 %v10508_v11  ;;  %v9765_v11 = vld [vmem:[%s19819_s3 + $0x198] sm:$0xff] }
 0x67d   :  { %v10440_v52 = vld [vmem:[%s19819_s3 + $0x16b0] sm:$0xff]  ;;  %11568 = vmatpush.msrb.mxu3 %v10620_v49  ;;  %11625 = vmatpush.msrb.mxu2 %v9865_v60  ;;  %v11172_v49 = vpop.f32.mrf.mxu1  ;;  %v9829_v40 = vld [vmem:[%s19819_s3 + $0x398] sm:$0xff] }
 0x67e   :  { %v10504_v6 = vld [vmem:[%s19819_s3 + $0x18b0] sm:$0xff]  ;;  %11505 = vmatpush.msra.mxu1 %v10440_v52  ;;  %v10161_v52 = vld [vmem:[%s19819_s3 + $0xdf8] sm:$0xff] }
 0x67f   :  { %v10616_v28 = vld [vmem:[%s19819_s3 + $0x1c30] sm:$0xff]  ;;  %11525 = vmatpush.msrb.mxu0 %v10504_v6  ;;  %11626 = vmatpush.msrb.mxu2 %v9861_v54  ;;  %v11153_v6 = vadd.f32 %v11152_v1, %v11133_v13  ;;  %v9825_v37 = vld [vmem:[%s19819_s3 + $0x378] sm:$0xff]  ;;  %v11212_v63 = vpop.f32.mrf.mxu0 }
 0x680   :  { %v10436_v23 = vld [vmem:[%s19819_s3 + $0x1690] sm:$0xff]  ;;  %11569 = vmatpush.msrb.mxu3 %v10616_v28  ;;  %v9941_v28 = vld [vmem:[%s19819_s3 + $0x718] sm:$0xff] }
 0x681   :  { %v10500_v4 = vld [vmem:[%s19819_s3 + $0x1890] sm:$0xff]  ;;  %11506 = vmatpush.msra.mxu1 %v10436_v23  ;;  %11627 = vmatpush.msrb.mxu2 %v9857_v62  ;;  %v9761_v23 = vld [vmem:[%s19819_s3 + $0x178] sm:$0xff] }
 0x682   :  { %v10612_v59 = vld [vmem:[%s19819_s3 + $0x1c10] sm:$0xff]  ;;  %11526 = vmatpush.msrb.mxu0 %v10500_v4  ;;  %v11173_v4 = vadd.f32 %v11172_v49, %v11153_v6  ;;  %v9933_v18 = vld [vmem:[%s19819_s3 + $0x6d8] sm:$0xff] }
 0x683   :  { %v10432_v27 = vld [vmem:[%s19819_s3 + $0x1670] sm:$0xff]  ;;  %11570 = vmatpush.msrb.mxu3 %v10612_v59  ;;  %11628 = vmatpush.msrb.mxu2 %v9853_v2  ;;  %v9757_v59 = vld [vmem:[%s19819_s3 + $0x158] sm:$0xff]  ;;  %v11232_v2 = vpop.f32.mrf.mxu2 }
 0x684   :  { %v10496_v44 = vld [vmem:[%s19819_s3 + $0x1870] sm:$0xff]  ;;  %11507 = vmatpush.msra.mxu1 %v10432_v27  ;;  %12287 = vmatmul.msk.f32.vlgmr.msrb.gmra.mxu3 %vm10658_vm2, %v17921_v15  ;;  %v9821_v27 = vld [vmem:[%s19819_s3 + $0x358] sm:$0xff] }
 0x685   :  { %v10428_v9 = vld [vmem:[%s19819_s3 + $0x1650] sm:$0xff]  ;;  %11635 = vmatpush.msra.mxu3 %v9969_v16  ;;  %11527 = vmatpush.msrb.mxu0 %v10496_v44  ;;  %v9753_v16 = vld [vmem:[%s19819_s3 + $0x138] sm:$0xff]  ;;  %v11192_v44 = vpop.f32.mrf.mxu3  ;;  %v11252_v13 = vpop.f32.mrf.mxu1 }
 0x686   :  { %v10492_v32 = vld [vmem:[%s19819_s3 + $0x1850] sm:$0xff]  ;;  %11508 = vmatpush.msra.mxu1 %v10428_v9  ;;  %11629 = vmatpush.msrb.mxu2 %v9849_v5  ;;  %v11193_v9 = vadd.f32 %v11192_v44, %v11173_v4  ;;  %v9929_v60 = vld [vmem:[%s19819_s3 + $0x6b8] sm:$0xff] }
 0x687   :  { %v10424_v26 = vld [vmem:[%s19819_s3 + $0x1630] sm:$0xff]  ;;  %11636 = vmatpush.msra.mxu3 %v9965_v39  ;;  %11528 = vmatpush.msrb.mxu0 %v10492_v32  ;;  %v10145_v39 = vld [vmem:[%s19819_s3 + $0xd78] sm:$0xff] }
 0x688   :  { %v10488_v61 = vld [vmem:[%s19819_s3 + $0x1830] sm:$0xff]  ;;  %11509 = vmatpush.msra.mxu1 %v10424_v26  ;;  %11630 = vmatpush.msrb.mxu2 %v9845_v56  ;;  %v9813_v32 = vld [vmem:[%s19819_s3 + $0x318] sm:$0xff] }
 0x689   :  { %v10420_v20 = vld [vmem:[%s19819_s3 + $0x1610] sm:$0xff]  ;;  %11637 = vmatpush.msra.mxu3 %v9961_v0  ;;  %11529 = vmatpush.msrb.mxu0 %v10488_v61  ;;  %v9925_v26 = vld [vmem:[%s19819_s3 + $0x698] sm:$0xff] }
 0x68a   :  { %v10484_v58 = vld [vmem:[%s19819_s3 + $0x1810] sm:$0xff]  ;;  %11510 = vmatpush.msra.mxu1 %v10420_v20  ;;  %11631 = vmatmul.f32.vlgmr.msrb.gmra.mxu2 %v17224_v14  ;;  %v10153_v14 = vld [vmem:[%s19819_s3 + $0xdb8] sm:$0xff]  ;;  %v11213_v20 = vadd.f32 %v11212_v63, %v11193_v9 }
 0x68b   :  { %11638 = vmatpush.msra.mxu3 %v9957_v29  ;;  %11511 = vmatmul.f32.vlgmr.msra.gmra.mxu1 %v17473_v35  ;;  %v9745_v54 = vld [vmem:[%s19819_s3 + $0xf8] sm:$0xff] }
 0x68c   :  { %11530 = vmatpush.msrb.mxu0 %v10484_v58  ;;  %11575 = vmatpush.msrb.mxu1 %v9777_v33  ;;  %v10141_v0 = vld [vmem:[%s19819_s3 + $0xd58] sm:$0xff]  ;;  %v11233_v7 = vadd.f32 %v11232_v2, %v11213_v20 }
 0x68d   :  { %11531 = vmatmul.f32.vlgmr.msrb.gmra.mxu0 %v17846_v53  ;;  %11639 = vmatpush.msra.mxu3 %v9953_v25  ;;  %v9809_v61 = vld [vmem:[%s19819_s3 + $0x2f8] sm:$0xff] }
 0x68e   :  { %11595 = vmatpush.msra.mxu0 %v9841_v30  ;;  %11576 = vmatpush.msrb.mxu1 %v9773_v46  ;;  %v9921_v62 = vld [vmem:[%s19819_s3 + $0x678] sm:$0xff] }
 0x68f   :  { %11640 = vmatpush.msra.mxu3 %v9949_v38  ;;  %11695 = vmatpush.msra.mxu2 %v10161_v52  ;;  %v9741_v29 = vld [vmem:[%s19819_s3 + $0xd8] sm:$0xff] }
 0x690   :  { %11596 = vmatpush.msra.mxu0 %v9837_v19  ;;  %11577 = vmatpush.msrb.mxu1 %v9769_v50  ;;  %v10137_v34 = vld [vmem:[%s19819_s3 + $0xd38] sm:$0xff] }
 0x691   :  { %11641 = vmatpush.msra.mxu3 %v9945_v57  ;;  %11696 = vmatpush.msra.mxu2 %v10157_v41  ;;  %v9805_v58 = vld [vmem:[%s19819_s3 + $0x2d8] sm:$0xff]  ;;  %v11272_v57 = vpop.f32.mrf.mxu3 }
 0x692   :  { %11597 = vmatpush.msra.mxu0 %v9833_v10  ;;  %11578 = vmatpush.msrb.mxu1 %v9765_v11  ;;  %v9917_v33 = vld [vmem:[%s19819_s3 + $0x658] sm:$0xff]  ;;  %v11253_v10 = vadd.f32 %v11252_v13, %v11233_v7 }
 0x693   :  { %11642 = vmatpush.msra.mxu3 %v9941_v28  ;;  %11697 = vmatpush.msra.mxu2 %v10153_v14  ;;  %v9737_v8 = vld [vmem:[%s19819_s3 + $0xb8] sm:$0xff] }
 0x694   :  { %11598 = vmatpush.msra.mxu0 %v9829_v40  ;;  %11579 = vmatpush.msrb.mxu1 %v9761_v23  ;;  %v10133_v30 = vld [vmem:[%s19819_s3 + $0xd18] sm:$0xff]  ;;  %v11273_v52 = vadd.f32 %v11272_v57, %v11253_v10 }
 0x695   :  { %11643 = vmatpush.msra.mxu3 %v9937_v12  ;;  %11698 = vmatpush.msra.mxu2 %v10149_v3  ;;  %v9801_v25 = vld [vmem:[%s19819_s3 + $0x2b8] sm:$0xff] }
 0x696   :  { %11599 = vmatpush.msra.mxu0 %v9825_v37  ;;  %11580 = vmatpush.msrb.mxu1 %v9757_v59  ;;  %v9913_v46 = vld [vmem:[%s19819_s3 + $0x638] sm:$0xff]  ;;  %11876 = vst [vmem:[%s19820_s4 + $0x8] sm:$0xff] %v11273_v52 }
 0x697   :  { %11644 = vmatpush.msra.mxu3 %v9933_v18  ;;  %11699 = vmatpush.msra.mxu2 %v10145_v39  ;;  %v9733_v5 = vld [vmem:[%s19819_s3 + $0x98] sm:$0xff] }
 0x698   :  { %11600 = vmatpush.msra.mxu0 %v9821_v27  ;;  %11581 = vmatpush.msrb.mxu1 %v9753_v16  ;;  %v10129_v19 = vld [vmem:[%s19819_s3 + $0xcf8] sm:$0xff] }
 0x699   :  { %11645 = vmatpush.msra.mxu3 %v9929_v60  ;;  %11700 = vmatpush.msra.mxu2 %v10141_v0  ;;  %v9797_v38 = vld [vmem:[%s19819_s3 + $0x298] sm:$0xff] }
 0x69a   :  { %11601 = vmatpush.msra.mxu0 %v9817_v22  ;;  %11582 = vmatpush.msrb.mxu1 %v9749_v42  ;;  %v9909_v50 = vld [vmem:[%s19819_s3 + $0x618] sm:$0xff] }
 0x69b   :  { %11646 = vmatpush.msra.mxu3 %v9925_v26  ;;  %11701 = vmatpush.msra.mxu2 %v10137_v34  ;;  %v9729_v56 = vld [vmem:[%s19819_s3 + $0x78] sm:$0xff] }
 0x69c   :  { %11602 = vmatpush.msra.mxu0 %v9813_v32  ;;  %11583 = vmatpush.msrb.mxu1 %v9745_v54  ;;  %v10125_v11 = vld [vmem:[%s19819_s3 + $0xcd8] sm:$0xff] }
 0x69d   :  { %11647 = vmatpush.msra.mxu3 %v9921_v62  ;;  %11702 = vmatpush.msra.mxu2 %v10133_v30  ;;  %v10225_v1 = vld [vmem:[%s19819_s3 + $0xff8] sm:$0xff] }
 0x69e   :  { %11603 = vmatpush.msra.mxu0 %v9809_v61  ;;  %11584 = vmatpush.msrb.mxu1 %v9741_v29  ;;  %v9793_v49 = vld [vmem:[%s19819_s3 + $0x278] sm:$0xff] }
 0x69f   :  { %11648 = vmatpush.msra.mxu3 %v9917_v33  ;;  %11703 = vmatpush.msra.mxu2 %v10129_v19  ;;  %v9725_v40 = vld [vmem:[%s19819_s3 + $0x58] sm:$0xff] }
 0x6a0   :  { %11604 = vmatpush.msra.mxu0 %v9805_v58  ;;  %11585 = vmatpush.msrb.mxu1 %v9737_v8  ;;  %v10121_v6 = vld [vmem:[%s19819_s3 + $0xcb8] sm:$0xff] }
 0x6a1   :  { %11649 = vmatpush.msra.mxu3 %v9913_v46  ;;  %11704 = vmatpush.msra.mxu2 %v10125_v11  ;;  %v10221_v28 = vld [vmem:[%s19819_s3 + $0xfd8] sm:$0xff] }
 0x6a2   :  { %11605 = vmatpush.msra.mxu0 %v9801_v25  ;;  %11586 = vmatpush.msrb.mxu1 %v9733_v5  ;;  %v9789_v23 = vld [vmem:[%s19819_s3 + $0x258] sm:$0xff] }
 0x6a3   :  { %11650 = vmatpush.msra.mxu3 %v9909_v50  ;;  %v9721_v41 = vld [vmem:[%s19819_s3 + $0x38] sm:$0xff]  ;;  %11705 = vmatpush.msra.mxu2 %v10121_v6 }
 0x6a4   :  { %11606 = vmatpush.msra.mxu0 %v9797_v38  ;;  %11587 = vmatpush.msrb.mxu1 %v9729_v56  ;;  %v10217_v37 = vld [vmem:[%s19819_s3 + $0xfb8] sm:$0xff] }
 0x6a5   :  { %11651 = vmatmul.f32.vlgmr.msra.gmra.mxu3 %v17226_v55  ;;  %v10117_v55 = vld [vmem:[%s19819_s3 + $0xc98] sm:$0xff] }
 0x6a6   :  { %11715 = vmatpush.msrb.mxu3 %v10225_v1  ;;  %11607 = vmatpush.msra.mxu0 %v9793_v49  ;;  %v9785_v4 = vld [vmem:[%s19819_s3 + $0x238] sm:$0xff] }
 0x6a7   :  { %11588 = vmatpush.msrb.mxu1 %v9725_v40  ;;  %v9717_v12 = vld [vmem:[%s19819_s3 + $0x18] sm:$0xff]  ;;  %11706 = vmatpush.msra.mxu2 %v10117_v55 }
 0x6a8   :  { %11716 = vmatpush.msrb.mxu3 %v10221_v28  ;;  %11608 = vmatpush.msra.mxu0 %v9789_v23  ;;  %v10113_v59 = vld [vmem:[%s19819_s3 + $0xc78] sm:$0xff] }
 0x6a9   :  { %11589 = vmatpush.msrb.mxu1 %v9721_v41  ;;  %v10213_v14 = vld [vmem:[%s19819_s3 + $0xf98] sm:$0xff]  ;;  %11707 = vmatpush.msra.mxu2 %v10113_v59 }
 0x6aa   :  { %11717 = vmatpush.msrb.mxu3 %v10217_v37  ;;  %11609 = vmatpush.msra.mxu0 %v9785_v4  ;;  %v9781_v27 = vld [vmem:[%s19819_s3 + $0x218] sm:$0xff] }
 0x6ab   :  { %v10033_v18 = vld [vmem:[%s19819_s3 + $0x9f8] sm:$0xff]  ;;  %11590 = vmatpush.msrb.mxu1 %v9717_v12 }
 0x6ac   :  { %v10109_v16 = vld [vmem:[%s19819_s3 + $0xc58] sm:$0xff]  ;;  %11718 = vmatpush.msrb.mxu3 %v10213_v14  ;;  %11591 = vmatmul.f32.vlgmr.msrb.gmra.mxu1 %v17202_v21 }
 0x6ad   :  { %v10097_v44 = vld [vmem:[%s19819_s3 + $0xbf8] sm:$0xff]  ;;  %11610 = vmatpush.msra.mxu0 %v9781_v27  ;;  %11655 = vmatpush.msra.mxu1 %v10033_v18 }
 0x6ae   :  { %v10209_v3 = vld [vmem:[%s19819_s3 + $0xf78] sm:$0xff]  ;;  %11611 = vmatmul.f32.vlgmr.msra.gmra.mxu0 %v17222_v43  ;;  %11708 = vmatpush.msra.mxu2 %v10109_v16 }
 0x6af   :  { %v10029_v22 = vld [vmem:[%s19819_s3 + $0x9d8] sm:$0xff]  ;;  %11675 = vmatpush.msrb.mxu0 %v10097_v44  ;;  %11719 = vmatpush.msrb.mxu3 %v10209_v3 }
 0x6b0   :  { %v10105_v9 = vld [vmem:[%s19819_s3 + $0xc38] sm:$0xff]  ;;  %11656 = vmatpush.msra.mxu1 %v10029_v22 }
 0x6b1   :  { %v10093_v21 = vld [vmem:[%s19819_s3 + $0xbd8] sm:$0xff]  ;;  %11709 = vmatpush.msra.mxu2 %v10105_v9 }
 0x6b2   :  { %v10205_v60 = vld [vmem:[%s19819_s3 + $0xf58] sm:$0xff]  ;;  %11676 = vmatpush.msrb.mxu0 %v10093_v21 }
 0x6b3   :  { %v10025_v42 = vld [vmem:[%s19819_s3 + $0x9b8] sm:$0xff]  ;;  %11720 = vmatpush.msrb.mxu3 %v10205_v60 }
 0x6b4   :  { %v10101_v39 = vld [vmem:[%s19819_s3 + $0xc18] sm:$0xff]  ;;  %11657 = vmatpush.msra.mxu1 %v10025_v42 }
 0x6b5   :  { %v10089_v43 = vld [vmem:[%s19819_s3 + $0xbb8] sm:$0xff]  ;;  %11710 = vmatpush.msra.mxu2 %v10101_v39 }
 0x6b6   :  { %v10201_v32 = vld [vmem:[%s19819_s3 + $0xf38] sm:$0xff]  ;;  %11677 = vmatpush.msrb.mxu0 %v10089_v43  ;;  %11711 = vmatmul.f32.vlgmr.msra.gmra.mxu2 %v17328_v48 }
 0x6b7   :  { %v10021_v26 = vld [vmem:[%s19819_s3 + $0x998] sm:$0xff]  ;;  %11721 = vmatpush.msrb.mxu3 %v10201_v32 }
 0x6b8   :  { %v10417_v54 = vld [vmem:[%s19819_s3 + $0x15f8] sm:$0xff]  ;;  %11658 = vmatpush.msra.mxu1 %v10021_v26 }
 0x6b9   :  { %v10085_v63 = vld [vmem:[%s19819_s3 + $0xb98] sm:$0xff]  ;;  %11775 = vmatpush.msrb.mxu2 %v10417_v54 }
 0x6ba   :  { %v10197_v0 = vld [vmem:[%s19819_s3 + $0xf18] sm:$0xff]  ;;  %11678 = vmatpush.msrb.mxu0 %v10085_v63 }
 0x6bb   :  { %v10017_v61 = vld [vmem:[%s19819_s3 + $0x978] sm:$0xff]  ;;  %11722 = vmatpush.msrb.mxu3 %v10197_v0 }
 0x6bc   :  { %v10413_v20 = vld [vmem:[%s19819_s3 + $0x15d8] sm:$0xff]  ;;  %11659 = vmatpush.msra.mxu1 %v10017_v61 }
 0x6bd   :  { %v10081_v62 = vld [vmem:[%s19819_s3 + $0xb78] sm:$0xff]  ;;  %11776 = vmatpush.msrb.mxu2 %v10413_v20 }
 0x6be   :  { %v10193_v29 = vld [vmem:[%s19819_s3 + $0xef8] sm:$0xff]  ;;  %11679 = vmatpush.msrb.mxu0 %v10081_v62 }
 0x6bf   :  { %v10013_v34 = vld [vmem:[%s19819_s3 + $0x958] sm:$0xff]  ;;  %11723 = vmatpush.msrb.mxu3 %v10193_v29 }
 0x6c0   :  { %v10409_v48 = vld [vmem:[%s19819_s3 + $0x15b8] sm:$0xff]  ;;  %11660 = vmatpush.msra.mxu1 %v10013_v34 }
 0x6c1   :  { %v10077_v58 = vld [vmem:[%s19819_s3 + $0xb58] sm:$0xff]  ;;  %11777 = vmatpush.msrb.mxu2 %v10409_v48 }
 0x6c2   :  { %v10189_v33 = vld [vmem:[%s19819_s3 + $0xed8] sm:$0xff]  ;;  %11680 = vmatpush.msrb.mxu0 %v10077_v58 }
 0x6c3   :  { %v10009_v8 = vld [vmem:[%s19819_s3 + $0x938] sm:$0xff]  ;;  %11724 = vmatpush.msrb.mxu3 %v10189_v33 }
 0x6c4   :  { %v10405_v2 = vld [vmem:[%s19819_s3 + $0x1598] sm:$0xff]  ;;  %11661 = vmatpush.msra.mxu1 %v10009_v8 }
 0x6c5   :  { %v10073_v30 = vld [vmem:[%s19819_s3 + $0xb38] sm:$0xff]  ;;  %11778 = vmatpush.msrb.mxu2 %v10405_v2 }
 0x6c6   :  { %v10185_v25 = vld [vmem:[%s19819_s3 + $0xeb8] sm:$0xff]  ;;  %11681 = vmatpush.msrb.mxu0 %v10073_v30 }
 0x6c7   :  { %v10005_v46 = vld [vmem:[%s19819_s3 + $0x918] sm:$0xff]  ;;  %11725 = vmatpush.msrb.mxu3 %v10185_v25 }
 0x6c8   :  { %v10401_v5 = vld [vmem:[%s19819_s3 + $0x1578] sm:$0xff]  ;;  %11662 = vmatpush.msra.mxu1 %v10005_v46 }
 0x6c9   :  { %v10069_v7 = vld [vmem:[%s19819_s3 + $0xb18] sm:$0xff]  ;;  %11779 = vmatpush.msrb.mxu2 %v10401_v5 }
 0x6ca   :  { %v10181_v19 = vld [vmem:[%s19819_s3 + $0xe98] sm:$0xff]  ;;  %11682 = vmatpush.msrb.mxu0 %v10069_v7 }
 0x6cb   :  { %v10001_v38 = vld [vmem:[%s19819_s3 + $0x8f8] sm:$0xff]  ;;  %11726 = vmatpush.msrb.mxu3 %v10181_v19 }
 0x6cc   :  { %v10397_v13 = vld [vmem:[%s19819_s3 + $0x1558] sm:$0xff]  ;;  %11663 = vmatpush.msra.mxu1 %v10001_v38 }
 0x6cd   :  { %v10065_v50 = vld [vmem:[%s19819_s3 + $0xaf8] sm:$0xff]  ;;  %11780 = vmatpush.msrb.mxu2 %v10397_v13 }
 0x6ce   :  { %v10177_v56 = vld [vmem:[%s19819_s3 + $0xe78] sm:$0xff]  ;;  %11683 = vmatpush.msrb.mxu0 %v10065_v50 }
 0x6cf   :  { %v9997_v10 = vld [vmem:[%s19819_s3 + $0x8d8] sm:$0xff]  ;;  %11727 = vmatpush.msrb.mxu3 %v10177_v56 }
 0x6d0   :  { %v10393_v57 = vld [vmem:[%s19819_s3 + $0x1538] sm:$0xff]  ;;  %11664 = vmatpush.msra.mxu1 %v9997_v10 }
 0x6d1   :  { %v10061_v11 = vld [vmem:[%s19819_s3 + $0xad8] sm:$0xff]  ;;  %11781 = vmatpush.msrb.mxu2 %v10393_v57 }
 0x6d2   :  { %v10173_v1 = vld [vmem:[%s19819_s3 + $0xe58] sm:$0xff]  ;;  %11684 = vmatpush.msrb.mxu0 %v10061_v11 }
 0x6d3   :  { %v9993_v49 = vld [vmem:[%s19819_s3 + $0x8b8] sm:$0xff]  ;;  %11728 = vmatpush.msrb.mxu3 %v10173_v1 }
 0x6d4   :  { %v10389_v52 = vld [vmem:[%s19819_s3 + $0x1518] sm:$0xff]  ;;  %11665 = vmatpush.msra.mxu1 %v9993_v49 }
 0x6d5   :  { %v10057_v40 = vld [vmem:[%s19819_s3 + $0xab8] sm:$0xff]  ;;  %11782 = vmatpush.msrb.mxu2 %v10389_v52 }
 0x6d6   :  { %v10169_v6 = vld [vmem:[%s19819_s3 + $0xe38] sm:$0xff]  ;;  %11685 = vmatpush.msrb.mxu0 %v10057_v40 }
 0x6d7   :  { %v9989_v28 = vld [vmem:[%s19819_s3 + $0x898] sm:$0xff]  ;;  %11729 = vmatpush.msrb.mxu3 %v10169_v6 }
 0x6d8   :  { %v10385_v23 = vld [vmem:[%s19819_s3 + $0x14f8] sm:$0xff]  ;;  %11666 = vmatpush.msra.mxu1 %v9989_v28 }
 0x6d9   :  { %v10053_v41 = vld [vmem:[%s19819_s3 + $0xa98] sm:$0xff]  ;;  %11783 = vmatpush.msrb.mxu2 %v10385_v23 }
 0x6da   :  { %v10165_v55 = vld [vmem:[%s19819_s3 + $0xe18] sm:$0xff]  ;;  %11686 = vmatpush.msrb.mxu0 %v10053_v41 }
 0x6db   :  { %v9985_v37 = vld [vmem:[%s19819_s3 + $0x878] sm:$0xff]  ;;  %11730 = vmatpush.msrb.mxu3 %v10165_v55 }
 0x6dc   :  { %v10381_v4 = vld [vmem:[%s19819_s3 + $0x14d8] sm:$0xff]  ;;  %11667 = vmatpush.msra.mxu1 %v9985_v37  ;;  %11731 = vmatmul.f32.vlgmr.msrb.gmra.mxu3 %v17333_v24 }
 0x6dd   :  { %v10481_v12 = vld [vmem:[%s19819_s3 + $0x17f8] sm:$0xff]  ;;  %11784 = vmatpush.msrb.mxu2 %v10381_v4 }
 0x6de   :  { %v10049_v59 = vld [vmem:[%s19819_s3 + $0xa78] sm:$0xff]  ;;  %11795 = vmatpush.msra.mxu3 %v10481_v12 }
 0x6df   :  { %v9981_v14 = vld [vmem:[%s19819_s3 + $0x858] sm:$0xff]  ;;  %11687 = vmatpush.msrb.mxu0 %v10049_v59 }
 0x6e0   :  { %v10377_v27 = vld [vmem:[%s19819_s3 + $0x14b8] sm:$0xff]  ;;  %11668 = vmatpush.msra.mxu1 %v9981_v14 }
 0x6e1   :  { %v10477_v18 = vld [vmem:[%s19819_s3 + $0x17d8] sm:$0xff]  ;;  %11785 = vmatpush.msrb.mxu2 %v10377_v27  ;;  %v11292_v27 = vpop.f32.mrf.mxu0 }
 0x6e2   :  { %v10045_v16 = vld [vmem:[%s19819_s3 + $0xa58] sm:$0xff]  ;;  %11796 = vmatpush.msra.mxu3 %v10477_v18 }
 0x6e3   :  { %v9977_v44 = vld [vmem:[%s19819_s3 + $0x838] sm:$0xff]  ;;  %11688 = vmatpush.msrb.mxu0 %v10045_v16 }
 0x6e4   :  { %v10373_v3 = vld [vmem:[%s19819_s3 + $0x1498] sm:$0xff]  ;;  %11669 = vmatpush.msra.mxu1 %v9977_v44 }
 0x6e5   :  { %v10473_v24 = vld [vmem:[%s19819_s3 + $0x17b8] sm:$0xff]  ;;  %11786 = vmatpush.msrb.mxu2 %v10373_v3  ;;  %v11312_v3 = vpop.f32.mrf.mxu2 }
 0x6e6   :  { %v10041_v22 = vld [vmem:[%s19819_s3 + $0xa38] sm:$0xff]  ;;  %11797 = vmatpush.msra.mxu3 %v10473_v24  ;;  %v11332_v24 = vpop.f32.mrf.mxu3 }
 0x6e7   :  { %v9973_v9 = vld [vmem:[%s19819_s3 + $0x818] sm:$0xff]  ;;  %11689 = vmatpush.msrb.mxu0 %v10041_v22 }
 0x6e8   :  { %v10369_v21 = vld [vmem:[%s19819_s3 + $0x1478] sm:$0xff]  ;;  %11670 = vmatpush.msra.mxu1 %v9973_v9 }
 0x6e9   :  { %v10469_v60 = vld [vmem:[%s19819_s3 + $0x1798] sm:$0xff]  ;;  %11787 = vmatpush.msrb.mxu2 %v10369_v21  ;;  %11671 = vmatmul.f32.vlgmr.msra.gmra.mxu1 %v17308_v36  ;;  %v11313_v21 = vadd.f32 %v11312_v3, %v11292_v27 }
 0x6ea   :  { %v10037_v42 = vld [vmem:[%s19819_s3 + $0xa18] sm:$0xff]  ;;  %11798 = vmatpush.msra.mxu3 %v10469_v60 }
 0x6eb   :  { %v10289_v39 = vld [vmem:[%s19819_s3 + $0x11f8] sm:$0xff]  ;;  %11690 = vmatpush.msrb.mxu0 %v10037_v42  ;;  %v11352_v42 = vpop.f32.mrf.mxu1 }
 0x6ec   :  { %v10365_v43 = vld [vmem:[%s19819_s3 + $0x1458] sm:$0xff]  ;;  %11735 = vmatpush.msrb.mxu1 %v10289_v39  ;;  %11691 = vmatmul.f32.vlgmr.msrb.gmra.mxu0 %v17320_v31 }
 0x6ed   :  { %v10353_v32 = vld [vmem:[%s19819_s3 + $0x13f8] sm:$0xff]  ;;  %11788 = vmatpush.msrb.mxu2 %v10365_v43 }
 0x6ee   :  { %v10465_v26 = vld [vmem:[%s19819_s3 + $0x1778] sm:$0xff]  ;;  %11755 = vmatpush.msra.mxu0 %v10353_v32  ;;  %v11333_v32 = vadd.f32 %v11332_v24, %v11313_v21 }
 0x6ef   :  { %v10285_v54 = vld [vmem:[%s19819_s3 + $0x11d8] sm:$0xff]  ;;  %11799 = vmatpush.msra.mxu3 %v10465_v26 }
 0x6f0   :  { %v10361_v63 = vld [vmem:[%s19819_s3 + $0x1438] sm:$0xff]  ;;  %11736 = vmatpush.msrb.mxu1 %v10285_v54  ;;  %v11353_v54 = vadd.f32 %v11352_v42, %v11333_v32 }
 0x6f1   :  { %v10349_v36 = vld [vmem:[%s19819_s3 + $0x13d8] sm:$0xff]  ;;  %11789 = vmatpush.msrb.mxu2 %v10361_v63 }
 0x6f2   :  { %v10461_v0 = vld [vmem:[%s19819_s3 + $0x1758] sm:$0xff]  ;;  %11756 = vmatpush.msra.mxu0 %v10349_v36  ;;  %v11372_v36 = vpop.f32.mrf.mxu0 }
 0x6f3   :  { %v10281_v61 = vld [vmem:[%s19819_s3 + $0x11b8] sm:$0xff]  ;;  %11800 = vmatpush.msra.mxu3 %v10461_v0 }
 0x6f4   :  { %v10357_v20 = vld [vmem:[%s19819_s3 + $0x1418] sm:$0xff]  ;;  %11737 = vmatpush.msrb.mxu1 %v10281_v61 }
 0x6f5   :  { %v10345_v31 = vld [vmem:[%s19819_s3 + $0x13b8] sm:$0xff]  ;;  %11790 = vmatpush.msrb.mxu2 %v10357_v20 }
 0x6f6   :  { %v10457_v62 = vld [vmem:[%s19819_s3 + $0x1738] sm:$0xff]  ;;  %11757 = vmatpush.msra.mxu0 %v10345_v31  ;;  %11791 = vmatmul.f32.vlgmr.msrb.gmra.mxu2 %v17469_v51  ;;  %v11373_v31 = vadd.f32 %v11372_v36, %v11353_v54 }
 0x6f7   :  { %v10277_v29 = vld [vmem:[%s19819_s3 + $0x1198] sm:$0xff]  ;;  %11801 = vmatpush.msra.mxu3 %v10457_v62 }
 0x6f8   :  { %v10657_v34 = vld [vmem:[%s19819_s3 + $0x1d78] sm:$0x7]  ;;  %11738 = vmatpush.msrb.mxu1 %v10277_v29 }
 0x6f9   :  { %v10341_v48 = vld [vmem:[%s19819_s3 + $0x1398] sm:$0xff]  ;;  %12288 = vmatpush.msk.msra.mxu2 %vm10662_vm0, %v10657_v34  ;;  %v11392_v34 = vpop.f32.mrf.mxu2 }
 0x6fa   :  { %v10453_v58 = vld [vmem:[%s19819_s3 + $0x1718] sm:$0xff]  ;;  %11758 = vmatpush.msra.mxu0 %v10341_v48  ;;  %v11393_v48 = vadd.f32 %v11392_v34, %v11373_v31 }
 0x6fb   :  { %v10273_v33 = vld [vmem:[%s19819_s3 + $0x1178] sm:$0xff]  ;;  %11802 = vmatpush.msra.mxu3 %v10453_v58  ;;  %v11412_v58 = vpop.f32.mrf.mxu3 }
 0x6fc   :  { %v10653_v8 = vld [vmem:[%s19819_s3 + $0x1d58] sm:$0xff]  ;;  %11739 = vmatpush.msrb.mxu1 %v10273_v33 }
 0x6fd   :  { %v10337_v2 = vld [vmem:[%s19819_s3 + $0x1378] sm:$0xff]  ;;  %11860 = vmatpush.msra.mxu2 %v10653_v8 }
 0x6fe   :  { %v10449_v30 = vld [vmem:[%s19819_s3 + $0x16f8] sm:$0xff]  ;;  %11759 = vmatpush.msra.mxu0 %v10337_v2  ;;  %v11432_v2 = vpop.f32.mrf.mxu1 }
 0x6ff   :  { %v10269_v25 = vld [vmem:[%s19819_s3 + $0x1158] sm:$0xff]  ;;  %11803 = vmatpush.msra.mxu3 %v10449_v30 }
 0x700   :  { %v10649_v51 = vld [vmem:[%s19819_s3 + $0x1d38] sm:$0xff]  ;;  %11740 = vmatpush.msrb.mxu1 %v10269_v25  ;;  %v11413_v25 = vadd.f32 %v11412_v58, %v11393_v48 }
 0x701   :  { %v10333_v46 = vld [vmem:[%s19819_s3 + $0x1358] sm:$0xff]  ;;  %11861 = vmatpush.msra.mxu2 %v10649_v51 }
 0x702   :  { %v10445_v5 = vld [vmem:[%s19819_s3 + $0x16d8] sm:$0xff]  ;;  %11760 = vmatpush.msra.mxu0 %v10333_v46 }
 0x703   :  { %v10265_v7 = vld [vmem:[%s19819_s3 + $0x1138] sm:$0xff]  ;;  %11804 = vmatpush.msra.mxu3 %v10445_v5  ;;  %v11433_v5 = vadd.f32 %v11432_v2, %v11413_v25 }
 0x704   :  { %v10645_v19 = vld [vmem:[%s19819_s3 + $0x1d18] sm:$0xff]  ;;  %11741 = vmatpush.msrb.mxu1 %v10265_v7 }
 0x705   :  { %v10329_v38 = vld [vmem:[%s19819_s3 + $0x1338] sm:$0xff]  ;;  %11862 = vmatpush.msra.mxu2 %v10645_v19  ;;  %v11452_v19 = vpop.f32.mrf.mxu0 }
 0x706   :  { %v10441_v13 = vld [vmem:[%s19819_s3 + $0x16b8] sm:$0xff]  ;;  %11761 = vmatpush.msra.mxu0 %v10329_v38 }
 0x707   :  { %v10261_v50 = vld [vmem:[%s19819_s3 + $0x1118] sm:$0xff]  ;;  %11805 = vmatpush.msra.mxu3 %v10441_v13 }
 0x708   :  { %v10641_v56 = vld [vmem:[%s19819_s3 + $0x1cf8] sm:$0xff]  ;;  %11742 = vmatpush.msrb.mxu1 %v10261_v50 }
 0x709   :  { %v10325_v10 = vld [vmem:[%s19819_s3 + $0x1318] sm:$0xff]  ;;  %11863 = vmatpush.msra.mxu2 %v10641_v56  ;;  %v11453_v56 = vadd.f32 %v11452_v19, %v11433_v5 }
 0x70a   :  { %v10437_v57 = vld [vmem:[%s19819_s3 + $0x1698] sm:$0xff]  ;;  %11762 = vmatpush.msra.mxu0 %v10325_v10 }
 0x70b   :  { %v10257_v11 = vld [vmem:[%s19819_s3 + $0x10f8] sm:$0xff]  ;;  %11806 = vmatpush.msra.mxu3 %v10437_v57 }
 0x70c   :  { %v10637_v1 = vld [vmem:[%s19819_s3 + $0x1cd8] sm:$0xff]  ;;  %11743 = vmatpush.msrb.mxu1 %v10257_v11 }
 0x70d   :  { %v10321_v49 = vld [vmem:[%s19819_s3 + $0x12f8] sm:$0xff]  ;;  %11864 = vmatpush.msra.mxu2 %v10637_v1  ;;  %v11472_v1 = vpop.f32.mrf.mxu2 }
 0x70e   :  { %v10433_v52 = vld [vmem:[%s19819_s3 + $0x1678] sm:$0xff]  ;;  %11763 = vmatpush.msra.mxu0 %v10321_v49 }
 0x70f   :  { %v10253_v40 = vld [vmem:[%s19819_s3 + $0x10d8] sm:$0xff]  ;;  %11807 = vmatpush.msra.mxu3 %v10433_v52  ;;  %v11473_v52 = vadd.f32 %v11472_v1, %v11453_v56 }
 0x710   :  { %v10633_v6 = vld [vmem:[%s19819_s3 + $0x1cb8] sm:$0xff]  ;;  %11744 = vmatpush.msrb.mxu1 %v10253_v40 }
 0x711   :  { %v10317_v28 = vld [vmem:[%s19819_s3 + $0x12d8] sm:$0xff]  ;;  %11865 = vmatpush.msra.mxu2 %v10633_v6  ;;  %v11492_v6 = vpop.f32.mrf.mxu3 }
 0x712   :  { %v10429_v23 = vld [vmem:[%s19819_s3 + $0x1658] sm:$0xff]  ;;  %11764 = vmatpush.msra.mxu0 %v10317_v28 }
 0x713   :  { %v10249_v41 = vld [vmem:[%s19819_s3 + $0x10b8] sm:$0xff]  ;;  %11808 = vmatpush.msra.mxu3 %v10429_v23 }
 0x714   :  { %v10629_v55 = vld [vmem:[%s19819_s3 + $0x1c98] sm:$0xff]  ;;  %11745 = vmatpush.msrb.mxu1 %v10249_v41 }
 0x715   :  { %v10313_v37 = vld [vmem:[%s19819_s3 + $0x12b8] sm:$0xff]  ;;  %11866 = vmatpush.msra.mxu2 %v10629_v55  ;;  %v11493_v55 = vadd.f32 %v11492_v6, %v11473_v52  ;;  %v11552_v3 = vpop.f32.mrf.mxu2 }
 0x716   :  { %v10425_v4 = vld [vmem:[%s19819_s3 + $0x1638] sm:$0xff]  ;;  %11765 = vmatpush.msra.mxu0 %v10313_v37 }
 0x717   :  { %v10245_v12 = vld [vmem:[%s19819_s3 + $0x1098] sm:$0xff]  ;;  %11809 = vmatpush.msra.mxu3 %v10425_v4 }
 0x718   :  { %v10625_v59 = vld [vmem:[%s19819_s3 + $0x1c78] sm:$0xff]  ;;  %11746 = vmatpush.msrb.mxu1 %v10245_v12  ;;  %v11512_v12 = vpop.f32.mrf.mxu1 }
 0x719   :  { %v10309_v14 = vld [vmem:[%s19819_s3 + $0x1298] sm:$0xff]  ;;  %11867 = vmatpush.msra.mxu2 %v10625_v59  ;;  %v11572_v21 = vpop.f32.mrf.mxu3 }
 0x71a   :  { %v10421_v18 = vld [vmem:[%s19819_s3 + $0x1618] sm:$0xff]  ;;  %11766 = vmatpush.msra.mxu0 %v10309_v14  ;;  %v11513_v14 = vadd.f32 %v11512_v12, %v11493_v55 }
 0x71b   :  { %v10241_v16 = vld [vmem:[%s19819_s3 + $0x1078] sm:$0xff]  ;;  %11810 = vmatpush.msra.mxu3 %v10421_v18  ;;  %v11532_v18 = vpop.f32.mrf.mxu0 }
 0x71c   :  { %v10621_v44 = vld [vmem:[%s19819_s3 + $0x1c58] sm:$0xff]  ;;  %11747 = vmatpush.msrb.mxu1 %v10241_v16  ;;  %11811 = vmatmul.f32.vlgmr.msra.gmra.mxu3 %v17473_v35 }
 0x71d   :  { %v10305_v22 = vld [vmem:[%s19819_s3 + $0x1278] sm:$0xff]  ;;  %11868 = vmatpush.msra.mxu2 %v10621_v44  ;;  %v11533_v44 = vadd.f32 %v11532_v18, %v11513_v14 }
 0x71e   :  { %v10237_v9 = vld [vmem:[%s19819_s3 + $0x1058] sm:$0xff]  ;;  %11767 = vmatpush.msra.mxu0 %v10305_v22 }
 0x71f   :  { %v10617_v60 = vld [vmem:[%s19819_s3 + $0x1c38] sm:$0xff]  ;;  %11748 = vmatpush.msrb.mxu1 %v10237_v9  ;;  %v11553_v9 = vadd.f32 %v11552_v3, %v11533_v44 }
 0x720   :  { %v10301_v39 = vld [vmem:[%s19819_s3 + $0x1258] sm:$0xff]  ;;  %11869 = vmatpush.msra.mxu2 %v10617_v60 }
 0x721   :  { %v10233_v43 = vld [vmem:[%s19819_s3 + $0x1038] sm:$0xff]  ;;  %11768 = vmatpush.msra.mxu0 %v10301_v39  ;;  %v11573_v42 = vadd.f32 %v11572_v21, %v11553_v9 }
 0x722   :  { %v10613_v26 = vld [vmem:[%s19819_s3 + $0x1c18] sm:$0xff]  ;;  %11749 = vmatpush.msrb.mxu1 %v10233_v43 }
 0x723   :  { %v10297_v35 = vld [vmem:[%s19819_s3 + $0x1238] sm:$0xff]  ;;  %11870 = vmatpush.msra.mxu2 %v10613_v26  ;;  %11877 = vst [vmem:[%s19820_s4 + $0x10] sm:$0xff] %v11573_v42  ;;  %v11632_v26 = vpop.f32.mrf.mxu2 }
 0x724   :  { %v10229_v63 = vld [vmem:[%s19819_s3 + $0x1018] sm:$0xff]  ;;  %11769 = vmatpush.msra.mxu0 %v10297_v35  ;;  %12289 = vmatmul.msk.f32.vlgmr.msra.gmra.mxu2 %vm10658_vm2, %v17921_v15 }
 0x725   :  { %v10293_v0 = vld [vmem:[%s19819_s3 + $0x1218] sm:$0xff]  ;;  %11750 = vmatpush.msrb.mxu1 %v10229_v63 }
 0x726   :  { %v10545_v61 = vld [vmem:[%s19819_s3 + $0x19f8] sm:$0xff]  ;;  %11751 = vmatmul.f32.vlgmr.msrb.gmra.mxu1 %v17442_v17  ;;  %11770 = vmatpush.msra.mxu0 %v10293_v0 }
 0x727   :  { %v10609_v20 = vld [vmem:[%s19819_s3 + $0x1bf8] sm:$0xff]  ;;  %11815 = vmatpush.msra.mxu1 %v10545_v61  ;;  %11771 = vmatmul.f32.vlgmr.msra.gmra.mxu0 %v17471_v47 }
 0x728   :  { %v10541_v62 = vld [vmem:[%s19819_s3 + $0x19d8] sm:$0xff]  ;;  %11835 = vmatpush.msrb.mxu0 %v10609_v20  ;;  %v11652_v54 = vpop.f32.mrf.mxu3 }
 0x729   :  { %v10605_v15 = vld [vmem:[%s19819_s3 + $0x1bd8] sm:$0xff]  ;;  %11816 = vmatpush.msra.mxu1 %v10541_v62  ;;  %v11592_v39 = vpop.f32.mrf.mxu1 }
 0x72a   :  { %v10537_v29 = vld [vmem:[%s19819_s3 + $0x19b8] sm:$0xff]  ;;  %11836 = vmatpush.msrb.mxu0 %v10605_v15 }
 0x72b   :  { %v10601_v17 = vld [vmem:[%s19819_s3 + $0x1bb8] sm:$0xff]  ;;  %11817 = vmatpush.msra.mxu1 %v10537_v29  ;;  %v11612_v43 = vpop.f32.mrf.mxu0 }
 0x72c   :  { %v10533_v47 = vld [vmem:[%s19819_s3 + $0x1998] sm:$0xff]  ;;  %11837 = vmatpush.msrb.mxu0 %v10601_v17  ;;  %v11613_v32 = vadd.f32 %v11612_v43, %v11592_v39 }
 0x72d   :  { %v10597_v33 = vld [vmem:[%s19819_s3 + $0x1b98] sm:$0xff]  ;;  %11818 = vmatpush.msra.mxu1 %v10533_v47 }
 0x72e   :  { %v10529_v8 = vld [vmem:[%s19819_s3 + $0x1978] sm:$0xff]  ;;  %11838 = vmatpush.msrb.mxu0 %v10597_v33  ;;  %v11633_v35 = vadd.f32 %v11632_v26, %v11613_v32 }
 0x72f   :  { %v10593_v30 = vld [vmem:[%s19819_s3 + $0x1b78] sm:$0xff]  ;;  %11819 = vmatpush.msra.mxu1 %v10529_v8 }
 0x730   :  { %v10525_v51 = vld [vmem:[%s19819_s3 + $0x1958] sm:$0xff]  ;;  %11839 = vmatpush.msrb.mxu0 %v10593_v30  ;;  %v11653_v36 = vadd.f32 %v11652_v54, %v11633_v35 }
 0x731   :  { %v10589_v46 = vld [vmem:[%s19819_s3 + $0x1b58] sm:$0xff]  ;;  %11820 = vmatpush.msra.mxu1 %v10525_v51 }
 0x732   :  { %v10521_v7 = vld [vmem:[%s19819_s3 + $0x1938] sm:$0xff]  ;;  %11840 = vmatpush.msrb.mxu0 %v10589_v46 }
 0x733   :  { %v10585_v38 = vld [vmem:[%s19819_s3 + $0x1b38] sm:$0xff]  ;;  %11821 = vmatpush.msra.mxu1 %v10521_v7 }
 0x734   :  { %v10517_v13 = vld [vmem:[%s19819_s3 + $0x1918] sm:$0xff]  ;;  %11841 = vmatpush.msrb.mxu0 %v10585_v38 }
 0x735   :  { %v10581_v50 = vld [vmem:[%s19819_s3 + $0x1b18] sm:$0xff]  ;;  %11822 = vmatpush.msra.mxu1 %v10517_v13 }
 0x736   :  { %v10513_v10 = vld [vmem:[%s19819_s3 + $0x18f8] sm:$0xff]  ;;  %11842 = vmatpush.msrb.mxu0 %v10581_v50 }
 0x737   :  { %v10577_v57 = vld [vmem:[%s19819_s3 + $0x1af8] sm:$0xff]  ;;  %11823 = vmatpush.msra.mxu1 %v10513_v10 }
 0x738   :  { %v10509_v11 = vld [vmem:[%s19819_s3 + $0x18d8] sm:$0xff]  ;;  %11843 = vmatpush.msrb.mxu0 %v10577_v57 }
 0x739   :  { %v10573_v49 = vld [vmem:[%s19819_s3 + $0x1ad8] sm:$0xff]  ;;  %11824 = vmatpush.msra.mxu1 %v10509_v11  ;;  %v11712_v31 = vpop.f32.mrf.mxu2 }
 0x73a   :  { %v10505_v40 = vld [vmem:[%s19819_s3 + $0x18b8] sm:$0xff]  ;;  %11844 = vmatpush.msrb.mxu0 %v10573_v49 }
 0x73b   :  { %v10569_v28 = vld [vmem:[%s19819_s3 + $0x1ab8] sm:$0xff]  ;;  %11825 = vmatpush.msra.mxu1 %v10505_v40 }
 0x73c   :  { %v10501_v23 = vld [vmem:[%s19819_s3 + $0x1898] sm:$0xff]  ;;  %11845 = vmatpush.msrb.mxu0 %v10569_v28 }
 0x73d   :  { %v10565_v41 = vld [vmem:[%s19819_s3 + $0x1a98] sm:$0xff]  ;;  %11826 = vmatpush.msra.mxu1 %v10501_v23 }
 0x73e   :  { %v10497_v37 = vld [vmem:[%s19819_s3 + $0x1878] sm:$0xff]  ;;  %11846 = vmatpush.msrb.mxu0 %v10565_v41 }
 0x73f   :  { %v10561_v4 = vld [vmem:[%s19819_s3 + $0x1a78] sm:$0xff]  ;;  %11827 = vmatpush.msra.mxu1 %v10497_v37 }
 0x740   :  { %v10493_v59 = vld [vmem:[%s19819_s3 + $0x1858] sm:$0xff]  ;;  %11847 = vmatpush.msrb.mxu0 %v10561_v4 }
 0x741   :  { %v10557_v27 = vld [vmem:[%s19819_s3 + $0x1a58] sm:$0xff]  ;;  %11828 = vmatpush.msra.mxu1 %v10493_v59 }
 0x742   :  { %v10489_v16 = vld [vmem:[%s19819_s3 + $0x1838] sm:$0xff]  ;;  %11848 = vmatpush.msrb.mxu0 %v10557_v27 }
 0x743   :  { %v10553_v24 = vld [vmem:[%s19819_s3 + $0x1a38] sm:$0xff]  ;;  %11829 = vmatpush.msra.mxu1 %v10489_v16 }
 0x744   :  { %v10485_v22 = vld [vmem:[%s19819_s3 + $0x1818] sm:$0xff]  ;;  %11849 = vmatpush.msrb.mxu0 %v10553_v24 }
 0x745   :  { %v10549_v60 = vld [vmem:[%s19819_s3 + $0x1a18] sm:$0xff]  ;;  %11830 = vmatpush.msra.mxu1 %v10485_v22 }
 0x746   :  { %11831 = vmatmul.f32.vlgmr.msra.gmra.mxu1 %v17846_v53  ;;  %11850 = vmatpush.msrb.mxu0 %v10549_v60 }
 0x747   :  { %11851 = vmatmul.f32.vlgmr.msrb.gmra.mxu0 %v17932_v45 }
 0x75f   :  { %v11732_v62 = vpop.f32.mrf.mxu3 }
 0x766   :  { %v11672_v63 = vpop.f32.mrf.mxu1 }
 0x767   :  { %v11673_v0 = vadd.f32 %v11672_v63, %v11653_v36 }
 0x769   :  { %v11692_v61 = vpop.f32.mrf.mxu0 }
 0x76a   :  { %v11693_v20 = vadd.f32 %v11692_v61, %v11673_v0 }
 0x76c   :  { %v11713_v53 = vadd.f32 %v11712_v31, %v11693_v20 }
 0x76e   :  { %v11733_v29 = vadd.f32 %v11732_v62, %v11713_v53 }
 0x779   :  { %v11792_v45 = vpop.f32.mrf.mxu2 }
 0x79f   :  { %v11812_v58 = vpop.f32.mrf.mxu3 }
 0x7a3   :  { %v11752_v15 = vpop.f32.mrf.mxu1 }
 0x7a4   :  { %v11753_v34 = vadd.f32 %v11752_v15, %v11733_v29  ;;  %v11772_v17 = vpop.f32.mrf.mxu0 }
 0x7a6   :  { %v11773_v48 = vadd.f32 %v11772_v17, %v11753_v34 }
 0x7a7   :  { %v11872_v51 = vpop.f32.mrf.mxu2 }
 0x7a8   :  { %v11793_v47 = vadd.f32 %v11792_v45, %v11773_v48 }
 0x7aa   :  { %v11813_v33 = vadd.f32 %v11812_v58, %v11793_v47 }
 0x7c3   :  { %v11832_v8 = vpop.f32.mrf.mxu1 }
 0x7c4   :  { %v11833_v2 = vadd.f32 %v11832_v8, %v11813_v33  ;;  %v11852_v30 = vpop.f32.mrf.mxu0 }
 0x7c6   :  { %v11853_v25 = vadd.f32 %v11852_v30, %v11833_v2 }
 0x7c8   :  { %v11873_v46 = vadd.f32 %v11872_v51, %v11853_v25 }
 0x7ca   :  { %11878 = vst.msk [vmem:[%s19820_s4 + $0x18] sm:$0xff] %vm110_vm1, %v11873_v46 }

</bundles_post_ra>
